<compile_context>
chip_gen: v7x
topology: tpu7x:2x2x1
jax: 0.10.0
libtpu: 0.0.40
codegen_flags: <defaults>
</compile_context>

<pallas_src>
import functools

import jax
import jax.numpy as jnp
from jax.experimental import pallas as pl
from jax.experimental.pallas import tpu as pltpu

RATES = (6, 12, 18)        # dilated-branch rates; rate[0]=0 -> plain 1x1 branch
_R = max(RATES)            # single halo / zero-pad shared by all branches


def _round_up(x, m):
    return (x + m - 1) // m * m


# ----------------------------------------------------------------------------
# Fused ASPP kernel: one grid step == one batch image.
# ----------------------------------------------------------------------------
def _aspp_fused_kernel(x_ref, w1_ref, w2_ref, w3_ref, w4_ref, shifts_ref,
                       cw_ref, bias_ref, o_ref, taps_ref, y_ref, *,
                       H, W, cin, cout):
    M = H * W

    # --- branch 1: plain 1x1 conv (BN + bias folded into w/shift) + ReLU -----
    center = x_ref[0, _R:_R + H, _R:_R + W, :].reshape(M, cin)
    z = jnp.dot(center, w1_ref[...], preferred_element_type=jnp.float32)
    y_ref[:, 0:cout] = jnp.maximum(z + shifts_ref[:, 0:cout],
                                   0.0).astype(y_ref.dtype)

    # --- branches 2-4: 3x3 dilated convs, taps folded into K = 9*cin ---------
    for bi, (w_ref, r) in enumerate(zip((w2_ref, w3_ref, w4_ref), RATES)):
        for t in range(9):                      # static, unrolled
            ky, kx = t // 3, t % 3
            y0 = _R + (ky - 1) * r
            x0 = _R + (kx - 1) * r
            # in-VMEM im2col (no HBM amplification): shifted window -> tap slot
            taps_ref[:, :, t * cin:(t + 1) * cin] = x_ref[0, y0:y0 + H,
                                                          x0:x0 + W, :]
        taps = taps_ref[...].reshape(M, 9 * cin)
        z = jnp.dot(taps, w_ref[...], preferred_element_type=jnp.float32)
        c0 = (bi + 1) * cout
        y_ref[:, c0:c0 + cout] = jnp.maximum(z + shifts_ref[:, c0:c0 + cout],
                                             0.0).astype(y_ref.dtype)

    # --- fused concat + cat 1x1 conv + BN + ReLU ------------------------------
    # The global-average-pool branch arrives pre-folded into bias_ref.
    acc = jnp.dot(y_ref[...], cw_ref[...], preferred_element_type=jnp.float32)
    o_ref[0] = jnp.maximum(acc + bias_ref[0], 0.0)


def _aspp_pallas(x_pad, f, bias_total, *, N, H, W, cin, cout, cout_pad):
    Hp, Wp = H + 2 * _R, W + 2 * _R
    kern = functools.partial(_aspp_fused_kernel, H=H, W=W, cin=cin, cout=cout)
    return pl.pallas_call(
        kern,
        out_shape=jax.ShapeDtypeStruct((N, H * W, cout_pad), jnp.float32),
        grid_spec=pltpu.PrefetchScalarGridSpec(
            num_scalar_prefetch=0,
            grid=(N,),
            in_specs=[
                pl.BlockSpec((1, Hp, Wp, cin), lambda n: (n, 0, 0, 0)),
                pl.BlockSpec((cin, cout), lambda n: (0, 0)),           # w1
                pl.BlockSpec((9 * cin, cout), lambda n: (0, 0)),       # w2 (r=6)
                pl.BlockSpec((9 * cin, cout), lambda n: (0, 0)),       # w3 (r=12)
                pl.BlockSpec((9 * cin, cout), lambda n: (0, 0)),       # w4 (r=18)
                pl.BlockSpec((1, 4 * cout), lambda n: (0, 0)),         # shifts
                pl.BlockSpec((4 * cout, cout_pad), lambda n: (0, 0)),  # cat w
                pl.BlockSpec((1, 1, cout_pad), lambda n: (n, 0, 0)),   # per-batch bias
            ],
            out_specs=pl.BlockSpec((1, H * W, cout_pad), lambda n: (n, 0, 0)),
            scratch_shapes=[
                pltpu.VMEM((H, W, 9 * cin), jnp.bfloat16),    # im2col taps
                pltpu.VMEM((H * W, 4 * cout), jnp.bfloat16),  # post-ReLU branches
            ],
        ),
        compiler_params=pltpu.CompilerParams(
            dimension_semantics=("parallel",),   # batch steps shard across TCs
            vmem_limit_bytes=32 * 1024 * 1024,
        ),
    )(x_pad, f["w1"], f["w2"], f["w3"], f["w4"], f["shifts"], f["cw14"],
      bias_total)


# ----------------------------------------------------------------------------
# Parameter construction (deterministic, kaiming-normal-like fan_out init).
# ----------------------------------------------------------------------------
def _make_conv_params(key, cin, cout, kh, kw):
    kw_, kb_ = jax.random.split(key)
    fan_out = cout * kh * kw
    std = (2.0 / fan_out) ** 0.5
    # PyTorch layout (Cout, Cin, kh, kw) -> tap-major (kh*kw, Cin, Cout)
    w = jax.random.normal(kw_, (cout, cin, kh, kw), jnp.float32) * std
    w_taps = jnp.transpose(w, (2, 3, 1, 0)).reshape(kh * kw, cin, cout)
    bias = (jax.random.uniform(kb_, (1, cout), jnp.float32) - 0.5) * 0.2
    return w_taps, bias


def _make_bn_params(cout, eps=1e-5):
    # PyTorch BatchNorm2d defaults (and __initial__): gamma=1, beta=0,
    # running_mean=0, running_var=1; eval-mode fold to scale/shift.
    gamma = jnp.ones((1, cout), jnp.float32)
    beta = jnp.zeros((1, cout), jnp.float32)
    mean = jnp.zeros((1, cout), jnp.float32)
    var = jnp.ones((1, cout), jnp.float32)
    scale = gamma / jnp.sqrt(var + eps)
    shift = beta - mean * scale
    return scale, shift


def init_aspp_params(key, dim_in, dim_out):
    keys = jax.random.split(key, 6)
    p = {}
    p["b1_w"], p["b1_b"] = _make_conv_params(keys[0], dim_in, dim_out, 1, 1)  # 1x1
    p["b2_w"], p["b2_b"] = _make_conv_params(keys[1], dim_in, dim_out, 3, 3)  # r=6
    p["b3_w"], p["b3_b"] = _make_conv_params(keys[2], dim_in, dim_out, 3, 3)  # r=12
    p["b4_w"], p["b4_b"] = _make_conv_params(keys[3], dim_in, dim_out, 3, 3)  # r=18
    p["b5_w"], p["b5_b"] = _make_conv_params(keys[4], dim_in, dim_out, 1, 1)  # global
    p["cat_w"], p["cat_b"] = _make_conv_params(keys[5], dim_out * 5, dim_out, 1, 1)
    for name in ("b1", "b2", "b3", "b4", "b5", "cat"):
        p[name + "_scale"], p[name + "_shift"] = _make_bn_params(dim_out)
    return p


def fold_aspp_params(p, dim_in, dim_out):
    """Fold conv bias + eval-mode BN into weights/shifts, pre-scale the cat conv
    by its BN, pad cat outputs to a lane-dense width, cast MXU operands bf16."""
    cin, cout = dim_in, dim_out
    cout_pad = _round_up(cout, 128)
    pad = cout_pad - cout

    def fold(name):
        w = p[name + "_w"] * p[name + "_scale"][None]               # (T, cin, cout)
        s = p[name + "_b"] * p[name + "_scale"] + p[name + "_shift"]  # (1, cout)
        return w, s

    f = {}
    w1, s1 = fold("b1")
    f["w1"] = w1.reshape(cin, cout).astype(jnp.bfloat16)
    shifts = [s1]
    for i, name in enumerate(("b2", "b3", "b4")):
        w, s = fold(name)
        f["w%d" % (i + 2)] = w.reshape(9 * cin, cout).astype(jnp.bfloat16)
        shifts.append(s)
    f["shifts"] = jnp.concatenate(shifts, axis=-1)                  # (1, 4*cout) f32

    w5, s5 = fold("b5")                                             # global branch (JAX)
    f["w5"], f["s5"] = w5.reshape(cin, cout), s5

    # cat 1x1 conv: concat order is [b1, b2, b3, b4, global]; fold BN scale in.
    cat_w = p["cat_w"].reshape(5 * cout, cout) * p["cat_scale"]
    f["cw14"] = jnp.pad(cat_w[:4 * cout], ((0, 0), (0, pad))).astype(jnp.bfloat16)
    f["cw5"] = jnp.pad(cat_w[4 * cout:], ((0, 0), (0, pad)))        # f32
    cat_sb = p["cat_b"] * p["cat_scale"] + p["cat_shift"]
    f["cb"] = jnp.pad(cat_sb, ((0, 0), (0, pad)))                   # (1, cout_pad) f32
    return f


# ----------------------------------------------------------------------------
# Forward: _deeplabv3's ASPP head on a backbone feature map (NCHW in/out).
# ----------------------------------------------------------------------------
def deeplabv3_aspp_forward(x_nchw, folded, dim_out):
    N, cin, H, W = x_nchw.shape
    cout = dim_out
    cout_pad = _round_up(cout, 128)

    x = jnp.transpose(x_nchw, (0, 2, 3, 1)).astype(jnp.float32)     # NHWC

    # branch 5: global avg pool -> 1x1 conv + BN + ReLU -> bilinear to (H, W).
    # Upsampling a 1x1 map (align_corners) is a spatial broadcast, so the whole
    # branch collapses to a per-batch bias on the cat conv; the (N, cin) matmul
    # is far too small for a pallas launch and stays in plain JAX.
    gf = jnp.mean(x, axis=(1, 2))                                   # (N, cin)
    y5 = jnp.maximum(gf @ folded["w5"] + folded["s5"], 0.0)         # (N, cout)
    bias_total = (y5 @ folded["cw5"] + folded["cb"]).reshape(N, 1, cout_pad)

    # one zero-pad with the max rate; each dilated branch only reads its own
    # +-rate halo, so semantics match per-branch padding=rate.
    x_pad = jnp.pad(x, ((0, 0), (_R, _R), (_R, _R), (0, 0))).astype(jnp.bfloat16)

    out = _aspp_pallas(x_pad, folded, bias_total,
                       N=N, H=H, W=W, cin=cin, cout=cout, cout_pad=cout_pad)
    out = out[..., :dim_out].reshape(N, H, W, dim_out)
    return jnp.transpose(out, (0, 3, 1, 2))                         # back to NCHW


if __name__ == "__main__":
    key = jax.random.PRNGKey(0)
    kx, kp = jax.random.split(key)

    # Small, module-consistent shapes: backbone feature map (N, Cin, H, W).
    N, CIN, H, W = 2, 8, 16, 16
    ASPP_OUTDIM = 16

    x = jax.random.normal(kx, (N, CIN, H, W), jnp.float32)
    raw_params = init_aspp_params(kp, CIN, ASPP_OUTDIM)
    folded = fold_aspp_params(raw_params, CIN, ASPP_OUTDIM)

    fwd = jax.jit(functools.partial(deeplabv3_aspp_forward, dim_out=ASPP_OUTDIM))
    out = jax.block_until_ready(fwd(x, folded))
    assert out.shape == (N, ASPP_OUTDIM, H, W), out.shape
    print("KERNEL_OK")
</pallas_src>

<mosaic_0001>
module attributes {stable_mosaic.version = 11 : i64} {
  func.func @_aspp_fused_kernel(%arg0: i32, %arg1: memref<1x52x52x8xbf16, #tpu.memory_space<vmem>>, %arg2: memref<8x16xbf16, #tpu.memory_space<vmem>>, %arg3: memref<72x16xbf16, #tpu.memory_space<vmem>>, %arg4: memref<72x16xbf16, #tpu.memory_space<vmem>>, %arg5: memref<72x16xbf16, #tpu.memory_space<vmem>>, %arg6: memref<1x64xf32, #tpu.memory_space<vmem>>, %arg7: memref<64x128xbf16, #tpu.memory_space<vmem>>, %arg8: memref<1x1x128xf32, #tpu.memory_space<vmem>>, %arg9: memref<1x256x128xf32, #tpu.memory_space<vmem>>, %arg10: memref<16x16x72xbf16, #tpu.memory_space<vmem>>, %arg11: memref<256x64xbf16, #tpu.memory_space<vmem>>) attributes {dimension_semantics = [#tpu.dimension_semantics<parallel>], iteration_bounds = array<i64: 2>, scalar_prefetch = 0 : i64, scratch_operands = 2 : i64, tpu.core_type = #tpu.core_type<tc>, window_params = [{transform_indices = @transform_0, window_bounds = array<i64: 1, 52, 52, 8>}, {pipeline_mode = #tpu.pipeline_mode<synchronous>, transform_indices = @transform_1, window_bounds = array<i64: 8, 16>}, {pipeline_mode = #tpu.pipeline_mode<synchronous>, transform_indices = @transform_2, window_bounds = array<i64: 72, 16>}, {pipeline_mode = #tpu.pipeline_mode<synchronous>, transform_indices = @transform_3, window_bounds = array<i64: 72, 16>}, {pipeline_mode = #tpu.pipeline_mode<synchronous>, transform_indices = @transform_4, window_bounds = array<i64: 72, 16>}, {pipeline_mode = #tpu.pipeline_mode<synchronous>, transform_indices = @transform_5, window_bounds = array<i64: 1, 64>}, {pipeline_mode = #tpu.pipeline_mode<synchronous>, transform_indices = @transform_6, window_bounds = array<i64: 64, 128>}, {transform_indices = @transform_7, window_bounds = array<i64: 1, 1, 128>}, {transform_indices = @transform_8, window_bounds = array<i64: 1, 256, 128>}]} {
    %c0 = arith.constant 0 : index
    %c18 = arith.constant 18 : index
    %c18_0 = arith.constant 18 : index
    %c0_1 = arith.constant 0 : index
    %0 = vector.load %arg1[%c0, %c18, %c18_0, %c0_1] : memref<1x52x52x8xbf16, #tpu.memory_space<vmem>>, vector<1x16x16x8xbf16>
    %1 = vector.shape_cast %0 : vector<1x16x16x8xbf16> to vector<16x16x8xbf16>
    %2 = vector.shape_cast %1 : vector<16x16x8xbf16> to vector<256x8xbf16>
    %c0_2 = arith.constant 0 : index
    %c0_3 = arith.constant 0 : index
    %3 = vector.load %arg2[%c0_2, %c0_3] : memref<8x16xbf16, #tpu.memory_space<vmem>>, vector<8x16xbf16>
    %cst = arith.constant dense<0.000000e+00> : vector<256x16xf32>
    %4 = tpu.matmul %2, %3, %cst {dimension_numbers = #tpu.dot_dimension_numbers<[1], [0], [0], [1], [0, 0, 1, 1], [], []>} : vector<256x8xbf16>, vector<8x16xbf16>, vector<256x16xf32> -> vector<256x16xf32>
    %c0_4 = arith.constant 0 : index
    %c0_5 = arith.constant 0 : index
    %5 = vector.load %arg6[%c0_4, %c0_5] : memref<1x64xf32, #tpu.memory_space<vmem>>, vector<1x16xf32>
    %6 = vector.broadcast %5 : vector<1x16xf32> to vector<256x16xf32>
    %7 = arith.addf %4, %6 : vector<256x16xf32>
    %cst_6 = arith.constant 0.000000e+00 : f32
    %8 = vector.broadcast %cst_6 : f32 to vector<256x16xf32>
    %9 = arith.maximumf %7, %8 : vector<256x16xf32>
    %10 = arith.truncf %9 : vector<256x16xf32> to vector<256x16xbf16>
    %c0_7 = arith.constant 0 : index
    %c0_8 = arith.constant 0 : index
    %11 = vector.load %arg11[%c0_7, %c0_8] : memref<256x64xbf16, #tpu.memory_space<vmem>>, vector<256x16xbf16>
    tpu.vector_store %arg11[%c0_7, %c0_8], %10 {strides = array<i32>} : memref<256x64xbf16, #tpu.memory_space<vmem>>, vector<256x16xbf16>,
    %c0_9 = arith.constant 0 : index
    %c12 = arith.constant 12 : index
    %c12_10 = arith.constant 12 : index
    %c0_11 = arith.constant 0 : index
    %12 = vector.load %arg1[%c0_9, %c12, %c12_10, %c0_11] : memref<1x52x52x8xbf16, #tpu.memory_space<vmem>>, vector<1x16x16x8xbf16>
    %13 = vector.shape_cast %12 : vector<1x16x16x8xbf16> to vector<16x16x8xbf16>
    %c0_12 = arith.constant 0 : index
    %c0_13 = arith.constant 0 : index
    %c0_14 = arith.constant 0 : index
    %14 = vector.load %arg10[%c0_12, %c0_13, %c0_14] : memref<16x16x72xbf16, #tpu.memory_space<vmem>>, vector<16x16x8xbf16>
    tpu.vector_store %arg10[%c0_12, %c0_13, %c0_14], %13 {strides = array<i32>} : memref<16x16x72xbf16, #tpu.memory_space<vmem>>, vector<16x16x8xbf16>,
    %c0_15 = arith.constant 0 : index
    %c12_16 = arith.constant 12 : index
    %c18_17 = arith.constant 18 : index
    %c0_18 = arith.constant 0 : index
    %15 = vector.load %arg1[%c0_15, %c12_16, %c18_17, %c0_18] : memref<1x52x52x8xbf16, #tpu.memory_space<vmem>>, vector<1x16x16x8xbf16>
    %16 = vector.shape_cast %15 : vector<1x16x16x8xbf16> to vector<16x16x8xbf16>
    %c0_19 = arith.constant 0 : index
    %c0_20 = arith.constant 0 : index
    %c8 = arith.constant 8 : index
    %17 = vector.load %arg10[%c0_19, %c0_20, %c8] : memref<16x16x72xbf16, #tpu.memory_space<vmem>>, vector<16x16x8xbf16>
    tpu.vector_store %arg10[%c0_19, %c0_20, %c8], %16 {strides = array<i32>} : memref<16x16x72xbf16, #tpu.memory_space<vmem>>, vector<16x16x8xbf16>,
    %c0_21 = arith.constant 0 : index
    %c12_22 = arith.constant 12 : index
    %c24 = arith.constant 24 : index
    %c0_23 = arith.constant 0 : index
    %18 = vector.load %arg1[%c0_21, %c12_22, %c24, %c0_23] : memref<1x52x52x8xbf16, #tpu.memory_space<vmem>>, vector<1x16x16x8xbf16>
    %19 = vector.shape_cast %18 : vector<1x16x16x8xbf16> to vector<16x16x8xbf16>
    %c0_24 = arith.constant 0 : index
    %c0_25 = arith.constant 0 : index
    %c16 = arith.constant 16 : index
    %20 = vector.load %arg10[%c0_24, %c0_25, %c16] : memref<16x16x72xbf16, #tpu.memory_space<vmem>>, vector<16x16x8xbf16>
    tpu.vector_store %arg10[%c0_24, %c0_25, %c16], %19 {strides = array<i32>} : memref<16x16x72xbf16, #tpu.memory_space<vmem>>, vector<16x16x8xbf16>,
    %c0_26 = arith.constant 0 : index
    %c18_27 = arith.constant 18 : index
    %c12_28 = arith.constant 12 : index
    %c0_29 = arith.constant 0 : index
    %21 = vector.load %arg1[%c0_26, %c18_27, %c12_28, %c0_29] : memref<1x52x52x8xbf16, #tpu.memory_space<vmem>>, vector<1x16x16x8xbf16>
    %22 = vector.shape_cast %21 : vector<1x16x16x8xbf16> to vector<16x16x8xbf16>
    %c0_30 = arith.constant 0 : index
    %c0_31 = arith.constant 0 : index
    %c24_32 = arith.constant 24 : index
    %23 = vector.load %arg10[%c0_30, %c0_31, %c24_32] : memref<16x16x72xbf16, #tpu.memory_space<vmem>>, vector<16x16x8xbf16>
    tpu.vector_store %arg10[%c0_30, %c0_31, %c24_32], %22 {strides = array<i32>} : memref<16x16x72xbf16, #tpu.memory_space<vmem>>, vector<16x16x8xbf16>,
    %c0_33 = arith.constant 0 : index
    %c18_34 = arith.constant 18 : index
    %c18_35 = arith.constant 18 : index
    %c0_36 = arith.constant 0 : index
    %24 = vector.load %arg1[%c0_33, %c18_34, %c18_35, %c0_36] : memref<1x52x52x8xbf16, #tpu.memory_space<vmem>>, vector<1x16x16x8xbf16>
    %25 = vector.shape_cast %24 : vector<1x16x16x8xbf16> to vector<16x16x8xbf16>
    %c0_37 = arith.constant 0 : index
    %c0_38 = arith.constant 0 : index
    %c32 = arith.constant 32 : index
    %26 = vector.load %arg10[%c0_37, %c0_38, %c32] : memref<16x16x72xbf16, #tpu.memory_space<vmem>>, vector<16x16x8xbf16>
    tpu.vector_store %arg10[%c0_37, %c0_38, %c32], %25 {strides = array<i32>} : memref<16x16x72xbf16, #tpu.memory_space<vmem>>, vector<16x16x8xbf16>,
    %c0_39 = arith.constant 0 : index
    %c18_40 = arith.constant 18 : index
    %c24_41 = arith.constant 24 : index
    %c0_42 = arith.constant 0 : index
    %27 = vector.load %arg1[%c0_39, %c18_40, %c24_41, %c0_42] : memref<1x52x52x8xbf16, #tpu.memory_space<vmem>>, vector<1x16x16x8xbf16>
    %28 = vector.shape_cast %27 : vector<1x16x16x8xbf16> to vector<16x16x8xbf16>
    %c0_43 = arith.constant 0 : index
    %c0_44 = arith.constant 0 : index
    %c40 = arith.constant 40 : index
    %29 = vector.load %arg10[%c0_43, %c0_44, %c40] : memref<16x16x72xbf16, #tpu.memory_space<vmem>>, vector<16x16x8xbf16>
    tpu.vector_store %arg10[%c0_43, %c0_44, %c40], %28 {strides = array<i32>} : memref<16x16x72xbf16, #tpu.memory_space<vmem>>, vector<16x16x8xbf16>,
    %c0_45 = arith.constant 0 : index
    %c24_46 = arith.constant 24 : index
    %c12_47 = arith.constant 12 : index
    %c0_48 = arith.constant 0 : index
    %30 = vector.load %arg1[%c0_45, %c24_46, %c12_47, %c0_48] : memref<1x52x52x8xbf16, #tpu.memory_space<vmem>>, vector<1x16x16x8xbf16>
    %31 = vector.shape_cast %30 : vector<1x16x16x8xbf16> to vector<16x16x8xbf16>
    %c0_49 = arith.constant 0 : index
    %c0_50 = arith.constant 0 : index
    %c48 = arith.constant 48 : index
    %32 = vector.load %arg10[%c0_49, %c0_50, %c48] : memref<16x16x72xbf16, #tpu.memory_space<vmem>>, vector<16x16x8xbf16>
    tpu.vector_store %arg10[%c0_49, %c0_50, %c48], %31 {strides = array<i32>} : memref<16x16x72xbf16, #tpu.memory_space<vmem>>, vector<16x16x8xbf16>,
    %c0_51 = arith.constant 0 : index
    %c24_52 = arith.constant 24 : index
    %c18_53 = arith.constant 18 : index
    %c0_54 = arith.constant 0 : index
    %33 = vector.load %arg1[%c0_51, %c24_52, %c18_53, %c0_54] : memref<1x52x52x8xbf16, #tpu.memory_space<vmem>>, vector<1x16x16x8xbf16>
    %34 = vector.shape_cast %33 : vector<1x16x16x8xbf16> to vector<16x16x8xbf16>
    %c0_55 = arith.constant 0 : index
    %c0_56 = arith.constant 0 : index
    %c56 = arith.constant 56 : index
    %35 = vector.load %arg10[%c0_55, %c0_56, %c56] : memref<16x16x72xbf16, #tpu.memory_space<vmem>>, vector<16x16x8xbf16>
    tpu.vector_store %arg10[%c0_55, %c0_56, %c56], %34 {strides = array<i32>} : memref<16x16x72xbf16, #tpu.memory_space<vmem>>, vector<16x16x8xbf16>,
    %c0_57 = arith.constant 0 : index
    %c24_58 = arith.constant 24 : index
    %c24_59 = arith.constant 24 : index
    %c0_60 = arith.constant 0 : index
    %36 = vector.load %arg1[%c0_57, %c24_58, %c24_59, %c0_60] : memref<1x52x52x8xbf16, #tpu.memory_space<vmem>>, vector<1x16x16x8xbf16>
    %37 = vector.shape_cast %36 : vector<1x16x16x8xbf16> to vector<16x16x8xbf16>
    %c0_61 = arith.constant 0 : index
    %c0_62 = arith.constant 0 : index
    %c64 = arith.constant 64 : index
    %38 = vector.load %arg10[%c0_61, %c0_62, %c64] : memref<16x16x72xbf16, #tpu.memory_space<vmem>>, vector<16x16x8xbf16>
    tpu.vector_store %arg10[%c0_61, %c0_62, %c64], %37 {strides = array<i32>} : memref<16x16x72xbf16, #tpu.memory_space<vmem>>, vector<16x16x8xbf16>,
    %c0_63 = arith.constant 0 : index
    %c0_64 = arith.constant 0 : index
    %c0_65 = arith.constant 0 : index
    %39 = vector.load %arg10[%c0_63, %c0_64, %c0_65] : memref<16x16x72xbf16, #tpu.memory_space<vmem>>, vector<16x16x72xbf16>
    %40 = vector.shape_cast %39 : vector<16x16x72xbf16> to vector<256x72xbf16>
    %c0_66 = arith.constant 0 : index
    %c0_67 = arith.constant 0 : index
    %41 = vector.load %arg3[%c0_66, %c0_67] : memref<72x16xbf16, #tpu.memory_space<vmem>>, vector<72x16xbf16>
    %cst_68 = arith.constant dense<0.000000e+00> : vector<256x16xf32>
    %42 = tpu.matmul %40, %41, %cst_68 {dimension_numbers = #tpu.dot_dimension_numbers<[1], [0], [0], [1], [0, 0, 1, 1], [], []>} : vector<256x72xbf16>, vector<72x16xbf16>, vector<256x16xf32> -> vector<256x16xf32>
    %c0_69 = arith.constant 0 : index
    %c16_70 = arith.constant 16 : index
    %43 = vector.load %arg6[%c0_69, %c16_70] : memref<1x64xf32, #tpu.memory_space<vmem>>, vector<1x16xf32>
    %44 = vector.broadcast %43 : vector<1x16xf32> to vector<256x16xf32>
    %45 = arith.addf %42, %44 : vector<256x16xf32>
    %cst_71 = arith.constant 0.000000e+00 : f32
    %46 = vector.broadcast %cst_71 : f32 to vector<256x16xf32>
    %47 = arith.maximumf %45, %46 : vector<256x16xf32>
    %48 = arith.truncf %47 : vector<256x16xf32> to vector<256x16xbf16>
    %c0_72 = arith.constant 0 : index
    %c16_73 = arith.constant 16 : index
    %49 = vector.load %arg11[%c0_72, %c16_73] : memref<256x64xbf16, #tpu.memory_space<vmem>>, vector<256x16xbf16>
    tpu.vector_store %arg11[%c0_72, %c16_73], %48 {strides = array<i32>} : memref<256x64xbf16, #tpu.memory_space<vmem>>, vector<256x16xbf16>,
    %c0_74 = arith.constant 0 : index
    %c6 = arith.constant 6 : index
    %c6_75 = arith.constant 6 : index
    %c0_76 = arith.constant 0 : index
    %50 = vector.load %arg1[%c0_74, %c6, %c6_75, %c0_76] : memref<1x52x52x8xbf16, #tpu.memory_space<vmem>>, vector<1x16x16x8xbf16>
    %51 = vector.shape_cast %50 : vector<1x16x16x8xbf16> to vector<16x16x8xbf16>
    %c0_77 = arith.constant 0 : index
    %c0_78 = arith.constant 0 : index
    %c0_79 = arith.constant 0 : index
    %52 = vector.load %arg10[%c0_77, %c0_78, %c0_79] : memref<16x16x72xbf16, #tpu.memory_space<vmem>>, vector<16x16x8xbf16>
    tpu.vector_store %arg10[%c0_77, %c0_78, %c0_79], %51 {strides = array<i32>} : memref<16x16x72xbf16, #tpu.memory_space<vmem>>, vector<16x16x8xbf16>,
    %c0_80 = arith.constant 0 : index
    %c6_81 = arith.constant 6 : index
    %c18_82 = arith.constant 18 : index
    %c0_83 = arith.constant 0 : index
    %53 = vector.load %arg1[%c0_80, %c6_81, %c18_82, %c0_83] : memref<1x52x52x8xbf16, #tpu.memory_space<vmem>>, vector<1x16x16x8xbf16>
    %54 = vector.shape_cast %53 : vector<1x16x16x8xbf16> to vector<16x16x8xbf16>
    %c0_84 = arith.constant 0 : index
    %c0_85 = arith.constant 0 : index
    %c8_86 = arith.constant 8 : index
    %55 = vector.load %arg10[%c0_84, %c0_85, %c8_86] : memref<16x16x72xbf16, #tpu.memory_space<vmem>>, vector<16x16x8xbf16>
    tpu.vector_store %arg10[%c0_84, %c0_85, %c8_86], %54 {strides = array<i32>} : memref<16x16x72xbf16, #tpu.memory_space<vmem>>, vector<16x16x8xbf16>,
    %c0_87 = arith.constant 0 : index
    %c6_88 = arith.constant 6 : index
    %c30 = arith.constant 30 : index
    %c0_89 = arith.constant 0 : index
    %56 = vector.load %arg1[%c0_87, %c6_88, %c30, %c0_89] : memref<1x52x52x8xbf16, #tpu.memory_space<vmem>>, vector<1x16x16x8xbf16>
    %57 = vector.shape_cast %56 : vector<1x16x16x8xbf16> to vector<16x16x8xbf16>
    %c0_90 = arith.constant 0 : index
    %c0_91 = arith.constant 0 : index
    %c16_92 = arith.constant 16 : index
    %58 = vector.load %arg10[%c0_90, %c0_91, %c16_92] : memref<16x16x72xbf16, #tpu.memory_space<vmem>>, vector<16x16x8xbf16>
    tpu.vector_store %arg10[%c0_90, %c0_91, %c16_92], %57 {strides = array<i32>} : memref<16x16x72xbf16, #tpu.memory_space<vmem>>, vector<16x16x8xbf16>,
    %c0_93 = arith.constant 0 : index
    %c18_94 = arith.constant 18 : index
    %c6_95 = arith.constant 6 : index
    %c0_96 = arith.constant 0 : index
    %59 = vector.load %arg1[%c0_93, %c18_94, %c6_95, %c0_96] : memref<1x52x52x8xbf16, #tpu.memory_space<vmem>>, vector<1x16x16x8xbf16>
    %60 = vector.shape_cast %59 : vector<1x16x16x8xbf16> to vector<16x16x8xbf16>
    %c0_97 = arith.constant 0 : index
    %c0_98 = arith.constant 0 : index
    %c24_99 = arith.constant 24 : index
    %61 = vector.load %arg10[%c0_97, %c0_98, %c24_99] : memref<16x16x72xbf16, #tpu.memory_space<vmem>>, vector<16x16x8xbf16>
    tpu.vector_store %arg10[%c0_97, %c0_98, %c24_99], %60 {strides = array<i32>} : memref<16x16x72xbf16, #tpu.memory_space<vmem>>, vector<16x16x8xbf16>,
    %c0_100 = arith.constant 0 : index
    %c18_101 = arith.constant 18 : index
    %c18_102 = arith.constant 18 : index
    %c0_103 = arith.constant 0 : index
    %62 = vector.load %arg1[%c0_100, %c18_101, %c18_102, %c0_103] : memref<1x52x52x8xbf16, #tpu.memory_space<vmem>>, vector<1x16x16x8xbf16>
    %63 = vector.shape_cast %62 : vector<1x16x16x8xbf16> to vector<16x16x8xbf16>
    %c0_104 = arith.constant 0 : index
    %c0_105 = arith.constant 0 : index
    %c32_106 = arith.constant 32 : index
    %64 = vector.load %arg10[%c0_104, %c0_105, %c32_106] : memref<16x16x72xbf16, #tpu.memory_space<vmem>>, vector<16x16x8xbf16>
    tpu.vector_store %arg10[%c0_104, %c0_105, %c32_106], %63 {strides = array<i32>} : memref<16x16x72xbf16, #tpu.memory_space<vmem>>, vector<16x16x8xbf16>,
    %c0_107 = arith.constant 0 : index
    %c18_108 = arith.constant 18 : index
    %c30_109 = arith.constant 30 : index
    %c0_110 = arith.constant 0 : index
    %65 = vector.load %arg1[%c0_107, %c18_108, %c30_109, %c0_110] : memref<1x52x52x8xbf16, #tpu.memory_space<vmem>>, vector<1x16x16x8xbf16>
    %66 = vector.shape_cast %65 : vector<1x16x16x8xbf16> to vector<16x16x8xbf16>
    %c0_111 = arith.constant 0 : index
    %c0_112 = arith.constant 0 : index
    %c40_113 = arith.constant 40 : index
    %67 = vector.load %arg10[%c0_111, %c0_112, %c40_113] : memref<16x16x72xbf16, #tpu.memory_space<vmem>>, vector<16x16x8xbf16>
    tpu.vector_store %arg10[%c0_111, %c0_112, %c40_113], %66 {strides = array<i32>} : memref<16x16x72xbf16, #tpu.memory_space<vmem>>, vector<16x16x8xbf16>,
    %c0_114 = arith.constant 0 : index
    %c30_115 = arith.constant 30 : index
    %c6_116 = arith.constant 6 : index
    %c0_117 = arith.constant 0 : index
    %68 = vector.load %arg1[%c0_114, %c30_115, %c6_116, %c0_117] : memref<1x52x52x8xbf16, #tpu.memory_space<vmem>>, vector<1x16x16x8xbf16>
    %69 = vector.shape_cast %68 : vector<1x16x16x8xbf16> to vector<16x16x8xbf16>
    %c0_118 = arith.constant 0 : index
    %c0_119 = arith.constant 0 : index
    %c48_120 = arith.constant 48 : index
    %70 = vector.load %arg10[%c0_118, %c0_119, %c48_120] : memref<16x16x72xbf16, #tpu.memory_space<vmem>>, vector<16x16x8xbf16>
    tpu.vector_store %arg10[%c0_118, %c0_119, %c48_120], %69 {strides = array<i32>} : memref<16x16x72xbf16, #tpu.memory_space<vmem>>, vector<16x16x8xbf16>,
    %c0_121 = arith.constant 0 : index
    %c30_122 = arith.constant 30 : index
    %c18_123 = arith.constant 18 : index
    %c0_124 = arith.constant 0 : index
    %71 = vector.load %arg1[%c0_121, %c30_122, %c18_123, %c0_124] : memref<1x52x52x8xbf16, #tpu.memory_space<vmem>>, vector<1x16x16x8xbf16>
    %72 = vector.shape_cast %71 : vector<1x16x16x8xbf16> to vector<16x16x8xbf16>
    %c0_125 = arith.constant 0 : index
    %c0_126 = arith.constant 0 : index
    %c56_127 = arith.constant 56 : index
    %73 = vector.load %arg10[%c0_125, %c0_126, %c56_127] : memref<16x16x72xbf16, #tpu.memory_space<vmem>>, vector<16x16x8xbf16>
    tpu.vector_store %arg10[%c0_125, %c0_126, %c56_127], %72 {strides = array<i32>} : memref<16x16x72xbf16, #tpu.memory_space<vmem>>, vector<16x16x8xbf16>,
    %c0_128 = arith.constant 0 : index
    %c30_129 = arith.constant 30 : index
    %c30_130 = arith.constant 30 : index
    %c0_131 = arith.constant 0 : index
    %74 = vector.load %arg1[%c0_128, %c30_129, %c30_130, %c0_131] : memref<1x52x52x8xbf16, #tpu.memory_space<vmem>>, vector<1x16x16x8xbf16>
    %75 = vector.shape_cast %74 : vector<1x16x16x8xbf16> to vector<16x16x8xbf16>
    %c0_132 = arith.constant 0 : index
    %c0_133 = arith.constant 0 : index
    %c64_134 = arith.constant 64 : index
    %76 = vector.load %arg10[%c0_132, %c0_133, %c64_134] : memref<16x16x72xbf16, #tpu.memory_space<vmem>>, vector<16x16x8xbf16>
    tpu.vector_store %arg10[%c0_132, %c0_133, %c64_134], %75 {strides = array<i32>} : memref<16x16x72xbf16, #tpu.memory_space<vmem>>, vector<16x16x8xbf16>,
    %c0_135 = arith.constant 0 : index
    %c0_136 = arith.constant 0 : index
    %c0_137 = arith.constant 0 : index
    %77 = vector.load %arg10[%c0_135, %c0_136, %c0_137] : memref<16x16x72xbf16, #tpu.memory_space<vmem>>, vector<16x16x72xbf16>
    %78 = vector.shape_cast %77 : vector<16x16x72xbf16> to vector<256x72xbf16>
    %c0_138 = arith.constant 0 : index
    %c0_139 = arith.constant 0 : index
    %79 = vector.load %arg4[%c0_138, %c0_139] : memref<72x16xbf16, #tpu.memory_space<vmem>>, vector<72x16xbf16>
    %cst_140 = arith.constant dense<0.000000e+00> : vector<256x16xf32>
    %80 = tpu.matmul %78, %79, %cst_140 {dimension_numbers = #tpu.dot_dimension_numbers<[1], [0], [0], [1], [0, 0, 1, 1], [], []>} : vector<256x72xbf16>, vector<72x16xbf16>, vector<256x16xf32> -> vector<256x16xf32>
    %c0_141 = arith.constant 0 : index
    %c32_142 = arith.constant 32 : index
    %81 = vector.load %arg6[%c0_141, %c32_142] : memref<1x64xf32, #tpu.memory_space<vmem>>, vector<1x16xf32>
    %82 = vector.broadcast %81 : vector<1x16xf32> to vector<256x16xf32>
    %83 = arith.addf %80, %82 : vector<256x16xf32>
    %cst_143 = arith.constant 0.000000e+00 : f32
    %84 = vector.broadcast %cst_143 : f32 to vector<256x16xf32>
    %85 = arith.maximumf %83, %84 : vector<256x16xf32>
    %86 = arith.truncf %85 : vector<256x16xf32> to vector<256x16xbf16>
    %c0_144 = arith.constant 0 : index
    %c32_145 = arith.constant 32 : index
    %87 = vector.load %arg11[%c0_144, %c32_145] : memref<256x64xbf16, #tpu.memory_space<vmem>>, vector<256x16xbf16>
    tpu.vector_store %arg11[%c0_144, %c32_145], %86 {strides = array<i32>} : memref<256x64xbf16, #tpu.memory_space<vmem>>, vector<256x16xbf16>,
    %c0_146 = arith.constant 0 : index
    %c0_147 = arith.constant 0 : index
    %c0_148 = arith.constant 0 : index
    %c0_149 = arith.constant 0 : index
    %88 = vector.load %arg1[%c0_146, %c0_147, %c0_148, %c0_149] : memref<1x52x52x8xbf16, #tpu.memory_space<vmem>>, vector<1x16x16x8xbf16>
    %89 = vector.shape_cast %88 : vector<1x16x16x8xbf16> to vector<16x16x8xbf16>
    %c0_150 = arith.constant 0 : index
    %c0_151 = arith.constant 0 : index
    %c0_152 = arith.constant 0 : index
    %90 = vector.load %arg10[%c0_150, %c0_151, %c0_152] : memref<16x16x72xbf16, #tpu.memory_space<vmem>>, vector<16x16x8xbf16>
    tpu.vector_store %arg10[%c0_150, %c0_151, %c0_152], %89 {strides = array<i32>} : memref<16x16x72xbf16, #tpu.memory_space<vmem>>, vector<16x16x8xbf16>,
    %c0_153 = arith.constant 0 : index
    %c0_154 = arith.constant 0 : index
    %c18_155 = arith.constant 18 : index
    %c0_156 = arith.constant 0 : index
    %91 = vector.load %arg1[%c0_153, %c0_154, %c18_155, %c0_156] : memref<1x52x52x8xbf16, #tpu.memory_space<vmem>>, vector<1x16x16x8xbf16>
    %92 = vector.shape_cast %91 : vector<1x16x16x8xbf16> to vector<16x16x8xbf16>
    %c0_157 = arith.constant 0 : index
    %c0_158 = arith.constant 0 : index
    %c8_159 = arith.constant 8 : index
    %93 = vector.load %arg10[%c0_157, %c0_158, %c8_159] : memref<16x16x72xbf16, #tpu.memory_space<vmem>>, vector<16x16x8xbf16>
    tpu.vector_store %arg10[%c0_157, %c0_158, %c8_159], %92 {strides = array<i32>} : memref<16x16x72xbf16, #tpu.memory_space<vmem>>, vector<16x16x8xbf16>,
    %c0_160 = arith.constant 0 : index
    %c0_161 = arith.constant 0 : index
    %c36 = arith.constant 36 : index
    %c0_162 = arith.constant 0 : index
    %94 = vector.load %arg1[%c0_160, %c0_161, %c36, %c0_162] : memref<1x52x52x8xbf16, #tpu.memory_space<vmem>>, vector<1x16x16x8xbf16>
    %95 = vector.shape_cast %94 : vector<1x16x16x8xbf16> to vector<16x16x8xbf16>
    %c0_163 = arith.constant 0 : index
    %c0_164 = arith.constant 0 : index
    %c16_165 = arith.constant 16 : index
    %96 = vector.load %arg10[%c0_163, %c0_164, %c16_165] : memref<16x16x72xbf16, #tpu.memory_space<vmem>>, vector<16x16x8xbf16>
    tpu.vector_store %arg10[%c0_163, %c0_164, %c16_165], %95 {strides = array<i32>} : memref<16x16x72xbf16, #tpu.memory_space<vmem>>, vector<16x16x8xbf16>,
    %c0_166 = arith.constant 0 : index
    %c18_167 = arith.constant 18 : index
    %c0_168 = arith.constant 0 : index
    %c0_169 = arith.constant 0 : index
    %97 = vector.load %arg1[%c0_166, %c18_167, %c0_168, %c0_169] : memref<1x52x52x8xbf16, #tpu.memory_space<vmem>>, vector<1x16x16x8xbf16>
    %98 = vector.shape_cast %97 : vector<1x16x16x8xbf16> to vector<16x16x8xbf16>
    %c0_170 = arith.constant 0 : index
    %c0_171 = arith.constant 0 : index
    %c24_172 = arith.constant 24 : index
    %99 = vector.load %arg10[%c0_170, %c0_171, %c24_172] : memref<16x16x72xbf16, #tpu.memory_space<vmem>>, vector<16x16x8xbf16>
    tpu.vector_store %arg10[%c0_170, %c0_171, %c24_172], %98 {strides = array<i32>} : memref<16x16x72xbf16, #tpu.memory_space<vmem>>, vector<16x16x8xbf16>,
    %c0_173 = arith.constant 0 : index
    %c18_174 = arith.constant 18 : index
    %c18_175 = arith.constant 18 : index
    %c0_176 = arith.constant 0 : index
    %100 = vector.load %arg1[%c0_173, %c18_174, %c18_175, %c0_176] : memref<1x52x52x8xbf16, #tpu.memory_space<vmem>>, vector<1x16x16x8xbf16>
    %101 = vector.shape_cast %100 : vector<1x16x16x8xbf16> to vector<16x16x8xbf16>
    %c0_177 = arith.constant 0 : index
    %c0_178 = arith.constant 0 : index
    %c32_179 = arith.constant 32 : index
    %102 = vector.load %arg10[%c0_177, %c0_178, %c32_179] : memref<16x16x72xbf16, #tpu.memory_space<vmem>>, vector<16x16x8xbf16>
    tpu.vector_store %arg10[%c0_177, %c0_178, %c32_179], %101 {strides = array<i32>} : memref<16x16x72xbf16, #tpu.memory_space<vmem>>, vector<16x16x8xbf16>,
    %c0_180 = arith.constant 0 : index
    %c18_181 = arith.constant 18 : index
    %c36_182 = arith.constant 36 : index
    %c0_183 = arith.constant 0 : index
    %103 = vector.load %arg1[%c0_180, %c18_181, %c36_182, %c0_183] : memref<1x52x52x8xbf16, #tpu.memory_space<vmem>>, vector<1x16x16x8xbf16>
    %104 = vector.shape_cast %103 : vector<1x16x16x8xbf16> to vector<16x16x8xbf16>
    %c0_184 = arith.constant 0 : index
    %c0_185 = arith.constant 0 : index
    %c40_186 = arith.constant 40 : index
    %105 = vector.load %arg10[%c0_184, %c0_185, %c40_186] : memref<16x16x72xbf16, #tpu.memory_space<vmem>>, vector<16x16x8xbf16>
    tpu.vector_store %arg10[%c0_184, %c0_185, %c40_186], %104 {strides = array<i32>} : memref<16x16x72xbf16, #tpu.memory_space<vmem>>, vector<16x16x8xbf16>,
    %c0_187 = arith.constant 0 : index
    %c36_188 = arith.constant 36 : index
    %c0_189 = arith.constant 0 : index
    %c0_190 = arith.constant 0 : index
    %106 = vector.load %arg1[%c0_187, %c36_188, %c0_189, %c0_190] : memref<1x52x52x8xbf16, #tpu.memory_space<vmem>>, vector<1x16x16x8xbf16>
    %107 = vector.shape_cast %106 : vector<1x16x16x8xbf16> to vector<16x16x8xbf16>
    %c0_191 = arith.constant 0 : index
    %c0_192 = arith.constant 0 : index
    %c48_193 = arith.constant 48 : index
    %108 = vector.load %arg10[%c0_191, %c0_192, %c48_193] : memref<16x16x72xbf16, #tpu.memory_space<vmem>>, vector<16x16x8xbf16>
    tpu.vector_store %arg10[%c0_191, %c0_192, %c48_193], %107 {strides = array<i32>} : memref<16x16x72xbf16, #tpu.memory_space<vmem>>, vector<16x16x8xbf16>,
    %c0_194 = arith.constant 0 : index
    %c36_195 = arith.constant 36 : index
    %c18_196 = arith.constant 18 : index
    %c0_197 = arith.constant 0 : index
    %109 = vector.load %arg1[%c0_194, %c36_195, %c18_196, %c0_197] : memref<1x52x52x8xbf16, #tpu.memory_space<vmem>>, vector<1x16x16x8xbf16>
    %110 = vector.shape_cast %109 : vector<1x16x16x8xbf16> to vector<16x16x8xbf16>
    %c0_198 = arith.constant 0 : index
    %c0_199 = arith.constant 0 : index
    %c56_200 = arith.constant 56 : index
    %111 = vector.load %arg10[%c0_198, %c0_199, %c56_200] : memref<16x16x72xbf16, #tpu.memory_space<vmem>>, vector<16x16x8xbf16>
    tpu.vector_store %arg10[%c0_198, %c0_199, %c56_200], %110 {strides = array<i32>} : memref<16x16x72xbf16, #tpu.memory_space<vmem>>, vector<16x16x8xbf16>,
    %c0_201 = arith.constant 0 : index
    %c36_202 = arith.constant 36 : index
    %c36_203 = arith.constant 36 : index
    %c0_204 = arith.constant 0 : index
    %112 = vector.load %arg1[%c0_201, %c36_202, %c36_203, %c0_204] : memref<1x52x52x8xbf16, #tpu.memory_space<vmem>>, vector<1x16x16x8xbf16>
    %113 = vector.shape_cast %112 : vector<1x16x16x8xbf16> to vector<16x16x8xbf16>
    %c0_205 = arith.constant 0 : index
    %c0_206 = arith.constant 0 : index
    %c64_207 = arith.constant 64 : index
    %114 = vector.load %arg10[%c0_205, %c0_206, %c64_207] : memref<16x16x72xbf16, #tpu.memory_space<vmem>>, vector<16x16x8xbf16>
    tpu.vector_store %arg10[%c0_205, %c0_206, %c64_207], %113 {strides = array<i32>} : memref<16x16x72xbf16, #tpu.memory_space<vmem>>, vector<16x16x8xbf16>,
    %c0_208 = arith.constant 0 : index
    %c0_209 = arith.constant 0 : index
    %c0_210 = arith.constant 0 : index
    %115 = vector.load %arg10[%c0_208, %c0_209, %c0_210] : memref<16x16x72xbf16, #tpu.memory_space<vmem>>, vector<16x16x72xbf16>
    %116 = vector.shape_cast %115 : vector<16x16x72xbf16> to vector<256x72xbf16>
    %c0_211 = arith.constant 0 : index
    %c0_212 = arith.constant 0 : index
    %117 = vector.load %arg5[%c0_211, %c0_212] : memref<72x16xbf16, #tpu.memory_space<vmem>>, vector<72x16xbf16>
    %cst_213 = arith.constant dense<0.000000e+00> : vector<256x16xf32>
    %118 = tpu.matmul %116, %117, %cst_213 {dimension_numbers = #tpu.dot_dimension_numbers<[1], [0], [0], [1], [0, 0, 1, 1], [], []>} : vector<256x72xbf16>, vector<72x16xbf16>, vector<256x16xf32> -> vector<256x16xf32>
    %c0_214 = arith.constant 0 : index
    %c48_215 = arith.constant 48 : index
    %119 = vector.load %arg6[%c0_214, %c48_215] : memref<1x64xf32, #tpu.memory_space<vmem>>, vector<1x16xf32>
    %120 = vector.broadcast %119 : vector<1x16xf32> to vector<256x16xf32>
    %121 = arith.addf %118, %120 : vector<256x16xf32>
    %cst_216 = arith.constant 0.000000e+00 : f32
    %122 = vector.broadcast %cst_216 : f32 to vector<256x16xf32>
    %123 = arith.maximumf %121, %122 : vector<256x16xf32>
    %124 = arith.truncf %123 : vector<256x16xf32> to vector<256x16xbf16>
    %c0_217 = arith.constant 0 : index
    %c48_218 = arith.constant 48 : index
    %125 = vector.load %arg11[%c0_217, %c48_218] : memref<256x64xbf16, #tpu.memory_space<vmem>>, vector<256x16xbf16>
    tpu.vector_store %arg11[%c0_217, %c48_218], %124 {strides = array<i32>} : memref<256x64xbf16, #tpu.memory_space<vmem>>, vector<256x16xbf16>,
    %c0_219 = arith.constant 0 : index
    %c0_220 = arith.constant 0 : index
    %126 = vector.load %arg11[%c0_219, %c0_220] : memref<256x64xbf16, #tpu.memory_space<vmem>>, vector<256x64xbf16>
    %c0_221 = arith.constant 0 : index
    %c0_222 = arith.constant 0 : index
    %127 = vector.load %arg7[%c0_221, %c0_222] : memref<64x128xbf16, #tpu.memory_space<vmem>>, vector<64x128xbf16>
    %cst_223 = arith.constant dense<0.000000e+00> : vector<256x128xf32>
    %128 = tpu.matmul %126, %127, %cst_223 {dimension_numbers = #tpu.dot_dimension_numbers<[1], [0], [0], [1], [0, 0, 1, 1], [], []>} : vector<256x64xbf16>, vector<64x128xbf16>, vector<256x128xf32> -> vector<256x128xf32>
    %c0_224 = arith.constant 0 : index
    %c0_225 = arith.constant 0 : index
    %c0_226 = arith.constant 0 : index
    %129 = vector.load %arg8[%c0_224, %c0_225, %c0_226] : memref<1x1x128xf32, #tpu.memory_space<vmem>>, vector<1x1x128xf32>
    %130 = vector.shape_cast %129 : vector<1x1x128xf32> to vector<1x128xf32>
    %131 = vector.broadcast %130 : vector<1x128xf32> to vector<256x128xf32>
    %132 = arith.addf %128, %131 : vector<256x128xf32>
    %cst_227 = arith.constant 0.000000e+00 : f32
    %133 = vector.broadcast %cst_227 : f32 to vector<256x128xf32>
    %134 = arith.maximumf %132, %133 : vector<256x128xf32>
    %c0_228 = arith.constant 0 : index
    %c0_229 = arith.constant 0 : index
    %c0_230 = arith.constant 0 : index
    %135 = vector.load %arg9[%c0_228, %c0_229, %c0_230] : memref<1x256x128xf32, #tpu.memory_space<vmem>>, vector<1x256x128xf32>
    %136 = vector.shape_cast %135 : vector<1x256x128xf32> to vector<256x128xf32>
    %137 = vector.shape_cast %134 : vector<256x128xf32> to vector<1x256x128xf32>
    tpu.vector_store %arg9[%c0_228, %c0_229, %c0_230], %137 {strides = array<i32>} : memref<1x256x128xf32, #tpu.memory_space<vmem>>, vector<1x256x128xf32>,
    return
  }
  func.func @transform_0(%arg0: i32) -> (i32, i32, i32, i32) {
    %c0_i32 = arith.constant 0 : i32
    %c0_i32_0 = arith.constant 0 : i32
    %c0_i32_1 = arith.constant 0 : i32
    %c0_i32_2 = arith.constant 0 : i32
    return %arg0, %c0_i32, %c0_i32_0, %c0_i32_1 : i32, i32, i32, i32
  }
  func.func @transform_1(%arg0: i32) -> (i32, i32) {
    %c0_i32 = arith.constant 0 : i32
    %c0_i32_0 = arith.constant 0 : i32
    %c0_i32_1 = arith.constant 0 : i32
    return %c0_i32, %c0_i32_0 : i32, i32
  }
  func.func @transform_2(%arg0: i32) -> (i32, i32) {
    %c0_i32 = arith.constant 0 : i32
    %c0_i32_0 = arith.constant 0 : i32
    %c0_i32_1 = arith.constant 0 : i32
    return %c0_i32, %c0_i32_0 : i32, i32
  }
  func.func @transform_3(%arg0: i32) -> (i32, i32) {
    %c0_i32 = arith.constant 0 : i32
    %c0_i32_0 = arith.constant 0 : i32
    %c0_i32_1 = arith.constant 0 : i32
    return %c0_i32, %c0_i32_0 : i32, i32
  }
  func.func @transform_4(%arg0: i32) -> (i32, i32) {
    %c0_i32 = arith.constant 0 : i32
    %c0_i32_0 = arith.constant 0 : i32
    %c0_i32_1 = arith.constant 0 : i32
    return %c0_i32, %c0_i32_0 : i32, i32
  }
  func.func @transform_5(%arg0: i32) -> (i32, i32) {
    %c0_i32 = arith.constant 0 : i32
    %c0_i32_0 = arith.constant 0 : i32
    %c0_i32_1 = arith.constant 0 : i32
    return %c0_i32, %c0_i32_0 : i32, i32
  }
  func.func @transform_6(%arg0: i32) -> (i32, i32) {
    %c0_i32 = arith.constant 0 : i32
    %c0_i32_0 = arith.constant 0 : i32
    %c0_i32_1 = arith.constant 0 : i32
    return %c0_i32, %c0_i32_0 : i32, i32
  }
  func.func @transform_7(%arg0: i32) -> (i32, i32, i32) {
    %c0_i32 = arith.constant 0 : i32
    %c0_i32_0 = arith.constant 0 : i32
    %c0_i32_1 = arith.constant 0 : i32
    return %arg0, %c0_i32, %c0_i32_0 : i32, i32, i32
  }
  func.func @transform_8(%arg0: i32) -> (i32, i32, i32) {
    %c0_i32 = arith.constant 0 : i32
    %c0_i32_0 = arith.constant 0 : i32
    %c0_i32_1 = arith.constant 0 : i32
    return %arg0, %c0_i32, %c0_i32_0 : i32, i32, i32
  }
}

</mosaic_0001>

<bundles_post_ra>
// kernel: deeplabv3_aspp_forward.1
= control target key start
LH: loop header
LB: loop body
LE: loop exit
PB: predicated region body
PF: predicated region fallthrough
CT: control target
= control target key end

     0   :  { %s12706_s27 = smov 0   ;;  %s15678_s0 = inlined_call_operand.vmem [shape: bf16[2,52,52,8], index: 0, kind: input, shape index: {}]   ;;  %s15679_s1 = inlined_call_operand.vmem [shape: bf16[8,16], index: 1, kind: input, shape index: {}]   ;;  %s15680_s2 = inlined_call_operand.vmem [shape: bf16[72,16], index: 2, kind: input, shape index: {}]   ;;  %s15681_s3 = inlined_call_operand.vmem [shape: bf16[72,16], index: 3, kind: input, shape index: {}]   ;;  %s15682_s4 = inlined_call_operand.vmem [shape: bf16[72,16], index: 4, kind: input, shape index: {}]   ;;  %s15683_s5 = inlined_call_operand.vmem [shape: f32[1,64], index: 5, kind: input, shape index: {}]   ;;  %s15684_s6 = inlined_call_operand.vmem [shape: bf16[64,128], index: 6, kind: input, shape index: {}]   ;;  %s15685_s7 = inlined_call_operand.vmem [shape: f32[2,1,128], index: 7, kind: input, shape index: {}]   ;;  %s15686_s8 = inlined_call_operand.vmem [shape: f32[2,256,128], index: 8, kind: output, shape index: {}]  }
   0x1 LB: > { %s9492_s28 = sadd.s32 4294967295, %s12648_s27   ;;  %p9496_p0 = scmp.ge.s32.totalorder %s12648_s27, 1  ;;  %s12648_s27 = sphi %s12706_s27, %s18_s27  }
   0x2   : > { %p270_p1 = scmp.lt.s32.totalorder %s12648_s27, 3 }
   0x4   : > { %p271_p2 = pnand %p9496_p0, %p270_p1 }
   0x6   : > { %274 = sbr.rel (%p271_p2) target bundleno = 1544 (0x608), region = 52 }
   0xd   : > { %p307_p3 = scmp.lt.s32.totalorder %s9492_s28, 1  ;;  %vm1302_vm0 = vcmask 1046528   ;;  %s12650_s11 = smov 8   ;;  %vm1045_vm1 = vcmask 1045504   ;;  %vm589_vm2 = vcmask 64512   ;;  %vm1399_vm3 = vcmask 130112  }
   0xe   : > { %s12651_s12 = smov 16   ;;  %s12652_s13 = smov 24   ;;  %vm1576_vm4 = vcmask 195712   ;;  %vm1865_vm5 = vcmask 261312   ;;  %vm2154_vm6 = vcmask 326912   ;;  %vm3684_vm7 = vcmask 1044480  }
   0xf   : > { %s15740_s28 = smov (!%p307_p3, %s9492_s28), 1  ;;  %s12653_s14 = smov 32   ;;  %vm2331_vm8 = vcmask 392512   ;;  %vm638_vm9 = vcmask 1043456   ;;  %vm418_vm10 = vcmask 1042432   ;;  %vm419_vm11 = vcmask 1046532  }
  0x10   : > { %s11834_s29 = smul.u32 1456, %s15740_s28  ;;  %s12654_s15 = smov 40   ;;  %vm13327_vm12 = vmor %vm418_vm10, %vm419_vm11  ;;  %vm2621_vm13 = vcmask 458112   ;;  %vm2910_vm14 = vcmask 523712   ;;  %vm3087_vm15 = vcmask 589312   ;;  %vm3165_vm10 = vcmask 588800  }
  0x11   : > { %s12655_s16 = smov 48   ;;  %s12656_s17 = smov 56  }
  0x12   : > { %s12720_s10 = scalar_lea.vmem %s15678_s0, %s11834_s29  ;;  %s12657_s18 = smov 64  }
  0x13   : > { %v11854_v0 = vld [vmem:[%s12720_s10 + $0x190] sm:$0xfe]   ;;  %v11855_v1 = vld [vmem:[%s12720_s10 + $0x198] ss:$0 sps:$4 sm:$0x11]   ;;  %s12660_s22 = smov 80  }
  0x14   : > { %v1309_v2 = vrot.slane %v11854_v0, 1  ;;  %v1310_v3 = vrot.slane %v11855_v1, 1  ;;  %v11856_v4 = vld [vmem:[%s12720_s10 + $0x158] sm:$0xfe]   ;;  %v11858_v8 = vld [vmem:[%s12720_s10 + $0x1ac] sm:$0xfe]  }
  0x15   : > { %v11857_v5 = vld [vmem:[%s12720_s10 + $0x160] ss:$0 sps:$4 sm:$0x11]   ;;  %v1303_v7 = vrot.slane %v11856_v4, 1  ;;  %v1312_v11 = vrot.slane %v11858_v8, 1  ;;  %s11526_s9 = sshll.u32 %s15740_s28, 8 }
  0x16   : > { %v1311_v6 = vsel %vm1302_vm0, %v1309_v2, %v1310_v3  ;;  %v1304_v9 = vrot.slane %v11857_v5, 1  ;;  %v11859_v10 = vld [vmem:[%s12720_s10 + $0x1b4] ss:$0 sps:$4 sm:$0x11]   ;;  %v11860_v14 = vld [vmem:[%s12720_s10 + $0x174] sm:$0xfe]   ;;  %s15610_s21 = scalar_lea.vmem %s15686_s8, %s11526_s9 }
  0x17   : > { %1355 = vrot.lane.b32.xlu1 %v1311_v6, %s12650_s11  ;;  %v1313_v13 = vrot.slane %v11859_v10, 1  ;;  %v11861_v15 = vld [vmem:[%s12720_s10 + $0x17c] ss:$0 sps:$4 sm:$0x11]   ;;  %v1306_v17 = vrot.slane %v11860_v14, 1 }
  0x18   : > { %v1305_v12 = vsel %vm1302_vm0, %v1303_v7, %v1304_v9  ;;  %v1307_v18 = vrot.slane %v11861_v15, 1  ;;  %v11862_v19 = vld [vmem:[%s12720_s10 + $0x1e4] sm:$0xfe]   ;;  %v11863_v20 = vld [vmem:[%s12720_s10 + $0x1ec] ss:$0 sps:$4 sm:$0x11]  }
  0x19   : > { %1351 = vrot.lane.b32.xlu0 %v1305_v12, %s12650_s11  ;;  %v1314_v16 = vsel %vm1302_vm0, %v1312_v11, %v1313_v13  ;;  %v1318_v22 = vrot.slane %v11862_v19, 1  ;;  %v11864_v23 = vld [vmem:[%s12720_s10 + $0x1c8] sm:$0xfe]   ;;  %v1319_v24 = vrot.slane %v11863_v20, 1  ;;  %v11866_v29 = vld [vmem:[%s12720_s10 + $0x21c] sm:$0xfe]  }
  0x1a   : > { %v1308_v21 = vsel %vm1302_vm0, %v1306_v17, %v1307_v18  ;;  %v11865_v25 = vld [vmem:[%s12720_s10 + $0x1d0] ss:$0 sps:$4 sm:$0x11]   ;;  %v1315_v26 = vrot.slane %v11864_v23, 1  ;;  %v1324_v32 = vrot.slane %v11866_v29, 1  ;;  %v11886_v12 = vld [vmem:[%s12720_s10 + $0x178] sm:$0xff]  }
  0x1b   : > { %1357 = vrot.lane.b32.xlu1 %v1314_v16, %s12650_s11  ;;  %v1320_v27 = vsel %vm1302_vm0, %v1318_v22, %v1319_v24  ;;  %v1316_v28 = vrot.slane %v11865_v25, 1  ;;  %v11867_v30 = vld [vmem:[%s12720_s10 + $0x224] ss:$0 sps:$4 sm:$0x11]   ;;  %v11870_v38 = vld [vmem:[%s12720_s10 + $0x254] sm:$0xfe]  }
  0x1c   : > { %v1325_v33 = vrot.slane %v11867_v30, 1  ;;  %v11868_v34 = vld [vmem:[%s12720_s10 + $0x200] sm:$0xfe]   ;;  %v11869_v35 = vld [vmem:[%s12720_s10 + $0x208] ss:$0 sps:$4 sm:$0x11]  }
  0x1d   : > { %1353 = vrot.lane.b32.xlu0 %v1308_v21, %s12650_s11  ;;  %v1317_v31 = vsel %vm1302_vm0, %v1315_v26, %v1316_v28  ;;  %v1321_v37 = vrot.slane %v11868_v34, 1  ;;  %v1322_v39 = vrot.slane %v11869_v35, 1  ;;  %v11871_v40 = vld [vmem:[%s12720_s10 + $0x25c] ss:$0 sps:$4 sm:$0x11]   ;;  %v1330_v41 = vrot.slane %v11870_v38, 1 }
  0x1e   : > { %v1326_v36 = vsel %vm1302_vm0, %v1324_v32, %v1325_v33  ;;  %v1331_v43 = vrot.slane %v11871_v40, 1  ;;  %v11872_v44 = vld [vmem:[%s12720_s10 + $0x238] sm:$0xfe]   ;;  %v11873_v45 = vld [vmem:[%s12720_s10 + $0x240] ss:$0 sps:$4 sm:$0x11]  }
  0x1f   : > { %1361 = vrot.lane.b32.xlu1 %v1320_v27, %s12650_s11  ;;  %v1323_v42 = vsel %vm1302_vm0, %v1321_v37, %v1322_v39  ;;  %v1327_v47 = vrot.slane %v11872_v44, 1  ;;  %v1328_v48 = vrot.slane %v11873_v45, 1  ;;  %v11874_v49 = vld [vmem:[%s12720_s10 + $0x28c] sm:$0xfe]   ;;  %v11878_v59 = vld [vmem:[%s12720_s10 + $0x2c4] sm:$0xfe]  }
  0x20   : > { %v1332_v46 = vsel %vm1302_vm0, %v1330_v41, %v1331_v43  ;;  %v11875_v50 = vld [vmem:[%s12720_s10 + $0x294] ss:$0 sps:$4 sm:$0x11]   ;;  %v1336_v52 = vrot.slane %v11874_v49, 1  ;;  %v1342_v62 = vrot.slane %v11878_v59, 1  ;;  %v11887_v16 = vld [vmem:[%s12720_s10 + $0x15c] sm:$0xff]  }
  0x21   : > { %1359 = vrot.lane.b32.xlu0 %v1317_v31, %s12650_s11  ;;  %v1329_v51 = vsel %vm1302_vm0, %v1327_v47, %v1328_v48  ;;  %v11876_v53 = vld [vmem:[%s12720_s10 + $0x270] sm:$0xfe]   ;;  %v1337_v54 = vrot.slane %v11875_v50, 1  ;;  %v11877_v55 = vld [vmem:[%s12720_s10 + $0x278] ss:$0 sps:$4 sm:$0x11]  }
  0x22   : > { %v1333_v56 = vrot.slane %v11876_v53, 1  ;;  %v1334_v58 = vrot.slane %v11877_v55, 1  ;;  %v11879_v60 = vld [vmem:[%s12720_s10 + $0x2cc] ss:$0 sps:$4 sm:$0x11]   ;;  %v11888_v18 = vld [vmem:[%s12720_s10 + $0x1b0] sm:$0xff]  }
  0x23   : > { %1365 = vrot.lane.b32.xlu1 %v1326_v36, %s12650_s11  ;;  %v1338_v57 = vsel %vm1302_vm0, %v1336_v52, %v1337_v54  ;;  %v1343_v63 = vrot.slane %v11879_v60, 1  ;;  %v11880_v0 = vld [vmem:[%s12720_s10 + $0x2a8] sm:$0xfe]   ;;  %v11881_v1 = vld [vmem:[%s12720_s10 + $0x2b0] ss:$0 sps:$4 sm:$0x11]  }
  0x24   : > { %v1335_v61 = vsel %vm1302_vm0, %v1333_v56, %v1334_v58  ;;  %v1339_v3 = vrot.slane %v11880_v0, 1  ;;  %v11882_v4 = vld [vmem:[%s12720_s10 + $0x2fc] sm:$0xfe]   ;;  %v1340_v5 = vrot.slane %v11881_v1, 1  ;;  %v11889_v19 = vld [vmem:[%s12720_s10 + $0x194] sm:$0xff]   ;;  %v11890_v20 = vld [vmem:[%s12720_s10 + $0x1e8] sm:$0xff]  }
  0x25   : > { %1363 = vrot.lane.b32.xlu0 %v1323_v42, %s12650_s11  ;;  %v1344_v2 = vsel %vm1302_vm0, %v1342_v62, %v1343_v63  ;;  %v11883_v6 = vld [vmem:[%s12720_s10 + $0x304] ss:$0 sps:$4 sm:$0x11]   ;;  %v1348_v7 = vrot.slane %v11882_v4, 1  ;;  %v11891_v21 = vld [vmem:[%s12720_s10 + $0x1cc] sm:$0xff]   ;;  %v11894_v24 = vld [vmem:[%s12720_s10 + $0x258] sm:$0xff]  }
  0x26   : > { %v1341_v8 = vsel %vm1302_vm0, %v1339_v3, %v1340_v5  ;;  %v1349_v9 = vrot.slane %v11883_v6, 1  ;;  %v11884_v10 = vld [vmem:[%s12720_s10 + $0x2e0] sm:$0xfe]   ;;  %v11885_v11 = vld [vmem:[%s12720_s10 + $0x2e8] ss:$0 sps:$4 sm:$0x11]  }
  0x27   : > { %1369 = vrot.lane.b32.xlu1 %v1332_v46, %s12650_s11  ;;  %v1345_v14 = vrot.slane %v11884_v10, 1  ;;  %v1346_v15 = vrot.slane %v11885_v11, 1  ;;  %v11892_v22 = vld [vmem:[%s12720_s10 + $0x220] sm:$0xff]   ;;  %v11896_v26 = vld [vmem:[%s12720_s10 + $0x290] sm:$0xff]   ;;  %v11902_v28 = vld [vmem:[%s12720_s10 + $0x218] sm:$0xfc]  }
  0x28   : > { %v1350_v13 = vsel %vm1302_vm0, %v1348_v7, %v1349_v9  ;;  %v11893_v23 = vld [vmem:[%s12720_s10 + $0x204] sm:$0xff]   ;;  %v11895_v25 = vld [vmem:[%s12720_s10 + $0x23c] sm:$0xff]   ;;  %v11897_v27 = vld [vmem:[%s12720_s10 + $0x274] sm:$0xff]   ;;  %v1772_v38 = vrot.slane %v11902_v28, 2 }
  0x29   : > { %1367 = vrot.lane.b32.xlu0 %v1329_v51, %s12650_s11  ;;  %v1347_v17 = vsel %vm1302_vm0, %v1345_v14, %v1346_v15  ;;  %v11903_v29 = vld [vmem:[%s12720_s10 + $0x220] ss:$0 sps:$4 sm:$0x33]   ;;  %v11898_v31 = vld [vmem:[%s12720_s10 + $0x2c8] sm:$0xff]   ;;  %v11906_v33 = vld [vmem:[%s12720_s10 + $0x250] sm:$0xfc]  }
  0x2a   : > { %v11904_v30 = vld [vmem:[%s12720_s10 + $0x1fc] sm:$0xfc]   ;;  %v11905_v32 = vld [vmem:[%s12720_s10 + $0x204] ss:$0 sps:$4 sm:$0x33]   ;;  %v11899_v34 = vld [vmem:[%s12720_s10 + $0x2ac] sm:$0xff]  }
  0x2b   : > { %1373 = vrot.lane.b32.xlu1 %v1338_v57, %s12650_s11  ;;  %v11900_v35 = vld [vmem:[%s12720_s10 + $0x300] sm:$0xff]   ;;  %v11907_v36 = vld [vmem:[%s12720_s10 + $0x258] ss:$0 sps:$4 sm:$0x33]   ;;  %v1773_v39 = vrot.slane %v11903_v29, 2  ;;  %v1769_v40 = vrot.slane %v11904_v30, 2 }
  0x2c   : > { %v11901_v37 = vld [vmem:[%s12720_s10 + $0x2e4] sm:$0xff]   ;;  %v1770_v41 = vrot.slane %v11905_v32, 2  ;;  %v1778_v42 = vrot.slane %v11906_v33, 2  ;;  %v11909_v43 = vld [vmem:[%s12720_s10 + $0x23c] ss:$0 sps:$4 sm:$0x33]  }
  0x2d   : > { %1371 = vrot.lane.b32.xlu0 %v1335_v61, %s12650_s11  ;;  %v11908_v44 = vld [vmem:[%s12720_s10 + $0x234] sm:$0xfc]   ;;  %v1779_v45 = vrot.slane %v11907_v36, 2  ;;  %v11910_v46 = vld [vmem:[%s12720_s10 + $0x288] sm:$0xfc]   ;;  %v1774_v49 = vsel %vm1045_vm1, %v1772_v38, %v1773_v39  ;;  %v1776_v55 = vrot.slane %v11909_v43, 2 }
  0x2e   : > { %v11911_v47 = vld [vmem:[%s12720_s10 + $0x290] ss:$0 sps:$4 sm:$0x33]   ;;  %v11913_v48 = vld [vmem:[%s12720_s10 + $0x274] ss:$0 sps:$4 sm:$0x33]   ;;  %v1771_v53 = vsel %vm1045_vm1, %v1769_v40, %v1770_v41 }
  0x2f   : > { %1377 = vrot.lane.b32.xlu1 %v1344_v2, %s12650_s11  ;;  %v11912_v50 = vld [vmem:[%s12720_s10 + $0x26c] sm:$0xfc]   ;;  %v11914_v51 = vld [vmem:[%s12720_s10 + $0x2c0] sm:$0xfc]   ;;  %v1775_v54 = vrot.slane %v11908_v44, 2  ;;  %v1780_v58 = vsel %vm1045_vm1, %v1778_v42, %v1779_v45  ;;  %v1784_v59 = vrot.slane %v11910_v46, 2 }
  0x30   : > { %v11915_v52 = vld [vmem:[%s12720_s10 + $0x2c8] ss:$0 sps:$4 sm:$0x33]   ;;  %v11917_v57 = vld [vmem:[%s12720_s10 + $0x2ac] ss:$0 sps:$4 sm:$0x33]  }
  0x31   : > { %1375 = vrot.lane.b32.xlu0 %v1341_v8, %s12650_s11  ;;  %v11916_v56 = vld [vmem:[%s12720_s10 + $0x2a4] sm:$0xfc]   ;;  %v1785_v60 = vrot.slane %v11911_v47, 2  ;;  %v1781_v61 = vrot.slane %v11912_v50, 2  ;;  %v1782_v62 = vrot.slane %v11913_v48, 2  ;;  %v1790_v63 = vrot.slane %v11914_v51, 2 }
  0x32   : > { %v1791_v0 = vrot.slane %v11915_v52, 2  ;;  %v11918_v1 = vld [vmem:[%s12720_s10 + $0x2f8] sm:$0xfc]   ;;  %v1777_v2 = vsel %vm1045_vm1, %v1775_v54, %v1776_v55  ;;  %v1787_v3 = vrot.slane %v11916_v56, 2  ;;  %v1788_v6 = vrot.slane %v11917_v57, 2 }
  0x33   : > { %1381 = vrot.lane.b32.xlu1 %v1350_v13, %s12650_s11  ;;  %v11919_v4 = vld [vmem:[%s12720_s10 + $0x300] ss:$0 sps:$4 sm:$0x33]   ;;  %v1786_v5 = vsel %vm1045_vm1, %v1784_v59, %v1785_v60  ;;  %v11921_v7 = vld [vmem:[%s12720_s10 + $0x2e4] ss:$0 sps:$4 sm:$0x33]   ;;  %v1783_v10 = vsel %vm1045_vm1, %v1781_v61, %v1782_v62 }
  0x34   : > { %v11920_v8 = vld [vmem:[%s12720_s10 + $0x2dc] sm:$0xfc]   ;;  %v11922_v9 = vld [vmem:[%s12720_s10 + $0x330] sm:$0xfc]   ;;  %v1796_v11 = vrot.slane %v11918_v1, 2  ;;  %v1792_v14 = vsel %vm1045_vm1, %v1790_v63, %v1791_v0  ;;  %v1797_v15 = vrot.slane %v11919_v4, 2 }
  0x35   : > { %1379 = vrot.lane.b32.xlu0 %v1347_v17, %s12650_s11  ;;  %v11924_v13 = vld [vmem:[%s12720_s10 + $0x314] sm:$0xfc]   ;;  %v11926_v17 = vld [vmem:[%s12720_s10 + $0x368] sm:$0xfc]   ;;  %v11930_v30 = vld [vmem:[%s12720_s10 + $0x3a0] sm:$0xfc]  }
  0x36   : > { %v11929_v28 = vld [vmem:[%s12720_s10 + $0x354] ss:$0 sps:$4 sm:$0x33]   ;;  %v1808_v29 = vrot.slane %v11926_v17, 2  ;;  %v11932_v33 = vld [vmem:[%s12720_s10 + $0x384] sm:$0xfc]  }
  0x37   : > { %1530 = vrot.lane.b32.xlu1 %v11886_v12, %s12651_s12  ;;  %v11923_v12 = vld [vmem:[%s12720_s10 + $0x338] ss:$0 sps:$4 sm:$0x33]   ;;  %v11934_v36 = vld [vmem:[%s12720_s10 + $0x21c] sm:$0xfe]   ;;  %v1806_v41 = vrot.slane %v11929_v28, 2 }
  0x38   : > { %v11935_v38 = vld [vmem:[%s12720_s10 + $0x224] ss:$0 sps:$4 sm:$0x11]   ;;  %v1814_v43 = vrot.slane %v11930_v30, 2  ;;  %v1811_v45 = vrot.slane %v11932_v33, 2 }
  0x39   : > { %1528 = vrot.lane.b32.xlu0 %v11887_v16, %s12651_s12  ;;  %v11925_v16 = vld [vmem:[%s12720_s10 + $0x31c] ss:$0 sps:$4 sm:$0x33]   ;;  %v11936_v42 = vld [vmem:[%s12720_s10 + $0x200] sm:$0xfe]   ;;  %v2062_v50 = vrot.slane %v11935_v38, 1 }
  0x3a   : > { %v11937_v48 = vld [vmem:[%s12720_s10 + $0x208] ss:$0 sps:$4 sm:$0x11]   ;;  %v2058_v52 = vrot.slane %v11936_v42, 1  ;;  %v11940_v57 = vld [vmem:[%s12720_s10 + $0x238] sm:$0xfe]  }
  0x3b   : > { %1534 = vrot.lane.b32.xlu1 %v11888_v18, %s12651_s12  ;;  %v1789_v18 = vsel %vm1045_vm1, %v1787_v3, %v1788_v6  ;;  %v11939_v54 = vld [vmem:[%s12720_s10 + $0x25c] ss:$0 sps:$4 sm:$0x11]   ;;  %v11941_v55 = vld [vmem:[%s12720_s10 + $0x240] ss:$0 sps:$4 sm:$0x11]  }
  0x3c   : > { %v2059_v59 = vrot.slane %v11937_v48, 1  ;;  %v11943_v60 = vld [vmem:[%s12720_s10 + $0x294] ss:$0 sps:$4 sm:$0x11]   ;;  %v2068_v1 = vrot.slane %v11939_v54, 1  ;;  %v2065_v6 = vrot.slane %v11941_v55, 1 }
  0x3d   : > { %1532 = vrot.lane.b32.xlu0 %v11889_v19, %s12651_s12  ;;  %v1793_v19 = vrot.slane %v11920_v8, 2  ;;  %v11944_v63 = vld [vmem:[%s12720_s10 + $0x270] sm:$0xfe]   ;;  %v11945_v0 = vld [vmem:[%s12720_s10 + $0x278] ss:$0 sps:$4 sm:$0x11]  }
  0x3e   : > { %v11946_v4 = vld [vmem:[%s12720_s10 + $0x2c4] sm:$0xfe]   ;;  %v11950_v17 = vld [vmem:[%s12720_s10 + $0x2fc] sm:$0xfe]   ;;  %v11964_v55 = vld [vmem:[%s12720_s10 + $0x170] sm:$0xfc]  }
  0x3f   : > { %1538 = vrot.lane.b32.xlu1 %v11890_v20, %s12651_s12  ;;  %v1794_v20 = vrot.slane %v11921_v7, 2  ;;  %v11948_v8 = vld [vmem:[%s12720_s10 + $0x2a8] sm:$0xfe]   ;;  %v11957_v30 = vld [vmem:[%s12720_s10 + $0x15c] ss:$0 sps:$4 sm:$0x33]  }
  0x40   : > { %v11960_v42 = vld [vmem:[%s12720_s10 + $0x318] sm:$0xfe]  }
  0x41   : > { %1536 = vrot.lane.b32.xlu0 %v11891_v21, %s12651_s12  ;;  %v1802_v21 = vrot.slane %v11922_v9, 2  ;;  %v1795_v32 = vsel %vm1045_vm1, %v1793_v19, %v1794_v20  ;;  %v2060_v9 = vsel %vm1302_vm0, %v2058_v52, %v2059_v59  ;;  %v2076_v20 = vrot.slane %v11948_v8, 1  ;;  %v11969_v8 = vld [vmem:[%s12720_s10 + $0x358] ss:$0 sps:$4 sm:$0x11]  }
  0x42   : > { %v2088_v48 = vrot.slane %v11960_v42, 1 }
  0x43   : > { %1542 = vrot.lane.b32.xlu1 %v11892_v22, %s12651_s12  ;;  %v1803_v22 = vrot.slane %v11923_v12, 2  ;;  %v11949_v12 = vld [vmem:[%s12720_s10 + $0x2b0] ss:$0 sps:$4 sm:$0x11]  }
  0x45   : > { %1540 = vrot.lane.b32.xlu0 %v11893_v23, %s12651_s12  ;;  %v1799_v23 = vrot.slane %v11924_v13, 2  ;;  %v2070_v13 = vrot.slane %v11944_v63, 1 }
  0x47   : > { %1546 = vrot.lane.b32.xlu1 %v11894_v24, %s12651_s12  ;;  %v11927_v24 = vld [vmem:[%s12720_s10 + $0x370] ss:$0 sps:$4 sm:$0x33]  }
  0x49   : > { %1544 = vrot.lane.b32.xlu0 %v11895_v25, %s12651_s12  ;;  %v1798_v25 = vsel %vm1045_vm1, %v1796_v11, %v1797_v15  ;;  %v2074_v11 = vrot.slane %v11943_v60, 1  ;;  %v2079_v15 = vrot.slane %v11946_v4, 1 }
  0x4b   : > { %1550 = vrot.lane.b32.xlu1 %v11896_v26, %s12651_s12  ;;  %v1800_v26 = vrot.slane %v11925_v16, 2 }
  0x4d   : > { %1548 = vrot.lane.b32.xlu0 %v11897_v27, %s12651_s12  ;;  %v11928_v27 = vld [vmem:[%s12720_s10 + $0x34c] sm:$0xfc]   ;;  %v1801_v39 = vsel %vm1045_vm1, %v1799_v23, %v1800_v26  ;;  %v11955_v23 = vld [vmem:[%s12720_s10 + $0x194] ss:$0 sps:$4 sm:$0x33]  }
  0x4e   : > { %v1805_v40 = vrot.slane %v11928_v27, 2  ;;  %v1053_v28 = vrot.slane %v11955_v23, 2 }
  0x4f   : > { %1554 = vrot.lane.b32.xlu1 %v11898_v31, %s12651_s12  ;;  %v11931_v31 = vld [vmem:[%s12720_s10 + $0x3a8] ss:$0 sps:$4 sm:$0x33]  }
  0x50   : > { %v1815_v44 = vrot.slane %v11931_v31, 2  ;;  %v1807_v51 = vsel %vm1045_vm1, %v1805_v40, %v1806_v41 }
  0x51   : > { %1552 = vrot.lane.b32.xlu0 %v11899_v34, %s12651_s12  ;;  %v1809_v34 = vrot.slane %v11927_v24, 2  ;;  %v2077_v24 = vrot.slane %v11949_v12, 1  ;;  %v2095_v12 = vrot.slane %v11969_v8, 1 }
  0x52   : > { %v1816_v56 = vsel %vm1045_vm1, %v1814_v43, %v1815_v44  ;;  %v11961_v44 = vld [vmem:[%s12720_s10 + $0x320] ss:$0 sps:$4 sm:$0x11]  }
  0x53   : > { %1558 = vrot.lane.b32.xlu1 %v11900_v35, %s12651_s12  ;;  %v11933_v35 = vld [vmem:[%s12720_s10 + $0x38c] ss:$0 sps:$4 sm:$0x33]   ;;  %v1810_v46 = vsel %vm1045_vm1, %v1808_v29, %v1809_v34  ;;  %v11956_v29 = vld [vmem:[%s12720_s10 + $0x154] sm:$0xfc]   ;;  %v1047_v34 = vrot.slane %v11957_v30, 2 }
  0x54   : > { %v1812_v47 = vrot.slane %v11933_v35, 2  ;;  %v1046_v33 = vrot.slane %v11956_v29, 2  ;;  %v11958_v35 = vld [vmem:[%s12720_s10 + $0x334] sm:$0xfe]  }
  0x55   : > { %1556 = vrot.lane.b32.xlu0 %v11901_v37, %s12651_s12  ;;  %v1804_v37 = vsel %vm1045_vm1, %v1802_v21, %v1803_v22  ;;  %v11951_v21 = vld [vmem:[%s12720_s10 + $0x304] ss:$0 sps:$4 sm:$0x11]  }
  0x56   : > { %v1813_v61 = vsel %vm1045_vm1, %v1811_v45, %v1812_v47  ;;  %v11952_v22 = vld [vmem:[%s12720_s10 + $0x2e0] sm:$0xfe]   ;;  %v1048_v41 = vsel %vm1045_vm1, %v1046_v33, %v1047_v34  ;;  %v2078_v45 = vsel %vm1302_vm0, %v2076_v20, %v2077_v24  ;;  %v11973_v20 = vld [vmem:[%s12720_s10 + $0x1cc] ss:$0 sps:$4 sm:$0x33]  }
  0x57   : > { %1819 = vrot.lane.b32.xlu1 %v1774_v49, %s12652_s13  ;;  %v2061_v49 = vrot.slane %v11934_v36, 1  ;;  %v2085_v36 = vrot.slane %v11950_v17, 1  ;;  %v2082_v40 = vrot.slane %v11952_v22, 1  ;;  %1110 = vst.msk [vmem:[#allocation2] sm:$0xff] %vm589_vm2, %v1048_v41  ;;  %v1059_v24 = vrot.slane %v11973_v20, 2  ;;  %v11982_v33 = vld [vmem:[%s12720_s10 + $0x220] sm:$0xff]  }
  0x58   : > { %v11983_v41 = vld [vmem:[%s12720_s10 + $0x204] sm:$0xff]  }
  0x59   : > { %1817 = vrot.lane.b32.xlu0 %v1771_v53, %s12652_s13  ;;  %v11938_v53 = vld [vmem:[%s12720_s10 + $0x254] sm:$0xfe]   ;;  %v2063_v3 = vsel %vm1302_vm0, %v2061_v49, %v2062_v50  ;;  %v11962_v49 = vld [vmem:[%s12720_s10 + $0x1a8] sm:$0xfc]  }
  0x5a   : > { %v2067_v62 = vrot.slane %v11938_v53, 1  ;;  %v11963_v50 = vld [vmem:[%s12720_s10 + $0x1b0] ss:$0 sps:$4 sm:$0x33]   ;;  %v1055_v53 = vrot.slane %v11962_v49, 2 }
  0x5b   : > { %1823 = vrot.lane.b32.xlu1 %v1780_v58, %s12652_s13  ;;  %v11942_v58 = vld [vmem:[%s12720_s10 + $0x28c] sm:$0xfe]   ;;  %v1056_v54 = vrot.slane %v11963_v50, 2 }
  0x5c   : > { %v2073_v7 = vrot.slane %v11942_v58, 1  ;;  %v11965_v58 = vld [vmem:[%s12720_s10 + $0x178] ss:$0 sps:$4 sm:$0x33]  }
  0x5d   : > { %1821 = vrot.lane.b32.xlu0 %v1777_v2, %s12652_s13  ;;  %v11947_v2 = vld [vmem:[%s12720_s10 + $0x2cc] ss:$0 sps:$4 sm:$0x11]   ;;  %v1057_v60 = vsel %vm1045_vm1, %v1055_v53, %v1056_v54  ;;  %v11985_v54 = vld [vmem:[%s12720_s10 + $0x258] ss:$0 sps:$4 sm:$0x33]  }
  0x5e   : > { %v2080_v16 = vrot.slane %v11947_v2, 1  ;;  %v2075_v27 = vsel %vm1302_vm0, %v2073_v7, %v2074_v11  ;;  %1113 = vst.msk [vmem:[#allocation2 + $0x18] sm:$0xff] %vm589_vm2, %v1057_v60  ;;  %v11968_v7 = vld [vmem:[%s12720_s10 + $0x350] sm:$0xfe]  }
  0x5f   : > { %1827 = vrot.lane.b32.xlu1 %v1786_v5, %s12652_s13  ;;  %v2064_v5 = vrot.slane %v11940_v57, 1  ;;  %v2089_v57 = vrot.slane %v11961_v44, 1  ;;  %v2094_v11 = vrot.slane %v11968_v7, 1  ;;  %v11986_v60 = vld [vmem:[%s12720_s10 + $0x234] sm:$0xfc]   ;;  %v12000_v7 = vld [vmem:[%s12720_s10 + $0x2c8] sm:$0xff]  }
  0x60   : > { %v2081_v38 = vsel %vm1302_vm0, %v2079_v15, %v2080_v16 }
  0x61   : > { %1825 = vrot.lane.b32.xlu0 %v1783_v10, %s12652_s13  ;;  %v2069_v10 = vsel %vm1302_vm0, %v2067_v62, %v2068_v1  ;;  %v2066_v19 = vsel %vm1302_vm0, %v2064_v5, %v2065_v6  ;;  %v11966_v62 = vld [vmem:[%s12720_s10 + $0x36c] sm:$0xfe]   ;;  %v11967_v1 = vld [vmem:[%s12720_s10 + $0x374] ss:$0 sps:$4 sm:$0x11]   ;;  %v2090_v4 = vsel %vm1302_vm0, %v2088_v48, %v2089_v57  ;;  %v2096_v15 = vsel %vm1302_vm0, %v2094_v11, %v2095_v12 }
  0x62   : > { %v2098_v6 = vrot.slane %v11967_v1, 1  ;;  %v1070_v1 = vrot.slane %v11986_v60, 2  ;;  %v11992_v12 = vld [vmem:[%s12720_s10 + $0x26c] sm:$0xfc]  }
  0x63   : > { %1831 = vrot.lane.b32.xlu1 %v1792_v14, %s12652_s13  ;;  %v2071_v14 = vrot.slane %v11945_v0, 1  ;;  %v1050_v0 = vrot.slane %v11965_v58, 2  ;;  %v11994_v58 = vld [vmem:[%s12720_s10 + $0x290] sm:$0xff]  }
  0x65   : > { %1829 = vrot.lane.b32.xlu0 %v1789_v18, %s12652_s13  ;;  %v11954_v18 = vld [vmem:[%s12720_s10 + $0x18c] sm:$0xfc]   ;;  %v2072_v31 = vsel %vm1302_vm0, %v2070_v13, %v2071_v14  ;;  %v11970_v13 = vld [vmem:[%s12720_s10 + $0x1e0] sm:$0xfc]  }
  0x66   : > { %v1052_v26 = vrot.slane %v11954_v18, 2  ;;  %v11971_v14 = vld [vmem:[%s12720_s10 + $0x1e8] ss:$0 sps:$4 sm:$0x33]   ;;  %v1061_v17 = vrot.slane %v11970_v13, 2 }
  0x67   : > { %1835 = vrot.lane.b32.xlu1 %v1798_v25, %s12652_s13  ;;  %v11953_v25 = vld [vmem:[%s12720_s10 + $0x2e8] ss:$0 sps:$4 sm:$0x11]   ;;  %v11993_v13 = vld [vmem:[%s12720_s10 + $0x274] ss:$0 sps:$4 sm:$0x33]  }
  0x68   : > { %v2083_v43 = vrot.slane %v11953_v25, 1  ;;  %v11972_v18 = vld [vmem:[%s12720_s10 + $0x1c4] sm:$0xfc]  }
  0x69   : > { %1833 = vrot.lane.b32.xlu0 %v1795_v32, %s12652_s13  ;;  %v1054_v32 = vsel %vm1045_vm1, %v1052_v26, %v1053_v28  ;;  %v1058_v22 = vrot.slane %v11972_v18, 2  ;;  %v11974_v25 = vld [vmem:[%s12720_s10 + $0x3a4] sm:$0xfe]   ;;  %v11975_v26 = vld [vmem:[%s12720_s10 + $0x3ac] ss:$0 sps:$4 sm:$0x11]  }
  0x6a   : > { %1112 = vst.msk [vmem:[#allocation2 + $0x10] sm:$0xff] %vm589_vm2, %v1054_v32  ;;  %v2103_v29 = vrot.slane %v11974_v25, 1  ;;  %v2104_v30 = vrot.slane %v11975_v26, 1  ;;  %v11977_v32 = vld [vmem:[%s12720_s10 + $0x390] ss:$0 sps:$4 sm:$0x11]  }
  0x6b   : > { %1839 = vrot.lane.b32.xlu1 %v1804_v37, %s12652_s13  ;;  %v11959_v37 = vld [vmem:[%s12720_s10 + $0x33c] ss:$0 sps:$4 sm:$0x11]   ;;  %v1060_v28 = vsel %vm1045_vm1, %v1058_v22, %v1059_v24  ;;  %v1077_v18 = vrot.slane %v11993_v13, 2 }
  0x6c   : > { %v2092_v47 = vrot.slane %v11959_v37, 1  ;;  %1114 = vst.msk [vmem:[#allocation2 + $0x20] sm:$0xff] %vm589_vm2, %v1060_v28  ;;  %v2105_v34 = vsel %vm1302_vm0, %v2103_v29, %v2104_v30  ;;  %v11997_v22 = vld [vmem:[%s12720_s10 + $0x2c8] ss:$0 sps:$4 sm:$0x33]   ;;  %v12008_v26 = vld [vmem:[%s12720_s10 + $0x338] sm:$0xff]  }
  0x6d   : > { %1837 = vrot.lane.b32.xlu0 %v1801_v39, %s12652_s13  ;;  %v2086_v39 = vrot.slane %v11951_v21, 1  ;;  %v11998_v28 = vld [vmem:[%s12720_s10 + $0x2a4] sm:$0xfc]   ;;  %v11999_v29 = vld [vmem:[%s12720_s10 + $0x2ac] ss:$0 sps:$4 sm:$0x33]  }
  0x6f   : > { %1843 = vrot.lane.b32.xlu1 %v1810_v46, %s12652_s13  ;;  %v2091_v46 = vrot.slane %v11958_v35, 1 }
  0x71   : > { %1841 = vrot.lane.b32.xlu0 %v1807_v51, %s12652_s13  ;;  %v2087_v51 = vsel %vm1302_vm0, %v2085_v36, %v2086_v39  ;;  %v2093_v63 = vsel %vm1302_vm0, %v2091_v46, %v2092_v47  ;;  %v11978_v36 = vld [vmem:[%s12720_s10 + $0x218] sm:$0xfc]   ;;  %v11979_v39 = vld [vmem:[%s12720_s10 + $0x220] ss:$0 sps:$4 sm:$0x33]  }
  0x72   : > { %v1068_v44 = vrot.slane %v11979_v39, 2  ;;  %v11981_v46 = vld [vmem:[%s12720_s10 + $0x204] ss:$0 sps:$4 sm:$0x33]   ;;  %v11988_v47 = vld [vmem:[%s12720_s10 + $0x258] sm:$0xff]   ;;  %v12010_v39 = vld [vmem:[%s12720_s10 + $0x370] sm:$0xff]  }
  0x73   : > { %1847 = vrot.lane.b32.xlu1 %v1816_v56, %s12652_s13  ;;  %v2084_v56 = vsel %vm1302_vm0, %v2082_v40, %v2083_v43  ;;  %v1067_v40 = vrot.slane %v11978_v36, 2 }
  0x75   : > { %1845 = vrot.lane.b32.xlu0 %v1813_v61, %s12652_s13  ;;  %v1049_v61 = vrot.slane %v11964_v55, 2  ;;  %v1069_v49 = vsel %vm1045_vm1, %v1067_v40, %v1068_v44  ;;  %v11989_v55 = vld [vmem:[%s12720_s10 + $0x23c] sm:$0xff]  }
  0x76   : > { %1117 = vst.msk [vmem:[#allocation2 + $0x38] sm:$0xff] %vm589_vm2, %v1069_v49  ;;  %v12004_v44 = vld [vmem:[%s12720_s10 + $0x2dc] sm:$0xfc]  }
  0x77   : > { %2108 = vrot.lane.b32.xlu1 %v2063_v3, %s12653_s14  ;;  %v2097_v3 = vrot.slane %v11966_v62, 1  ;;  %v1051_v5 = vsel %vm1045_vm1, %v1049_v61, %v1050_v0  ;;  %v11987_v61 = vld [vmem:[%s12720_s10 + $0x23c] ss:$0 sps:$4 sm:$0x33]   ;;  %v1088_v49 = vrot.slane %v12004_v44, 2 }
  0x78   : > { %1111 = vst.msk [vmem:[#allocation2 + $0x8] sm:$0xff] %vm589_vm2, %v1051_v5 }
  0x79   : > { %2106 = vrot.lane.b32.xlu0 %v2060_v9, %s12653_s14 }
  0x7b   : > { %2112 = vrot.lane.b32.xlu1 %v2069_v10, %s12653_s14  ;;  %v2099_v10 = vsel %vm1302_vm0, %v2097_v3, %v2098_v6  ;;  %v11991_v6 = vld [vmem:[%s12720_s10 + $0x290] ss:$0 sps:$4 sm:$0x33]  }
  0x7c   : > { %v1080_v11 = vrot.slane %v11991_v6, 2 }
  0x7d   : > { %2110 = vrot.lane.b32.xlu0 %v2066_v19, %s12653_s14  ;;  %v1062_v19 = vrot.slane %v11971_v14, 2  ;;  %v12006_v14 = vld [vmem:[%s12720_s10 + $0x300] sm:$0xff]  }
  0x7f   : > { %2116 = vrot.lane.b32.xlu1 %v2075_v27, %s12653_s14  ;;  %v1063_v23 = vsel %vm1045_vm1, %v1061_v17, %v1062_v19  ;;  %v1076_v17 = vrot.slane %v11992_v12, 2  ;;  %v11996_v19 = vld [vmem:[%s12720_s10 + $0x2c0] sm:$0xfc]  }
  0x80   : > { %1115 = vst.msk [vmem:[#allocation2 + $0x28] sm:$0xff] %vm589_vm2, %v1063_v23  ;;  %v12007_v23 = vld [vmem:[%s12720_s10 + $0x2e4] sm:$0xff]   ;;  %v1085_v24 = vrot.slane %v11996_v19, 2 }
  0x81   : > { %2114 = vrot.lane.b32.xlu0 %v2072_v31, %s12653_s14  ;;  %v11976_v31 = vld [vmem:[%s12720_s10 + $0x388] sm:$0xfe]  }
  0x82   : > { %v2100_v35 = vrot.slane %v11976_v31, 1  ;;  %v12009_v31 = vld [vmem:[%s12720_s10 + $0x31c] sm:$0xff]  }
  0x83   : > { %2120 = vrot.lane.b32.xlu1 %v2081_v38, %s12653_s14  ;;  %v2101_v38 = vrot.slane %v11977_v32, 1 }
  0x85   : > { %2118 = vrot.lane.b32.xlu0 %v2078_v45, %s12653_s14  ;;  %v2102_v43 = vsel %vm1302_vm0, %v2100_v35, %v2101_v38  ;;  %v11980_v45 = vld [vmem:[%s12720_s10 + $0x1fc] sm:$0xfc]  }
  0x86   : > { %v1064_v50 = vrot.slane %v11980_v45, 2  ;;  %v12002_v35 = vld [vmem:[%s12720_s10 + $0x2f8] sm:$0xfc]   ;;  %v12003_v38 = vld [vmem:[%s12720_s10 + $0x300] ss:$0 sps:$4 sm:$0x33]  }
  0x87   : > { %2124 = vrot.lane.b32.xlu1 %v2087_v51, %s12653_s14  ;;  %v1065_v51 = vrot.slane %v11981_v46, 2  ;;  %v1091_v40 = vrot.slane %v12002_v35, 2  ;;  %v12005_v45 = vld [vmem:[%s12720_s10 + $0x2e4] ss:$0 sps:$4 sm:$0x33]   ;;  %v12012_v46 = vld [vmem:[%s12720_s10 + $0x3a8] sm:$0xff]  }
  0x88   : > { %v12029_v35 = vld [vmem:[%s12720_s10 + $0x354] ss:$0 sps:$4 sm:$0x33]  }
  0x89   : > { %v1356_v52 = vpop.permute.xlu1 %1355  ;;  %2122 = vrot.lane.b32.xlu0 %v2084_v56, %s12653_s14  ;;  %v1066_v53 = vsel %vm1045_vm1, %v1064_v50, %v1065_v51  ;;  %v1089_v50 = vrot.slane %v12005_v45, 2  ;;  %v12032_v45 = vld [vmem:[%s12720_s10 + $0x2a8] sm:$0xfe]  }
  0x8a   : > { %1402 = vst.msk [vmem:[#allocation2 + $0x10] sm:$0xff] %vm1399_vm3, %v1356_v52  ;;  %v11984_v52 = vld [vmem:[%s12720_s10 + $0x250] sm:$0xfc]  }
  0x8b   : > { %v1352_v59 = vpop.permute.xlu0 %1351  ;;  %2128 = vrot.lane.b32.xlu1 %v2093_v63, %s12653_s14  ;;  %1116 = vst.msk [vmem:[#allocation2 + $0x30] sm:$0xff] %vm589_vm2, %v1066_v53  ;;  %v1073_v57 = vrot.slane %v11984_v52, 2  ;;  %v11995_v63 = vld [vmem:[%s12720_s10 + $0x274] sm:$0xff]   ;;  %v12013_v52 = vld [vmem:[%s12720_s10 + $0x38c] sm:$0xff]   ;;  %v1090_v53 = vsel %vm1045_vm1, %v1088_v49, %v1089_v50  ;;  %v2814_v49 = vrot.slane %v12032_v45, 1 }
  0x8c   : > { %1400 = vst.msk [vmem:[#allocation2] sm:$0xff] %vm1399_vm3, %v1352_v59  ;;  %v1074_v59 = vrot.slane %v11985_v54, 2  ;;  %v12059_v45 = vld [vmem:[%s12720_s10 + $0x3ac] ss:$0 sps:$4 sm:$0x11]  }
  0x8d   : > { %v1358_v2 = vpop.permute.xlu1 %1357  ;;  %2126 = vrot.lane.b32.xlu0 %v2090_v4, %s12653_s14  ;;  %v11990_v4 = vld [vmem:[%s12720_s10 + $0x288] sm:$0xfc]   ;;  %1124 = vst.msk [vmem:[#allocation2 + $0x70] sm:$0xff] %vm589_vm2, %v1090_v53 }
  0x8e   : > { %1403 = vst.msk [vmem:[#allocation2 + $0x18] sm:$0xff] %vm1399_vm3, %v1358_v2  ;;  %v1075_v0 = vsel %vm1045_vm1, %v1073_v57, %v1074_v59  ;;  %v1071_v2 = vrot.slane %v11987_v61, 2  ;;  %v1079_v8 = vrot.slane %v11990_v4, 2  ;;  %v12015_v57 = vld [vmem:[%s12720_s10 + $0x2c8] ss:$0 sps:$4 sm:$0x33]  }
  0x8f   : > { %v1354_v9 = vpop.permute.xlu0 %1353  ;;  %2132 = vrot.lane.b32.xlu1 %v2099_v10, %s12653_s14  ;;  %1119 = vst.msk [vmem:[#allocation2 + $0x48] sm:$0xff] %vm589_vm2, %v1075_v0  ;;  %v12001_v10 = vld [vmem:[%s12720_s10 + $0x2ac] sm:$0xff]   ;;  %v2529_v60 = vrot.slane %v12015_v57, 2  ;;  %v12016_v61 = vld [vmem:[%s12720_s10 + $0x2a4] sm:$0xfc]  }
  0x90   : > { %1401 = vst.msk [vmem:[#allocation2 + $0x8] sm:$0xff] %vm1399_vm3, %v1354_v9  ;;  %v1072_v5 = vsel %vm1045_vm1, %v1070_v1, %v1071_v2  ;;  %v2525_v1 = vrot.slane %v12016_v61, 2  ;;  %v12019_v4 = vld [vmem:[%s12720_s10 + $0x300] ss:$0 sps:$4 sm:$0x33]  }
  0x91   : > { %v1362_v16 = vpop.permute.xlu1 %1361  ;;  %2130 = vrot.lane.b32.xlu0 %v2096_v15, %s12653_s14  ;;  %1118 = vst.msk [vmem:[#allocation2 + $0x40] sm:$0xff] %vm589_vm2, %v1072_v5  ;;  %v12038_v61 = vld [vmem:[%s12720_s10 + $0x2e0] sm:$0xfe]  }
  0x92   : > { %1405 = vst.msk [vmem:[#allocation2 + $0x28] sm:$0xff] %vm1399_vm3, %v1362_v16  ;;  %v1081_v16 = vsel %vm1045_vm1, %v1079_v8, %v1080_v11  ;;  %v12020_v8 = vld [vmem:[%s12720_s10 + $0x2dc] sm:$0xfc]  }
  0x93   : > { %v1360_v21 = vpop.permute.xlu0 %1359  ;;  %2136 = vrot.lane.b32.xlu1 %v2105_v34, %s12653_s14  ;;  %1121 = vst.msk [vmem:[#allocation2 + $0x58] sm:$0xff] %vm589_vm2, %v1081_v16  ;;  %v1083_v34 = vrot.slane %v11999_v29, 2  ;;  %v2531_v12 = vrot.slane %v12020_v8, 2  ;;  %v12023_v16 = vld [vmem:[%s12720_s10 + $0x338] ss:$0 sps:$4 sm:$0x33]  }
  0x94   : > { %1404 = vst.msk [vmem:[#allocation2 + $0x20] sm:$0xff] %vm1399_vm3, %v1360_v21  ;;  %v1078_v21 = vsel %vm1045_vm1, %v1076_v17, %v1077_v18  ;;  %v12027_v29 = vld [vmem:[%s12720_s10 + $0x370] ss:$0 sps:$4 sm:$0x33]  }
  0x95   : > { %v1366_v27 = vpop.permute.xlu1 %1365  ;;  %2134 = vrot.lane.b32.xlu0 %v2102_v43, %s12653_s14  ;;  %1120 = vst.msk [vmem:[#allocation2 + $0x50] sm:$0xff] %vm589_vm2, %v1078_v21  ;;  %v1092_v43 = vrot.slane %v12003_v38, 2  ;;  %v12024_v21 = vld [vmem:[%s12720_s10 + $0x314] sm:$0xfc]  }
  0x96   : > { %1407 = vst.msk [vmem:[#allocation2 + $0x38] sm:$0xff] %vm1399_vm3, %v1366_v27  ;;  %v1086_v27 = vrot.slane %v11997_v22, 2  ;;  %v12043_v8 = vld [vmem:[%s12720_s10 + $0x33c] ss:$0 sps:$4 sm:$0x11]  }
  0x97   : > { %v1364_v37 = vpop.permute.xlu0 %1363  ;;  %2285 = vrot.lane.b32.xlu1 %v11982_v33, %s12654_s15  ;;  %v1082_v33 = vrot.slane %v11998_v28, 2 }
  0x98   : > { %1406 = vst.msk [vmem:[#allocation2 + $0x30] sm:$0xff] %vm1399_vm3, %v1364_v37  ;;  %v1087_v32 = vsel %vm1045_vm1, %v1085_v24, %v1086_v27 }
  0x99   : > { %v1370_v42 = vpop.permute.xlu1 %1369  ;;  %2283 = vrot.lane.b32.xlu0 %v11983_v41, %s12654_s15  ;;  %1123 = vst.msk [vmem:[#allocation2 + $0x68] sm:$0xff] %vm589_vm2, %v1087_v32  ;;  %v1084_v37 = vsel %vm1045_vm1, %v1082_v33, %v1083_v34  ;;  %v2547_v33 = vrot.slane %v12027_v29, 2  ;;  %v12028_v34 = vld [vmem:[%s12720_s10 + $0x34c] sm:$0xfc]  }
  0x9a   : > { %1409 = vst.msk [vmem:[#allocation2 + $0x48] sm:$0xff] %vm1399_vm3, %v1370_v42  ;;  %v12011_v42 = vld [vmem:[%s12720_s10 + $0x354] sm:$0xff]   ;;  %v2543_v38 = vrot.slane %v12028_v34, 2 }
  0x9b   : > { %v1368_v48 = vpop.permute.xlu0 %1367  ;;  %2289 = vrot.lane.b32.xlu1 %v11988_v47, %s12654_s15  ;;  %1122 = vst.msk [vmem:[#allocation2 + $0x60] sm:$0xff] %vm589_vm2, %v1084_v37 }
  0x9c   : > { %1408 = vst.msk [vmem:[#allocation2 + $0x40] sm:$0xff] %vm1399_vm3, %v1368_v48  ;;  %v1093_v48 = vsel %vm1045_vm1, %v1091_v40, %v1092_v43  ;;  %v12030_v40 = vld [vmem:[%s12720_s10 + $0x2c4] sm:$0xfe]  }
  0x9d   : > { %v1374_v56 = vpop.permute.xlu1 %1373  ;;  %2287 = vrot.lane.b32.xlu0 %v11989_v55, %s12654_s15  ;;  %1125 = vst.msk [vmem:[#allocation2 + $0x78] sm:$0xff] %vm589_vm2, %v1093_v48  ;;  %v2817_v44 = vrot.slane %v12030_v40, 1 }
  0x9e   : > { %1411 = vst.msk [vmem:[#allocation2 + $0x58] sm:$0xff] %vm1399_vm3, %v1374_v56  ;;  %v12014_v56 = vld [vmem:[%s12720_s10 + $0x2c0] sm:$0xfc]  }
  0x9f   : > { %v1372_v62 = vpop.permute.xlu0 %1371  ;;  %2293 = vrot.lane.b32.xlu1 %v11994_v58, %s12654_s15  ;;  %v2528_v58 = vrot.slane %v12014_v56, 2  ;;  %v12037_v56 = vld [vmem:[%s12720_s10 + $0x304] ss:$0 sps:$4 sm:$0x11]  }
  0xa0   : > { %1410 = vst.msk [vmem:[#allocation2 + $0x50] sm:$0xff] %vm1399_vm3, %v1372_v62  ;;  %v12017_v62 = vld [vmem:[%s12720_s10 + $0x2ac] ss:$0 sps:$4 sm:$0x33]  }
  0xa1   : > { %v1378_v3 = vpop.permute.xlu1 %1377  ;;  %2291 = vrot.lane.b32.xlu0 %v11995_v63, %s12654_s15  ;;  %v2530_v0 = vsel %vm1045_vm1, %v2528_v58, %v2529_v60  ;;  %v2526_v2 = vrot.slane %v12017_v62, 2  ;;  %v12035_v58 = vld [vmem:[%s12720_s10 + $0x2ac] sm:$0xff]   ;;  %v2824_v60 = vrot.slane %v12037_v56, 1  ;;  %v12039_v62 = vld [vmem:[%s12720_s10 + $0x2e8] ss:$0 sps:$4 sm:$0x11]  }
  0xa2   : > { %1413 = vst.msk [vmem:[#allocation2 + $0x68] sm:$0xff] %vm1399_vm3, %v1378_v3  ;;  %v12018_v3 = vld [vmem:[%s12720_s10 + $0x2f8] sm:$0xfc]   ;;  %v2842_v56 = vrot.slane %v12059_v45, 1 }
  0xa3   : > { %v1376_v9 = vpop.permute.xlu0 %1375  ;;  %2297 = vrot.lane.b32.xlu1 %v12000_v7, %s12654_s15  ;;  %v2527_v6 = vsel %vm1045_vm1, %v2525_v1, %v2526_v2  ;;  %v2534_v7 = vrot.slane %v12018_v3, 2  ;;  %v2820_v1 = vrot.slane %v12038_v61, 1  ;;  %v2821_v2 = vrot.slane %v12039_v62, 1  ;;  %v12064_v62 = vld [vmem:[%s12720_s10 + $0x3d8] sm:$0xfc]  }
  0xa4   : > { %1412 = vst.msk [vmem:[#allocation2 + $0x60] sm:$0xff] %vm1399_vm3, %v1376_v9  ;;  %v2535_v9 = vrot.slane %v12019_v4, 2  ;;  %v12042_v4 = vld [vmem:[%s12720_s10 + $0x334] sm:$0xfe]  }
  0xa5   : > { %v1382_v15 = vpop.permute.xlu1 %1381  ;;  %2295 = vrot.lane.b32.xlu0 %v12001_v10, %s12654_s15  ;;  %v12021_v10 = vld [vmem:[%s12720_s10 + $0x2e4] ss:$0 sps:$4 sm:$0x33]   ;;  %v12082_v45 = vld [vmem:[%s12720_s10 + $0x214] sm:$0xf8]  }
  0xa6   : > { %1415 = vst.msk [vmem:[#allocation2 + $0x78] sm:$0xff] %vm1399_vm3, %v1382_v15  ;;  %v2536_v13 = vsel %vm1045_vm1, %v2534_v7, %v2535_v9  ;;  %v12022_v15 = vld [vmem:[%s12720_s10 + $0x330] sm:$0xfc]   ;;  %v12041_v9 = vld [vmem:[%s12720_s10 + $0x2e4] sm:$0xff]  }
  0xa7   : > { %v1380_v20 = vpop.permute.xlu0 %1379  ;;  %2301 = vrot.lane.b32.xlu1 %v12006_v14, %s12654_s15  ;;  %v2532_v14 = vrot.slane %v12021_v10, 2  ;;  %v2540_v19 = vrot.slane %v12022_v15, 2  ;;  %v2829_v10 = vrot.slane %v12042_v4, 1  ;;  %v12067_v4 = vld [vmem:[%s12720_s10 + $0x3c4] ss:$0 sps:$4 sm:$0x33]  }
  0xa8   : > { %1414 = vst.msk [vmem:[#allocation2 + $0x70] sm:$0xff] %vm1399_vm3, %v1380_v20  ;;  %v2541_v20 = vrot.slane %v12023_v16, 2 }
  0xa9   : > { %v1531_v25 = vpop.permute.xlu1 %1530  ;;  %2299 = vrot.lane.b32.xlu0 %v12007_v23, %s12654_s15  ;;  %v2533_v18 = vsel %vm1045_vm1, %v2531_v12, %v2532_v14  ;;  %v12025_v23 = vld [vmem:[%s12720_s10 + $0x31c] ss:$0 sps:$4 sm:$0x33]  }
  0xaa   : > { %1578 = vst.msk [vmem:[#allocation2 + $0x8] sm:$0xff] %vm1576_vm4, %v1531_v25  ;;  %v2542_v24 = vsel %vm1045_vm1, %v2540_v19, %v2541_v20  ;;  %v2537_v25 = vrot.slane %v12024_v21, 2  ;;  %v2538_v28 = vrot.slane %v12025_v23, 2  ;;  %v12044_v12 = vld [vmem:[%s12720_s10 + $0x318] sm:$0xfe]  }
  0xab   : > { %v1529_v30 = vpop.permute.xlu0 %1528  ;;  %2305 = vrot.lane.b32.xlu1 %v12008_v26, %s12654_s15  ;;  %v12026_v26 = vld [vmem:[%s12720_s10 + $0x368] sm:$0xfc]   ;;  %v2826_v15 = vrot.slane %v12044_v12, 1  ;;  %v12049_v21 = vld [vmem:[%s12720_s10 + $0x374] ss:$0 sps:$4 sm:$0x11]  }
  0xac   : > { %1577 = vst.msk [vmem:[#allocation2] sm:$0xff] %vm1576_vm4, %v1529_v30  ;;  %v2546_v30 = vrot.slane %v12026_v26, 2  ;;  %v2539_v32 = vsel %vm1045_vm1, %v2537_v25, %v2538_v28  ;;  %v12050_v26 = vld [vmem:[%s12720_s10 + $0x350] sm:$0xfe]   ;;  %v12047_v28 = vld [vmem:[%s12720_s10 + $0x31c] sm:$0xff]   ;;  %v2836_v29 = vrot.slane %v12049_v21, 1 }
  0xad   : > { %v1535_v36 = vpop.permute.xlu1 %1534  ;;  %2303 = vrot.lane.b32.xlu0 %v12009_v31, %s12654_s15 }
  0xae   : > { %1580 = vst.msk [vmem:[#allocation2 + $0x18] sm:$0xff] %vm1576_vm4, %v1535_v36  ;;  %v2548_v37 = vsel %vm1045_vm1, %v2546_v30, %v2547_v33  ;;  %v2832_v30 = vrot.slane %v12050_v26, 1 }
  0xaf   : > { %v1533_v41 = vpop.permute.xlu0 %1532  ;;  %2309 = vrot.lane.b32.xlu1 %v12010_v39, %s12654_s15  ;;  %v2544_v39 = vrot.slane %v12029_v35, 2  ;;  %v12055_v35 = vld [vmem:[%s12720_s10 + $0x3a8] ss:$0 sps:$4 sm:$0x33]  }
  0xb0   : > { %1579 = vst.msk [vmem:[#allocation2 + $0x10] sm:$0xff] %vm1576_vm4, %v1533_v41  ;;  %v12031_v41 = vld [vmem:[%s12720_s10 + $0x2cc] ss:$0 sps:$4 sm:$0x11]  }
  0xb1   : > { %v1539_v47 = vpop.permute.xlu1 %1538  ;;  %2307 = vrot.lane.b32.xlu0 %v12011_v42, %s12654_s15  ;;  %v2545_v43 = vsel %vm1045_vm1, %v2543_v38, %v2544_v39  ;;  %v12056_v38 = vld [vmem:[%s12720_s10 + $0x384] sm:$0xfc]   ;;  %v12052_v39 = vld [vmem:[%s12720_s10 + $0x370] sm:$0xff]  }
  0xb2   : > { %1582 = vst.msk [vmem:[#allocation2 + $0x28] sm:$0xff] %vm1576_vm4, %v1539_v47  ;;  %v12033_v47 = vld [vmem:[%s12720_s10 + $0x2b0] ss:$0 sps:$4 sm:$0x11]  }
  0xb3   : > { %v1537_v51 = vpop.permute.xlu0 %1536  ;;  %2313 = vrot.lane.b32.xlu1 %v12012_v46, %s12654_s15  ;;  %v2818_v46 = vrot.slane %v12031_v41, 1 }
  0xb4   : > { %1581 = vst.msk [vmem:[#allocation2 + $0x20] sm:$0xff] %vm1576_vm4, %v1537_v51  ;;  %v2815_v51 = vrot.slane %v12033_v47, 1  ;;  %v12058_v47 = vld [vmem:[%s12720_s10 + $0x3a4] sm:$0xfe]  }
  0xb5   : > { %v1543_v54 = vpop.permute.xlu1 %1542  ;;  %2311 = vrot.lane.b32.xlu0 %v12013_v52, %s12654_s15  ;;  %v2819_v50 = vsel %vm1302_vm0, %v2817_v44, %v2818_v46  ;;  %v12034_v52 = vld [vmem:[%s12720_s10 + $0x2c8] sm:$0xff]   ;;  %v2553_v44 = vrot.slane %v12055_v35, 2 }
  0xb6   : > { %1584 = vst.msk [vmem:[#allocation2 + $0x38] sm:$0xff] %vm1576_vm4, %v1543_v54  ;;  %v12036_v54 = vld [vmem:[%s12720_s10 + $0x2fc] sm:$0xfe]  }
  0xb7   : > { %v1541_v55 = vpop.permute.xlu0 %1540  ;;  %2575 = vrot.lane.b32.xlu1 %v2530_v0, %s12655_s16 }
  0xb8   : > { %1583 = vst.msk [vmem:[#allocation2 + $0x30] sm:$0xff] %vm1576_vm4, %v1541_v55  ;;  %v2816_v55 = vsel %vm1302_vm0, %v2814_v49, %v2815_v51  ;;  %v12053_v49 = vld [vmem:[%s12720_s10 + $0x354] sm:$0xff]   ;;  %v2549_v51 = vrot.slane %v12056_v38, 2  ;;  %v12073_v38 = vld [vmem:[%s12720_s10 + $0x3c4] sm:$0xff]  }
  0xb9   : > { %v1547_v59 = vpop.permute.xlu1 %1546  ;;  %2573 = vrot.lane.b32.xlu0 %v2527_v6, %s12655_s16  ;;  %v12040_v6 = vld [vmem:[%s12720_s10 + $0x300] sm:$0xff]  }
  0xba   : > { %1586 = vst.msk [vmem:[#allocation2 + $0x48] sm:$0xff] %vm1576_vm4, %v1547_v59  ;;  %v2823_v59 = vrot.slane %v12036_v54, 1 }
  0xbb   : > { %v1545_v63 = vpop.permute.xlu0 %1544  ;;  %2579 = vrot.lane.b32.xlu1 %v2536_v13, %s12655_s16  ;;  %v12045_v13 = vld [vmem:[%s12720_s10 + $0x320] ss:$0 sps:$4 sm:$0x11]  }
  0xbc   : > { %1585 = vst.msk [vmem:[#allocation2 + $0x40] sm:$0xff] %vm1576_vm4, %v1545_v63  ;;  %v2825_v0 = vsel %vm1302_vm0, %v2823_v59, %v2824_v60  ;;  %v2827_v16 = vrot.slane %v12045_v13, 1  ;;  %v12071_v13 = vld [vmem:[%s12720_s10 + $0x3c8] ss:$0 sps:$4 sm:$0x11]  }
  0xbd   : > { %v1551_v5 = vpop.permute.xlu1 %1550  ;;  %2577 = vrot.lane.b32.xlu0 %v2533_v18, %s12655_s16  ;;  %v12048_v18 = vld [vmem:[%s12720_s10 + $0x36c] sm:$0xfe]  }
  0xbe   : > { %1588 = vst.msk [vmem:[#allocation2 + $0x58] sm:$0xff] %vm1576_vm4, %v1551_v5  ;;  %v2822_v5 = vsel %vm1302_vm0, %v2820_v1, %v2821_v2  ;;  %v2828_v23 = vsel %vm1302_vm0, %v2826_v15, %v2827_v16  ;;  %v2835_v25 = vrot.slane %v12048_v18, 1  ;;  %v12066_v2 = vld [vmem:[%s12720_s10 + $0x3bc] sm:$0xfc]   ;;  %v2556_v16 = vrot.slane %v12067_v4, 2 }
  0xbf   : > { %v1549_v11 = vpop.permute.xlu0 %1548  ;;  %2583 = vrot.lane.b32.xlu1 %v2542_v24, %s12655_s16  ;;  %v2555_v15 = vrot.slane %v12066_v2, 2  ;;  %v12090_v4 = vld [vmem:[%s12720_s10 + $0x3f4] sm:$0xfc]  }
  0xc0   : > { %1587 = vst.msk [vmem:[#allocation2 + $0x50] sm:$0xff] %vm1576_vm4, %v1549_v11  ;;  %v2830_v11 = vrot.slane %v12043_v8, 1  ;;  %v12069_v8 = vld [vmem:[%s12720_s10 + $0x3e4] ss:$0 sps:$4 sm:$0x11]  }
  0xc1   : > { %v1555_v17 = vpop.permute.xlu1 %1554  ;;  %2581 = vrot.lane.b32.xlu0 %v2539_v32, %s12655_s16  ;;  %v12054_v32 = vld [vmem:[%s12720_s10 + $0x3a0] sm:$0xfc]  }
  0xc2   : > { %1590 = vst.msk [vmem:[#allocation2 + $0x68] sm:$0xff] %vm1576_vm4, %v1555_v17  ;;  %v2831_v19 = vsel %vm1302_vm0, %v2829_v10, %v2830_v11  ;;  %v12070_v10 = vld [vmem:[%s12720_s10 + $0x3c0] sm:$0xfe]  }
  0xc3   : > { %v1553_v22 = vpop.permute.xlu0 %1552  ;;  %2587 = vrot.lane.b32.xlu1 %v2548_v37, %s12655_s16  ;;  %v2844_v21 = vrot.slane %v12070_v10, 1  ;;  %v12092_v10 = vld [vmem:[%s12720_s10 + $0x204] sm:$0xf8]  }
  0xc4   : > { %1589 = vst.msk [vmem:[#allocation2 + $0x60] sm:$0xff] %vm1576_vm4, %v1553_v22  ;;  %v12046_v22 = vld [vmem:[%s12720_s10 + $0x338] sm:$0xff]  }
  0xc5   : > { %v1559_v27 = vpop.permute.xlu1 %1558  ;;  %2585 = vrot.lane.b32.xlu0 %v2545_v43, %s12655_s16  ;;  %v12057_v43 = vld [vmem:[%s12720_s10 + $0x38c] ss:$0 sps:$4 sm:$0x33]  }
  0xc6   : > { %1592 = vst.msk [vmem:[#allocation2 + $0x78] sm:$0xff] %vm1576_vm4, %v1559_v27  ;;  %v12051_v27 = vld [vmem:[%s12720_s10 + $0x358] ss:$0 sps:$4 sm:$0x11]  }
  0xc7   : > { %v1557_v31 = vpop.permute.xlu0 %1556  ;;  %2864 = vrot.lane.b32.xlu1 %v2819_v50, %s12656_s17  ;;  %v2833_v33 = vrot.slane %v12051_v27, 1  ;;  %v12061_v50 = vld [vmem:[%s12720_s10 + $0x390] ss:$0 sps:$4 sm:$0x11]  }
  0xc8   : > { %1591 = vst.msk [vmem:[#allocation2 + $0x70] sm:$0xff] %vm1576_vm4, %v1557_v31  ;;  %v2839_v59 = vrot.slane %v12061_v50, 1  ;;  %v12075_v27 = vld [vmem:[%s12720_s10 + $0xd4] ss:$0 sps:$4 sm:$0x11]  }
  0xc9   : > { %v1820_v36 = vpop.permute.xlu1 %1819  ;;  %2862 = vrot.lane.b32.xlu0 %v2816_v55, %s12656_s17  ;;  %v2834_v40 = vsel %vm1302_vm0, %v2832_v30, %v2833_v33  ;;  %v2841_v55 = vrot.slane %v12058_v47, 1 }
  0xca   : > { %1867 = vst.msk [vmem:[#allocation2 + $0x8] sm:$0xff] %vm1865_vm5, %v1820_v36  ;;  %v2837_v36 = vsel %vm1302_vm0, %v2835_v25, %v2836_v29  ;;  %v2845_v25 = vrot.slane %v12071_v13, 1 }
  0xcb   : > { %v1818_v42 = vpop.permute.xlu0 %1817  ;;  %3041 = vrot.lane.b32.xlu1 %v12034_v52, %s12657_s18  ;;  %v2550_v52 = vrot.slane %v12057_v43, 2 }
  0xcc   : > { %1866 = vst.msk [vmem:[#allocation2] sm:$0xff] %vm1865_vm5, %v1818_v42  ;;  %v2552_v42 = vrot.slane %v12054_v32, 2  ;;  %v12077_v32 = vld [vmem:[%s12720_s10 + $0xb8] ss:$0 sps:$4 sm:$0x11]   ;;  %v2846_v33 = vsel %vm1302_vm0, %v2844_v21, %v2845_v25 }
  0xcd   : > { %v1824_v48 = vpop.permute.xlu1 %1823  ;;  %3039 = vrot.lane.b32.xlu0 %v12035_v58, %s12657_s18  ;;  %v2551_v60 = vsel %vm1045_vm1, %v2549_v51, %v2550_v52  ;;  %v3942_v43 = vrot.slane %v12077_v32, 1  ;;  %v12084_v52 = vld [vmem:[%s12720_s10 + $0x1f8] sm:$0xf8]  }
  0xce   : > { %1869 = vst.msk [vmem:[#allocation2 + $0x18] sm:$0xff] %vm1865_vm5, %v1824_v48  ;;  %v12060_v48 = vld [vmem:[%s12720_s10 + $0x388] sm:$0xfe]   ;;  %v2554_v54 = vsel %vm1045_vm1, %v2552_v42, %v2553_v44  ;;  %v12080_v42 = vld [vmem:[%s12720_s10 + $0xb4] sm:$0xf8]   ;;  %v4517_v2 = vrot.slane %v12084_v52, 3 }
  0xcf   : > { %v1822_v53 = vpop.permute.xlu0 %1821  ;;  %2868 = vrot.lane.b32.xlu1 %v2825_v0, %s12656_s17  ;;  %v2838_v58 = vrot.slane %v12060_v48, 1  ;;  %v2843_v0 = vsel %vm1302_vm0, %v2841_v55, %v2842_v56  ;;  %v12081_v44 = vld [vmem:[%s12720_s10 + $0xbc] ss:$0 sps:$4 sm:$0x77]   ;;  %v4229_v51 = vrot.slane %v12080_v42, 3  ;;  %v4520_v56 = vrot.slane %v12082_v45, 3 }
  0xd0   : > { %1868 = vst.msk [vmem:[#allocation2 + $0x10] sm:$0xff] %vm1865_vm5, %v1822_v53  ;;  %v12083_v48 = vld [vmem:[%s12720_s10 + $0x21c] ss:$0 sps:$4 sm:$0x77]  }
  0xd1   : > { %v1828_v57 = vpop.permute.xlu1 %1827  ;;  %2866 = vrot.lane.b32.xlu0 %v2822_v5, %s12656_s17  ;;  %v2840_v5 = vsel %vm1302_vm0, %v2838_v58, %v2839_v59  ;;  %v12086_v59 = vld [vmem:[%s12720_s10 + $0x21c] sm:$0xfe]   ;;  %v12103_v45 = vld [vmem:[%s12720_s10 + $0x358] ss:$0 sps:$4 sm:$0x11]  }
  0xd2   : > { %1871 = vst.msk [vmem:[#allocation2 + $0x28] sm:$0xff] %vm1865_vm5, %v1828_v57  ;;  %v12105_v52 = vld [vmem:[%s12720_s10 + $0x36c] ss:$0 sps:$4 sm:$0x77]  }
  0xd3   : > { %v1826_v63 = vpop.permute.xlu0 %1825  ;;  %3045 = vrot.lane.b32.xlu1 %v12040_v6, %s12657_s18 }
  0xd4   : > { %1870 = vst.msk [vmem:[#allocation2 + $0x20] sm:$0xff] %vm1865_vm5, %v1826_v63  ;;  %v12065_v63 = vld [vmem:[%s12720_s10 + $0x3e0] ss:$0 sps:$4 sm:$0x33]  }
  0xd5   : > { %v1832_v3 = vpop.permute.xlu1 %1831  ;;  %3043 = vrot.lane.b32.xlu0 %v12041_v9, %s12657_s18  ;;  %v12068_v9 = vld [vmem:[%s12720_s10 + $0x3dc] sm:$0xfe]   ;;  %v2559_v11 = vrot.slane %v12065_v63, 2  ;;  %v12089_v63 = vld [vmem:[%s12720_s10 + $0x208] ss:$0 sps:$4 sm:$0x11]  }
  0xd6   : > { %1873 = vst.msk [vmem:[#allocation2 + $0x38] sm:$0xff] %vm1865_vm5, %v1832_v3  ;;  %v12062_v3 = vld [vmem:[%s12720_s10 + $0x3a8] sm:$0xff]  }
  0xd7   : > { %v1830_v7 = vpop.permute.xlu0 %1829  ;;  %2872 = vrot.lane.b32.xlu1 %v2831_v19, %s12656_s17  ;;  %v2847_v19 = vrot.slane %v12068_v9, 1 }
  0xd8   : > { %1872 = vst.msk [vmem:[#allocation2 + $0x30] sm:$0xff] %vm1865_vm5, %v1830_v7  ;;  %v2558_v7 = vrot.slane %v12064_v62, 2  ;;  %v12088_v62 = vld [vmem:[%s12720_s10 + $0x200] sm:$0xfe]  }
  0xd9   : > { %v1836_v14 = vpop.permute.xlu1 %1835  ;;  %2870 = vrot.lane.b32.xlu0 %v2828_v23, %s12656_s17  ;;  %v12074_v23 = vld [vmem:[%s12720_s10 + $0xcc] sm:$0xfe]  }
  0xda   : > { %1875 = vst.msk [vmem:[#allocation2 + $0x48] sm:$0xff] %vm1865_vm5, %v1836_v14  ;;  %v12063_v14 = vld [vmem:[%s12720_s10 + $0x38c] sm:$0xff]   ;;  %v2560_v18 = vsel %vm1045_vm1, %v2558_v7, %v2559_v11  ;;  %v3944_v35 = vrot.slane %v12074_v23, 1  ;;  %v4805_v11 = vrot.slane %v12088_v62, 1  ;;  %v12096_v23 = vld [vmem:[%s12720_s10 + $0x220] sm:$0xf8]  }
  0xdb   : > { %v1834_v17 = vpop.permute.xlu0 %1833  ;;  %3049 = vrot.lane.b32.xlu1 %v12046_v22, %s12657_s18  ;;  %v12108_v62 = vld [vmem:[%s12720_s10 + $0x41c] ss:$0 sps:$4 sm:$0x11]  }
  0xdc   : > { %1874 = vst.msk [vmem:[#allocation2 + $0x40] sm:$0xff] %vm1865_vm5, %v1834_v17 }
  0xdd   : > { %v1840_v20 = vpop.permute.xlu1 %1839  ;;  %3047 = vrot.lane.b32.xlu0 %v12047_v28, %s12657_s18  ;;  %v12076_v28 = vld [vmem:[%s12720_s10 + $0xb0] sm:$0xfe]  }
  0xde   : > { %1877 = vst.msk [vmem:[#allocation2 + $0x58] sm:$0xff] %vm1865_vm5, %v1840_v20  ;;  %v2848_v20 = vrot.slane %v12069_v8, 1  ;;  %v4808_v8 = vrot.slane %v12086_v59, 1 }
  0xdf   : > { %v1838_v24 = vpop.permute.xlu0 %1837  ;;  %2876 = vrot.lane.b32.xlu1 %v2837_v36, %s12656_s17  ;;  %v3945_v36 = vrot.slane %v12075_v27, 1  ;;  %v12097_v27 = vld [vmem:[%s12720_s10 + $0x228] ss:$0 sps:$4 sm:$0x77]  }
  0xe0   : > { %1876 = vst.msk [vmem:[#allocation2 + $0x50] sm:$0xff] %vm1865_vm5, %v1838_v24  ;;  %v2557_v24 = vsel %vm1045_vm1, %v2555_v15, %v2556_v16  ;;  %v2849_v29 = vsel %vm1302_vm0, %v2847_v19, %v2848_v20  ;;  %v4806_v15 = vrot.slane %v12089_v63, 1  ;;  %v2561_v16 = vrot.slane %v12090_v4, 2  ;;  %v12094_v19 = vld [vmem:[%s12720_s10 + $0x348] sm:$0xf8]   ;;  %v12106_v4 = vld [vmem:[%s12720_s10 + $0x3fc] sm:$0xff]  }
  0xe1   : > { %v1844_v31 = vpop.permute.xlu1 %1843  ;;  %2874 = vrot.lane.b32.xlu0 %v2834_v40, %s12656_s17  ;;  %v12079_v40 = vld [vmem:[%s12720_s10 + $0xd8] ss:$0 sps:$4 sm:$0x77]   ;;  %v12095_v20 = vld [vmem:[%s12720_s10 + $0x350] ss:$0 sps:$4 sm:$0x77]  }
  0xe2   : > { %1879 = vst.msk [vmem:[#allocation2 + $0x68] sm:$0xff] %vm1865_vm5, %v1844_v31  ;;  %v12072_v31 = vld [vmem:[%s12720_s10 + $0x3e0] sm:$0xff]   ;;  %v4233_v50 = vrot.slane %v12079_v40, 3  ;;  %v5383_v32 = vrot.slane %v12095_v20, 3 }
  0xe3   : > { %v1842_v34 = vpop.permute.xlu0 %1841  ;;  %3053 = vrot.lane.b32.xlu1 %v12052_v39, %s12657_s18  ;;  %v3941_v39 = vrot.slane %v12076_v28, 1  ;;  %v12247_v20 = vld [vmem:[%s15681_s3 + $0x20] ss:$0 sps:$4 sm:$0xff]  }
  0xe4   : > { %1878 = vst.msk [vmem:[#allocation2 + $0x60] sm:$0xff] %vm1865_vm5, %v1842_v34 }
  0xe5   : > { %v1848_v37 = vpop.permute.xlu1 %1847  ;;  %3051 = vrot.lane.b32.xlu0 %v12053_v49, %s12657_s18  ;;  %v3946_v49 = vsel %vm1302_vm0, %v3944_v35, %v3945_v36  ;;  %v3943_v55 = vsel %vm1302_vm0, %v3941_v39, %v3942_v43  ;;  %v12101_v39 = vld [vmem:[%s12720_s10 + $0x418] ss:$0 sps:$4 sm:$0x33]  }
  0xe6   : > { %1881 = vst.msk [vmem:[#allocation2 + $0x78] sm:$0xff] %vm1865_vm5, %v1848_v37  ;;  %v12078_v37 = vld [vmem:[%s12720_s10 + $0xd0] sm:$0xf8]  }
  0xe7   : > { %v1846_v41 = vpop.permute.xlu0 %1845  ;;  %2591 = vrot.lane.b32.xlu1 %v2554_v54, %s12655_s16  ;;  %v4232_v47 = vrot.slane %v12078_v37, 3  ;;  %v12085_v54 = vld [vmem:[%s12720_s10 + $0x200] ss:$0 sps:$4 sm:$0x77]   ;;  %v5097_v37 = vrot.slane %v12097_v27, 3 }
  0xe8   : > { %1880 = vst.msk [vmem:[#allocation2 + $0x70] sm:$0xff] %vm1865_vm5, %v1846_v41  ;;  %v12113_v27 = vld [vmem:[%s12720_s10 + $0xe8] sm:$0xfe]  }
  0xe9   : > { %v2109_v46 = vpop.permute.xlu1 %2108  ;;  %2589 = vrot.lane.b32.xlu0 %v2551_v60, %s12655_s16  ;;  %v4234_v60 = vsel %vm3684_vm7, %v4232_v47, %v4233_v50  ;;  %v12104_v50 = vld [vmem:[%s12720_s10 + $0x364] sm:$0xf8]  }
  0xea   : > { %2156 = vst.msk [vmem:[#allocation2 + $0x8] sm:$0xff] %vm2154_vm6, %v2109_v46 }
  0xeb   : > { %v2107_v53 = vpop.permute.xlu0 %2106  ;;  %2880 = vrot.lane.b32.xlu1 %v2843_v0, %s12656_s17 }
  0xec   : > { %2155 = vst.msk [vmem:[#allocation2] sm:$0xff] %vm2154_vm6, %v2107_v53  ;;  %v4230_v53 = vrot.slane %v12081_v44, 3  ;;  %v12102_v44 = vld [vmem:[%s12720_s10 + $0x350] sm:$0xfe]  }
  0xed   : > { %v2113_v57 = vpop.permute.xlu1 %2112  ;;  %2878 = vrot.lane.b32.xlu0 %v2840_v5, %s12656_s17 }
  0xee   : > { %2158 = vst.msk [vmem:[#allocation2 + $0x18] sm:$0xff] %vm2154_vm6, %v2113_v57  ;;  %v12087_v57 = vld [vmem:[%s12720_s10 + $0x224] ss:$0 sps:$4 sm:$0x11]   ;;  %v4231_v0 = vsel %vm3684_vm7, %v4229_v51, %v4230_v53 }
  0xef   : > { %v2111_v61 = vpop.permute.xlu0 %2110  ;;  %3057 = vrot.lane.b32.xlu1 %v12062_v3, %s12657_s18  ;;  %v4518_v3 = vrot.slane %v12085_v54, 3  ;;  %v4809_v9 = vrot.slane %v12087_v57, 1  ;;  %v5670_v54 = vrot.slane %v12102_v44, 1  ;;  %v13295_v57 = vld [vmem:[%s15680_s2] sm:$0xff]  }
  0xf0   : > { %2157 = vst.msk [vmem:[#allocation2 + $0x10] sm:$0xff] %vm2154_vm6, %v2111_v61  ;;  %v4521_v61 = vrot.slane %v12083_v48, 3 }
  0xf1   : > { %v2117_v1 = vpop.permute.xlu1 %2116  ;;  %3055 = vrot.lane.b32.xlu0 %v12063_v14, %s12657_s18  ;;  %v4519_v13 = vsel %vm3684_vm7, %v4517_v2, %v4518_v3  ;;  %v4810_v21 = vsel %vm1302_vm0, %v4808_v8, %v4809_v9  ;;  %v12109_v3 = vld [vmem:[%s12720_s10 + $0x354] sm:$0xf8]   ;;  %v2854_v9 = vrot.slane %v12108_v62, 1 }
  0xf2   : > { %2160 = vst.msk [vmem:[#allocation2 + $0x28] sm:$0xff] %vm2154_vm6, %v2117_v1  ;;  %v4522_v7 = vsel %vm3684_vm7, %v4520_v56, %v4521_v61  ;;  %v5385_v56 = vrot.slane %v12104_v50, 3  ;;  %v12107_v61 = vld [vmem:[%s12720_s10 + $0x414] sm:$0xfe]   ;;  %v12133_v50 = vld [vmem:[%s15680_s2 + $0x8] sm:$0xff]  }
  0xf3   : > { %v2115_v6 = vpop.permute.xlu0 %2114  ;;  %2595 = vrot.lane.b32.xlu1 %v2560_v18, %s12655_s16  ;;  %v2853_v2 = vrot.slane %v12107_v61, 1 }
  0xf4   : > { %2159 = vst.msk [vmem:[#allocation2 + $0x20] sm:$0xff] %vm2154_vm6, %v2115_v6  ;;  %v12091_v6 = vld [vmem:[%s12720_s10 + $0x3fc] ss:$0 sps:$4 sm:$0x33]  }
  0xf5   : > { %v2121_v12 = vpop.permute.xlu1 %2120  ;;  %2593 = vrot.lane.b32.xlu0 %v2557_v24, %s12655_s16  ;;  %v2562_v18 = vrot.slane %v12091_v6, 2  ;;  %v4807_v24 = vsel %vm1302_vm0, %v4805_v11, %v4806_v15  ;;  %v9524_v15 = vld [vmem:[%s12720_s10 + $0x2e0] sm:$0xe] }
  0xf6   : > { %2162 = vst.msk [vmem:[#allocation2 + $0x38] sm:$0xff] %vm2154_vm6, %v2121_v12  ;;  %v12093_v12 = vld [vmem:[%s12720_s10 + $0x20c] ss:$0 sps:$4 sm:$0x77]  }
  0xf7   : > { %v2119_v17 = vpop.permute.xlu0 %2118  ;;  %2884 = vrot.lane.b32.xlu1 %v2849_v29, %s12656_s17  ;;  %v5382_v29 = vrot.slane %v12094_v19, 3 }
  0xf8   : > { %2161 = vst.msk [vmem:[#allocation2 + $0x30] sm:$0xff] %vm2154_vm6, %v2119_v17 }
  0xf9   : > { %v2125_v22 = vpop.permute.xlu1 %2124  ;;  %2882 = vrot.lane.b32.xlu0 %v2846_v33, %s12656_s17  ;;  %v12099_v33 = vld [vmem:[%s12720_s10 + $0x400] ss:$0 sps:$4 sm:$0x11]  }
  0xfa   : > { %2164 = vst.msk [vmem:[#allocation2 + $0x48] sm:$0xff] %vm2154_vm6, %v2125_v22  ;;  %v5093_v22 = vrot.slane %v12092_v10, 3  ;;  %v2851_v43 = vrot.slane %v12099_v33, 1  ;;  %v5958_v10 = vrot.slane %v12109_v3, 3 }
  0xfb   : > { %v2123_v26 = vpop.permute.xlu0 %2122  ;;  %3061 = vrot.lane.b32.xlu1 %v12072_v31, %s12657_s18  ;;  %v2563_v31 = vsel %vm1045_vm1, %v2561_v16, %v2562_v18  ;;  %v9525_v16 = vld [vmem:[%s12720_s10 + $0x2e4] sm:$0xf] }
  0xfc   : > { %2163 = vst.msk [vmem:[#allocation2 + $0x40] sm:$0xff] %vm2154_vm6, %v2123_v26  ;;  %v5094_v26 = vrot.slane %v12093_v12, 3 }
  0xfd   : > { %v2129_v30 = vpop.permute.xlu1 %2128  ;;  %3059 = vrot.lane.b32.xlu0 %v12073_v38, %s12657_s18  ;;  %v12100_v38 = vld [vmem:[%s12720_s10 + $0x410] sm:$0xfc]  }
  0xfe   : > { %2166 = vst.msk [vmem:[#allocation2 + $0x58] sm:$0xff] %vm2154_vm6, %v2129_v30  ;;  %v12098_v30 = vld [vmem:[%s12720_s10 + $0x3f8] sm:$0xfe]   ;;  %v5095_v35 = vsel %vm3684_vm7, %v5093_v22, %v5094_v26  ;;  %v2564_v48 = vrot.slane %v12100_v38, 2  ;;  %v2855_v22 = vsel %vm1302_vm0, %v2853_v2, %v2854_v9  ;;  %v12138_v9 = vld [vmem:[%s15680_s2 + $0x10] sm:$0xff]  }
  0xff   : > { %v2127_v34 = vpop.permute.xlu0 %2126  ;;  %3991 = vrot.lane.b32.xlu1 %v3946_v49, %s12650_s11  ;;  %v2850_v42 = vrot.slane %v12098_v30, 1  ;;  %v2565_v49 = vrot.slane %v12101_v39, 2  ;;  %v9529_v39 = vld [vmem:[%s12720_s10 + $0x304] sm:$0x1] }
 0x100   : > { %2165 = vst.msk [vmem:[#allocation2 + $0x50] sm:$0xff] %vm2154_vm6, %v2127_v34  ;;  %v5096_v34 = vrot.slane %v12096_v23, 3  ;;  %v489_v44 = vrot.slane %v9529_v39, 5  ;;  %v12127_v39 = vld [vmem:[%s12720_s10 + $0x230] sm:$0xf8]  }
 0x101   : > { %v2133_v41 = vpop.permute.xlu1 %2132  ;;  %3989 = vrot.lane.b32.xlu0 %v3943_v55, %s12650_s11  ;;  %v2852_v53 = vsel %vm1302_vm0, %v2850_v42, %v2851_v43  ;;  %v5671_v55 = vrot.slane %v12103_v45, 1  ;;  %v12115_v43 = vld [vmem:[%s12720_s10 + $0x418] sm:$0xff]  }
 0x102   : > { %2168 = vst.msk [vmem:[#allocation2 + $0x68] sm:$0xff] %vm2154_vm6, %v2133_v41  ;;  %v5384_v41 = vsel %vm3684_vm7, %v5382_v29, %v5383_v32  ;;  %v3947_v32 = vrot.slane %v12113_v27, 1 }
 0x103   : > { %v2131_v46 = vpop.permute.xlu0 %2130  ;;  %4279 = vrot.lane.b32.xlu1 %v4234_v60, %s12651_s12  ;;  %v5386_v60 = vrot.slane %v12105_v52, 3 }
 0x104   : > { %2167 = vst.msk [vmem:[#allocation2 + $0x60] sm:$0xff] %vm2154_vm6, %v2131_v46  ;;  %v5098_v46 = vsel %vm3684_vm7, %v5096_v34, %v5097_v37  ;;  %v9527_v34 = vld [vmem:[%s12720_s10 + $0x2fc] sm:$0xe] }
 0x105   : > { %v2137_v58 = vpop.permute.xlu1 %2136  ;;  %4277 = vrot.lane.b32.xlu0 %v4231_v0, %s12651_s12  ;;  %v533_v0 = vld [vmem:[%s15679_s1] sm:$0xf] }
 0x106   : > { %2170 = vst.msk [vmem:[#allocation2 + $0x78] sm:$0xff] %vm2154_vm6, %v2137_v58  ;;  %v2566_v58 = vsel %vm1045_vm1, %v2564_v48, %v2565_v49  ;;  %11830 = vmatprep.subr.msk.bf16.mxu1 %vm638_vm9, %v533_v0  ;;  %11829 = vmatprep.subr.msk.bf16.mxu0 %vm638_vm9, %v533_v0  ;;  %v640_v6 = vsel %vm638_vm9, %v533_v0, 0  ;;  %v12116_v48 = vld [vmem:[%s12720_s10 + $0x104] sm:$0xfe]  }
 0x107   : > { %v2135_v1 = vpop.permute.xlu0 %2134  ;;  %4567 = vrot.lane.b32.xlu1 %v4522_v7, %s12652_s13  ;;  %v5387_v7 = vsel %vm3684_vm7, %v5385_v56, %v5386_v60  ;;  %11828 = vmatpush3.bf16.msra.mxu1 %v640_v6  ;;  %v12117_v49 = vld [vmem:[%s12720_s10 + $0x10c] ss:$0 sps:$4 sm:$0x11]   ;;  %v9530_v56 = vld [vmem:[%s12720_s10 + $0x318] sm:$0xe] }
 0x108   : > { %2169 = vst.msk [vmem:[#allocation2 + $0x70] sm:$0xff] %vm2154_vm6, %v2135_v1  ;;  %v5672_v1 = vsel %vm1302_vm0, %v5670_v54, %v5671_v55  ;;  %11628 = vmatpush3.bf16.msra.mxu0 %v640_v6  ;;  %11661 = vmatprep.subr.bf16.mxu1 %v13295_v57  ;;  %v3951_v54 = vrot.slane %v12117_v49, 1  ;;  %v12118_v55 = vld [vmem:[%s12720_s10 + $0x370] sm:$0xf8]   ;;  %v9531_v60 = vld [vmem:[%s12720_s10 + $0x31c] sm:$0xf] }
 0x109   : > { %v2286_v5 = vpop.permute.xlu1 %2285  ;;  %4565 = vrot.lane.b32.xlu0 %v4519_v13, %s12652_s13  ;;  %v12111_v13 = vld [vmem:[%s12720_s10 + $0x36c] sm:$0xfe]   ;;  %v9558_v61 = vrot.slane %v9530_v56, 9  ;;  %v5961_v0 = vrot.slane %v12118_v55, 3  ;;  %v493_v2 = vrot.slane %v9531_v60, 5 }
 0x10a   : > { %2333 = vst.msk [vmem:[#allocation2 + $0x8] sm:$0xff] %vm2331_vm8, %v2286_v5  ;;  %v12110_v5 = vld [vmem:[%s12720_s10 + $0x35c] ss:$0 sps:$4 sm:$0x77]   ;;  %v5673_v18 = vrot.slane %v12111_v13, 1 }
 0x10b   : > { %v2284_v14 = vpop.permute.xlu0 %2283  ;;  %4855 = vrot.lane.b32.xlu1 %v4810_v21, %s12653_s14  ;;  %v5959_v12 = vrot.slane %v12110_v5, 3  ;;  %v9556_v21 = vrot.slane %v9524_v15, 9  ;;  %v494_v5 = vsel %vm13327_vm12, %v9558_v61, %v493_v2  ;;  %v495_v6 = vrot.slane %v493_v2, 4  ;;  %v9533_v15 = vld [vmem:[%s12720_s10 + $0x334] sm:$0xe] }
 0x10c   : > { %2332 = vst.msk [vmem:[#allocation2] sm:$0xff] %vm2331_vm8, %v2284_v14  ;;  %v12112_v14 = vld [vmem:[%s12720_s10 + $0x374] ss:$0 sps:$4 sm:$0x11]   ;;  %v12129_v55 = vld [vmem:[%s12720_s10 + $0x254] sm:$0xfe]  }
 0x10d   : > { %v2290_v17 = vpop.permute.xlu1 %2289  ;;  %4853 = vrot.lane.b32.xlu0 %v4807_v24, %s12653_s14  ;;  %v5674_v19 = vrot.slane %v12112_v14, 1  ;;  %v479_v24 = vrot.slane %v9525_v16, 5  ;;  %v5960_v29 = vsel %vm3684_vm7, %v5958_v10, %v5959_v12  ;;  %v12130_v56 = vld [vmem:[%s12720_s10 + $0x25c] ss:$0 sps:$4 sm:$0x11]   ;;  %v4814_v60 = vrot.slane %v12129_v55, 1 }
 0x10e   : > { %2335 = vst.msk [vmem:[#allocation2 + $0x18] sm:$0xff] %vm2331_vm8, %v2290_v17  ;;  %v9526_v17 = vld [vmem:[%s12720_s10 + $0x2e8] sm:$0x1]  ;;  %v4815_v61 = vrot.slane %v12130_v56, 1  ;;  %v9540_v2 = vld [vmem:[%s12720_s10 + $0x370] sm:$0xf] }
 0x10f   : > { %v2288_v25 = vpop.permute.xlu0 %2287  ;;  %2597 = vrot.lane.b32.xlu1 %v2563_v31, %s12655_s16  ;;  %v480_v30 = vsel %vm13327_vm12, %v9556_v21, %v479_v24  ;;  %v481_v31 = vrot.slane %v479_v24, 4  ;;  %v9559_v21 = vrot.slane %v9533_v15, 9 }
 0x110   : > { %2334 = vst.msk [vmem:[#allocation2 + $0x10] sm:$0xff] %vm2331_vm8, %v2288_v25  ;;  %v482_v25 = vrot.slane %v9526_v17, 5 }
 0x111   : > { %v2294_v28 = vpop.permute.xlu1 %2293  ;;  %5141 = vrot.lane.b32.xlu0 %v5095_v35, %s12654_s15  ;;  %v9528_v35 = vld [vmem:[%s12720_s10 + $0x300] sm:$0xf] }
 0x112   : > { %2337 = vst.msk [vmem:[#allocation2 + $0x28] sm:$0xff] %vm2331_vm8, %v2294_v28  ;;  %v12114_v28 = vld [vmem:[%s12720_s10 + $0xf0] ss:$0 sps:$4 sm:$0x11]   ;;  %v483_v38 = vsel %vm13327_vm12, %v481_v31, %v482_v25  ;;  %v9535_v25 = vld [vmem:[%s12720_s10 + $0x33c] sm:$0x1] }
 0x113   : > { %v2292_v36 = vpop.permute.xlu0 %2291  ;;  %5430 = vrot.lane.b32.xlu1 %v5384_v41, %s12655_s16  ;;  %v3948_v33 = vrot.slane %v12114_v28, 1  ;;  %v486_v41 = vrot.slane %v9528_v35, 5  ;;  %v9573_v42 = vcombine.low %v480_v30, %v483_v38  ;;  %v503_v28 = vrot.slane %v9535_v25, 5 }
 0x114   : > { %2336 = vst.msk [vmem:[#allocation2 + $0x20] sm:$0xff] %vm2331_vm8, %v2292_v36  ;;  %v5675_v36 = vsel %vm1302_vm0, %v5673_v18, %v5674_v19  ;;  %v12123_v18 = vld [vmem:[%s12720_s10 + $0xf4] ss:$0 sps:$4 sm:$0x77]   ;;  %v9534_v19 = vld [vmem:[%s12720_s10 + $0x338] sm:$0xf] }
 0x115   : > { %v2298_v40 = vpop.permute.xlu1 %2297  ;;  %5143 = vrot.lane.b32.xlu0 %v5098_v46, %s12654_s15  ;;  %v3949_v45 = vsel %vm1302_vm0, %v3947_v32, %v3948_v33  ;;  %11645 = vmatprep.mubr.msk.bf16.mxu1 %vm589_vm2, %v9573_v42  ;;  %v4236_v27 = vrot.slane %v12123_v18, 3  ;;  %v12125_v32 = vld [vmem:[%s12720_s10 + $0x24c] sm:$0xf8]   ;;  %v12126_v33 = vld [vmem:[%s12720_s10 + $0x254] ss:$0 sps:$4 sm:$0x77]  }
 0x116   : > { %2339 = vst.msk [vmem:[#allocation2 + $0x38] sm:$0xff] %vm2331_vm8, %v2298_v40  ;;  %v9557_v40 = vrot.slane %v9527_v34, 9  ;;  %v4527_v38 = vrot.slane %v12126_v33, 3  ;;  %v12128_v42 = vld [vmem:[%s12720_s10 + $0x238] ss:$0 sps:$4 sm:$0x77]  }
 0x117   : > { %v2296_v47 = vpop.permute.xlu0 %2295  ;;  %2886 = vrot.lane.b32.xlu1 %v2852_v53, %s12656_s17  ;;  %v3950_v53 = vrot.slane %v12116_v48, 1  ;;  %v9538_v48 = vld [vmem:[%s12720_s10 + $0x358] sm:$0x1] }
 0x118   : > { %2338 = vst.msk [vmem:[#allocation2 + $0x30] sm:$0xff] %vm2331_vm8, %v2296_v47  ;;  %v487_v46 = vsel %vm13327_vm12, %v9557_v40, %v486_v41  ;;  %v488_v47 = vrot.slane %v486_v41, 4  ;;  %v9536_v40 = vld [vmem:[%s12720_s10 + $0x350] sm:$0xe] }
 0x119   : > { %v2302_v51 = vpop.permute.xlu1 %2301  ;;  %2599 = vrot.lane.b32.xlu0 %v2566_v58, %s12655_s16 }
 0x11a   : > { %2341 = vst.msk [vmem:[#allocation2 + $0x48] sm:$0xff] %vm2331_vm8, %v2302_v51  ;;  %v490_v51 = vsel %vm13327_vm12, %v488_v47, %v489_v44  ;;  %v9560_v44 = vrot.slane %v9536_v40, 9 }
 0x11b   : > { %v2300_v59 = vpop.permute.xlu0 %2299  ;;  %5718 = vrot.lane.b32.xlu1 %v5672_v1, %s12656_s17  ;;  %v9574_v58 = vcombine.low %v487_v46, %v490_v51  ;;  %v9532_v1 = vld [vmem:[%s12720_s10 + $0x320] sm:$0x1]  ;;  %v4523_v46 = vrot.slane %v12127_v39, 3  ;;  %v510_v51 = vrot.slane %v9538_v48, 5  ;;  %v9546_v48 = vld [vmem:[%s12720_s10 + $0x3a8] sm:$0xf] }
 0x11c   : > { %2340 = vst.msk [vmem:[#allocation2 + $0x40] sm:$0xff] %vm2331_vm8, %v2300_v59  ;;  %v12119_v59 = vld [vmem:[%s12720_s10 + $0x378] ss:$0 sps:$4 sm:$0x77]  }
 0x11d   : > { %v2306_v63 = vpop.permute.xlu1 %2305  ;;  %5432 = vrot.lane.b32.xlu0 %v5387_v7, %s12655_s16  ;;  %11646 = vmatmul.mubr.msk.bf16.vlgmr.msra.gmra.mrb[0].mxu1 %vm589_vm2, %v9574_v58  ;;  %v5962_v3 = vrot.slane %v12119_v59, 3  ;;  %v12120_v7 = vld [vmem:[%s12720_s10 + $0x108] sm:$0xf8]  }
 0x11e   : > { %2343 = vst.msk [vmem:[#allocation2 + $0x58] sm:$0xff] %vm2331_vm8, %v2306_v63  ;;  %v3952_v63 = vsel %vm1302_vm0, %v3950_v53, %v3951_v54  ;;  %11662 = vmatpush3.bf16.msra.mxu1 %v13295_v57  ;;  %v4238_v13 = vrot.slane %v12120_v7, 3  ;;  %v12122_v57 = vld [vmem:[%s12720_s10 + $0xec] sm:$0xf8]   ;;  %v9541_v7 = vld [vmem:[%s12720_s10 + $0x374] sm:$0x1] }
 0x11f   : > { %v2304_v8 = vpop.permute.xlu0 %2303  ;;  %3063 = vrot.lane.b32.xlu1 %v12106_v4, %s12657_s18  ;;  %v496_v4 = vrot.slane %v9532_v1, 5  ;;  %v5963_v10 = vsel %vm3684_vm7, %v5961_v0, %v5962_v3  ;;  %11663 = vmatprep.subr.bf16.mxu1 %v12133_v50  ;;  %v4235_v24 = vrot.slane %v12122_v57, 3  ;;  %v12132_v1 = vld [vmem:[%s12720_s10 + $0x240] ss:$0 sps:$4 sm:$0x11]  }
 0x120   : > { %2342 = vst.msk [vmem:[#allocation2 + $0x50] sm:$0xff] %vm2331_vm8, %v2304_v8  ;;  %v12121_v8 = vld [vmem:[%s12720_s10 + $0x110] ss:$0 sps:$4 sm:$0x77]  }
 0x121   : > { %v2310_v11 = vpop.permute.xlu1 %2309  ;;  %2888 = vrot.lane.b32.xlu0 %v2855_v22, %s12656_s17  ;;  %v497_v12 = vsel %vm13327_vm12, %v495_v6, %v496_v4  ;;  %v4239_v14 = vrot.slane %v12121_v8, 3  ;;  %v12143_v22 = vld [vmem:[%s15680_s2 + $0x18] sm:$0xff]   ;;  %v4237_v34 = vsel %vm3684_vm7, %v4235_v24, %v4236_v27  ;;  %v514_v8 = vrot.slane %v9540_v2, 5  ;;  %v12135_v57 = vld [vmem:[%s12720_s10 + $0x434] ss:$0 sps:$4 sm:$0x33]  }
 0x122   : > { %2345 = vst.msk [vmem:[#allocation2 + $0x68] sm:$0xff] %vm2331_vm8, %v2310_v11  ;;  %v9575_v17 = vcombine.low %v494_v5, %v497_v12  ;;  %11664 = vmatpush3.bf16.msra.mxu1 %v12133_v50  ;;  %v4524_v50 = vrot.slane %v12128_v42, 3  ;;  %v4816_v5 = vsel %vm1302_vm0, %v4814_v60, %v4815_v61  ;;  %v12137_v24 = vld [vmem:[%s12720_s10 + $0x244] ss:$0 sps:$4 sm:$0x77]  }
 0x123   : > { %v2308_v23 = vpop.permute.xlu0 %2307  ;;  %6006 = vrot.lane.b32.xlu1 %v5960_v29, %s12657_s18  ;;  %11665 = vmatprep.subr.bf16.mxu1 %v12138_v9  ;;  %v12144_v61 = vld [vmem:[%s12720_s10 + $0x430] sm:$0xfe]  }
 0x124   : > { %2344 = vst.msk [vmem:[#allocation2 + $0x60] sm:$0xff] %vm2331_vm8, %v2308_v23  ;;  %v4240_v23 = vsel %vm3684_vm7, %v4238_v13, %v4239_v14  ;;  %11649 = vmatprep.mubr.msk.bf16.mxu1 %vm589_vm2, %v9575_v17  ;;  %v4525_v58 = vsel %vm3684_vm7, %v4523_v46, %v4524_v50  ;;  %v516_v13 = vrot.slane %v514_v8, 4  ;;  %v12134_v14 = vld [vmem:[%s12720_s10 + $0x42c] sm:$0xfc]   ;;  %v2856_v2 = vrot.slane %v12144_v61, 1 }
 0x125   : > { %v2314_v26 = vpop.permute.xlu1 %2313  ;;  %5720 = vrot.lane.b32.xlu0 %v5675_v36, %s12656_s17  ;;  %v2567_v18 = vrot.slane %v12134_v14, 2  ;;  %v12149_v14 = vld [vmem:[%s12720_s10 + $0x388] sm:$0xfe]   ;;  %v12164_v61 = vld [vmem:[%s12720_s10 + $0x10] ss:$0 sps:$4 sm:$0x11]  }
 0x126   : > { %2347 = vst.msk [vmem:[#allocation2 + $0x78] sm:$0xff] %vm2331_vm8, %v2314_v26  ;;  %v500_v26 = vrot.slane %v9534_v19, 5  ;;  %11666 = vmatpush3.bf16.msra.mxu1 %v12138_v9  ;;  %v4812_v9 = vrot.slane %v12132_v1, 1  ;;  %v2568_v19 = vrot.slane %v12135_v57, 2 }
 0x127   : > { %v2312_v37 = vpop.permute.xlu0 %2311  ;;  %3993 = vrot.lane.b32.xlu1 %v3949_v45, %s12650_s11  ;;  %11667 = vmatprep.subr.bf16.mxu1 %v12143_v22  ;;  %v12150_v57 = vld [vmem:[%s12720_s10 + $0x390] ss:$0 sps:$4 sm:$0x11]  }
 0x128   : > { %2346 = vst.msk [vmem:[#allocation2 + $0x70] sm:$0xff] %vm2331_vm8, %v2312_v37  ;;  %v501_v30 = vsel %vm13327_vm12, %v9559_v21, %v500_v26  ;;  %v502_v31 = vrot.slane %v500_v26, 4  ;;  %v4526_v37 = vrot.slane %v12125_v32, 3  ;;  %v12136_v21 = vld [vmem:[%s12720_s10 + $0x23c] sm:$0xf8]   ;;  %v5100_v32 = vrot.slane %v12137_v24, 3 }
 0x129   : > { %v2576_v52 = vpop.permute.xlu1 %2575  ;;  %3065 = vrot.lane.b32.xlu0 %v12115_v43, %s12657_s18  ;;  %v9537_v43 = vld [vmem:[%s12720_s10 + $0x354] sm:$0xf]  ;;  %v9543_v26 = vld [vmem:[%s12720_s10 + $0x38c] sm:$0xf] }
 0x12a   : > { %2623 = vst.msk [vmem:[#allocation2 + $0x8] sm:$0xff] %vm2621_vm13, %v2576_v52  ;;  %v504_v35 = vsel %vm13327_vm12, %v502_v31, %v503_v28  ;;  %v4528_v45 = vsel %vm3684_vm7, %v4526_v37, %v4527_v38  ;;  %v507_v49 = vrot.slane %v9537_v43, 5  ;;  %11668 = vmatpush3.bf16.msra.mxu1 %v12143_v22  ;;  %v9542_v22 = vld [vmem:[%s12720_s10 + $0x388] sm:$0xe]  ;;  %v2569_v28 = vsel %vm1045_vm1, %v2567_v18, %v2568_v19  ;;  %v12139_v37 = vld [vmem:[%s12720_s10 + $0x380] sm:$0xf8]  }
 0x12b   : > { %v2574_v62 = vpop.permute.xlu0 %2573  ;;  %3995 = vrot.lane.b32.xlu1 %v3952_v63, %s12650_s11  ;;  %v9576_v41 = vcombine.low %v501_v30, %v504_v35  ;;  %v9539_v63 = vld [vmem:[%s12720_s10 + $0x36c] sm:$0xe]  ;;  %v9562_v27 = vrot.slane %v9542_v22, 9  ;;  %v9544_v30 = vld [vmem:[%s12720_s10 + $0x390] sm:$0x1]  ;;  %v521_v31 = vrot.slane %v9543_v26, 5 }
 0x12c   : > { %2622 = vst.msk [vmem:[#allocation2] sm:$0xff] %vm2621_vm13, %v2574_v62  ;;  %v508_v53 = vsel %vm13327_vm12, %v9560_v44, %v507_v49  ;;  %v509_v54 = vrot.slane %v507_v49, 4  ;;  %v12131_v62 = vld [vmem:[%s12720_s10 + $0x238] sm:$0xfe]   ;;  %v9561_v3 = vrot.slane %v9539_v63, 9  ;;  %v524_v33 = vrot.slane %v9544_v30, 5 }
 0x12d   : > { %v2580_v11 = vpop.permute.xlu1 %2579  ;;  %6008 = vrot.lane.b32.xlu0 %v5963_v10, %s12657_s18  ;;  %11650 = vmatmul.mubr.msk.bf16.gmra.mrb[4].mxu1 %vm589_vm2, %v9576_v41  ;;  %v4811_v6 = vrot.slane %v12131_v62, 1  ;;  %v517_v10 = vrot.slane %v9541_v7, 5  ;;  %v522_v35 = vsel %vm13327_vm12, %v9562_v27, %v521_v31  ;;  %v12140_v38 = vld [vmem:[%s12720_s10 + $0x388] ss:$0 sps:$4 sm:$0x77]   ;;  %v5388_v42 = vrot.slane %v12139_v37, 3 }
 0x12e   : > { %2625 = vst.msk [vmem:[#allocation2 + $0x18] sm:$0xff] %vm2621_vm13, %v2580_v11  ;;  %v511_v59 = vsel %vm13327_vm12, %v509_v54, %v510_v51  ;;  %v515_v12 = vsel %vm13327_vm12, %v9561_v3, %v514_v8  ;;  %v5389_v43 = vrot.slane %v12140_v38, 3  ;;  %v12141_v44 = vld [vmem:[%s12720_s10 + $0x258] sm:$0xf8]   ;;  %v528_v54 = vrot.slane %v9546_v48, 5  ;;  %v13509_v27 = vld [vmem:[%s15681_s3] sm:$0xff]  }
 0x12f   : > { %v2578_v16 = vpop.permute.xlu0 %2577  ;;  %4283 = vrot.lane.b32.xlu1 %v4240_v23, %s12651_s12  ;;  %v9577_v0 = vcombine.low %v508_v53, %v511_v59  ;;  %v4813_v15 = vsel %vm1302_vm0, %v4811_v6, %v4812_v9  ;;  %v518_v17 = vsel %vm13327_vm12, %v516_v13, %v517_v10  ;;  %v9547_v53 = vld [vmem:[%s12720_s10 + $0x3ac] sm:$0x1]  ;;  %v12145_v62 = vld [vmem:[%s12720_s10 + $0x438] ss:$0 sps:$4 sm:$0x11]   ;;  %v5677_v18 = vrot.slane %v12150_v57, 1  ;;  %11703 = vmatprep.subr.bf16.mxu0 %v13509_v27 }
 0x130   : > { %2624 = vst.msk [vmem:[#allocation2 + $0x10] sm:$0xff] %vm2621_vm13, %v2578_v16  ;;  %v9578_v23 = vcombine.low %v515_v12, %v518_v17  ;;  %v5390_v51 = vsel %vm3684_vm7, %v5388_v42, %v5389_v43  ;;  %v531_v56 = vrot.slane %v9547_v53, 5  ;;  %v530_v60 = vrot.slane %v528_v54, 4  ;;  %v12147_v7 = vld [vmem:[%s12720_s10 + $0x450] ss:$0 sps:$4 sm:$0x33]  }
 0x131   : > { %v2584_v29 = vpop.permute.xlu1 %2583  ;;  %4281 = vrot.lane.b32.xlu0 %v4237_v34, %s12651_s12  ;;  %11653 = vmatprep.mubr.msk.bf16.mxu1 %vm589_vm2, %v9577_v0  ;;  %v2857_v3 = vrot.slane %v12145_v62, 1  ;;  %v2571_v13 = vrot.slane %v12147_v7, 2  ;;  %v5676_v17 = vrot.slane %v12149_v14, 1  ;;  %v12151_v19 = vld [vmem:[%s12720_s10 + $0x39c] sm:$0xf8]  }
 0x132   : > { %2627 = vst.msk [vmem:[#allocation2 + $0x28] sm:$0xff] %vm2621_vm13, %v2584_v29  ;;  %v5099_v29 = vrot.slane %v12136_v21, 3  ;;  %v532_v1 = vsel %vm13327_vm12, %v530_v60, %v531_v56  ;;  %v12152_v22 = vld [vmem:[%s12720_s10 + $0x3a4] ss:$0 sps:$4 sm:$0x77]  }
 0x133   : > { %v2582_v36 = vpop.permute.xlu0 %2581  ;;  %4571 = vrot.lane.b32.xlu1 %v4528_v45, %s12652_s13  ;;  %v9545_v45 = vld [vmem:[%s12720_s10 + $0x3a4] sm:$0xe]  ;;  %v2858_v10 = vsel %vm1302_vm0, %v2856_v2, %v2857_v3  ;;  %v5678_v24 = vsel %vm1302_vm0, %v5676_v17, %v5677_v18  ;;  %v12154_v30 = vld [vmem:[%s12720_s10 + $0x44c] sm:$0xfe]  }
 0x134   : > { %2626 = vst.msk [vmem:[#allocation2 + $0x20] sm:$0xff] %vm2621_vm13, %v2582_v36  ;;  %v523_v36 = vrot.slane %v521_v31, 4  ;;  %v5101_v39 = vsel %vm3684_vm7, %v5099_v29, %v5100_v32  ;;  %v9563_v49 = vrot.slane %v9545_v45, 9  ;;  %v12155_v31 = vld [vmem:[%s12720_s10 + $0x454] ss:$0 sps:$4 sm:$0x11]  }
 0x135   : > { %v2588_v47 = vpop.permute.xlu1 %2587  ;;  %4569 = vrot.lane.b32.xlu0 %v4525_v58, %s12652_s13  ;;  %11654 = vmatmul.mubr.msk.bf16.gmra.mrb[8].mxu1 %vm589_vm2, %v9578_v23  ;;  %v12153_v23 = vld [vmem:[%s12720_s10 + $0x434] sm:$0xff]   ;;  %v12156_v37 = vld [vmem:[%s12720_s10 + $0x38c] sm:$0xf8]   ;;  %v12158_v42 = vld [vmem:[%s12720_s10 + $0x3a4] sm:$0xfe]  }
 0x136   : > { %2629 = vst.msk [vmem:[#allocation2 + $0x38] sm:$0xff] %vm2621_vm13, %v2588_v47  ;;  %v525_v41 = vsel %vm13327_vm12, %v523_v36, %v524_v33  ;;  %v12142_v47 = vld [vmem:[%s12720_s10 + $0x260] ss:$0 sps:$4 sm:$0x77]   ;;  %v529_v59 = vsel %vm13327_vm12, %v9563_v49, %v528_v54  ;;  %v2860_v36 = vrot.slane %v12155_v31, 1 }
 0x137   : > { %v2586_v52 = vpop.permute.xlu0 %2585  ;;  %4859 = vrot.lane.b32.xlu1 %v4816_v5, %s12653_s14  ;;  %v9579_v46 = vcombine.low %v522_v35, %v525_v41  ;;  %v5103_v55 = vrot.slane %v12142_v47, 3  ;;  %v12148_v5 = vld [vmem:[%s15680_s2 + $0x20] ss:$0 sps:$4 sm:$0xff]   ;;  %v9580_v6 = vcombine.low %v529_v59, %v532_v1  ;;  %v2859_v35 = vrot.slane %v12154_v30, 1  ;;  %v12162_v59 = vld [vmem:[%s12720_s10 + $0x450] sm:$0xff]  }
 0x138   : > { %2628 = vst.msk [vmem:[#allocation2 + $0x30] sm:$0xff] %vm2621_vm13, %v2586_v52  ;;  %v5102_v52 = vrot.slane %v12141_v44, 3  ;;  %11831 = vmatprep.subr.msk.bf16.mxu1 %vm638_vm9, %v12148_v5  ;;  %v3215_v12 = vsel %vm638_vm9, %v12148_v5, 0  ;;  %v5964_v41 = vrot.slane %v12156_v37, 3  ;;  %v5679_v47 = vrot.slane %v12158_v42, 1 }
 0x139   : > { %v2865_v4 = vpop.permute.xlu1 %2864  ;;  %4857 = vrot.lane.b32.xlu0 %v4813_v15, %s12653_s14  ;;  %11657 = vmatprep.mubr.msk.bf16.mxu1 %vm589_vm2, %v9579_v46  ;;  %v12159_v45 = vld [vmem:[%s12720_s10 + $0x3ac] ss:$0 sps:$4 sm:$0x11]   ;;  %v12161_v53 = vld [vmem:[%s12720_s10 + $0x128] ss:$0 sps:$4 sm:$0x11]  }
 0x13a   : > { %2912 = vst.msk [vmem:[#allocation2 + $0x8] sm:$0xff] %vm2910_vm14, %v2865_v4  ;;  %v5104_v63 = vsel %vm3684_vm7, %v5102_v52, %v5103_v55  ;;  %v12146_v4 = vld [vmem:[%s12720_s10 + $0x448] sm:$0xfc]   ;;  %11670 = vmatpush3.bf16.msra.mxu1 %v3215_v12  ;;  %v12160_v52 = vld [vmem:[%s12720_s10 + $0x120] sm:$0xfe]   ;;  %v6793_v1 = vrot.slane %v12164_v61, 1 }
 0x13b   : > { %v2863_v11 = vpop.permute.xlu0 %2862  ;;  %2601 = vrot.lane.b32.xlu1 %v2569_v28, %s12655_s16  ;;  %v5392_v28 = vrot.slane %v12152_v22, 3  ;;  %v3953_v56 = vrot.slane %v12160_v52, 1  ;;  %v12163_v60 = vld [vmem:[%s12720_s10 + $0x8] sm:$0xfe]  }
 0x13c   : > { %2911 = vst.msk [vmem:[#allocation2] sm:$0xff] %vm2910_vm14, %v2863_v11  ;;  %v2570_v11 = vrot.slane %v12146_v4, 2  ;;  %v12165_v2 = vld [vmem:[%s12720_s10 + $0x3a8] sm:$0xf8]  }
 0x13d   : > { %v3042_v16 = vpop.permute.xlu1 %3041  ;;  %5145 = vrot.lane.b32.xlu0 %v5101_v39, %s12654_s15  ;;  %11658 = vmatmul.mubr.msk.bf16.gmra.mrb[12].mxu1 %vm589_vm2, %v9580_v6  ;;  %v12157_v39 = vld [vmem:[%s12720_s10 + $0x394] ss:$0 sps:$4 sm:$0x77]   ;;  %v12166_v4 = vld [vmem:[%s12720_s10 + $0x3b0] ss:$0 sps:$4 sm:$0x77]  }
 0x13e   : > { %3089 = vst.msk [vmem:[#allocation2 + $0x8] sm:$0xff] %vm3087_vm15, %v3042_v16  ;;  %v2572_v16 = vsel %vm1045_vm1, %v2570_v11, %v2571_v13  ;;  %v5965_v44 = vrot.slane %v12157_v39, 3  ;;  %v5967_v6 = vrot.slane %v12165_v2, 3  ;;  %v12168_v11 = vld [vmem:[%s12720_s10 + $0x12c] ss:$0 sps:$4 sm:$0x77]  }
 0x13f   : > { %v3040_v25 = vpop.permute.xlu0 %3039  ;;  %5434 = vrot.lane.b32.xlu1 %v5390_v51, %s12655_s16  ;;  %v5680_v51 = vrot.slane %v12159_v45, 1  ;;  %v12170_v17 = vld [vmem:[%s12720_s10 + $0x144] ss:$0 sps:$4 sm:$0x11]   ;;  %v12175_v37 = vld [vmem:[%s12720_s10 + $0x268] sm:$0xf8]  }
 0x140   : > { %3088 = vst.msk [vmem:[#allocation2] sm:$0xff] %vm3087_vm15, %v3040_v25  ;;  %v5391_v25 = vrot.slane %v12151_v19, 3  ;;  %v3957_v22 = vrot.slane %v12170_v17, 1  ;;  %v12174_v31 = vld [vmem:[%s12720_s10 + $0x2c] ss:$0 sps:$4 sm:$0x11]  }
 0x141   : > { %v2869_v34 = vpop.permute.xlu1 %2868  ;;  %5147 = vrot.lane.b32.xlu0 %v5104_v63, %s12654_s15  ;;  %v5681_v55 = vsel %vm1302_vm0, %v5679_v47, %v5680_v51  ;;  %v12178_v45 = vld [vmem:[%s12720_s10 + $0x148] ss:$0 sps:$4 sm:$0x77]   ;;  %v12179_v51 = vld [vmem:[%s12720_s10 + $0x1f8] sm:$0xff]   ;;  %v12180_v52 = vld [vmem:[%s12720_s10 + $0x2c] sm:$0xfc]  }
 0x142   : > { %2914 = vst.msk [vmem:[#allocation2 + $0x18] sm:$0xff] %vm2910_vm14, %v2869_v34  ;;  %v5393_v34 = vsel %vm3684_vm7, %v5391_v25, %v5392_v28  ;;  %v12183_v61 = vld [vmem:[%s12720_s10 + $0x278] ss:$0 sps:$4 sm:$0x11]   ;;  %v12184_v2 = vld [vmem:[%s12720_s10 + $0x284] sm:$0xf8]  }
 0x143   : > { %v2867_v40 = vpop.permute.xlu0 %2866  ;;  %2890 = vrot.lane.b32.xlu1 %v2858_v10, %s12656_s17  ;;  %v5968_v10 = vrot.slane %v12166_v4, 3  ;;  %v12185_v4 = vld [vmem:[%s12720_s10 + $0x28c] ss:$0 sps:$4 sm:$0x77]   ;;  %v12189_v17 = vld [vmem:[%s12720_s10 + $0xc4] sm:$0xf8]  }
 0x144   : > { %2913 = vst.msk [vmem:[#allocation2 + $0x10] sm:$0xff] %vm2910_vm14, %v2867_v40  ;;  %v2861_v40 = vsel %vm1302_vm0, %v2859_v35, %v2860_v36  ;;  %v6796_v36 = vrot.slane %v12174_v31, 1 }
 0x145   : > { %v3046_v50 = vpop.permute.xlu1 %3045  ;;  %2603 = vrot.lane.b32.xlu0 %v2572_v16, %s12655_s16  ;;  %v3105_v29 = vld [vmem:[#allocation2 + $0x8] sm:$0xff]  ;;  %v5969_v57 = vsel %vm3684_vm7, %v5967_v6, %v5968_v10  ;;  %v12169_v16 = vld [vmem:[%s12720_s10 + $0x13c] sm:$0xfe]   ;;  %v4532_v6 = vrot.slane %v12184_v2, 3  ;;  %v4533_v10 = vrot.slane %v12185_v4, 3 }
 0x146   : > { %3091 = vst.msk [vmem:[#allocation2 + $0x18] sm:$0xff] %vm3087_vm15, %v3046_v50  ;;  %v5966_v50 = vsel %vm3684_vm7, %v5964_v41, %v5965_v44  ;;  %v4529_v41 = vrot.slane %v12175_v37, 3 }
 0x147   : > { %v3044_v58 = vpop.permute.xlu0 %3043  ;;  %v3104_v8 = vld [vmem:[#allocation2] sm:$0xff]  ;;  %5722 = vrot.lane.b32.xlu1 %v5678_v24, %s12656_s17  ;;  %v12172_v24 = vld [vmem:[%s12720_s10 + $0x18] ss:$0 sps:$4 sm:$0x33]  }
 0x148   : > { %3090 = vst.msk [vmem:[#allocation2 + $0x10] sm:$0xff] %vm3087_vm15, %v3044_v58  ;;  %11671 = vmatprep.mubr.msk.bf16.mxu1 %vm3165_vm10, %v3104_v8  ;;  %v3954_v58 = vrot.slane %v12161_v53, 1  ;;  %v12167_v8 = vld [vmem:[%s12720_s10 + $0x124] sm:$0xf8]   ;;  %v7081_v30 = vrot.slane %v12172_v24, 2 }
 0x149   : > { %v2873_v0 = vpop.permute.xlu1 %2872  ;;  %5436 = vrot.lane.b32.xlu0 %v5393_v34, %s12655_s16  ;;  %11672 = vmatmul.mubr.msk.bf16.vlgmr.msra.gmra.mrb[16].mxu1 %vm3165_vm10, %v3105_v29  ;;  %v4241_v12 = vrot.slane %v12167_v8, 3  ;;  %v12173_v29 = vld [vmem:[%s12720_s10 + $0x24] sm:$0xfe]   ;;  %v12181_v53 = vld [vmem:[%s12720_s10 + $0x34] ss:$0 sps:$4 sm:$0x33]  }
 0x14a   : > { %2916 = vst.msk [vmem:[#allocation2 + $0x28] sm:$0xff] %vm2910_vm14, %v2873_v0  ;;  %v3955_v63 = vsel %vm1302_vm0, %v3953_v56, %v3954_v58  ;;  %v6792_v0 = vrot.slane %v12163_v60, 1  ;;  %v7083_v56 = vrot.slane %v12180_v52, 2  ;;  %v12182_v60 = vld [vmem:[%s12720_s10 + $0x270] sm:$0xfe]  }
 0x14b   : > { %v2871_v9 = vpop.permute.xlu0 %2870  ;;  %3067 = vrot.lane.b32.xlu1 %v12153_v23, %s12657_s18  ;;  %v12171_v23 = vld [vmem:[%s12720_s10 + $0x10] sm:$0xfc]   ;;  %v12191_v24 = vld [vmem:[%s12720_s10 + $0xa8] sm:$0xf8]  }
 0x14c   : > { %2915 = vst.msk [vmem:[#allocation2 + $0x20] sm:$0xff] %vm2910_vm14, %v2871_v9  ;;  %v6794_v5 = vsel %vm1302_vm0, %v6792_v0, %v6793_v1  ;;  %v7080_v28 = vrot.slane %v12171_v23, 2  ;;  %v4817_v0 = vrot.slane %v12182_v60, 1  ;;  %v4818_v1 = vrot.slane %v12183_v61, 1 }
 0x14d   : > { %v3050_v15 = vpop.permute.xlu1 %3049  ;;  %v3107_v46 = vld [vmem:[#allocation2 + $0x18] sm:$0xff]  ;;  %2892 = vrot.lane.b32.xlu0 %v2861_v40, %s12656_s17 }
 0x14e   : > { %3093 = vst.msk [vmem:[#allocation2 + $0x28] sm:$0xff] %vm3087_vm15, %v3050_v15  ;;  %v4242_v15 = vrot.slane %v12168_v11, 3  ;;  %v7082_v35 = vsel %vm1045_vm1, %v7080_v28, %v7081_v30  ;;  %v12187_v11 = vld [vmem:[%s12720_s10 + $0x208] ss:$0 sps:$4 sm:$0x11]  }
 0x14f   : > { %v3048_v21 = vpop.permute.xlu0 %3047  ;;  %v3106_v32 = vld [vmem:[#allocation2 + $0x10] sm:$0xff]  ;;  %6010 = vrot.lane.b32.xlu1 %v5966_v50, %s12657_s18  ;;  %v4245_v50 = vrot.slane %v12178_v45, 3 }
 0x150   : > { %3092 = vst.msk [vmem:[#allocation2 + $0x20] sm:$0xff] %vm3087_vm15, %v3048_v21  ;;  %11675 = vmatprep.mubr.msk.bf16.mxu1 %vm3165_vm10, %v3106_v32  ;;  %v4243_v19 = vsel %vm3684_vm7, %v4241_v12, %v4242_v15  ;;  %v3956_v21 = vrot.slane %v12169_v16, 1  ;;  %v12188_v16 = vld [vmem:[%s12720_s10 + $0x214] sm:$0xff]   ;;  %v12198_v45 = vld [vmem:[%s12720_s10 + $0x210] ss:$0 sps:$4 sm:$0x33]  }
 0x151   : > { %v2877_v26 = vpop.permute.xlu1 %2876  ;;  %5724 = vrot.lane.b32.xlu0 %v5681_v55, %s12656_s17  ;;  %11676 = vmatmul.mubr.msk.bf16.gmra.mrb[20].mxu1 %vm3165_vm10, %v3107_v46  ;;  %v12193_v30 = vld [vmem:[%s12720_s10 + $0x274] sm:$0xf8]  }
 0x152   : > { %2918 = vst.msk [vmem:[#allocation2 + $0x38] sm:$0xff] %vm2910_vm14, %v2877_v26  ;;  %v3958_v26 = vsel %vm1302_vm0, %v3956_v21, %v3957_v22  ;;  %v3688_v22 = vrot.slane %v12189_v17, 3 }
 0x153   : > { %v2875_v33 = vpop.permute.xlu0 %2874  ;;  %3997 = vrot.lane.b32.xlu1 %v3955_v63, %s12650_s11 }
 0x154   : > { %2917 = vst.msk [vmem:[#allocation2 + $0x30] sm:$0xff] %vm2910_vm14, %v2875_v33  ;;  %v6795_v33 = vrot.slane %v12173_v29, 1  ;;  %v3685_v29 = vrot.slane %v12191_v24, 3 }
 0x155   : > { %v3054_v38 = vpop.permute.xlu1 %3053  ;;  %3069 = vrot.lane.b32.xlu0 %v12162_v59, %s12657_s18  ;;  %v3109_v7 = vld [vmem:[#allocation2 + $0x28] sm:$0xff]  ;;  %v7084_v59 = vrot.slane %v12181_v53, 2 }
 0x156   : > { %3095 = vst.msk [vmem:[#allocation2 + $0x38] sm:$0xff] %vm3087_vm15, %v3054_v38  ;;  %v12176_v38 = vld [vmem:[%s12720_s10 + $0x270] ss:$0 sps:$4 sm:$0x77]   ;;  %v6797_v40 = vsel %vm1302_vm0, %v6795_v33, %v6796_v36 }
 0x157   : > { %v3052_v43 = vpop.permute.xlu0 %3051  ;;  %v3108_v48 = vld [vmem:[#allocation2 + $0x20] sm:$0xff]  ;;  %6840 = vrot.lane.b32.xlu1 %v6794_v5, %s12650_s11  ;;  %v4530_v42 = vrot.slane %v12176_v38, 3  ;;  %v7085_v63 = vsel %vm1045_vm1, %v7083_v56, %v7084_v59  ;;  %v4819_v5 = vsel %vm1302_vm0, %v4817_v0, %v4818_v1  ;;  %v12194_v33 = vld [vmem:[%s12720_s10 + $0x27c] ss:$0 sps:$4 sm:$0x77]  }
 0x158   : > { %3094 = vst.msk [vmem:[#allocation2 + $0x30] sm:$0xff] %vm3087_vm15, %v3052_v43  ;;  %11679 = vmatprep.mubr.msk.bf16.mxu1 %vm3165_vm10, %v3108_v48  ;;  %v12177_v43 = vld [vmem:[%s12720_s10 + $0x140] sm:$0xf8]   ;;  %v5106_v37 = vrot.slane %v12194_v33, 3  ;;  %v12195_v38 = vld [vmem:[%s12720_s10 + $0x28c] sm:$0xfe]  }
 0x159   : > { %v2592_v49 = vpop.permute.xlu1 %2591  ;;  %6012 = vrot.lane.b32.xlu0 %v5969_v57, %s12657_s18  ;;  %11680 = vmatmul.mubr.msk.bf16.gmra.mrb[24].mxu1 %vm3165_vm10, %v3109_v7  ;;  %v4531_v47 = vsel %vm3684_vm7, %v4529_v41, %v4530_v42  ;;  %v4244_v48 = vrot.slane %v12177_v43, 3  ;;  %v12186_v7 = vld [vmem:[%s12720_s10 + $0x200] sm:$0xfe]   ;;  %v7545_v57 = vrot.slane %v12187_v11, 1  ;;  %v4820_v42 = vrot.slane %v12195_v38, 1 }
 0x15a   : > { %2631 = vst.msk [vmem:[#allocation2 + $0x48] sm:$0xff] %vm2621_vm13, %v2592_v49  ;;  %v7544_v12 = vrot.slane %v12186_v7, 1  ;;  %v12201_v56 = vld [vmem:[%s12720_s10 + $0x3b8] sm:$0xf8]   ;;  %v12206_v7 = vld [vmem:[%s12720_s10 + $0x224] sm:$0xfc]  }
 0x15b   : > { %v2590_v54 = vpop.permute.xlu0 %2589  ;;  %4285 = vrot.lane.b32.xlu1 %v4243_v19, %s12651_s12  ;;  %v4246_v55 = vsel %vm3684_vm7, %v4244_v48, %v4245_v50  ;;  %v7833_v50 = vrot.slane %v12198_v45, 2  ;;  %v5394_v61 = vrot.slane %v12201_v56, 3  ;;  %v12204_v1 = vld [vmem:[%s12720_s10 + $0x298] ss:$0 sps:$4 sm:$0x77]   ;;  %v7835_v11 = vrot.slane %v12206_v7, 2 }
 0x15c   : > { %2630 = vst.msk [vmem:[#allocation2 + $0x40] sm:$0xff] %vm2621_vm13, %v2590_v54  ;;  %v7546_v21 = vsel %vm1302_vm0, %v7544_v12, %v7545_v57 }
 0x15d   : > { %v2881_v62 = vpop.permute.xlu1 %2880  ;;  %3999 = vrot.lane.b32.xlu0 %v3958_v26, %s12650_s11  ;;  %v3111_v34 = vld [vmem:[#allocation2 + $0x38] sm:$0xff]  ;;  %v12192_v26 = vld [vmem:[%s12720_s10 + $0xb0] ss:$0 sps:$4 sm:$0x77]  }
 0x15e   : > { %2920 = vst.msk [vmem:[#allocation2 + $0x48] sm:$0xff] %vm2910_vm14, %v2881_v62 }
 0x15f   : > { %v2879_v3 = vpop.permute.xlu0 %2878  ;;  %v3110_v13 = vld [vmem:[#allocation2 + $0x30] sm:$0xff]  ;;  %7128 = vrot.lane.b32.xlu1 %v7082_v35, %s12651_s12 }
 0x160   : > { %2919 = vst.msk [vmem:[#allocation2 + $0x40] sm:$0xff] %vm2910_vm14, %v2879_v3  ;;  %11683 = vmatprep.mubr.msk.bf16.mxu1 %vm3165_vm10, %v3110_v13 }
 0x161   : > { %v3058_v9 = vpop.permute.xlu1 %3057  ;;  %11684 = vmatmul.mubr.msk.bf16.gmra.mrb[28].mxu1 %vm3165_vm10, %v3111_v34  ;;  %6842 = vrot.lane.b32.xlu0 %v6797_v40, %s12650_s11  ;;  %v5105_v34 = vrot.slane %v12193_v30, 3  ;;  %v9503_v30 = vld [vmem:[%s12720_s10 + $0x21c] sm:$0xe] }
 0x162   : > { %3097 = vst.msk [vmem:[#allocation2 + $0x48] sm:$0xff] %vm3087_vm15, %v3058_v9  ;;  %v9549_v38 = vrot.slane %v9503_v30, 9 }
 0x163   : > { %v3056_v14 = vpop.permute.xlu0 %3055  ;;  %4573 = vrot.lane.b32.xlu1 %v4531_v47, %s12652_s13  ;;  %v5107_v41 = vsel %vm3684_vm7, %v5105_v34, %v5106_v37  ;;  %v9504_v34 = vld [vmem:[%s12720_s10 + $0x220] sm:$0xf] }
 0x164   : > { %3096 = vst.msk [vmem:[#allocation2 + $0x40] sm:$0xff] %vm3087_vm15, %v3056_v14  ;;  %v4534_v14 = vsel %vm3684_vm7, %v4532_v6, %v4533_v10  ;;  %v12205_v6 = vld [vmem:[%s12720_s10 + $0x3f0] sm:$0xff]  }
 0x165   : > { %v2596_v18 = vpop.permute.xlu1 %2595  ;;  %4287 = vrot.lane.b32.xlu0 %v4246_v55, %s12651_s12 }
 0x166   : > { %2633 = vst.msk [vmem:[#allocation2 + $0x58] sm:$0xff] %vm2621_vm13, %v2596_v18  ;;  %v12190_v18 = vld [vmem:[%s12720_s10 + $0xcc] ss:$0 sps:$4 sm:$0x77]  }
 0x167   : > { %v2594_v25 = vpop.permute.xlu0 %2593  ;;  %7304 = vrot.lane.b32.xlu1 %v12179_v51, %s12652_s13  ;;  %v3689_v23 = vrot.slane %v12190_v18, 3  ;;  %v12200_v51 = vld [vmem:[%s12720_s10 + $0x224] ss:$0 sps:$4 sm:$0x11]   ;;  %v12210_v18 = vld [vmem:[%s12720_s10 + $0x3d4] sm:$0xf8]  }
 0x168   : > { %2632 = vst.msk [vmem:[#allocation2 + $0x50] sm:$0xff] %vm2621_vm13, %v2594_v25  ;;  %v7548_v55 = vrot.slane %v12200_v51, 1  ;;  %v12228_v51 = vld [vmem:[%s15681_s3 + $0x8] sm:$0xff]  }
 0x169   : > { %v2885_v32 = vpop.permute.xlu1 %2884  ;;  %v3113_v58 = vld [vmem:[#allocation2 + $0x48] sm:$0xff]  ;;  %7130 = vrot.lane.b32.xlu0 %v7085_v63, %s12651_s12  ;;  %v3690_v28 = vsel %vm3684_vm7, %v3688_v22, %v3689_v23  ;;  %v12203_v63 = vld [vmem:[%s12720_s10 + $0x290] sm:$0xf8]   ;;  %v12211_v22 = vld [vmem:[%s12720_s10 + $0x3dc] ss:$0 sps:$4 sm:$0x77]  }
 0x16a   : > { %2922 = vst.msk [vmem:[#allocation2 + $0x58] sm:$0xff] %vm2910_vm14, %v2885_v32  ;;  %v3686_v32 = vrot.slane %v12192_v26, 3  ;;  %v9501_v23 = vld [vmem:[%s12720_s10 + $0x204] sm:$0xf]  ;;  %v5397_v26 = vrot.slane %v12210_v18, 3 }
 0x16b   : > { %v2883_v39 = vpop.permute.xlu0 %2882  ;;  %v3112_v46 = vld [vmem:[#allocation2 + $0x40] sm:$0xff]  ;;  %4861 = vrot.lane.b32.xlu1 %v4819_v5, %s12653_s14  ;;  %3750 = vst.msk [vmem:[#allocation2 + $0x8] sm:$0xff] %vm589_vm2, %v3690_v28  ;;  %v5109_v5 = vrot.slane %v12204_v1, 3  ;;  %v9502_v28 = vld [vmem:[%s12720_s10 + $0x208] sm:$0x1] }
 0x16c   : > { %2921 = vst.msk [vmem:[#allocation2 + $0x50] sm:$0xff] %vm2910_vm14, %v2883_v39  ;;  %11687 = vmatprep.mubr.msk.bf16.mxu1 %vm3165_vm10, %v3112_v46  ;;  %v3687_v36 = vsel %vm3684_vm7, %v3685_v29, %v3686_v32  ;;  %v12196_v39 = vld [vmem:[%s12720_s10 + $0x294] ss:$0 sps:$4 sm:$0x11]   ;;  %v423_v29 = vrot.slane %v9501_v23, 5  ;;  %v5398_v32 = vrot.slane %v12211_v22, 3 }
 0x16d   : > { %v3062_v44 = vpop.permute.xlu1 %3061  ;;  %11688 = vmatmul.mubr.msk.bf16.gmra.mrb[32].mxu1 %vm3165_vm10, %v3113_v58  ;;  %4575 = vrot.lane.b32.xlu0 %v4534_v14, %s12652_s13  ;;  %3749 = vst.msk [vmem:[#allocation2] sm:$0xff] %vm589_vm2, %v3687_v36  ;;  %v4821_v43 = vrot.slane %v12196_v39, 1  ;;  %v12202_v58 = vld [vmem:[%s12720_s10 + $0x3c0] ss:$0 sps:$4 sm:$0x77]   ;;  %v426_v33 = vrot.slane %v9502_v28, 5 }
 0x16e   : > { %3099 = vst.msk [vmem:[#allocation2 + $0x58] sm:$0xff] %vm3087_vm15, %v3062_v44  ;;  %v12197_v44 = vld [vmem:[%s12720_s10 + $0x208] sm:$0xfc]   ;;  %v12209_v14 = vld [vmem:[%s12720_s10 + $0x3c8] ss:$0 sps:$4 sm:$0x11]  }
 0x16f   : > { %v3060_v49 = vpop.permute.xlu0 %3059  ;;  %7592 = vrot.lane.b32.xlu1 %v7546_v21, %s12653_s14  ;;  %v4822_v47 = vsel %vm1302_vm0, %v4820_v42, %v4821_v43  ;;  %v7832_v48 = vrot.slane %v12197_v44, 2  ;;  %v5683_v17 = vrot.slane %v12209_v14, 1  ;;  %v425_v37 = vrot.slane %v423_v29, 4  ;;  %v12214_v43 = vld [vmem:[%s12720_s10 + $0x40c] sm:$0xff]   ;;  %v12242_v22 = vld [vmem:[%s15681_s3 + $0x18] sm:$0xff]  }
 0x170   : > { %3098 = vst.msk [vmem:[#allocation2 + $0x50] sm:$0xff] %vm3087_vm15, %v3060_v49  ;;  %v12199_v49 = vld [vmem:[%s12720_s10 + $0x21c] sm:$0xfe]   ;;  %v430_v39 = vrot.slane %v9504_v34, 5 }
 0x171   : > { %v3992_v54 = vpop.permute.xlu1 %3991  ;;  %7306 = vrot.lane.b32.xlu0 %v12188_v16, %s12652_s13  ;;  %v7547_v53 = vrot.slane %v12199_v49, 1  ;;  %v427_v44 = vsel %vm13327_vm12, %v425_v37, %v426_v33  ;;  %v12220_v33 = vld [vmem:[%s12720_s10 + $0x408] ss:$0 sps:$4 sm:$0x33]  }
 0x172   : > { %4038 = vst.msk [vmem:[#allocation2 + $0x8] sm:$0xff] %vm1399_vm3, %v3992_v54  ;;  %v7834_v54 = vsel %vm1045_vm1, %v7832_v48, %v7833_v50  ;;  %v431_v45 = vsel %vm13327_vm12, %v9549_v38, %v430_v39  ;;  %v12213_v48 = vld [vmem:[%s12720_s10 + $0x400] ss:$0 sps:$4 sm:$0x11]   ;;  %v8586_v38 = vrot.slane %v12220_v33, 2 }
 0x173   : > { %v3990_v62 = vpop.permute.xlu0 %3989  ;;  %5149 = vrot.lane.b32.xlu1 %v5107_v41, %s12654_s15  ;;  %v7549_v60 = vsel %vm1302_vm0, %v7547_v53, %v7548_v55  ;;  %v5399_v41 = vsel %vm3684_vm7, %v5397_v26, %v5398_v32  ;;  %v12219_v32 = vld [vmem:[%s12720_s10 + $0x400] sm:$0xfc]  }
 0x174   : > { %4037 = vst.msk [vmem:[#allocation2] sm:$0xff] %vm1399_vm3, %v3990_v62  ;;  %v5395_v62 = vrot.slane %v12202_v58, 3  ;;  %v12215_v58 = vld [vmem:[%s12720_s10 + $0x3c4] sm:$0xf8]   ;;  %v8585_v37 = vrot.slane %v12219_v32, 2 }
 0x175   : > { %v4280_v3 = vpop.permute.xlu1 %4279  ;;  %v3115_v15 = vld [vmem:[#allocation2 + $0x58] sm:$0xff]  ;;  %4863 = vrot.lane.b32.xlu0 %v4822_v47, %s12653_s14  ;;  %v12340_v32 = vld [vmem:[%s15682_s4] sm:$0xff]  }
 0x176   : > { %4326 = vst.msk [vmem:[#allocation2 + $0x8] sm:$0xff] %vm1576_vm4, %v4280_v3  ;;  %v5396_v2 = vsel %vm3684_vm7, %v5394_v61, %v5395_v62  ;;  %v5108_v3 = vrot.slane %v12203_v63, 3  ;;  %v12212_v47 = vld [vmem:[%s12720_s10 + $0x3f8] sm:$0xfe]   ;;  %v12286_v63 = vld [vmem:[%s12720_s10] sm:$0xff]   ;;  %11745 = vmatprep.subr.bf16.mxu1 %v12340_v32 }
 0x177   : > { %v4278_v8 = vpop.permute.xlu0 %4277  ;;  %v3114_v9 = vld [vmem:[#allocation2 + $0x50] sm:$0xff]  ;;  %7880 = vrot.lane.b32.xlu1 %v7834_v54, %s12654_s15  ;;  %v8297_v53 = vrot.slane %v12212_v47, 1  ;;  %v8298_v54 = vrot.slane %v12213_v48, 1  ;;  %v12225_v48 = vld [vmem:[%s12720_s10 + $0x3e8] ss:$0 sps:$4 sm:$0x77]   ;;  %11746 = vmatpush3.bf16.msra.mxu1 %v12340_v32 }
 0x178   : > { %11691 = vmatprep.mubr.msk.bf16.mxu1 %vm3165_vm10, %v3114_v9  ;;  %4325 = vst.msk [vmem:[#allocation2] sm:$0xff] %vm1576_vm4, %v4278_v8  ;;  %v12207_v8 = vld [vmem:[%s12720_s10 + $0x22c] ss:$0 sps:$4 sm:$0x33]   ;;  %v5110_v10 = vsel %vm3684_vm7, %v5108_v3, %v5109_v5  ;;  %v9506_v3 = vld [vmem:[%s12720_s10 + $0x238] sm:$0xe] }
 0x179   : > { %v4568_v13 = vpop.permute.xlu1 %4567  ;;  %11692 = vmatmul.mubr.msk.bf16.gmra.mrb[36].mxu1 %vm3165_vm10, %v3115_v15  ;;  %7594 = vrot.lane.b32.xlu0 %v7549_v60, %s12653_s14  ;;  %v7836_v12 = vrot.slane %v12207_v8, 2  ;;  %v8299_v61 = vsel %vm1302_vm0, %v8297_v53, %v8298_v54  ;;  %v12218_v5 = vld [vmem:[%s12720_s10 + $0x3e4] ss:$0 sps:$4 sm:$0x11]   ;;  %v9550_v7 = vrot.slane %v9506_v3, 9  ;;  %v5974_v53 = vrot.slane %v12225_v48, 3 }
 0x17a   : > { %4614 = vst.msk [vmem:[#allocation2 + $0x8] sm:$0xff] %vm1865_vm5, %v4568_v13  ;;  %v12208_v13 = vld [vmem:[%s12720_s10 + $0x3c0] sm:$0xfe]   ;;  %v5686_v14 = vrot.slane %v12218_v5, 1  ;;  %v12226_v54 = vld [vmem:[%s12720_s10 + $0x158] sm:$0xfe]  }
 0x17b   : > { %v4566_v19 = vpop.permute.xlu0 %4565  ;;  %5438 = vrot.lane.b32.xlu1 %v5396_v2, %s12655_s16  ;;  %v7837_v15 = vsel %vm1045_vm1, %v7835_v11, %v7836_v12  ;;  %v5682_v16 = vrot.slane %v12208_v13, 1  ;;  %v12217_v2 = vld [vmem:[%s12720_s10 + $0x3dc] sm:$0xfe]   ;;  %v9509_v13 = vld [vmem:[%s12720_s10 + $0x254] sm:$0xe] }
 0x17c   : > { %4613 = vst.msk [vmem:[#allocation2] sm:$0xff] %vm1865_vm5, %v4566_v19  ;;  %v9500_v19 = vld [vmem:[%s12720_s10 + $0x200] sm:$0xe]  ;;  %v9508_v11 = vld [vmem:[%s12720_s10 + $0x240] sm:$0x1] }
 0x17d   : > { %v4856_v25 = vpop.permute.xlu1 %4855  ;;  %5151 = vrot.lane.b32.xlu0 %v5110_v10, %s12654_s15  ;;  %v9548_v24 = vrot.slane %v9500_v19, 9  ;;  %v5685_v10 = vrot.slane %v12217_v2, 1  ;;  %v9551_v19 = vrot.slane %v9509_v13, 9  ;;  %v9516_v5 = vld [vmem:[%s12720_s10 + $0x290] sm:$0xf] }
 0x17e   : > { %4902 = vst.msk [vmem:[#allocation2 + $0x8] sm:$0xff] %vm2154_vm6, %v4856_v25  ;;  %v5684_v25 = vsel %vm1302_vm0, %v5682_v16, %v5683_v17  ;;  %v9511_v16 = vld [vmem:[%s12720_s10 + $0x25c] sm:$0x1] }
 0x17f   : > { %v4854_v31 = vpop.permute.xlu0 %4853  ;;  %8057 = vrot.lane.b32.xlu1 %v12205_v6, %s12655_s16  ;;  %v424_v36 = vsel %vm13327_vm12, %v9548_v24, %v423_v29  ;;  %v9507_v6 = vld [vmem:[%s12720_s10 + $0x23c] sm:$0xf]  ;;  %v447_v26 = vrot.slane %v9511_v16, 5  ;;  %v12230_v16 = vld [vmem:[%s12720_s10 + $0x424] ss:$0 sps:$4 sm:$0x33]  }
 0x180   : > { %4901 = vst.msk [vmem:[#allocation2] sm:$0xff] %vm2154_vm6, %v4854_v31  ;;  %v9565_v50 = vcombine.low %v424_v36, %v427_v44  ;;  %v437_v12 = vrot.slane %v9507_v6, 5  ;;  %v12297_v24 = vld [vmem:[%s12720_s10 + $0x1c] sm:$0xff]   ;;  %v8587_v44 = vsel %vm1045_vm1, %v8585_v37, %v8586_v38  ;;  %v9517_v6 = vld [vmem:[%s12720_s10 + $0x294] sm:$0x1] }
 0x181   : > { %v2598_v35 = vpop.permute.xlu1 %2597  ;;  %7882 = vrot.lane.b32.xlu0 %v7837_v15, %s12654_s15  ;;  %v9510_v15 = vld [vmem:[%s12720_s10 + $0x258] sm:$0xf] }
 0x182   : > { %2634 = vst.msk [vmem:[#allocation2 + $0x60] sm:$0xff] %vm2621_vm13, %v2598_v35  ;;  %v9505_v35 = vld [vmem:[%s12720_s10 + $0x224] sm:$0x1]  ;;  %11629 = vmatprep.mubr.msk.bf16.mxu0 %vm589_vm2, %v9565_v50  ;;  %v439_v18 = vrot.slane %v437_v12, 4 }
 0x183   : > { %v5142_v40 = vpop.permute.xlu0 %5141  ;;  %5726 = vrot.lane.b32.xlu1 %v5684_v25, %s12656_s17  ;;  %v433_v42 = vrot.slane %v9505_v35, 5  ;;  %v5687_v25 = vsel %vm1302_vm0, %v5685_v10, %v5686_v14  ;;  %v461_v10 = vrot.slane %v9517_v6, 5 }
 0x184   : > { %5189 = vst.msk [vmem:[#allocation2] sm:$0xff] %vm2331_vm8, %v5142_v40 }
 0x185   : > { %v5431_v46 = vpop.permute.xlu1 %5430  ;;  %5440 = vrot.lane.b32.xlu0 %v5399_v41, %s12655_s16  ;;  %v12222_v41 = vld [vmem:[%s12720_s10 + $0x41c] ss:$0 sps:$4 sm:$0x11]  }
 0x186   : > { %5478 = vst.msk [vmem:[#allocation2] sm:$0xff] %vm2621_vm13, %v5431_v46  ;;  %v432_v46 = vrot.slane %v430_v39, 4  ;;  %v12221_v39 = vld [vmem:[%s12720_s10 + $0x414] sm:$0xfe]   ;;  %v8301_v47 = vrot.slane %v12222_v41, 1 }
 0x187   : > { %v5144_v52 = vpop.permute.xlu0 %5143  ;;  %8345 = vrot.lane.b32.xlu1 %v8299_v61, %s12656_s17  ;;  %v3959_v61 = vrot.slane %v12226_v54, 1  ;;  %v12237_v41 = vld [vmem:[%s12720_s10 + $0x164] ss:$0 sps:$4 sm:$0x77]  }
 0x188   : > { %5190 = vst.msk [vmem:[#allocation2 + $0x8] sm:$0xff] %vm2331_vm8, %v5144_v52  ;;  %v434_v52 = vsel %vm13327_vm12, %v432_v46, %v433_v42  ;;  %v12224_v46 = vld [vmem:[%s12720_s10 + $0x3e0] sm:$0xf8]   ;;  %v4248_v48 = vrot.slane %v12237_v41, 3 }
 0x189   : > { %v2887_v59 = vpop.permute.xlu1 %2886  ;;  %v9566_v56 = vcombine.low %v431_v45, %v434_v52  ;;  %8059 = vrot.lane.b32.xlu0 %v12214_v43, %s12655_s16  ;;  %v8300_v45 = vrot.slane %v12221_v39, 1  ;;  %v5973_v50 = vrot.slane %v12224_v46, 3  ;;  %v12251_v41 = vld [vmem:[%s12720_s10 + $0x180] ss:$0 sps:$4 sm:$0x77]  }
 0x18a   : > { %2923 = vst.msk [vmem:[#allocation2 + $0x60] sm:$0xff] %vm2910_vm14, %v2887_v59  ;;  %v12216_v59 = vld [vmem:[%s12720_s10 + $0x3cc] ss:$0 sps:$4 sm:$0x77]  }
 0x18b   : > { %v2600_v0 = vpop.permute.xlu0 %2599  ;;  %11630 = vmatmul.mubr.msk.bf16.vlgmr.msra.gmra.mrb[0].mxu0 %vm589_vm2, %v9566_v56  ;;  %v5971_v1 = vrot.slane %v12216_v59, 3  ;;  %v8302_v52 = vsel %vm1302_vm0, %v8300_v45, %v8301_v47  ;;  %v9512_v56 = vld [vmem:[%s12720_s10 + $0x270] sm:$0xe]  ;;  %v9514_v59 = vld [vmem:[%s12720_s10 + $0x278] sm:$0x1]  ;;  %v12344_v45 = vld [vmem:[%s15682_s4 + $0x8] sm:$0xff]  }
 0x18c   : > { %2635 = vst.msk [vmem:[#allocation2 + $0x68] sm:$0xff] %vm2621_vm13, %v2600_v0  ;;  %v5970_v0 = vrot.slane %v12215_v58, 3  ;;  %11704 = vmatpush3.bf16.msra.mxu0 %v13509_v27  ;;  %v438_v27 = vsel %vm13327_vm12, %v9550_v7, %v437_v12  ;;  %v9513_v58 = vld [vmem:[%s12720_s10 + $0x274] sm:$0xf]  ;;  %11747 = vmatprep.subr.bf16.mxu1 %v12344_v45 }
 0x18d   : > { %v5719_v4 = vpop.permute.xlu1 %5718  ;;  %11705 = vmatprep.subr.bf16.mxu0 %v12228_v51  ;;  %5728 = vrot.lane.b32.xlu0 %v5687_v25, %s12656_s17  ;;  %v451_v3 = vrot.slane %v9513_v58, 5  ;;  %v12240_v58 = vld [vmem:[%s12720_s10 + $0xfc] sm:$0xf8]  }
 0x18e   : > { %5766 = vst.msk [vmem:[#allocation2] sm:$0xff] %vm2910_vm14, %v5719_v4  ;;  %v12235_v4 = vld [vmem:[%s15681_s3 + $0x10] sm:$0xff]   ;;  %11748 = vmatpush3.bf16.msra.mxu1 %v12344_v45 }
 0x18f   : > { %v5433_v9 = vpop.permute.xlu0 %5432  ;;  %v453_v12 = vrot.slane %v451_v3, 4 }
 0x190   : > { %5479 = vst.msk [vmem:[#allocation2 + $0x8] sm:$0xff] %vm2621_vm13, %v5433_v9  ;;  %v5972_v9 = vsel %vm3684_vm7, %v5970_v0, %v5971_v1  ;;  %11706 = vmatpush3.bf16.msra.mxu0 %v12228_v51  ;;  %v9552_v0 = vrot.slane %v9512_v56, 9  ;;  %v9515_v1 = vld [vmem:[%s12720_s10 + $0x28c] sm:$0xe] }
 0x191   : > { %v3064_v57 = vpop.permute.xlu1 %3063  ;;  %6014 = vrot.lane.b32.xlu1 %v5972_v9, %s12657_s18  ;;  %11707 = vmatprep.subr.bf16.mxu0 %v12235_v4  ;;  %v458_v9 = vrot.slane %v9516_v5, 5 }
 0x192   : > { %3100 = vst.msk [vmem:[#allocation2 + $0x60] sm:$0xff] %vm3087_vm15, %v3064_v57  ;;  %v440_v57 = vrot.slane %v9508_v11, 5  ;;  %8347 = vrot.lane.b32.xlu0 %v8302_v52, %s12656_s17  ;;  %v452_v11 = vsel %vm13327_vm12, %v9552_v0, %v451_v3  ;;  %v12239_v52 = vld [vmem:[%s12720_s10 + $0x17c] ss:$0 sps:$4 sm:$0x11]   ;;  %v3694_v0 = vrot.slane %v12240_v58, 3 }
 0x193   : > { %v2889_v21 = vpop.permute.xlu0 %2888  ;;  %v3963_v56 = vrot.slane %v12239_v52, 1  ;;  %v12254_v52 = vld [vmem:[%s12720_s10 + $0x6c] ss:$0 sps:$4 sm:$0x33]  }
 0x194   : > { %2924 = vst.msk [vmem:[#allocation2 + $0x68] sm:$0xff] %vm2910_vm14, %v2889_v21  ;;  %v444_v21 = vrot.slane %v9510_v15, 5  ;;  %v441_v29 = vsel %vm13327_vm12, %v439_v18, %v440_v57  ;;  %11708 = vmatpush3.bf16.msra.mxu0 %v12235_v4  ;;  %v454_v4 = vrot.slane %v9514_v59, 5  ;;  %v460_v57 = vrot.slane %v458_v9, 4  ;;  %v12229_v15 = vld [vmem:[%s12720_s10 + $0x41c] sm:$0xfc]  }
 0x195   : > { %v6007_v31 = vpop.permute.xlu1 %6006  ;;  %v9567_v35 = vcombine.low %v438_v27, %v441_v29  ;;  %11709 = vmatprep.subr.bf16.mxu0 %v12242_v22  ;;  %8633 = vrot.lane.b32.xlu1 %v8587_v44, %s12657_s18  ;;  %v9518_v59 = vld [vmem:[%s12720_s10 + $0x2a8] sm:$0xe]  ;;  %v7090_v58 = vrot.slane %v12254_v52, 2 }
 0x196   : > { %6054 = vst.msk [vmem:[#allocation2] sm:$0xff] %vm3087_vm15, %v6007_v31  ;;  %v445_v30 = vsel %vm13327_vm12, %v9551_v19, %v444_v21  ;;  %v446_v31 = vrot.slane %v444_v21, 4  ;;  %v455_v27 = vsel %vm13327_vm12, %v453_v12, %v454_v4  ;;  %v462_v19 = vsel %vm13327_vm12, %v460_v57, %v461_v10  ;;  %v9521_v4 = vld [vmem:[%s12720_s10 + $0x2c4] sm:$0xe]  ;;  %v12351_v12 = vld [vmem:[%s15682_s4 + $0x10] sm:$0xff]  }
 0x197   : > { %v5721_v40 = vpop.permute.xlu0 %5720  ;;  %11633 = vmatprep.mubr.msk.bf16.mxu0 %vm589_vm2, %v9567_v35  ;;  %v9569_v18 = vcombine.low %v452_v11, %v455_v27  ;;  %v8588_v21 = vrot.slane %v12229_v15, 2  ;;  %v12234_v35 = vld [vmem:[%s12720_s10 + $0xe8] ss:$0 sps:$4 sm:$0x77]   ;;  %v9555_v10 = vrot.slane %v9521_v4, 9  ;;  %11749 = vmatprep.subr.bf16.mxu1 %v12351_v12 }
 0x198   : > { %5767 = vst.msk [vmem:[#allocation2 + $0x8] sm:$0xff] %vm2910_vm14, %v5721_v40  ;;  %v448_v36 = vsel %vm13327_vm12, %v446_v31, %v447_v26  ;;  %11710 = vmatpush3.bf16.msra.mxu0 %v12242_v22  ;;  %v8589_v22 = vrot.slane %v12230_v16, 2  ;;  %v12233_v31 = vld [vmem:[%s12720_s10 + $0xe0] sm:$0xf8]   ;;  %v3692_v39 = vrot.slane %v12234_v35, 3  ;;  %11750 = vmatpush3.bf16.msra.mxu1 %v12351_v12  ;;  %v6180_v35 = vsel %vm638_vm9, %v12247_v20, 0 }
 0x199   : > { %v13694_v49 = vpop.permute.xlu1 %3993  ;;  %v3116_v60 = vld [vmem:[#allocation2 + $0x60] sm:$0xff]  ;;  %v9568_v40 = vcombine.low %v445_v30, %v448_v36  ;;  %v3691_v37 = vrot.slane %v12233_v31, 3  ;;  %11832 = vmatprep.subr.msk.bf16.mxu0 %vm638_vm9, %v12247_v20 }
 0x19a   : > { %11695 = vmatprep.mubr.msk.bf16.mxu1 %vm3165_vm10, %v3116_v60  ;;  %v5975_v60 = vsel %vm3684_vm7, %v5973_v50, %v5974_v53  ;;  %v8590_v29 = vsel %vm1045_vm1, %v8588_v21, %v8589_v22  ;;  %v12238_v50 = vld [vmem:[%s12720_s10 + $0x174] sm:$0xfe]   ;;  %v12244_v21 = vld [vmem:[%s12720_s10 + $0x50] ss:$0 sps:$4 sm:$0x33]  }
 0x19b   : > { %v3066_v55 = vpop.permute.xlu0 %3065  ;;  %11634 = vmatmul.mubr.msk.bf16.gmra.mrb[4].mxu0 %vm589_vm2, %v9568_v40  ;;  %6016 = vrot.lane.b32.xlu1 %v5975_v60, %s12657_s18  ;;  %v12236_v40 = vld [vmem:[%s12720_s10 + $0x15c] sm:$0xf8]   ;;  %v3693_v46 = vsel %vm3684_vm7, %v3691_v37, %v3692_v39  ;;  %v12241_v60 = vld [vmem:[%s12720_s10 + $0x104] ss:$0 sps:$4 sm:$0x77]  }
 0x19c   : > { %3101 = vst.msk [vmem:[#allocation2 + $0x68] sm:$0xff] %vm3087_vm15, %v3066_v55  ;;  %v12227_v55 = vld [vmem:[%s12720_s10 + $0x160] ss:$0 sps:$4 sm:$0x11]   ;;  %11637 = vmatprep.mubr.msk.bf16.mxu0 %vm589_vm2, %v9569_v18  ;;  %v4247_v47 = vrot.slane %v12236_v40, 3  ;;  %11712 = vmatpush3.bf16.msra.mxu0 %v6180_v35 }
 0x19d   : > { %v13708_v62 = vpop.permute.xlu1 %3995  ;;  %v13735_v23 = vld [vmem:[#allocation2] sm:$0xff]  ;;  %3751 = vst.msk [vmem:[#allocation2 + $0x10] sm:$0xff] %vm589_vm2, %v3693_v46  ;;  %v12250_v40 = vld [vmem:[%s12720_s10 + $0x178] sm:$0xf8]  }
 0x19e   : > { %6600 = vst.msk [vmem:[#allocation2] sm:$0xff] %vm589_vm2, %v12286_v63  ;;  %v3960_v63 = vrot.slane %v12227_v55, 1  ;;  %v4249_v54 = vsel %vm3684_vm7, %v4247_v47, %v4248_v48  ;;  %v3962_v55 = vrot.slane %v12238_v50, 1  ;;  %v4250_v46 = vrot.slane %v12250_v40, 3  ;;  %v12252_v48 = vld [vmem:[%s12720_s10 + $0x230] sm:$0xff]  }
 0x19f   : > { %v6009_v8 = vpop.permute.xlu0 %6008  ;;  %8635 = vrot.lane.b32.xlu1 %v8590_v29, %s12657_s18  ;;  %4039 = vst.msk [vmem:[#allocation2 + $0x10] sm:$0xff] %vm1399_vm3, %v13694_v49  ;;  %v9519_v49 = vld [vmem:[%s12720_s10 + $0x2ac] sm:$0xf]  ;;  %v12246_v29 = vld [vmem:[%s12720_s10 + $0x64] ss:$0 sps:$4 sm:$0x11]  }
 0x1a0   : > { %6055 = vst.msk [vmem:[#allocation2 + $0x8] sm:$0xff] %vm3087_vm15, %v6009_v8  ;;  %v3961_v7 = vsel %vm1302_vm0, %v3959_v61, %v3960_v63  ;;  %v9553_v8 = vrot.slane %v9515_v1, 9  ;;  %v9554_v61 = vrot.slane %v9518_v59, 9  ;;  %v3964_v63 = vsel %vm1302_vm0, %v3962_v55, %v3963_v56  ;;  %v9520_v1 = vld [vmem:[%s12720_s10 + $0x2b0] sm:$0x1]  ;;  %v12355_v55 = vld [vmem:[%s12720_s10 + $0x38] sm:$0xff]  }
 0x1a1   : > { %v13727_v17 = vpop.permute.xlu1 %4283  ;;  %4001 = vrot.lane.b32.xlu0 %v3961_v7, %s12650_s11  ;;  %v465_v3 = vrot.slane %v9519_v49, 5  ;;  %v468_v6 = vrot.slane %v9520_v1, 5  ;;  %v9522_v7 = vld [vmem:[%s12720_s10 + $0x2c8] sm:$0xf]  ;;  %v4251_v47 = vrot.slane %v12251_v41, 3 }
 0x1a2   : > { %v459_v14 = vsel %vm13327_vm12, %v9553_v8, %v458_v9  ;;  %v9523_v8 = vld [vmem:[%s12720_s10 + $0x2cc] sm:$0x1]  ;;  %v472_v11 = vrot.slane %v9522_v7, 5  ;;  %v12253_v50 = vld [vmem:[%s12720_s10 + $0x64] sm:$0xfc]  }
 0x1a3   : > { %v3117_v28 = vld [vmem:[#allocation2 + $0x68] sm:$0xff]  ;;  %v13747_v34 = vpop.permute.xlu0 %4281  ;;  %v9570_v26 = vcombine.low %v459_v14, %v462_v19  ;;  %4289 = vrot.lane.b32.xlu1 %v4249_v54, %s12651_s12  ;;  %v467_v9 = vrot.slane %v465_v3, 4  ;;  %v475_v14 = vrot.slane %v9523_v8, 5  ;;  %v4252_v54 = vsel %vm3684_vm7, %v4250_v46, %v4251_v47  ;;  %v12256_v49 = vld [vmem:[%s12720_s10 + $0x2b0] ss:$0 sps:$4 sm:$0x11]  }
 0x1a4   : > { %11696 = vmatmul.mubr.msk.bf16.gmra.mrb[40].mxu1 %vm3165_vm10, %v3117_v28  ;;  %v12232_v28 = vld [vmem:[%s12720_s10 + $0x48] ss:$0 sps:$4 sm:$0x11]   ;;  %4327 = vst.msk [vmem:[#allocation2 + $0x10] sm:$0xff] %vm1576_vm4, %v13747_v34  ;;  %v3695_v34 = vrot.slane %v12241_v60, 3  ;;  %v473_v16 = vsel %vm13327_vm12, %v9555_v10, %v472_v11  ;;  %v474_v27 = vrot.slane %v472_v11, 4 }
 0x1a5   : > { %v13755_v42 = vpop.permute.xlu1 %4571  ;;  %11638 = vmatmul.mubr.msk.bf16.gmra.mrb[8].mxu0 %vm589_vm2, %v9570_v26  ;;  %v6799_v33 = vrot.slane %v12232_v28, 1  ;;  %v469_v15 = vsel %vm13327_vm12, %v467_v9, %v468_v6  ;;  %v12243_v19 = vld [vmem:[%s12720_s10 + $0x48] sm:$0xfc]   ;;  %v7087_v28 = vrot.slane %v12244_v21, 2  ;;  %v7089_v56 = vrot.slane %v12253_v50, 2 }
 0x1a6   : > { %v7086_v26 = vrot.slane %v12243_v19, 2  ;;  %v12255_v59 = vld [vmem:[%s12720_s10 + $0x2a8] sm:$0xfe]   ;;  %v12258_v4 = vld [vmem:[%s12720_s10 + $0x2c4] ss:$0 sps:$4 sm:$0x77]  }
 0x1a7   : > { %v13757_v43 = vld [vmem:[#allocation2 + $0x8] sm:$0xff]  ;;  %v13765_v51 = vpop.permute.xlu0 %4569  ;;  %v4539_v8 = vrot.slane %v12258_v4, 3  ;;  %v12260_v9 = vld [vmem:[%s12720_s10 + $0x240] ss:$0 sps:$4 sm:$0x11]  }
 0x1a8   : > { %6601 = vst.msk [vmem:[#allocation2 + $0x8] sm:$0xff] %vm589_vm2, %v12297_v24  ;;  %v12231_v24 = vld [vmem:[%s12720_s10 + $0x40] sm:$0xfe]   ;;  %v7088_v31 = vsel %vm1045_vm1, %v7086_v26, %v7087_v28  ;;  %v12269_v35 = vld [vmem:[%s12720_s10 + $0x25c] ss:$0 sps:$4 sm:$0x11]  }
 0x1a9   : > { %v13776_v2 = vpop.permute.xlu1 %4859  ;;  %v6798_v30 = vrot.slane %v12231_v24, 1  ;;  %4615 = vst.msk [vmem:[#allocation2 + $0x10] sm:$0xff] %vm1865_vm5, %v13765_v51  ;;  %v466_v51 = vsel %vm13327_vm12, %v9554_v61, %v465_v3  ;;  %v476_v24 = vsel %vm13327_vm12, %v474_v27, %v475_v14  ;;  %7132 = vrot.lane.b32.xlu1 %v7088_v31, %s12651_s12  ;;  %v4824_v3 = vrot.slane %v12256_v49, 1  ;;  %v12261_v14 = vld [vmem:[%s12720_s10 + $0x24c] sm:$0xff]  }
 0x1aa   : > { %v9571_v18 = vcombine.low %v466_v51, %v469_v15  ;;  %v12259_v51 = vld [vmem:[%s12720_s10 + $0x238] sm:$0xfe]   ;;  %v12263_v15 = vld [vmem:[%s12720_s10 + $0x2b4] ss:$0 sps:$4 sm:$0x77]  }
 0x1ab   : > { %v4858_v13 = vpop.permute.xlu0 %4857  ;;  %v6800_v38 = vsel %vm1302_vm0, %v6798_v30, %v6799_v33  ;;  %v12356_v30 = vld [vmem:[%s15682_s4 + $0x18] sm:$0xff]   ;;  %v6802_v33 = vrot.slane %v12246_v29, 1  ;;  %v7550_v12 = vrot.slane %v12259_v51, 1  ;;  %v5112_v21 = vrot.slane %v12263_v15, 3  ;;  %v12266_v29 = vld [vmem:[%s12720_s10 + $0x240] sm:$0xfc]  }
 0x1ac   : > { %6844 = vrot.lane.b32.xlu0 %v6800_v38, %s12650_s11  ;;  %4903 = vst.msk [vmem:[#allocation2 + $0x10] sm:$0xff] %vm2154_vm6, %v4858_v13  ;;  %v3696_v13 = vsel %vm3684_vm7, %v3694_v0, %v3695_v34  ;;  %11641 = vmatprep.mubr.msk.bf16.mxu0 %vm589_vm2, %v9571_v18  ;;  %v12257_v0 = vld [vmem:[%s12720_s10 + $0x2bc] sm:$0xf8]   ;;  %v12368_v18 = vld [vmem:[%s12720_s10 + $0x54] sm:$0xff]   ;;  %v7838_v31 = vrot.slane %v12266_v29, 2 }
 0x1ad   : > { %v2602_v25 = vpop.permute.xlu1 %2601  ;;  %3752 = vst.msk [vmem:[#allocation2 + $0x18] sm:$0xff] %vm589_vm2, %v3696_v13  ;;  %11751 = vmatprep.subr.bf16.mxu1 %v12356_v30  ;;  %v7551_v13 = vrot.slane %v12260_v9, 1  ;;  %v12271_v41 = vld [vmem:[%s12720_s10 + $0x3f8] ss:$0 sps:$4 sm:$0x77]  }
 0x1ae   : > { %2636 = vst.msk [vmem:[#allocation2 + $0x70] sm:$0xff] %vm2621_vm13, %v2602_v25  ;;  %v9572_v25 = vcombine.low %v473_v16, %v476_v24  ;;  %11752 = vmatpush3.bf16.msra.mxu1 %v12356_v30  ;;  %v12272_v46 = vld [vmem:[%s12720_s10 + $0x2c8] sm:$0xf8]   ;;  %v5401_v47 = vrot.slane %v12271_v41, 3 }
 0x1af   : > { %v5146_v36 = vpop.permute.xlu0 %5145  ;;  %4040 = vst.msk [vmem:[#allocation2 + $0x18] sm:$0xff] %vm1399_vm3, %v13708_v62  ;;  %v12245_v62 = vld [vmem:[%s12720_s10 + $0x5c] sm:$0xfe]   ;;  %v7552_v27 = vsel %vm1302_vm0, %v7550_v12, %v7551_v13  ;;  %v5114_v52 = vrot.slane %v12272_v46, 3  ;;  %v12295_v46 = vld [vmem:[%s12720_s10 + $0x44c] sm:$0xfe]  }
 0x1b0   : > { %4003 = vrot.lane.b32.xlu0 %v3964_v63, %s12650_s11  ;;  %5191 = vst.msk [vmem:[#allocation2 + $0x10] sm:$0xff] %vm2331_vm8, %v5146_v36  ;;  %11642 = vmatmul.mubr.msk.bf16.gmra.mrb[12].mxu0 %vm589_vm2, %v9572_v25  ;;  %v6801_v32 = vrot.slane %v12245_v62, 1  ;;  %v12249_v36 = vld [vmem:[%s12720_s10 + $0x2a8] ss:$0 sps:$4 sm:$0x77]   ;;  %v7091_v63 = vsel %vm1045_vm1, %v7089_v56, %v7090_v58 }
 0x1b1   : > { %v5435_v44 = vpop.permute.xlu1 %5434  ;;  %4328 = vst.msk [vmem:[#allocation2 + $0x18] sm:$0xff] %vm1576_vm4, %v13727_v17  ;;  %11713 = vmatprep.mubr.msk.bf16.mxu0 %vm3165_vm10, %v13735_v23  ;;  %v4536_v39 = vrot.slane %v12249_v36, 3  ;;  %v12265_v25 = vld [vmem:[%s12720_s10 + $0x2cc] ss:$0 sps:$4 sm:$0x11]  }
 0x1b2   : > { %5480 = vst.msk [vmem:[#allocation2 + $0x10] sm:$0xff] %vm2621_vm13, %v5435_v44  ;;  %v6803_v37 = vsel %vm1302_vm0, %v6801_v32, %v6802_v33  ;;  %v4827_v20 = vrot.slane %v12265_v25, 1  ;;  %v12274_v56 = vld [vmem:[%s12720_s10 + $0x428] sm:$0xff]   ;;  %v12275_v58 = vld [vmem:[%s12720_s10 + $0x25c] sm:$0xfc]  }
 0x1b3   : > { %v13818_v53 = vpop.permute.xlu0 %5147  ;;  %4616 = vst.msk [vmem:[#allocation2 + $0x18] sm:$0xff] %vm1865_vm5, %v13755_v42  ;;  %v12282_v12 = vld [vmem:[%s12720_s10 + $0x120] ss:$0 sps:$4 sm:$0x77]  }
 0x1b4   : > { %4904 = vst.msk [vmem:[#allocation2 + $0x18] sm:$0xff] %vm2154_vm6, %v13776_v2  ;;  %v12248_v2 = vld [vmem:[%s12720_s10 + $0x2a0] sm:$0xf8]   ;;  %6846 = vrot.lane.b32.xlu0 %v6803_v37, %s12650_s11  ;;  %v3698_v15 = vrot.slane %v12282_v12, 3 }
 0x1b5   : > { %v2891_v5 = vpop.permute.xlu1 %2890  ;;  %5192 = vst.msk [vmem:[#allocation2 + $0x18] sm:$0xff] %vm2331_vm8, %v13818_v53  ;;  %v4535_v38 = vrot.slane %v12248_v2, 3  ;;  %v12268_v2 = vld [vmem:[%s12720_s10 + $0x254] sm:$0xfe]  }
 0x1b6   : > { %2925 = vst.msk [vmem:[#allocation2 + $0x70] sm:$0xff] %vm2910_vm14, %v2891_v5  ;;  %v4538_v5 = vrot.slane %v12257_v0, 3  ;;  %v12277_v0 = vld [vmem:[%s12720_s10 + $0x3f8] sm:$0xfe]  }
 0x1b7   : > { %v2604_v57 = vpop.permute.xlu0 %2603  ;;  %v4537_v45 = vsel %vm3684_vm7, %v4535_v38, %v4536_v39  ;;  %v7553_v38 = vrot.slane %v12268_v2, 1  ;;  %v12270_v39 = vld [vmem:[%s12720_s10 + $0x3f0] sm:$0xf8]   ;;  %v12288_v29 = vld [vmem:[%s12720_s10 + $0x404] ss:$0 sps:$4 sm:$0x77]  }
 0x1b8   : > { %2637 = vst.msk [vmem:[#allocation2 + $0x78] sm:$0xff] %vm2621_vm13, %v2604_v57  ;;  %4577 = vrot.lane.b32.xlu1 %v4537_v45, %s12652_s13  ;;  %11714 = vmatmul.mubr.msk.bf16.vlgmr.msra.gmra.mrb[16].mxu0 %vm3165_vm10, %v13757_v43  ;;  %v4823_v43 = vrot.slane %v12255_v59, 1  ;;  %v4540_v11 = vsel %vm3684_vm7, %v4538_v5, %v4539_v8  ;;  %v12262_v57 = vld [vmem:[%s12720_s10 + $0x2ac] sm:$0xf8]   ;;  %v5400_v45 = vrot.slane %v12270_v39, 3  ;;  %v5688_v5 = vrot.slane %v12277_v0, 1 }
 0x1b9   : > { %v5723_v22 = vpop.permute.xlu1 %5722  ;;  %4291 = vrot.lane.b32.xlu0 %v4252_v54, %s12651_s12  ;;  %v5111_v19 = vrot.slane %v12262_v57, 3  ;;  %v12276_v59 = vld [vmem:[%s12720_s10 + $0x264] ss:$0 sps:$4 sm:$0x33]   ;;  %v12291_v2 = vld [vmem:[%s12720_s10 + $0x134] sm:$0xf8]  }
 0x1ba   : > { %5768 = vst.msk [vmem:[#allocation2 + $0x10] sm:$0xff] %vm2910_vm14, %v5723_v22  ;;  %v4825_v7 = vsel %vm1302_vm0, %v4823_v43, %v4824_v3  ;;  %v12264_v22 = vld [vmem:[%s12720_s10 + $0x2c4] sm:$0xfe]   ;;  %v5402_v54 = vsel %vm3684_vm7, %v5400_v45, %v5401_v47  ;;  %v7842_v43 = vrot.slane %v12276_v59, 2 }
 0x1bb   : > { %v5437_v17 = vpop.permute.xlu0 %5436  ;;  %v5113_v28 = vsel %vm3684_vm7, %v5111_v19, %v5112_v21  ;;  %v4826_v62 = vrot.slane %v12264_v22, 1  ;;  %v12278_v3 = vld [vmem:[%s12720_s10 + $0x400] ss:$0 sps:$4 sm:$0x11]   ;;  %v12285_v21 = vld [vmem:[%s12720_s10 + $0x444] sm:$0xff]  }
 0x1bc   : > { %5481 = vst.msk [vmem:[#allocation2 + $0x18] sm:$0xff] %vm2621_vm13, %v5437_v17  ;;  %7308 = vrot.lane.b32.xlu1 %v12252_v48, %s12652_s13  ;;  %v12267_v17 = vld [vmem:[%s12720_s10 + $0x248] ss:$0 sps:$4 sm:$0x33]  }
 0x1bd   : > { %v3068_v42 = vpop.permute.xlu1 %3067  ;;  %7134 = vrot.lane.b32.xlu0 %v7091_v63, %s12651_s12  ;;  %v7839_v33 = vrot.slane %v12267_v17, 2  ;;  %v12273_v48 = vld [vmem:[%s12720_s10 + $0x2d0] ss:$0 sps:$4 sm:$0x77]   ;;  %v7841_v63 = vrot.slane %v12275_v58, 2 }
 0x1be   : > { %3102 = vst.msk [vmem:[#allocation2 + $0x70] sm:$0xff] %vm3087_vm15, %v3068_v42  ;;  %v4828_v42 = vsel %vm1302_vm0, %v4826_v62, %v4827_v20  ;;  %v12284_v19 = vld [vmem:[%s12720_s10 + $0x438] ss:$0 sps:$4 sm:$0x11]  }
 0x1bf   : > { %v2893_v23 = vpop.permute.xlu0 %2892  ;;  %v7840_v37 = vsel %vm1045_vm1, %v7838_v31, %v7839_v33  ;;  %v7843_v4 = vsel %vm1045_vm1, %v7841_v63, %v7842_v43  ;;  %v12289_v17 = vld [vmem:[%s12720_s10 + $0x414] sm:$0xfe]   ;;  %v12290_v31 = vld [vmem:[%s12720_s10 + $0x41c] ss:$0 sps:$4 sm:$0x11]  }
 0x1c0   : > { %2926 = vst.msk [vmem:[#allocation2 + $0x78] sm:$0xff] %vm2910_vm14, %v2893_v23  ;;  %4865 = vrot.lane.b32.xlu1 %v4825_v7, %s12653_s14  ;;  %v7554_v23 = vrot.slane %v12269_v35, 1  ;;  %v12280_v7 = vld [vmem:[%s12720_s10 + $0x414] ss:$0 sps:$4 sm:$0x77]   ;;  %v5692_v33 = vrot.slane %v12290_v31, 1 }
 0x1c1   : > { %v6011_v44 = vpop.permute.xlu1 %6010  ;;  %4579 = vrot.lane.b32.xlu0 %v4540_v11, %s12652_s13  ;;  %v12281_v11 = vld [vmem:[%s12720_s10 + $0x118] sm:$0xf8]  }
 0x1c2   : > { %6056 = vst.msk [vmem:[#allocation2 + $0x10] sm:$0xff] %vm3087_vm15, %v6011_v44  ;;  %v7555_v44 = vsel %vm1302_vm0, %v7553_v38, %v7554_v23  ;;  %v3697_v57 = vrot.slane %v12281_v11, 3  ;;  %v12292_v35 = vld [vmem:[%s12720_s10 + $0x13c] ss:$0 sps:$4 sm:$0x77]  }
 0x1c3   : > { %v5725_v53 = vpop.permute.xlu0 %5724  ;;  %v3701_v38 = vrot.slane %v12292_v35, 3  ;;  %v12293_v23 = vld [vmem:[%s12720_s10 + $0x438] sm:$0xfc]  }
 0x1c4   : > { %5769 = vst.msk [vmem:[#allocation2 + $0x18] sm:$0xff] %vm2910_vm14, %v5725_v53  ;;  %7596 = vrot.lane.b32.xlu1 %v7552_v27, %s12653_s14  ;;  %v12283_v27 = vld [vmem:[%s12720_s10 + $0x430] sm:$0xfe]   ;;  %v3699_v22 = vsel %vm3684_vm7, %v3697_v57, %v3698_v15  ;;  %v8591_v45 = vrot.slane %v12293_v23, 2 }
 0x1c5   : > { %v13905_v60 = vpop.permute.xlu1 %3997  ;;  %v3118_v61 = vld [vmem:[#allocation2 + $0x70] sm:$0xff]  ;;  %7310 = vrot.lane.b32.xlu0 %v12261_v14, %s12652_s13  ;;  %v8303_v25 = vrot.slane %v12283_v27, 1  ;;  %3753 = vst.msk [vmem:[#allocation2 + $0x20] sm:$0xff] %vm589_vm2, %v3699_v22  ;;  %v12305_v57 = vld [vmem:[%s12720_s10 + $0x80] ss:$0 sps:$4 sm:$0x11]  }
 0x1c6   : > { %11699 = vmatprep.mubr.msk.bf16.mxu1 %vm3165_vm10, %v3118_v61  ;;  %4041 = vst.msk [vmem:[#allocation2 + $0x20] sm:$0xff] %vm1399_vm3, %v13905_v60  ;;  %v12307_v22 = vld [vmem:[%s12720_s10 + $0x19c] ss:$0 sps:$4 sm:$0x77]  }
 0x1c7   : > { %v3070_v1 = vpop.permute.xlu0 %3069  ;;  %v12313_v23 = vld [vmem:[%s12720_s10 + $0x9c] ss:$0 sps:$4 sm:$0x11]  }
 0x1c8   : > { %3103 = vst.msk [vmem:[#allocation2 + $0x78] sm:$0xff] %vm3087_vm15, %v3070_v1  ;;  %5153 = vrot.lane.b32.xlu1 %v5113_v28, %s12654_s15  ;;  %v12287_v28 = vld [vmem:[%s12720_s10 + $0x3fc] sm:$0xf8]  }
 0x1c9   : > { %v6841_v34 = vpop.permute.xlu1 %6840  ;;  %v6072_v6 = vld [vmem:[#allocation2 + $0x10] sm:$0xff]  ;;  %4867 = vrot.lane.b32.xlu0 %v4828_v42, %s12653_s14  ;;  %v5976_v20 = vrot.slane %v12287_v28, 3 }
 0x1ca   : > { %6888 = vst.msk [vmem:[#allocation2] sm:$0xff] %vm1399_vm3, %v6841_v34  ;;  %11717 = vmatprep.mubr.msk.bf16.mxu0 %vm3165_vm10, %v6072_v6  ;;  %v12279_v34 = vld [vmem:[%s12720_s10 + $0x40c] sm:$0xf8]   ;;  %v5689_v6 = vrot.slane %v12278_v3, 1 }
 0x1cb   : > { %6602 = vst.msk [vmem:[#allocation2 + $0x10] sm:$0xff] %vm589_vm2, %v12355_v55  ;;  %v6013_v10 = vpop.permute.xlu0 %6012  ;;  %v5115_v55 = vrot.slane %v12273_v48, 3  ;;  %v5403_v51 = vrot.slane %v12279_v34, 3 }
 0x1cc   : > { %6057 = vst.msk [vmem:[#allocation2 + $0x18] sm:$0xff] %vm3087_vm15, %v6013_v10  ;;  %7884 = vrot.lane.b32.xlu1 %v7840_v37, %s12654_s15  ;;  %v5690_v9 = vsel %vm1302_vm0, %v5688_v5, %v5689_v6  ;;  %v5404_v10 = vrot.slane %v12280_v7, 3  ;;  %v3700_v37 = vrot.slane %v12291_v2, 3  ;;  %v12302_v6 = vld [vmem:[%s12720_s10 + $0x454] sm:$0xfc]  }
 0x1cd   : > { %v13928_v16 = vpop.permute.xlu1 %4285  ;;  %7598 = vrot.lane.b32.xlu0 %v7555_v44, %s12653_s14  ;;  %v5116_v49 = vsel %vm3684_vm7, %v5114_v52, %v5115_v55 }
 0x1ce   : > { %v5405_v14 = vsel %vm3684_vm7, %v5403_v51, %v5404_v10  ;;  %4329 = vst.msk [vmem:[#allocation2 + $0x20] sm:$0xff] %vm1576_vm4, %v13928_v16  ;;  %v3702_v44 = vsel %vm3684_vm7, %v3700_v37, %v3701_v38  ;;  %v12312_v38 = vld [vmem:[%s12720_s10 + $0x94] sm:$0xfe]  }
 0x1cf   : > { %v13934_v24 = vpop.permute.xlu0 %3999  ;;  %v3119_v26 = vld [vmem:[#allocation2 + $0x78] sm:$0xff]  ;;  %3754 = vst.msk [vmem:[#allocation2 + $0x28] sm:$0xff] %vm589_vm2, %v3702_v44 }
 0x1d0   : > { %11700 = vmatmul.mubr.msk.bf16.gmra.mrb[44].mxu1 %vm3165_vm10, %v3119_v26  ;;  %5442 = vrot.lane.b32.xlu1 %v5402_v54, %s12655_s16  ;;  %v8304_v26 = vrot.slane %v12284_v19, 1  ;;  %4042 = vst.msk [vmem:[#allocation2 + $0x28] sm:$0xff] %vm1399_vm3, %v13934_v24  ;;  %v8306_v54 = vrot.slane %v12295_v46, 1  ;;  %v12299_v24 = vld [vmem:[%s12720_s10 + $0x420] ss:$0 sps:$4 sm:$0x77]  }
 0x1d1   : > { %v7129_v30 = vpop.permute.xlu1 %7128  ;;  %5155 = vrot.lane.b32.xlu0 %v5116_v49, %s12654_s15  ;;  %v5980_v0 = vrot.slane %v12299_v24, 3  ;;  %v12306_v19 = vld [vmem:[%s12720_s10 + $0x194] sm:$0xf8]  }
 0x1d2   : > { %7176 = vst.msk [vmem:[#allocation2] sm:$0xff] %vm1576_vm4, %v7129_v30  ;;  %v8305_v62 = vsel %vm1302_vm0, %v8303_v25, %v8304_v26  ;;  %v5977_v30 = vrot.slane %v12288_v29, 3  ;;  %v4253_v28 = vrot.slane %v12306_v19, 3  ;;  %v12314_v44 = vld [vmem:[%s12720_s10 + $0x2d8] sm:$0xf8]  }
 0x1d3   : > { %v6073_v32 = vld [vmem:[#allocation2 + $0x18] sm:$0xff]  ;;  %v6843_v36 = vpop.permute.xlu0 %6842 }
 0x1d4   : > { %11718 = vmatmul.mubr.msk.bf16.gmra.mrb[20].mxu0 %vm3165_vm10, %v6073_v32  ;;  %6603 = vst.msk [vmem:[#allocation2 + $0x18] sm:$0xff] %vm589_vm2, %v12368_v18  ;;  %8061 = vrot.lane.b32.xlu1 %v12274_v56, %s12655_s16  ;;  %v5691_v32 = vrot.slane %v12289_v17, 1  ;;  %v5978_v16 = vsel %vm3684_vm7, %v5976_v20, %v5977_v30  ;;  %v4254_v20 = vrot.slane %v12307_v22, 3  ;;  %v12309_v17 = vld [vmem:[%s12720_s10 + $0x1b4] ss:$0 sps:$4 sm:$0x11]  }
 0x1d5   : > { %6889 = vst.msk [vmem:[#allocation2 + $0x8] sm:$0xff] %vm1399_vm3, %v6843_v36  ;;  %v13953_v40 = vpop.permute.xlu1 %4573  ;;  %7886 = vrot.lane.b32.xlu0 %v7843_v4, %s12654_s15  ;;  %v12301_v4 = vld [vmem:[%s12720_s10 + $0x198] ss:$0 sps:$4 sm:$0x11]  }
 0x1d6   : > { %4617 = vst.msk [vmem:[#allocation2 + $0x20] sm:$0xff] %vm1865_vm5, %v13953_v40  ;;  %v5693_v36 = vsel %vm1302_vm0, %v5691_v32, %v5692_v33  ;;  %v12294_v40 = vld [vmem:[%s12720_s10 + $0x440] ss:$0 sps:$4 sm:$0x33]   ;;  %v3966_v7 = vrot.slane %v12301_v4, 1  ;;  %v4255_v32 = vsel %vm3684_vm7, %v4253_v28, %v4254_v20  ;;  %v12327_v20 = vld [vmem:[%s12720_s10 + $0x284] sm:$0xff]  }
 0x1d7   : > { %v13961_v50 = vpop.permute.xlu0 %4287  ;;  %v8592_v52 = vrot.slane %v12294_v40, 2  ;;  %v12311_v33 = vld [vmem:[%s12720_s10 + $0x88] ss:$0 sps:$4 sm:$0x33]   ;;  %v6807_v40 = vrot.slane %v12312_v38, 1 }
 0x1d8   : > { %5730 = vrot.lane.b32.xlu1 %v5690_v9, %s12656_s17  ;;  %4330 = vst.msk [vmem:[#allocation2 + $0x28] sm:$0xff] %vm1576_vm4, %v13961_v50  ;;  %v8594_v9 = vrot.slane %v12302_v6, 2  ;;  %v7093_v37 = vrot.slane %v12311_v33, 2  ;;  %v12317_v24 = vld [vmem:[%s12720_s10 + $0x1b8] ss:$0 sps:$4 sm:$0x77]  }
 0x1d9   : > { %v7305_v53 = vpop.permute.xlu1 %7304  ;;  %5444 = vrot.lane.b32.xlu0 %v5405_v14, %s12655_s16  ;;  %v8593_v58 = vsel %vm1045_vm1, %v8591_v45, %v8592_v52  ;;  %v12304_v14 = vld [vmem:[%s12720_s10 + $0x78] sm:$0xfe]   ;;  %v12315_v52 = vld [vmem:[%s12720_s10 + $0x2e0] ss:$0 sps:$4 sm:$0x77]  }
 0x1da   : > { %7352 = vst.msk [vmem:[#allocation2] sm:$0xff] %vm1865_vm5, %v7305_v53  ;;  %v12296_v53 = vld [vmem:[%s12720_s10 + $0x454] ss:$0 sps:$4 sm:$0x11]   ;;  %v6804_v27 = vrot.slane %v12304_v14, 1 }
 0x1db   : > { %v7131_v61 = vpop.permute.xlu0 %7130  ;;  %v8307_v59 = vrot.slane %v12296_v53, 1  ;;  %v4541_v53 = vrot.slane %v12314_v44, 3  ;;  %v12325_v28 = vld [vmem:[%s12720_s10 + $0x270] sm:$0xfe]   ;;  %v12332_v44 = vld [vmem:[%s12720_s10 + $0x278] sm:$0xfc]  }
 0x1dc   : > { %7177 = vst.msk [vmem:[#allocation2 + $0x8] sm:$0xff] %vm1576_vm4, %v7131_v61  ;;  %8349 = vrot.lane.b32.xlu1 %v8305_v62, %s12656_s17  ;;  %v12298_v61 = vld [vmem:[%s12720_s10 + $0x418] sm:$0xf8]   ;;  %v12308_v62 = vld [vmem:[%s12720_s10 + $0x1ac] sm:$0xfe]  }
 0x1dd   : > { %v4862_v1 = vpop.permute.xlu1 %4861  ;;  %8063 = vrot.lane.b32.xlu0 %v12285_v21, %s12655_s16  ;;  %v8308_v63 = vsel %vm1302_vm0, %v8306_v54, %v8307_v59  ;;  %v5979_v50 = vrot.slane %v12298_v61, 3  ;;  %v4542_v59 = vrot.slane %v12315_v52, 3  ;;  %v12316_v61 = vld [vmem:[%s12720_s10 + $0x1b0] sm:$0xf8]  }
 0x1de   : > { %4905 = vst.msk [vmem:[#allocation2 + $0x20] sm:$0xff] %vm2154_vm6, %v4862_v1  ;;  %v12300_v1 = vld [vmem:[%s12720_s10 + $0x190] sm:$0xfe]   ;;  %v12331_v38 = vld [vmem:[%s12720_s10 + $0x304] ss:$0 sps:$4 sm:$0x11]  }
 0x1df   : > { %v13978_v8 = vpop.permute.xlu0 %4575  ;;  %v5981_v5 = vsel %vm3684_vm7, %v5979_v50, %v5980_v0  ;;  %v3965_v34 = vrot.slane %v12300_v1, 1  ;;  %v4256_v50 = vrot.slane %v12316_v61, 3  ;;  %v4257_v0 = vrot.slane %v12317_v24, 3  ;;  %v12319_v1 = vld [vmem:[%s12720_s10 + $0x9c] sm:$0xfc]  }
 0x1e0   : > { %6018 = vrot.lane.b32.xlu1 %v5978_v16, %s12657_s18  ;;  %4618 = vst.msk [vmem:[#allocation2 + $0x28] sm:$0xff] %vm1865_vm5, %v13978_v8  ;;  %v12303_v8 = vld [vmem:[%s12720_s10 + $0x45c] ss:$0 sps:$4 sm:$0x33]   ;;  %v12310_v16 = vld [vmem:[%s12720_s10 + $0x80] sm:$0xfc]  }
 0x1e1   : > { %v7593_v13 = vpop.permute.xlu1 %7592  ;;  %5732 = vrot.lane.b32.xlu0 %v5693_v36, %s12656_s17  ;;  %v3967_v12 = vsel %vm1302_vm0, %v3965_v34, %v3966_v7  ;;  %v7092_v36 = vrot.slane %v12310_v16, 2  ;;  %v7095_v6 = vrot.slane %v12319_v1, 2  ;;  %v4833_v52 = vrot.slane %v12331_v38, 1  ;;  %v12334_v24 = vld [vmem:[%s12720_s10 + $0x28c] sm:$0xfe]  }
 0x1e2   : > { %7640 = vst.msk [vmem:[#allocation2] sm:$0xff] %vm2154_vm6, %v7593_v13  ;;  %v8595_v13 = vrot.slane %v12303_v8, 2  ;;  %v12321_v8 = vld [vmem:[%s12720_s10 + $0x2e0] sm:$0xfe]  }
 0x1e3   : > { %v7307_v18 = vpop.permute.xlu0 %7306  ;;  %v12348_v38 = vld [vmem:[%s12720_s10 + $0x44c] ss:$0 sps:$4 sm:$0x77]  }
 0x1e4   : > { %7353 = vst.msk [vmem:[#allocation2 + $0x8] sm:$0xff] %vm1865_vm5, %v7307_v18  ;;  %8637 = vrot.lane.b32.xlu1 %v8593_v58, %s12657_s18  ;;  %v8596_v15 = vsel %vm1045_vm1, %v8594_v9, %v8595_v13  ;;  %v6805_v18 = vrot.slane %v12305_v57, 1  ;;  %v12323_v13 = vld [vmem:[%s12720_s10 + $0x2f4] sm:$0xf8]  }
 0x1e5   : > { %v5150_v60 = vpop.permute.xlu1 %5149  ;;  %8351 = vrot.lane.b32.xlu0 %v8308_v63, %s12656_s17  ;;  %v12318_v63 = vld [vmem:[%s12720_s10 + $0x268] sm:$0xff]  }
 0x1e6   : > { %5193 = vst.msk [vmem:[#allocation2 + $0x20] sm:$0xff] %vm2331_vm8, %v5150_v60  ;;  %v6806_v26 = vsel %vm1302_vm0, %v6804_v27, %v6805_v18  ;;  %v3968_v60 = vrot.slane %v12308_v62, 1  ;;  %v12324_v27 = vld [vmem:[%s12720_s10 + $0x2fc] ss:$0 sps:$4 sm:$0x77]   ;;  %v4544_v18 = vrot.slane %v12323_v13, 3 }
 0x1e7   : > { %v4864_v42 = vpop.permute.xlu0 %4863  ;;  %v12326_v62 = vld [vmem:[%s12720_s10 + $0x278] ss:$0 sps:$4 sm:$0x11]   ;;  %v12341_v13 = vld [vmem:[%s12720_s10 + $0x460] sm:$0xff]  }
 0x1e8   : > { %4906 = vst.msk [vmem:[#allocation2 + $0x28] sm:$0xff] %vm2154_vm6, %v4864_v42  ;;  %6020 = vrot.lane.b32.xlu1 %v5981_v5, %s12657_s18  ;;  %v3969_v42 = vrot.slane %v12309_v17, 1  ;;  %v4258_v5 = vsel %vm3684_vm7, %v4256_v50, %v4257_v0  ;;  %v7559_v0 = vrot.slane %v12334_v24, 1 }
 0x1e9   : > { %v7881_v39 = vpop.permute.xlu1 %7880  ;;  %4005 = vrot.lane.b32.xlu0 %v3967_v12, %s12650_s11  ;;  %v4829_v12 = vrot.slane %v12321_v8, 1  ;;  %v12338_v8 = vld [vmem:[%s12720_s10 + $0x300] sm:$0xf8]  }
 0x1ea   : > { %7928 = vst.msk [vmem:[#allocation2] sm:$0xff] %vm2331_vm8, %v7881_v39  ;;  %v3970_v35 = vsel %vm1302_vm0, %v3968_v60, %v3969_v42  ;;  %v7094_v39 = vsel %vm1045_vm1, %v7092_v36, %v7093_v37  ;;  %v7556_v60 = vrot.slane %v12325_v28, 1  ;;  %v12329_v42 = vld [vmem:[%s12720_s10 + $0x2ec] ss:$0 sps:$4 sm:$0x77]  }
 0x1eb   : > { %v7595_v47 = vpop.permute.xlu0 %7594  ;;  %v5118_v36 = vrot.slane %v12329_v42, 3  ;;  %v12330_v37 = vld [vmem:[%s12720_s10 + $0x2fc] sm:$0xfe]  }
 0x1ec   : > { %7641 = vst.msk [vmem:[#allocation2 + $0x8] sm:$0xff] %vm2154_vm6, %v7595_v47  ;;  %8639 = vrot.lane.b32.xlu1 %v8596_v15, %s12657_s18  ;;  %v6808_v47 = vrot.slane %v12313_v23, 1 }
 0x1ed   : > { %v5439_v55 = vpop.permute.xlu1 %5438  ;;  %6848 = vrot.lane.b32.xlu0 %v6806_v26, %s12650_s11  ;;  %v4545_v26 = vrot.slane %v12324_v27, 3 }
 0x1ee   : > { %5482 = vst.msk [vmem:[#allocation2 + $0x20] sm:$0xff] %vm2621_vm13, %v5439_v55  ;;  %v6809_v58 = vsel %vm1302_vm0, %v6807_v40, %v6808_v47  ;;  %v4832_v40 = vrot.slane %v12330_v37, 1  ;;  %v12347_v37 = vld [vmem:[%s12720_s10 + $0x444] sm:$0xf8]  }
 0x1ef   : > { %v5152_v43 = vpop.permute.xlu0 %5151  ;;  %v4546_v17 = vsel %vm3684_vm7, %v4544_v18, %v4545_v26  ;;  %v12342_v18 = vld [vmem:[%s12720_s10 + $0x294] sm:$0xfc]  }
 0x1f0   : > { %v14018_v41 = vpop.f32.mrb[0].mxu1  ;;  %5194 = vst.msk [vmem:[#allocation2 + $0x28] sm:$0xff] %vm2331_vm8, %v5152_v43  ;;  %4293 = vrot.lane.b32.xlu1 %v4255_v32, %s12651_s12  ;;  %v4543_v43 = vsel %vm3684_vm7, %v4541_v53, %v4542_v59  ;;  %v12328_v32 = vld [vmem:[%s12720_s10 + $0x2e4] sm:$0xf8]   ;;  %v4834_v59 = vsel %vm1302_vm0, %v4832_v40, %v4833_v52  ;;  %v7847_v28 = vrot.slane %v12342_v18, 2 }
 0x1f1   : > { %v14022_v48 = vpop.f32.mrb[1].mxu1  ;;  %v8058_v3 = vpop.permute.xlu1 %8057  ;;  %4007 = vrot.lane.b32.xlu0 %v3970_v35, %s12650_s11  ;;  %v5117_v35 = vrot.slane %v12328_v32, 3  ;;  %v12333_v53 = vld [vmem:[%s12720_s10 + $0x280] ss:$0 sps:$4 sm:$0x33]  }
 0x1f2   : > { %v14029_v56 = vpop.f32.mrb[2].mxu1  ;;  %8105 = vst.msk [vmem:[#allocation2] sm:$0xff] %vm2621_vm13, %v8058_v3  ;;  %v12320_v3 = vld [vmem:[%s12720_s10 + $0xa4] ss:$0 sps:$4 sm:$0x33]   ;;  %v7845_v61 = vrot.slane %v12333_v53, 2 }
 0x1f3   : > { %v14035_v49 = vpop.f32.mrb[3].mxu1  ;;  %v7883_v51 = vpop.permute.xlu0 %7882  ;;  %v7096_v7 = vrot.slane %v12320_v3, 2  ;;  %v12336_v3 = vld [vmem:[%s12720_s10 + $0x428] sm:$0xf8]   ;;  %v5410_v53 = vrot.slane %v12348_v38, 3 }
 0x1f4   : > { %7929 = vst.msk [vmem:[#allocation2 + $0x8] sm:$0xff] %vm2331_vm8, %v7883_v51  ;;  %7136 = vrot.lane.b32.xlu1 %v7094_v39, %s12651_s12  ;;  %v12322_v51 = vld [vmem:[%s12720_s10 + $0x2e8] ss:$0 sps:$4 sm:$0x11]   ;;  %v5119_v39 = vsel %vm3684_vm7, %v5117_v35, %v5118_v36 }
 0x1f5   : > { %v5727_v10 = vpop.permute.xlu1 %5726  ;;  %6850 = vrot.lane.b32.xlu0 %v6809_v58, %s12650_s11  ;;  %v4830_v15 = vrot.slane %v12322_v51, 1  ;;  %v12346_v32 = vld [vmem:[%s12720_s10 + $0x438] ss:$0 sps:$4 sm:$0x11]  }
 0x1f6   : > { %5770 = vst.msk [vmem:[#allocation2 + $0x20] sm:$0xff] %vm2910_vm14, %v5727_v10  ;;  %v7097_v10 = vsel %vm1045_vm1, %v7095_v6, %v7096_v7  ;;  %v5406_v7 = vrot.slane %v12336_v3, 3  ;;  %v5695_v36 = vrot.slane %v12346_v32, 1  ;;  %v12353_v3 = vld [vmem:[%s12720_s10 + $0x470] ss:$0 sps:$4 sm:$0x11]  }
 0x1f7   : > { %v5441_v21 = vpop.permute.xlu0 %5440  ;;  %v4831_v22 = vsel %vm1302_vm0, %v4829_v12, %v4830_v15  ;;  %v5120_v12 = vrot.slane %v12338_v8, 3  ;;  %v8310_v8 = vrot.slane %v12353_v3, 1  ;;  %v12360_v32 = vld [vmem:[%s12720_s10 + $0x454] ss:$0 sps:$4 sm:$0x11]  }
 0x1f8   : > { %5483 = vst.msk [vmem:[#allocation2 + $0x28] sm:$0xff] %vm2621_vm13, %v5441_v21  ;;  %4581 = vrot.lane.b32.xlu1 %v4543_v43, %s12652_s13 }
 0x1f9   : > { %v8346_v2 = vpop.permute.xlu1 %8345  ;;  %4295 = vrot.lane.b32.xlu0 %v4258_v5, %s12651_s12  ;;  %v12337_v5 = vld [vmem:[%s12720_s10 + $0x430] ss:$0 sps:$4 sm:$0x77]  }
 0x1fa   : > { %8393 = vst.msk [vmem:[#allocation2] sm:$0xff] %vm2910_vm14, %v8346_v2 }
 0x1fb   : > { %v8060_v30 = vpop.permute.xlu0 %8059 }
 0x1fc   : > { %8106 = vst.msk [vmem:[#allocation2 + $0x8] sm:$0xff] %vm2621_vm13, %v8060_v30  ;;  %7312 = vrot.lane.b32.xlu1 %v12318_v63, %s12652_s13  ;;  %v7557_v30 = vrot.slane %v12326_v62, 1  ;;  %v12335_v63 = vld [vmem:[%s12720_s10 + $0x294] ss:$0 sps:$4 sm:$0x11]  }
 0x1fd   : > { %7138 = vrot.lane.b32.xlu0 %v7097_v10, %s12651_s12  ;;  %v7560_v1 = vrot.slane %v12335_v63, 1  ;;  %v12339_v10 = vld [vmem:[%s12720_s10 + $0x308] ss:$0 sps:$4 sm:$0x77]  }
 0x1fe   : > { %v7558_v33 = vsel %vm1302_vm0, %v7556_v60, %v7557_v30  ;;  %v5121_v15 = vrot.slane %v12339_v10, 3  ;;  %v12345_v30 = vld [vmem:[%s12720_s10 + $0x430] sm:$0xfe]  }
 0x1ff   : > { %v5729_v54 = vpop.permute.xlu0 %5728  ;;  %v7561_v6 = vsel %vm1302_vm0, %v7559_v0, %v7560_v1  ;;  %v5694_v35 = vrot.slane %v12345_v30, 1  ;;  %v12352_v1 = vld [vmem:[%s12720_s10 + $0x468] sm:$0xfe]  }
 0x200   : > { %v14054_v11 = vpop.f32.mrb[4].mxu1  ;;  %5771 = vst.msk [vmem:[#allocation2 + $0x28] sm:$0xff] %vm2910_vm14, %v5729_v54  ;;  %4869 = vrot.lane.b32.xlu1 %v4831_v22, %s12653_s14  ;;  %v7844_v54 = vrot.slane %v12332_v44, 2  ;;  %v12343_v22 = vld [vmem:[%s12720_s10 + $0x29c] ss:$0 sps:$4 sm:$0x33]  }
 0x201   : > { %v14066_v25 = vpop.f32.mrb[5].mxu1  ;;  %4583 = vrot.lane.b32.xlu0 %v4546_v17, %s12652_s13  ;;  %v7848_v17 = vrot.slane %v12343_v22, 2  ;;  %v5696_v40 = vsel %vm1302_vm0, %v5694_v35, %v5695_v36  ;;  %v5409_v44 = vrot.slane %v12347_v37, 3 }
 0x202   : > { %v14070_v29 = vpop.f32.mrb[6].mxu1  ;;  %v7846_v50 = vsel %vm1045_vm1, %v7844_v54, %v7845_v61  ;;  %v12350_v54 = vld [vmem:[%s12720_s10 + $0x158] ss:$0 sps:$4 sm:$0x77]   ;;  %v12354_v61 = vld [vmem:[%s12720_s10 + $0x47c] sm:$0xff]  }
 0x203   : > { %v14074_v31 = vpop.f32.mrb[7].mxu1  ;;  %v6015_v45 = vpop.permute.xlu1 %6014  ;;  %v5411_v63 = vsel %vm3684_vm7, %v5409_v44, %v5410_v53  ;;  %v12361_v44 = vld [vmem:[%s12720_s10 + $0x16c] sm:$0xf8]  }
 0x204   : > { %6058 = vst.msk [vmem:[#allocation2 + $0x20] sm:$0xff] %vm3087_vm15, %v6015_v45  ;;  %v8348_v14 = vpop.permute.xlu0 %8347  ;;  %7600 = vrot.lane.b32.xlu1 %v7558_v33, %s12653_s14 }
 0x205   : > { %8394 = vst.msk [vmem:[#allocation2 + $0x8] sm:$0xff] %vm2910_vm14, %v8348_v14  ;;  %7314 = vrot.lane.b32.xlu0 %v12327_v20, %s12652_s13 }
 0x207   : > { %v8634_v34 = vpop.permute.xlu1 %8633 }
 0x208   : > { %v14088_v46 = vpop.f32.mrb[8].mxu1  ;;  %8681 = vst.msk [vmem:[#allocation2] sm:$0xff] %vm3087_vm15, %v8634_v34  ;;  %5157 = vrot.lane.b32.xlu1 %v5119_v39, %s12654_s15 }
 0x209   : > { %v14093_v55 = vpop.f32.mrb[9].mxu1  ;;  %4871 = vrot.lane.b32.xlu0 %v4834_v59, %s12653_s14 }
 0x20a   : > { %v14105_v4 = vpop.f32.mrb[10].mxu1 }
 0x20b   : > { %v6074_v9 = vld [vmem:[#allocation2 + $0x20] sm:$0xff]  ;;  %v14116_v57 = vpop.f32.mrb[11].mxu1 }
 0x20c   : > { %11721 = vmatprep.mubr.msk.bf16.mxu0 %vm3165_vm10, %v6074_v9  ;;  %7888 = vrot.lane.b32.xlu1 %v7846_v50, %s12654_s15  ;;  %v5407_v9 = vrot.slane %v12337_v5, 3 }
 0x20d   : > { %v6017_v19 = vpop.permute.xlu1 %6016  ;;  %7602 = vrot.lane.b32.xlu0 %v7561_v6, %s12653_s14 }
 0x20e   : > { %6059 = vst.msk [vmem:[#allocation2 + $0x28] sm:$0xff] %vm3087_vm15, %v6017_v19  ;;  %v5408_v14 = vsel %vm3684_vm7, %v5406_v7, %v5407_v9  ;;  %v5122_v19 = vsel %vm3684_vm7, %v5120_v12, %v5121_v15  ;;  %v8309_v7 = vrot.slane %v12352_v1, 1  ;;  %v14220_v9 = vld [vmem:[%s15683_s5] ss:$0 sm:$0xff]  ;;  %v12357_v15 = vld [vmem:[%s12720_s10 + $0x434] sm:$0xf8]  }
 0x20f   : > { %v8697_v16 = vld [vmem:[#allocation2] sm:$0xff]  ;;  %v749_v12 = vadd.f32 %v14018_v41, %v14220_v9  ;;  %v752_v18 = vadd.f32 %v14029_v56, %v14220_v9  ;;  %v5982_v22 = vrot.slane %v12357_v15, 3  ;;  %v768_v36 = vadd.f32 %v14070_v29, %v14220_v9 }
 0x210   : > { %v14121_v21 = vpop.f32.mrb[12].mxu1  ;;  %11755 = vmatprep.mubr.msk.bf16.mxu1 %vm3165_vm10, %v8697_v16  ;;  %5446 = vrot.lane.b32.xlu1 %v5408_v14, %s12655_s16  ;;  %v7849_v16 = vsel %vm1045_vm1, %v7847_v28, %v7848_v17  ;;  %v8311_v14 = vsel %vm1302_vm0, %v8309_v7, %v8310_v8  ;;  %v765_v17 = vadd.f32 %v14054_v11, %v14220_v9  ;;  %v5698_v11 = vrot.slane %v12360_v32, 1  ;;  %v12364_v7 = vld [vmem:[%s12720_s10 + $0x470] sm:$0xfc]  }
 0x211   : > { %v14140_v23 = vpop.f32.mrb[13].mxu1  ;;  %v8636_v45 = vpop.permute.xlu1 %8635  ;;  %5159 = vrot.lane.b32.xlu0 %v5122_v19, %s12654_s15  ;;  %v821_v41 = vmax.f32 %v749_v12, 0.0  ;;  %v760_v1 = vadd.f32 %v14220_v9, %v14074_v31  ;;  %v12365_v8 = vld [vmem:[%s12720_s10 + $0x478] ss:$0 sps:$4 sm:$0x33]   ;;  %v781_v12 = vadd.f32 %v14088_v46, %v14220_v9  ;;  %v773_v31 = vadd.f32 %v14220_v9, %v14093_v55 }
 0x212   : > { %8682 = vst.msk [vmem:[#allocation2 + $0x8] sm:$0xff] %vm3087_vm15, %v8636_v45  ;;  %v14149_v58 = vpop.f32.mrb[14].mxu1  ;;  %v12349_v45 = vld [vmem:[%s12720_s10 + $0x150] sm:$0xf8]   ;;  %v825_v53 = vmax.f32 %v765_v17, 0.0  ;;  %v776_v55 = vadd.f32 %v14220_v9, %v14116_v57 }
 0x213   : > { %v14134_v2 = vpop.permute.xlu0 %4001  ;;  %v14160_v34 = vpop.f32.mrb[15].mxu1  ;;  %v3703_v59 = vrot.slane %v12349_v45, 3  ;;  %v12367_v46 = vld [vmem:[%s12720_s10 + $0x48c] ss:$0 sps:$4 sm:$0x11]   ;;  %v827_v32 = vmax.f32 %v773_v31, 0.0 }
 0x214   : > { %8065 = vrot.lane.b32.xlu1 %v12341_v13, %s12655_s16  ;;  %v741_v13 = vadd.f32 %v14220_v9, %v14022_v48  ;;  %v12358_v48 = vld [vmem:[%s12720_s10 + $0x43c] ss:$0 sps:$4 sm:$0x77]  }
 0x215   : > { %v6075_v47 = vld [vmem:[#allocation2 + $0x28] sm:$0xff]  ;;  %v4290_v62 = vpop.permute.xlu1 %4289  ;;  %7890 = vrot.lane.b32.xlu0 %v7849_v16, %s12654_s15  ;;  %v5983_v30 = vrot.slane %v12358_v48, 3  ;;  %v822_v16 = vmax.f32 %v752_v18, 0.0  ;;  %v8597_v18 = vrot.slane %v12364_v7, 2  ;;  %v784_v48 = vadd.f32 %v14105_v4, %v14220_v9 }
 0x216   : > { %11722 = vmatmul.mubr.msk.bf16.gmra.mrb[24].mxu0 %vm3165_vm10, %v6075_v47  ;;  %v819_v28 = vmax.f32 %v741_v13, 0.0  ;;  %v797_v4 = vadd.f32 %v14121_v21, %v14220_v9 }
 0x217   : > { %v5984_v38 = vsel %vm3684_vm7, %v5982_v22, %v5983_v30  ;;  %v14254_v45 = vpack.c.bf16 %v822_v16, %v821_v41  ;;  %v12366_v41 = vld [vmem:[%s12720_s10 + $0x484] sm:$0xfe]   ;;  %v824_v22 = vmax.f32 %v760_v1, 0.0  ;;  %v829_v30 = vmax.f32 %v781_v12, 0.0  ;;  %v12375_v12 = vld [vmem:[%s12720_s10 + $0xb0] sm:$0xfe]  }
 0x218   : > { %5734 = vrot.lane.b32.xlu1 %v5696_v40, %s12656_s17  ;;  %v12370_v16 = vld [vmem:[%s12720_s10 + $0x458] ss:$0 sps:$4 sm:$0x77]   ;;  %v12374_v1 = vld [vmem:[%s12720_s10 + $0x494] ss:$0 sps:$4 sm:$0x33]  }
 0x219   : > { %5448 = vrot.lane.b32.xlu0 %v5411_v63, %s12655_s16  ;;  %v8698_v3 = vld [vmem:[#allocation2 + $0x8] sm:$0xff] }
 0x21b   : > { %v7133_v47 = vpop.permute.xlu1 %7132 }
 0x21c   : > { %v14164_v51 = vpop.f32.mrb[16].mxu1  ;;  %8353 = vrot.lane.b32.xlu1 %v8311_v14, %s12656_s17 }
 0x21d   : > { %v14170_v27 = vpop.f32.mrb[17].mxu1  ;;  %8067 = vrot.lane.b32.xlu0 %v12354_v61, %s12655_s16  ;;  %v12363_v61 = vld [vmem:[%s15682_s4 + $0x20] ss:$0 sps:$4 sm:$0xff]  }
 0x21e   : > { %v6845_v43 = vpop.permute.xlu0 %6844  ;;  %v14176_v26 = vpop.f32.mrb[18].mxu1  ;;  %11833 = vmatprep.subr.msk.bf16.mxu1 %vm638_vm9, %v12363_v61 }
 0x21f   : > { %6890 = vst.msk [vmem:[#allocation2 + $0x10] sm:$0xff] %vm1399_vm3, %v6845_v43  ;;  %v14179_v20 = vpop.f32.mrb[19].mxu1  ;;  %v3704_v43 = vrot.slane %v12350_v54, 3 }
 0x220   : > { %7178 = vst.msk [vmem:[#allocation2 + $0x10] sm:$0xff] %vm1576_vm4, %v7133_v47  ;;  %6022 = vrot.lane.b32.xlu1 %v5984_v38, %s12657_s18  ;;  %v800_v38 = vadd.f32 %v14149_v58, %v14220_v9 }
 0x221   : > { %v3705_v6 = vsel %vm3684_vm7, %v3703_v59, %v3704_v43  ;;  %v3706_v59 = vrot.slane %v12361_v44, 3  ;;  %v12372_v44 = vld [vmem:[%s12720_s10 + $0x1d0] ss:$0 sps:$4 sm:$0x11]  }
 0x222   : > { %v14189_v33 = vpop.permute.xlu0 %4003  ;;  %3755 = vst.msk [vmem:[#allocation2 + $0x30] sm:$0xff] %vm589_vm2, %v3705_v6 }
 0x223   : > { %4043 = vst.msk [vmem:[#allocation2 + $0x30] sm:$0xff] %vm1399_vm3, %v14134_v2  ;;  %v744_v2 = vadd.f32 %v14220_v9, %v14035_v49  ;;  %v757_v49 = vadd.f32 %v14220_v9, %v14066_v25  ;;  %v12362_v25 = vld [vmem:[%s12720_s10 + $0x174] ss:$0 sps:$4 sm:$0x77]  }
 0x224   : > { %v14181_v60 = vpop.f32.mrb[20].mxu1  ;;  %4331 = vst.msk [vmem:[#allocation2 + $0x30] sm:$0xff] %vm1576_vm4, %v4290_v62  ;;  %v12359_v62 = vld [vmem:[%s12720_s10 + $0x44c] sm:$0xfe]   ;;  %v3707_v43 = vrot.slane %v12362_v25, 3 }
 0x225   : > { %v14186_v42 = vpop.f32.mrb[21].mxu1  ;;  %v820_v35 = vmax.f32 %v744_v2, 0.0  ;;  %v5697_v40 = vrot.slane %v12359_v62, 1  ;;  %v823_v63 = vmax.f32 %v757_v49, 0.0  ;;  %v8598_v2 = vrot.slane %v12365_v8, 2 }
 0x226   : > { %v14194_v39 = vpop.f32.mrb[22].mxu1  ;;  %v6847_v50 = vpop.permute.xlu0 %6846  ;;  %v3708_v13 = vsel %vm3684_vm7, %v3706_v59, %v3707_v43  ;;  %v12369_v62 = vld [vmem:[%s12720_s10 + $0x450] sm:$0xf8]   ;;  %v789_v49 = vadd.f32 %v14220_v9, %v14140_v23  ;;  %v12371_v23 = vld [vmem:[%s12720_s10 + $0x1c8] sm:$0xfe]   ;;  %v3972_v43 = vrot.slane %v12372_v44, 1 }
 0x227   : > { %v14198_v52 = vpop.f32.mrb[23].mxu1  ;;  %6891 = vst.msk [vmem:[#allocation2 + $0x18] sm:$0xff] %vm1399_vm3, %v6847_v50  ;;  %v14257_v47 = vpack.c.bf16 %v820_v35, %v819_v28  ;;  %v5699_v29 = vsel %vm1302_vm0, %v5697_v40, %v5698_v11  ;;  %v826_v50 = vmax.f32 %v768_v36, 0.0  ;;  %v8599_v17 = vsel %vm1045_vm1, %v8597_v18, %v8598_v2 }
 0x228   : > { %5736 = vrot.lane.b32.xlu0 %v5699_v29, %s12656_s17  ;;  %3756 = vst.msk [vmem:[#allocation2 + $0x38] sm:$0xff] %vm589_vm2, %v3708_v13  ;;  %8641 = vrot.lane.b32.xlu1 %v8599_v17, %s12657_s18  ;;  %v14296_v57 = vpack.c.bf16 %v824_v22, %v823_v63  ;;  %v830_v35 = vmax.f32 %v784_v48, 0.0  ;;  %v5985_v36 = vrot.slane %v12369_v62, 3  ;;  %v5986_v11 = vrot.slane %v12370_v16, 3 }
 0x229   : > { %v14274_v14 = vpack.c.bf16 %v826_v50, %v825_v53  ;;  %4044 = vst.msk [vmem:[#allocation2 + $0x38] sm:$0xff] %vm1399_vm3, %v14189_v33  ;;  %v8313_v33 = vrot.slane %v12367_v46, 1  ;;  %v792_v53 = vadd.f32 %v14220_v9, %v14160_v34  ;;  %v833_v29 = vmax.f32 %v797_v4, 0.0  ;;  %v12373_v50 = vld [vmem:[%s12720_s10 + $0x48c] sm:$0xfc]  }
 0x22a   : > { %v4578_v10 = vpop.permute.xlu1 %4577  ;;  %v14310_v25 = vpack.c.bf16 %v830_v35, %v829_v30  ;;  %v831_v59 = vmax.f32 %v789_v49, 0.0  ;;  %v3971_v63 = vrot.slane %v12371_v23, 1  ;;  %v834_v34 = vmax.f32 %v800_v38, 0.0  ;;  %v12376_v13 = vld [vmem:[%s12720_s10 + $0xb8] ss:$0 sps:$4 sm:$0x11]  }
 0x22b   : > { %v14236_v19 = vpop.permute.xlu0 %4291  ;;  %4619 = vst.msk [vmem:[#allocation2 + $0x30] sm:$0xff] %vm1865_vm5, %v4578_v10  ;;  %v8807_v10 = vsel %vm638_vm9, %v12363_v61, 0  ;;  %v5987_v61 = vsel %vm3684_vm7, %v5985_v36, %v5986_v11  ;;  %v8600_v7 = vrot.slane %v12373_v50, 2  ;;  %v832_v8 = vmax.f32 %v792_v53, 0.0  ;;  %v12377_v46 = vld [vmem:[%s12720_s10 + $0x1cc] sm:$0xf8]  }
 0x22c   : > { %v14204_v24 = vpop.f32.mrb[24].mxu1  ;;  %11754 = vmatpush3.bf16.msra.mxu1 %v8807_v10  ;;  %4332 = vst.msk [vmem:[#allocation2 + $0x38] sm:$0xff] %vm1576_vm4, %v14236_v19  ;;  %6024 = vrot.lane.b32.xlu1 %v5987_v61, %s12657_s18  ;;  %v8601_v10 = vrot.slane %v12374_v1, 2  ;;  %v14327_v31 = vpack.c.bf16 %v834_v34, %v833_v29  ;;  %v6811_v48 = vrot.slane %v12376_v13, 1  ;;  %v12379_v30 = vld [vmem:[%s12720_s10 + $0x1e4] sm:$0xfe]  }
 0x22d   : > { %v14207_v0 = vpop.f32.mrb[25].mxu1  ;;  %v12378_v22 = vld [vmem:[%s12720_s10 + $0x1d4] ss:$0 sps:$4 sm:$0x77]   ;;  %v3974_v49 = vrot.slane %v12379_v30, 1 }
 0x22e   : > { %v14213_v5 = vpop.f32.mrb[26].mxu1  ;;  %v7309_v56 = vpop.permute.xlu1 %7308  ;;  %v8602_v2 = vsel %vm1045_vm1, %v8600_v7, %v8601_v10  ;;  %v12380_v62 = vld [vmem:[%s12720_s10 + $0x1ec] ss:$0 sps:$4 sm:$0x11]   ;;  %v12383_v23 = vld [vmem:[%s12720_s10 + $0xcc] sm:$0xfe]  }
 0x22f   : > { %7354 = vst.msk [vmem:[#allocation2 + $0x10] sm:$0xff] %vm1865_vm5, %v7309_v56  ;;  %v7135_v37 = vpop.permute.xlu0 %7134  ;;  %v8312_v56 = vrot.slane %v12366_v41, 1  ;;  %11756 = vmatmul.mubr.msk.bf16.vlgmr.msra.gmra.mrb[48].mxu1 %vm3165_vm10, %v8698_v3  ;;  %v6810_v41 = vrot.slane %v12375_v12, 1  ;;  %v3975_v35 = vrot.slane %v12380_v62, 1  ;;  %v12385_v61 = vld [vmem:[%s12720_s10 + $0x310] sm:$0xf8]  }
 0x230   : > { %7179 = vst.msk [vmem:[#allocation2 + $0x18] sm:$0xff] %vm1576_vm4, %v7135_v37  ;;  %v828_v37 = vmax.f32 %v776_v55, 0.0  ;;  %8643 = vrot.lane.b32.xlu1 %v8602_v2, %s12657_s18  ;;  %v12382_v36 = vld [vmem:[%s12720_s10 + $0xc0] ss:$0 sps:$4 sm:$0x33]   ;;  %v4547_v34 = vrot.slane %v12385_v61, 3 }
 0x231   : > { %v8314_v21 = vsel %vm1302_vm0, %v8312_v56, %v8313_v33  ;;  %v6812_v17 = vsel %vm1302_vm0, %v6810_v41, %v6811_v48  ;;  %v4259_v56 = vrot.slane %v12377_v46, 3  ;;  %v4260_v33 = vrot.slane %v12378_v22, 3  ;;  %v12384_v53 = vld [vmem:[%s12720_s10 + $0xd4] ss:$0 sps:$4 sm:$0x11]   ;;  %v12389_v12 = vld [vmem:[%s12720_s10 + $0x2a0] sm:$0xff]  }
 0x232   : > { %v4866_v54 = vpop.permute.xlu1 %4865  ;;  %8355 = vrot.lane.b32.xlu0 %v8314_v21, %s12656_s17  ;;  %v12381_v21 = vld [vmem:[%s12720_s10 + $0xb8] sm:$0xfc]   ;;  %v3976_v38 = vsel %vm1302_vm0, %v3974_v49, %v3975_v35  ;;  %v7099_v11 = vrot.slane %v12382_v36, 2  ;;  %v6814_v50 = vrot.slane %v12384_v53, 1 }
 0x233   : > { %4907 = vst.msk [vmem:[#allocation2 + $0x30] sm:$0xff] %vm2154_vm6, %v4866_v54  ;;  %v4580_v6 = vpop.permute.xlu0 %4579  ;;  %v14315_v54 = vpack.c.bf16 %v828_v37, %v827_v32  ;;  %v4261_v16 = vsel %vm3684_vm7, %v4259_v56, %v4260_v33  ;;  %v12386_v1 = vld [vmem:[%s12720_s10 + $0x318] ss:$0 sps:$4 sm:$0x77]   ;;  %v12392_v33 = vld [vmem:[%s12720_s10 + $0x318] sm:$0xfe]  }
 0x234   : > { %4620 = vst.msk [vmem:[#allocation2 + $0x38] sm:$0xff] %vm1865_vm5, %v4580_v6  ;;  %v3973_v6 = vsel %vm1302_vm0, %v3971_v63, %v3972_v43  ;;  %4297 = vrot.lane.b32.xlu1 %v4261_v16, %s12651_s12  ;;  %v4548_v7 = vrot.slane %v12386_v1, 3  ;;  %v12388_v10 = vld [vmem:[%s12720_s10 + $0x1f0] ss:$0 sps:$4 sm:$0x77]   ;;  %v4835_v35 = vrot.slane %v12392_v33, 1 }
 0x235   : > { %v4263_v41 = vrot.slane %v12388_v10, 3  ;;  %v12390_v46 = vld [vmem:[%s12720_s10 + $0xd4] sm:$0xfc]   ;;  %v12391_v22 = vld [vmem:[%s12720_s10 + $0xdc] ss:$0 sps:$4 sm:$0x33]  }
 0x236   : > { %v7597_v15 = vpop.permute.xlu1 %7596  ;;  %4009 = vrot.lane.b32.xlu0 %v3973_v6, %s12650_s11  ;;  %v7101_v56 = vrot.slane %v12390_v46, 2  ;;  %v7102_v30 = vrot.slane %v12391_v22, 2  ;;  %v12393_v62 = vld [vmem:[%s12720_s10 + $0x320] ss:$0 sps:$4 sm:$0x11]  }
 0x237   : > { %7642 = vst.msk [vmem:[#allocation2 + $0x10] sm:$0xff] %vm2154_vm6, %v7597_v15  ;;  %v7311_v28 = vpop.permute.xlu0 %7310  ;;  %v14329_v15 = vpack.c.bf16 %v832_v8, %v831_v59  ;;  %v12387_v8 = vld [vmem:[%s12720_s10 + $0x1e8] sm:$0xf8]   ;;  %v12398_v61 = vld [vmem:[%s12720_s10 + $0x2bc] sm:$0xff]  }
 0x238   : > { %7355 = vst.msk [vmem:[#allocation2 + $0x18] sm:$0xff] %vm1865_vm5, %v7311_v28  ;;  %v14336_v28 = vpop.f32.mrb[27].mxu1  ;;  %v4262_v2 = vrot.slane %v12387_v8, 3  ;;  %v7103_v16 = vsel %vm1045_vm1, %v7101_v56, %v7102_v30  ;;  %v12404_v33 = vld [vmem:[%s12720_s10 + $0x2b8] ss:$0 sps:$4 sm:$0x33]  }
 0x239   : > { %v14341_v4 = vpop.f32.mrb[28].mxu1 }
 0x23a   : > { %v5154_v19 = vpop.permute.xlu1 %5153  ;;  %15689 = vst [vmem:[#allocation4_spill] sm:$0xff] %v14341_v4  ;;  %6852 = vrot.lane.b32.xlu0 %v6812_v17, %s12650_s11  ;;  %v4264_v17 = vsel %vm3684_vm7, %v4262_v2, %v4263_v41  ;;  %v12402_v41 = vld [vmem:[%s12720_s10 + $0x33c] ss:$0 sps:$4 sm:$0x11]  }
 0x23b   : > { %5195 = vst.msk [vmem:[#allocation2 + $0x30] sm:$0xff] %vm2331_vm8, %v5154_v19  ;;  %v4868_v40 = vpop.permute.xlu0 %4867  ;;  %v14346_v19 = vpop.f32.mrb[29].mxu1  ;;  %v4839_v30 = vrot.slane %v12402_v41, 1  ;;  %v12434_v41 = vld [vmem:[%s12720_s10 + $0x8c] sm:$0xff]  }
 0x23c   : > { %4908 = vst.msk [vmem:[#allocation2 + $0x38] sm:$0xff] %vm2154_vm6, %v4868_v40  ;;  %15690 = vst [vmem:[#allocation5_spill] sm:$0xff] %v14346_v19  ;;  %v7098_v40 = vrot.slane %v12381_v21, 2  ;;  %v14357_v29 = vpop.f32.mrb[30].mxu1  ;;  %v12394_v21 = vld [vmem:[%s12720_s10 + $0x32c] sm:$0xf8]  }
 0x23d   : > { %15691 = vst [vmem:[#allocation6_spill] sm:$0xff] %v14357_v29  ;;  %v14362_v43 = vpop.f32.mrb[31].mxu1  ;;  %6605 = vst.msk [vmem:[#allocation2 + $0x28] sm:$0xff] %vm589_vm2, %v12434_v41  ;;  %v12615_v29 = vld [vmem:[%s12720_s10 + $0x3ac] sm:$0xfc]  }
 0x23e   : > { %v7885_v58 = vpop.permute.xlu1 %7884  ;;  %4011 = vrot.lane.b32.xlu0 %v3976_v38, %s12650_s11  ;;  %v7100_v59 = vsel %vm1045_vm1, %v7098_v40, %v7099_v11  ;;  %15692 = vst [vmem:[#allocation7_spill] sm:$0xff] %v14362_v43  ;;  %v12395_v38 = vld [vmem:[%s12720_s10 + $0x334] ss:$0 sps:$4 sm:$0x77]   ;;  %v4550_v11 = vrot.slane %v12394_v21, 3  ;;  %v7851_v21 = vrot.slane %v12404_v33, 2 }
 0x23f   : > { %7930 = vst.msk [vmem:[#allocation2 + $0x10] sm:$0xff] %vm2331_vm8, %v7885_v58  ;;  %v7599_v3 = vpop.permute.xlu0 %7598  ;;  %v6813_v58 = vrot.slane %v12383_v23, 1  ;;  %7140 = vrot.lane.b32.xlu1 %v7100_v59, %s12651_s12  ;;  %v12423_v23 = vld [vmem:[%s12720_s10 + $0x70] sm:$0xff]   ;;  %v4551_v53 = vrot.slane %v12395_v38, 3  ;;  %v12396_v59 = vld [vmem:[%s12720_s10 + $0x2a8] sm:$0xfe]  }
 0x240   : > { %7643 = vst.msk [vmem:[#allocation2 + $0x18] sm:$0xff] %vm2154_vm6, %v7599_v3  ;;  %v14367_v3 = vpop.f32.mrb[32].mxu1  ;;  %v12406_v38 = vld [vmem:[%s12720_s10 + $0x2cc] ss:$0 sps:$4 sm:$0x11]  }
 0x241   : > { %15693 = vst [vmem:[#allocation8_spill] sm:$0xff] %v14367_v3  ;;  %v6815_v6 = vsel %vm1302_vm0, %v6813_v58, %v6814_v50  ;;  %v12397_v58 = vld [vmem:[%s12720_s10 + $0x2b0] ss:$0 sps:$4 sm:$0x11]   ;;  %6604 = vst.msk [vmem:[#allocation2 + $0x20] sm:$0xff] %vm589_vm2, %v12423_v23  ;;  %v7562_v50 = vrot.slane %v12396_v59, 1 }
 0x242   : > { %v5443_v18 = vpop.permute.xlu1 %5442  ;;  %6854 = vrot.lane.b32.xlu0 %v6815_v6, %s12650_s11  ;;  %v7563_v1 = vrot.slane %v12397_v58, 1  ;;  %v12400_v6 = vld [vmem:[%s12720_s10 + $0x324] ss:$0 sps:$4 sm:$0x77]   ;;  %v12562_v43 = vld [vmem:[%s12720_s10 + $0x518] sm:$0xfc]  }
 0x243   : > { %5484 = vst.msk [vmem:[#allocation2 + $0x30] sm:$0xff] %vm2621_vm13, %v5443_v18  ;;  %v5156_v55 = vpop.permute.xlu0 %5155  ;;  %v4549_v18 = vsel %vm3684_vm7, %v4547_v34, %v4548_v7  ;;  %v12399_v34 = vld [vmem:[%s12720_s10 + $0x31c] sm:$0xf8]   ;;  %v12408_v59 = vld [vmem:[%s12720_s10 + $0x468] ss:$0 sps:$4 sm:$0x77]  }
 0x244   : > { %5196 = vst.msk [vmem:[#allocation2 + $0x38] sm:$0xff] %vm2331_vm8, %v5156_v55  ;;  %4585 = vrot.lane.b32.xlu1 %v4549_v18, %s12652_s13  ;;  %v14380_v55 = vpop.f32.mrb[33].mxu1  ;;  %v7564_v10 = vsel %vm1302_vm0, %v7562_v50, %v7563_v1  ;;  %v12401_v18 = vld [vmem:[%s12720_s10 + $0x334] sm:$0xfe]  }
 0x245   : > { %15694 = vst [vmem:[#allocation9_spill] sm:$0xff] %v14380_v55  ;;  %v14386_v49 = vpop.f32.mrb[34].mxu1  ;;  %v4838_v22 = vrot.slane %v12401_v18, 1  ;;  %v12409_v1 = vld [vmem:[%s12720_s10 + $0x338] sm:$0xf8]  }
 0x246   : > { %v8062_v32 = vpop.permute.xlu1 %8061  ;;  %4299 = vrot.lane.b32.xlu0 %v4264_v17, %s12651_s12  ;;  %15695 = vst [vmem:[#allocation10_spill] sm:$0xff] %v14386_v49  ;;  %v14392_v36 = vpop.f32.mrb[35].mxu1  ;;  %v12403_v17 = vld [vmem:[%s12720_s10 + $0x2b0] sm:$0xfc]  }
 0x247   : > { %8107 = vst.msk [vmem:[#allocation2 + $0x10] sm:$0xff] %vm2621_vm13, %v8062_v32  ;;  %v7887_v37 = vpop.permute.xlu0 %7886  ;;  %15696 = vst [vmem:[#allocation11_spill] sm:$0xff] %v14392_v36  ;;  %v12561_v3 = vld [vmem:[%s12720_s10 + $0x21c] ss:$0 sps:$4 sm:$0x77]  }
 0x248   : > { %7931 = vst.msk [vmem:[#allocation2 + $0x18] sm:$0xff] %vm2331_vm8, %v7887_v37  ;;  %7316 = vrot.lane.b32.xlu1 %v12389_v12, %s12652_s13  ;;  %v4836_v37 = vrot.slane %v12393_v62, 1  ;;  %v5123_v12 = vrot.slane %v12399_v34, 3  ;;  %v12618_v4 = vld [vmem:[%s12720_s10 + $0x398] ss:$0 sps:$4 sm:$0x33]  }
 0x24a   : > { %v5731_v44 = vpop.permute.xlu1 %5730  ;;  %7142 = vrot.lane.b32.xlu0 %v7103_v16, %s12651_s12 }
 0x24b   : > { %5772 = vst.msk [vmem:[#allocation2 + $0x30] sm:$0xff] %vm2910_vm14, %v5731_v44  ;;  %v5445_v63 = vpop.permute.xlu0 %5444  ;;  %v4837_v44 = vsel %vm1302_vm0, %v4835_v35, %v4836_v37  ;;  %v4840_v35 = vsel %vm1302_vm0, %v4838_v22, %v4839_v30  ;;  %v12405_v37 = vld [vmem:[%s12720_s10 + $0x2c4] sm:$0xfe]   ;;  %v12413_v22 = vld [vmem:[%s12720_s10 + $0x2d4] ss:$0 sps:$4 sm:$0x33]  }
 0x24c   : > { %5485 = vst.msk [vmem:[#allocation2 + $0x38] sm:$0xff] %vm2621_vm13, %v5445_v63  ;;  %4873 = vrot.lane.b32.xlu1 %v4837_v44, %s12653_s14  ;;  %v4552_v63 = vsel %vm3684_vm7, %v4550_v11, %v4551_v53  ;;  %v14408_v8 = vpop.f32.mrb[36].mxu1  ;;  %v7565_v23 = vrot.slane %v12405_v37, 1  ;;  %v7566_v44 = vrot.slane %v12406_v38, 1  ;;  %v12407_v53 = vld [vmem:[%s12720_s10 + $0x460] sm:$0xf8]  }
 0x24d   : > { %15697 = vst [vmem:[#allocation12_spill] sm:$0xff] %v14408_v8  ;;  %v14420_v56 = vpop.f32.mrb[37].mxu1  ;;  %v5412_v50 = vrot.slane %v12407_v53, 3  ;;  %v12536_v8 = vld [vmem:[%s12720_s10 + $0x328] ss:$0 sps:$4 sm:$0x33]  }
 0x24e   : > { %v8350_v48 = vpop.permute.xlu1 %8349  ;;  %4587 = vrot.lane.b32.xlu0 %v4552_v63, %s12652_s13  ;;  %15698 = vst [vmem:[#allocation13_spill] sm:$0xff] %v14420_v56  ;;  %v14425_v16 = vpop.f32.mrb[38].mxu1  ;;  %v7567_v63 = vsel %vm1302_vm0, %v7565_v23, %v7566_v44  ;;  %v12416_v23 = vld [vmem:[%s12720_s10 + $0x47c] sm:$0xf8]  }
 0x24f   : > { %v8064_v13 = vpop.permute.xlu0 %8063  ;;  %8395 = vst.msk [vmem:[#allocation2 + $0x10] sm:$0xff] %vm2910_vm14, %v8350_v48  ;;  %15699 = vst [vmem:[#allocation14_spill] sm:$0xff] %v14425_v16  ;;  %v14441_v34 = vpop.f32.mrb[39].mxu1 }
 0x250   : > { %8108 = vst.msk [vmem:[#allocation2 + $0x18] sm:$0xff] %vm2621_vm13, %v8064_v13  ;;  %7604 = vrot.lane.b32.xlu1 %v7564_v10, %s12653_s14  ;;  %v5124_v13 = vrot.slane %v12400_v6, 3  ;;  %15700 = vst [vmem:[#allocation15_spill] sm:$0xff] %v14441_v34  ;;  %v5413_v6 = vrot.slane %v12408_v59, 3 }
 0x252   : > { %v6019_v32 = vpop.permute.xlu1 %6018  ;;  %7318 = vrot.lane.b32.xlu0 %v12398_v61, %s12652_s13  ;;  %v5125_v46 = vsel %vm3684_vm7, %v5123_v12, %v5124_v13  ;;  %v5126_v12 = vrot.slane %v12409_v1, 3  ;;  %v5414_v18 = vsel %vm3684_vm7, %v5412_v50, %v5413_v6 }
 0x253   : > { %6060 = vst.msk [vmem:[#allocation2 + $0x30] sm:$0xff] %vm3087_vm15, %v6019_v32  ;;  %v5733_v40 = vpop.permute.xlu0 %5732  ;;  %v7850_v32 = vrot.slane %v12403_v17, 2 }
 0x254   : > { %5773 = vst.msk [vmem:[#allocation2 + $0x38] sm:$0xff] %vm2910_vm14, %v5733_v40  ;;  %5161 = vrot.lane.b32.xlu1 %v5125_v46, %s12654_s15  ;;  %v12412_v46 = vld [vmem:[%s12720_s10 + $0x2cc] sm:$0xfc]  }
 0x255   : > { %v7852_v11 = vsel %vm1045_vm1, %v7850_v32, %v7851_v21  ;;  %v7853_v33 = vrot.slane %v12412_v46, 2  ;;  %v12414_v32 = vld [vmem:[%s12720_s10 + $0x468] sm:$0xfe]   ;;  %v12415_v21 = vld [vmem:[%s12720_s10 + $0x470] ss:$0 sps:$4 sm:$0x11]  }
 0x256   : > { %v8638_v7 = vpop.permute.xlu1 %8637  ;;  %4875 = vrot.lane.b32.xlu0 %v4840_v35, %s12653_s14  ;;  %v5701_v59 = vrot.slane %v12415_v21, 1  ;;  %v12420_v46 = vld [vmem:[%s12720_s10 + $0x4a0] sm:$0xfe]  }
 0x257   : > { %8683 = vst.msk [vmem:[#allocation2 + $0x10] sm:$0xff] %vm3087_vm15, %v8638_v7  ;;  %v8352_v2 = vpop.permute.xlu0 %8351  ;;  %v12410_v7 = vld [vmem:[%s12720_s10 + $0x340] ss:$0 sps:$4 sm:$0x77]  }
 0x258   : > { %8396 = vst.msk [vmem:[#allocation2 + $0x18] sm:$0xff] %vm2910_vm14, %v8352_v2  ;;  %7892 = vrot.lane.b32.xlu1 %v7852_v11, %s12654_s15  ;;  %v5127_v2 = vrot.slane %v12410_v7, 3  ;;  %v5700_v11 = vrot.slane %v12414_v32, 1  ;;  %v12418_v7 = vld [vmem:[%s12720_s10 + $0x188] sm:$0xf8]   ;;  %v8315_v32 = vrot.slane %v12420_v46, 1 }
 0x259   : > { %v3709_v41 = vrot.slane %v12418_v7, 3  ;;  %v12429_v46 = vld [vmem:[%s12720_s10 + $0x1ac] ss:$0 sps:$4 sm:$0x77]  }
 0x25a   : > { %v6076_v48 = vld [vmem:[#allocation2 + $0x30] sm:$0xff]  ;;  %v6021_v62 = vpop.permute.xlu1 %6020  ;;  %7606 = vrot.lane.b32.xlu0 %v7567_v63, %s12653_s14  ;;  %v5128_v30 = vsel %vm3684_vm7, %v5126_v12, %v5127_v2  ;;  %v5702_v1 = vsel %vm1302_vm0, %v5700_v11, %v5701_v59 }
 0x25b   : > { %11725 = vmatprep.mubr.msk.bf16.mxu0 %vm3165_vm10, %v6076_v48  ;;  %6061 = vst.msk [vmem:[#allocation2 + $0x38] sm:$0xff] %vm3087_vm15, %v6021_v62  ;;  %v14431_v40 = vpop.permute.xlu0 %4005  ;;  %v12411_v48 = vld [vmem:[%s12720_s10 + $0x498] sm:$0xff]   ;;  %v7854_v62 = vrot.slane %v12413_v22, 2 }
 0x25c   : > { %5450 = vrot.lane.b32.xlu1 %v5414_v18, %s12655_s16  ;;  %v12422_v18 = vld [vmem:[%s12720_s10 + $0x4b4] sm:$0xff]  }
 0x25d   : > { %v7855_v38 = vsel %vm1045_vm1, %v7853_v33, %v7854_v62 }
 0x25e   : > { %v8640_v58 = vpop.permute.xlu1 %8639  ;;  %v8699_v61 = vld [vmem:[#allocation2 + $0x10] sm:$0xff]  ;;  %5163 = vrot.lane.b32.xlu0 %v5128_v30, %s12654_s15  ;;  %v11631_v53 = vpop.f32.mrb[0].mxu0  ;;  %v12421_v30 = vld [vmem:[%s12720_s10 + $0x4a8] ss:$0 sps:$4 sm:$0x11]  }
 0x25f   : > { %8684 = vst.msk [vmem:[#allocation2 + $0x18] sm:$0xff] %vm3087_vm15, %v8640_v58  ;;  %11759 = vmatprep.mubr.msk.bf16.mxu1 %vm3165_vm10, %v8699_v61  ;;  %v6849_v10 = vpop.permute.xlu0 %6848  ;;  %v12417_v58 = vld [vmem:[%s12720_s10 + $0x484] ss:$0 sps:$4 sm:$0x77]   ;;  %v5415_v61 = vrot.slane %v12416_v23, 3  ;;  %v685_v63 = vadd.f32 %v11631_v53, %v14220_v9  ;;  %v676_v50 = vpop.f32.mrb[1].mxu0 }
 0x260   : > { %6892 = vst.msk [vmem:[#allocation2 + $0x20] sm:$0xff] %vm1399_vm3, %v6849_v10  ;;  %8069 = vrot.lane.b32.xlu1 %v12411_v48, %s12655_s16  ;;  %v5416_v6 = vrot.slane %v12417_v58, 3  ;;  %v12419_v10 = vld [vmem:[%s12720_s10 + $0x190] ss:$0 sps:$4 sm:$0x77]   ;;  %v11632_v11 = vpop.f32.mrb[2].mxu0 }
 0x261   : > { %v3710_v48 = vrot.slane %v12419_v10, 3  ;;  %v805_v33 = vmax.f32 %v685_v63, 0.0  ;;  %v12424_v23 = vld [vmem:[%s12720_s10 + $0x46c] sm:$0xf8]   ;;  %v688_v53 = vadd.f32 %v11632_v11, %v14220_v9 }
 0x262   : > { %v6077_v13 = vld [vmem:[#allocation2 + $0x38] sm:$0xff]  ;;  %v4294_v17 = vpop.permute.xlu1 %4293  ;;  %7894 = vrot.lane.b32.xlu0 %v7855_v38, %s12654_s15  ;;  %v5417_v2 = vsel %vm3684_vm7, %v5415_v61, %v5416_v6  ;;  %v8316_v38 = vrot.slane %v12421_v30, 1  ;;  %v12425_v58 = vld [vmem:[%s12720_s10 + $0x474] ss:$0 sps:$4 sm:$0x77]   ;;  %v679_v61 = vpop.f32.mrb[3].mxu0 }
 0x263   : > { %11726 = vmatmul.mubr.msk.bf16.gmra.mrb[28].mxu0 %vm3165_vm10, %v6077_v13  ;;  %v14457_v35 = vpop.permute.xlu0 %4007  ;;  %v677_v13 = vadd.f32 %v14220_v9, %v676_v50  ;;  %v3711_v62 = vsel %vm3684_vm7, %v3709_v41, %v3710_v48  ;;  %v5988_v63 = vrot.slane %v12424_v23, 3  ;;  %v680_v6 = vadd.f32 %v14220_v9, %v679_v61  ;;  %v12427_v10 = vld [vmem:[%s12720_s10 + $0x48c] ss:$0 sps:$4 sm:$0x11]   ;;  %v12428_v48 = vld [vmem:[%s12720_s10 + $0x1a4] sm:$0xf8]  }
 0x264   : > { %5738 = vrot.lane.b32.xlu1 %v5702_v1, %s12656_s17  ;;  %3757 = vst.msk [vmem:[#allocation2 + $0x40] sm:$0xff] %vm589_vm2, %v3711_v62  ;;  %v8317_v59 = vsel %vm1302_vm0, %v8315_v32, %v8316_v38  ;;  %v806_v1 = vmax.f32 %v688_v53, 0.0  ;;  %v5989_v7 = vrot.slane %v12425_v58, 3  ;;  %v5704_v41 = vrot.slane %v12427_v10, 1  ;;  %v12430_v38 = vld [vmem:[%s12720_s10 + $0x4a8] sm:$0xfc]  }
 0x265   : > { %4045 = vst.msk [vmem:[#allocation2 + $0x40] sm:$0xff] %vm1399_vm3, %v14431_v40  ;;  %v12426_v40 = vld [vmem:[%s12720_s10 + $0x484] sm:$0xfe]   ;;  %v3712_v32 = vrot.slane %v12428_v48, 3  ;;  %v12432_v58 = vld [vmem:[%s12720_s10 + $0x4bc] sm:$0xfe]  }
 0x266   : > { %v8700_v37 = vld [vmem:[#allocation2 + $0x18] sm:$0xff]  ;;  %v7137_v44 = vpop.permute.xlu1 %7136  ;;  %5452 = vrot.lane.b32.xlu0 %v5417_v2, %s12655_s16  ;;  %4333 = vst.msk [vmem:[#allocation2 + $0x40] sm:$0xff] %vm1576_vm4, %v4294_v17  ;;  %v5703_v17 = vrot.slane %v12426_v40, 1  ;;  %v5990_v2 = vsel %vm3684_vm7, %v5988_v63, %v5989_v7  ;;  %v12431_v11 = vld [vmem:[%s12720_s10 + $0x4b0] ss:$0 sps:$4 sm:$0x33]  }
 0x267   : > { %11760 = vmatmul.mubr.msk.bf16.gmra.mrb[52].mxu1 %vm3165_vm10, %v8700_v37  ;;  %7180 = vst.msk [vmem:[#allocation2 + $0x20] sm:$0xff] %vm1576_vm4, %v7137_v44  ;;  %v6851_v12 = vpop.permute.xlu0 %6850  ;;  %v803_v37 = vmax.f32 %v677_v13, 0.0  ;;  %v14496_v13 = vpack.c.bf16 %v806_v1, %v805_v33  ;;  %v3713_v33 = vrot.slane %v12429_v46, 3  ;;  %v8604_v63 = vrot.slane %v12431_v11, 2  ;;  %v12437_v46 = vld [vmem:[%s12720_s10 + $0x200] sm:$0xfe]  }
 0x268   : > { %6893 = vst.msk [vmem:[#allocation2 + $0x28] sm:$0xff] %vm1399_vm3, %v6851_v12  ;;  %8357 = vrot.lane.b32.xlu1 %v8317_v59, %s12656_s17  ;;  %v5705_v62 = vsel %vm1302_vm0, %v5703_v17, %v5704_v41  ;;  %v8603_v59 = vrot.slane %v12430_v38, 2  ;;  %v12433_v40 = vld [vmem:[%s12720_s10 + $0x4c4] ss:$0 sps:$4 sm:$0x11]   ;;  %v3977_v38 = vrot.slane %v12437_v46, 1 }
 0x269   : > { %v3714_v53 = vsel %vm3684_vm7, %v3712_v32, %v3713_v33  ;;  %v8319_v10 = vrot.slane %v12433_v40, 1  ;;  %v12439_v11 = vld [vmem:[%s12720_s10 + $0x4c4] sm:$0xfc]  }
 0x26a   : > { %v4582_v22 = vpop.permute.xlu1 %4581  ;;  %8071 = vrot.lane.b32.xlu0 %v12422_v18, %s12655_s16  ;;  %v804_v18 = vmax.f32 %v680_v6, 0.0  ;;  %3758 = vst.msk [vmem:[#allocation2 + $0x48] sm:$0xff] %vm589_vm2, %v3714_v53  ;;  %v8318_v6 = vrot.slane %v12432_v58, 1  ;;  %v8605_v7 = vsel %vm1045_vm1, %v8603_v59, %v8604_v63  ;;  %v12440_v58 = vld [vmem:[%s12720_s10 + $0x4cc] ss:$0 sps:$4 sm:$0x33]  }
 0x26b   : > { %v4296_v21 = vpop.permute.xlu0 %4295  ;;  %4621 = vst.msk [vmem:[#allocation2 + $0x40] sm:$0xff] %vm1865_vm5, %v4582_v22 }
 0x26c   : > { %6026 = vrot.lane.b32.xlu1 %v5990_v2, %s12657_s18  ;;  %v14503_v30 = vpack.c.bf16 %v804_v18, %v803_v37  ;;  %4046 = vst.msk [vmem:[#allocation2 + $0x48] sm:$0xff] %vm1399_vm3, %v14457_v35  ;;  %v12435_v18 = vld [vmem:[%s12720_s10 + $0x488] sm:$0xf8]   ;;  %v8320_v2 = vsel %vm1302_vm0, %v8318_v6, %v8319_v10 }
 0x26d   : > { %4334 = vst.msk [vmem:[#allocation2 + $0x48] sm:$0xff] %vm1576_vm4, %v4296_v21  ;;  %v5991_v21 = vrot.slane %v12435_v18, 3  ;;  %v12441_v6 = vld [vmem:[%s12720_s10 + $0xe8] sm:$0xfe]  }
 0x26e   : > { %v7313_v44 = vpop.permute.xlu1 %7312  ;;  %5740 = vrot.lane.b32.xlu0 %v5705_v62, %s12656_s17  ;;  %v12438_v62 = vld [vmem:[%s12720_s10 + $0x208] ss:$0 sps:$4 sm:$0x11]  }
 0x26f   : > { %7356 = vst.msk [vmem:[#allocation2 + $0x20] sm:$0xff] %vm1865_vm5, %v7313_v44  ;;  %v7139_v50 = vpop.permute.xlu0 %7138  ;;  %v11635_v44 = vpop.f32.mrb[4].mxu0  ;;  %v3978_v59 = vrot.slane %v12438_v62, 1 }
 0x270   : > { %7181 = vst.msk [vmem:[#allocation2 + $0x28] sm:$0xff] %vm1576_vm4, %v7139_v50  ;;  %v701_v37 = vadd.f32 %v11635_v44, %v14220_v9  ;;  %v692_v61 = vpop.f32.mrb[5].mxu0  ;;  %8645 = vrot.lane.b32.xlu1 %v8605_v7, %s12657_s18  ;;  %v12442_v7 = vld [vmem:[%s12720_s10 + $0xf0] ss:$0 sps:$4 sm:$0x11]  }
 0x271   : > { %v14516_v1 = vadd.f32 %v14220_v9, %v692_v61  ;;  %v12436_v9 = vld [vmem:[%s12720_s10 + $0x490] ss:$0 sps:$4 sm:$0x77]   ;;  %v11636_v33 = vpop.f32.mrb[6].mxu0  ;;  %v8606_v61 = vrot.slane %v12439_v11, 2 }
 0x272   : > { %v4870_v12 = vpop.permute.xlu1 %4869  ;;  %8359 = vrot.lane.b32.xlu0 %v8320_v2, %s12656_s17  ;;  %v5992_v48 = vrot.slane %v12436_v9, 3  ;;  %v695_v53 = vpop.f32.mrb[7].mxu0  ;;  %v6816_v9 = vrot.slane %v12441_v6, 1  ;;  %v6817_v2 = vrot.slane %v12442_v7, 1 }
 0x273   : > { %4909 = vst.msk [vmem:[#allocation2 + $0x40] sm:$0xff] %vm2154_vm6, %v4870_v12  ;;  %v4584_v22 = vpop.permute.xlu0 %4583  ;;  %v809_v12 = vmax.f32 %v701_v37, 0.0  ;;  %v807_v35 = vmax.f32 %v14516_v1, 0.0  ;;  %v8607_v1 = vrot.slane %v12440_v58, 2 }
 0x274   : > { %4622 = vst.msk [vmem:[#allocation2 + $0x48] sm:$0xff] %vm1865_vm5, %v4584_v22  ;;  %v5993_v22 = vsel %vm3684_vm7, %v5991_v21, %v5992_v48  ;;  %v12444_v21 = vld [vmem:[%s12720_s10 + $0x20c] ss:$0 sps:$4 sm:$0x77]   ;;  %v6818_v62 = vsel %vm1302_vm0, %v6816_v9, %v6817_v2 }
 0x275   : > { %6028 = vrot.lane.b32.xlu1 %v5993_v22, %s12657_s18  ;;  %v8608_v18 = vsel %vm1045_vm1, %v8606_v61, %v8607_v1  ;;  %v4266_v22 = vrot.slane %v12444_v21, 3 }
 0x276   : > { %v7601_v23 = vpop.permute.xlu1 %7600 }
 0x277   : > { %7644 = vst.msk [vmem:[#allocation2 + $0x20] sm:$0xff] %vm2154_vm6, %v7601_v23  ;;  %v7315_v50 = vpop.permute.xlu0 %7314  ;;  %v14540_v23 = vld [vmem:[%s15683_s5] ss:$0 sm:$0xff] }
 0x278   : > { %7357 = vst.msk [vmem:[#allocation2 + $0x28] sm:$0xff] %vm1865_vm5, %v7315_v50  ;;  %v704_v44 = vadd.f32 %v14540_v23, %v11636_v33  ;;  %v696_v40 = vadd.f32 %v14540_v23, %v695_v53  ;;  %v3979_v50 = vsel %vm1302_vm0, %v3977_v38, %v3978_v59  ;;  %v11639_v33 = vpop.f32.mrb[8].mxu0  ;;  %v12446_v38 = vld [vmem:[%s12720_s10 + $0x224] ss:$0 sps:$4 sm:$0x11]  }
 0x279   : > { %4013 = vrot.lane.b32.xlu0 %v3979_v50, %s12650_s11  ;;  %8647 = vrot.lane.b32.xlu1 %v8608_v18, %s12657_s18  ;;  %v717_v59 = vadd.f32 %v14540_v23, %v11639_v33  ;;  %v708_v58 = vpop.f32.mrb[9].mxu0  ;;  %v3981_v61 = vrot.slane %v12446_v38, 1  ;;  %v12450_v18 = vld [vmem:[%s12720_s10 + $0x10c] ss:$0 sps:$4 sm:$0x11]  }
 0x27a   : > { %v5158_v17 = vpop.permute.xlu1 %5157  ;;  %v810_v63 = vmax.f32 %v704_v44, 0.0  ;;  %v808_v46 = vmax.f32 %v696_v40, 0.0  ;;  %v12448_v40 = vld [vmem:[%s12720_s10 + $0xf8] ss:$0 sps:$4 sm:$0x33]   ;;  %v14571_v1 = vadd.f32 %v14540_v23, %v708_v58  ;;  %v11640_v33 = vpop.f32.mrb[10].mxu0 }
 0x27b   : > { %5197 = vst.msk [vmem:[#allocation2 + $0x40] sm:$0xff] %vm2331_vm8, %v5158_v17  ;;  %v4872_v41 = vpop.permute.xlu0 %4871  ;;  %v7105_v7 = vrot.slane %v12448_v40, 2  ;;  %v813_v9 = vmax.f32 %v717_v59, 0.0  ;;  %v12454_v59 = vld [vmem:[%s12720_s10 + $0x228] ss:$0 sps:$4 sm:$0x77]   ;;  %v720_v58 = vadd.f32 %v14540_v23, %v11640_v33 }
 0x27c   : > { %4910 = vst.msk [vmem:[#allocation2 + $0x48] sm:$0xff] %vm2154_vm6, %v4872_v41  ;;  %v14551_v17 = vpack.c.bf16 %v810_v63, %v809_v12  ;;  %v12443_v41 = vld [vmem:[%s12720_s10 + $0x204] sm:$0xf8]   ;;  %v12445_v12 = vld [vmem:[%s12720_s10 + $0x21c] sm:$0xfe]   ;;  %v14563_v11 = vpack.c.bf16 %v808_v46, %v807_v35  ;;  %v811_v46 = vmax.f32 %v14571_v1, 0.0 }
 0x27d   : > { %6856 = vrot.lane.b32.xlu0 %v6818_v62, %s12650_s11  ;;  %v3980_v53 = vrot.slane %v12445_v12, 1  ;;  %v12447_v63 = vld [vmem:[%s12720_s10 + $0xf0] sm:$0xfc]   ;;  %v6820_v62 = vrot.slane %v12450_v18, 1  ;;  %v4269_v40 = vrot.slane %v12454_v59, 3 }
 0x27e   : > { %v7889_v32 = vpop.permute.xlu1 %7888  ;;  %v7104_v6 = vrot.slane %v12447_v63, 2  ;;  %v12457_v1 = vld [vmem:[%s12720_s10 + $0x114] ss:$0 sps:$4 sm:$0x33]   ;;  %v12460_v33 = vld [vmem:[%s12720_s10 + $0x364] sm:$0xf8]  }
 0x27f   : > { %7932 = vst.msk [vmem:[#allocation2 + $0x20] sm:$0xff] %vm2331_vm8, %v7889_v32  ;;  %v7603_v37 = vpop.permute.xlu0 %7602  ;;  %v4265_v32 = vrot.slane %v12443_v41, 3  ;;  %v3982_v35 = vsel %vm1302_vm0, %v3980_v53, %v3981_v61  ;;  %v12453_v53 = vld [vmem:[%s12720_s10 + $0x220] sm:$0xf8]  }
 0x280   : > { %7645 = vst.msk [vmem:[#allocation2 + $0x28] sm:$0xff] %vm2154_vm6, %v7603_v37  ;;  %v7106_v41 = vsel %vm1045_vm1, %v7104_v6, %v7105_v7  ;;  %v4268_v63 = vrot.slane %v12453_v53, 3  ;;  %v12461_v53 = vld [vmem:[%s12720_s10 + $0x36c] ss:$0 sps:$4 sm:$0x77]  }
 0x281   : > { %v4267_v37 = vsel %vm3684_vm7, %v4265_v32, %v4266_v22  ;;  %4015 = vrot.lane.b32.xlu0 %v3982_v35, %s12650_s11  ;;  %v12452_v32 = vld [vmem:[%s12720_s10 + $0x350] ss:$0 sps:$4 sm:$0x77]   ;;  %v814_v35 = vmax.f32 %v720_v58, 0.0 }
 0x282   : > { %v5447_v10 = vpop.permute.xlu1 %5446  ;;  %4301 = vrot.lane.b32.xlu1 %v4267_v37, %s12651_s12  ;;  %v12455_v37 = vld [vmem:[%s12720_s10 + $0x2d8] sm:$0xff]   ;;  %v4270_v7 = vsel %vm3684_vm7, %v4268_v63, %v4269_v40  ;;  %v4557_v63 = vrot.slane %v12461_v53, 3  ;;  %v12462_v40 = vld [vmem:[%s12720_s10 + $0x2e0] sm:$0xfe]  }
 0x283   : > { %5486 = vst.msk [vmem:[#allocation2 + $0x40] sm:$0xff] %vm2621_vm13, %v5447_v10  ;;  %v5160_v48 = vpop.permute.xlu0 %5159  ;;  %v12449_v10 = vld [vmem:[%s12720_s10 + $0x104] sm:$0xfe]  }
 0x284   : > { %5198 = vst.msk [vmem:[#allocation2 + $0x48] sm:$0xff] %vm2331_vm8, %v5160_v48  ;;  %v6819_v21 = vrot.slane %v12449_v10, 1  ;;  %v12451_v48 = vld [vmem:[%s12720_s10 + $0x348] sm:$0xf8]  }
 0x285   : > { %v4553_v12 = vrot.slane %v12451_v48, 3  ;;  %v12459_v48 = vld [vmem:[%s12720_s10 + $0x358] ss:$0 sps:$4 sm:$0x11]  }
 0x286   : > { %v8066_v44 = vpop.permute.xlu1 %8065  ;;  %7144 = vrot.lane.b32.xlu1 %v7106_v41, %s12651_s12  ;;  %v6821_v38 = vsel %vm1302_vm0, %v6819_v21, %v6820_v62  ;;  %v12458_v41 = vld [vmem:[%s12720_s10 + $0x350] sm:$0xfe]   ;;  %v14600_v21 = vpack.c.bf16 %v814_v35, %v813_v9  ;;  %v711_v62 = vpop.f32.mrb[11].mxu0  ;;  %v4556_v9 = vrot.slane %v12460_v33, 3 }
 0x287   : > { %8109 = vst.msk [vmem:[#allocation2 + $0x20] sm:$0xff] %vm2621_vm13, %v8066_v44  ;;  %v7891_v50 = vpop.permute.xlu0 %7890  ;;  %v4554_v44 = vrot.slane %v12452_v32, 3  ;;  %6858 = vrot.lane.b32.xlu0 %v6821_v38, %s12650_s11  ;;  %v11643_v38 = vpop.f32.mrb[12].mxu0 }
 0x288   : > { %7933 = vst.msk [vmem:[#allocation2 + $0x28] sm:$0xff] %vm2331_vm8, %v7891_v50  ;;  %v12456_v50 = vld [vmem:[%s12720_s10 + $0x10c] sm:$0xfc]   ;;  %v733_v58 = vadd.f32 %v14540_v23, %v11643_v38  ;;  %v14627_v33 = vpop.f32.mrb[40].mxu1 }
 0x289   : > { %v4555_v61 = vsel %vm3684_vm7, %v4553_v12, %v4554_v44  ;;  %v7107_v18 = vrot.slane %v12456_v50, 2  ;;  %v4841_v12 = vrot.slane %v12458_v41, 1  ;;  %v4842_v44 = vrot.slane %v12459_v48, 1  ;;  %v12463_v50 = vld [vmem:[%s12720_s10 + $0x2e8] ss:$0 sps:$4 sm:$0x11]  }
 0x28a   : > { %v5735_v2 = vpop.permute.xlu1 %5734  ;;  %4589 = vrot.lane.b32.xlu1 %v4555_v61, %s12652_s13  ;;  %v12466_v41 = vld [vmem:[%s12720_s10 + $0x35c] ss:$0 sps:$4 sm:$0x77]   ;;  %v817_v48 = vmax.f32 %v733_v58, 0.0  ;;  %15701 = vst [vmem:[#allocation16_spill] sm:$0xff] %v14627_v33  ;;  %v14631_v53 = vpop.f32.mrb[41].mxu1 }
 0x28b   : > { %5774 = vst.msk [vmem:[#allocation2 + $0x40] sm:$0xff] %vm2910_vm14, %v5735_v2  ;;  %v5449_v22 = vpop.permute.xlu0 %5448  ;;  %4303 = vrot.lane.b32.xlu0 %v4270_v7, %s12651_s12  ;;  %v7108_v2 = vrot.slane %v12457_v1, 2  ;;  %v12464_v1 = vld [vmem:[%s12720_s10 + $0x2f4] sm:$0xff]   ;;  %v4558_v7 = vsel %vm3684_vm7, %v4556_v9, %v4557_v63  ;;  %15702 = vst [vmem:[#allocation17_spill] sm:$0xff] %v14631_v53  ;;  %v12566_v33 = vld [vmem:[%s12720_s10 + $0xfc] sm:$0xff]  }
 0x28c   : > { %5487 = vst.msk [vmem:[#allocation2 + $0x48] sm:$0xff] %vm2621_vm13, %v5449_v22  ;;  %v712_v22 = vadd.f32 %v14540_v23, %v711_v62  ;;  %v12468_v38 = vld [vmem:[%s12720_s10 + $0x374] ss:$0 sps:$4 sm:$0x11]  }
 0x28d   : > { %v7109_v32 = vsel %vm1045_vm1, %v7107_v18, %v7108_v2  ;;  %v7569_v18 = vrot.slane %v12463_v50, 1  ;;  %v12465_v2 = vld [vmem:[%s12720_s10 + $0x354] sm:$0xf8]  }
 0x28e   : > { %v8354_v10 = vpop.permute.xlu1 %8353  ;;  %7320 = vrot.lane.b32.xlu1 %v12455_v37, %s12652_s13  ;;  %v812_v59 = vmax.f32 %v712_v22, 0.0  ;;  %v4843_v37 = vsel %vm1302_vm0, %v4841_v12, %v4842_v44  ;;  %v12467_v12 = vld [vmem:[%s12720_s10 + $0x36c] sm:$0xfe]   ;;  %v724_v22 = vpop.f32.mrb[13].mxu0 }
 0x28f   : > { %v8068_v6 = vpop.permute.xlu0 %8067  ;;  %8397 = vst.msk [vmem:[#allocation2 + $0x20] sm:$0xff] %vm2910_vm14, %v8354_v10  ;;  %7146 = vrot.lane.b32.xlu0 %v7109_v32, %s12651_s12  ;;  %v7568_v10 = vrot.slane %v12462_v40, 1  ;;  %v5130_v32 = vrot.slane %v12466_v41, 3  ;;  %v725_v44 = vadd.f32 %v14540_v23, %v724_v22  ;;  %v11644_v58 = vpop.f32.mrb[14].mxu0  ;;  %v12469_v40 = vld [vmem:[%s12720_s10 + $0x2e8] sm:$0xfc]  }
 0x290   : > { %8110 = vst.msk [vmem:[#allocation2 + $0x28] sm:$0xff] %vm2621_vm13, %v8068_v6  ;;  %v14617_v35 = vpack.c.bf16 %v812_v59, %v811_v46  ;;  %v5129_v46 = vrot.slane %v12465_v2, 3  ;;  %v4844_v59 = vrot.slane %v12467_v12, 1  ;;  %v736_v50 = vadd.f32 %v14540_v23, %v11644_v58 }
 0x291   : > { %v7570_v62 = vsel %vm1302_vm0, %v7568_v10, %v7569_v18  ;;  %v815_v63 = vmax.f32 %v725_v44, 0.0  ;;  %v7856_v10 = vrot.slane %v12469_v40, 2  ;;  %v12471_v18 = vld [vmem:[%s12720_s10 + $0x2fc] sm:$0xfe]  }
 0x292   : > { %v6023_v61 = vpop.permute.xlu1 %6022  ;;  %4877 = vrot.lane.b32.xlu1 %v4843_v37, %s12653_s14  ;;  %v5131_v9 = vsel %vm3684_vm7, %v5129_v46, %v5130_v32  ;;  %v4845_v37 = vrot.slane %v12468_v38, 1  ;;  %v818_v2 = vmax.f32 %v736_v50, 0.0  ;;  %v12472_v46 = vld [vmem:[%s12720_s10 + $0x304] ss:$0 sps:$4 sm:$0x11]   ;;  %v727_v32 = vpop.f32.mrb[15].mxu0 }
 0x293   : > { %6062 = vst.msk [vmem:[#allocation2 + $0x40] sm:$0xff] %vm3087_vm15, %v6023_v61  ;;  %4591 = vrot.lane.b32.xlu0 %v4558_v7, %s12652_s13  ;;  %v14640_v7 = vpop.f32.mrb[42].mxu1  ;;  %v7571_v22 = vrot.slane %v12471_v18, 1  ;;  %v728_v44 = vadd.f32 %v14540_v23, %v727_v32  ;;  %v7572_v58 = vrot.slane %v12472_v46, 1  ;;  %v12477_v32 = vld [vmem:[%s12720_s10 + $0x4d0] sm:$0xff]  }
 0x294   : > { %15703 = vst [vmem:[#allocation18_spill] sm:$0xff] %v14640_v7  ;;  %v14646_v12 = vpop.f32.mrb[43].mxu1  ;;  %v14649_v38 = vpack.c.bf16 %v818_v2, %v817_v48  ;;  %v12486_v7 = vld [vmem:[%s12720_s10 + $0x4d8] sm:$0xfe]  }
 0x295   : > { %15704 = vst [vmem:[#allocation19_spill] sm:$0xff] %v14646_v12  ;;  %v816_v50 = vmax.f32 %v728_v44, 0.0  ;;  %v7573_v23 = vsel %vm1302_vm0, %v7571_v22, %v7572_v58  ;;  %v12482_v12 = vld [vmem:[%s12720_s10 + $0x4b4] sm:$0xf8]  }
 0x296   : > { %7608 = vrot.lane.b32.xlu1 %v7570_v62, %s12653_s14 }
 0x297   : > { %7322 = vrot.lane.b32.xlu0 %v12464_v1, %s12652_s13  ;;  %v4846_v1 = vsel %vm1302_vm0, %v4844_v59, %v4845_v37  ;;  %v12473_v37 = vld [vmem:[%s12720_s10 + $0x498] sm:$0xf8]   ;;  %v14667_v18 = vpack.c.bf16 %v816_v50, %v815_v63 }
 0x298   : > { %v5418_v48 = vrot.slane %v12473_v37, 3  ;;  %v12478_v37 = vld [vmem:[%s12720_s10 + $0x304] sm:$0xfc]  }
 0x29a   : > { %v5737_v6 = vpop.permute.xlu0 %5736  ;;  %v8642_v61 = vpop.permute.xlu1 %8641  ;;  %5165 = vrot.lane.b32.xlu1 %v5131_v9, %s12654_s15 }
 0x29b   : > { %5775 = vst.msk [vmem:[#allocation2 + $0x48] sm:$0xff] %vm2910_vm14, %v5737_v6  ;;  %v12470_v6 = vld [vmem:[%s12720_s10 + $0x2f0] ss:$0 sps:$4 sm:$0x33]   ;;  %4879 = vrot.lane.b32.xlu0 %v4846_v1, %s12653_s14  ;;  %v14652_v9 = vpop.f32.mrb[16].mxu0 }
 0x29c   : > { %8685 = vst.msk [vmem:[#allocation2 + $0x20] sm:$0xff] %vm3087_vm15, %v8642_v61  ;;  %v7857_v62 = vrot.slane %v12470_v6, 2  ;;  %v14655_v61 = vpop.f32.mrb[17].mxu0  ;;  %v12474_v6 = vld [vmem:[%s12720_s10 + $0x4a0] ss:$0 sps:$4 sm:$0x77]  }
 0x29d   : > { %v14662_v1 = vpop.f32.mrb[18].mxu0  ;;  %v5419_v2 = vrot.slane %v12474_v6, 3  ;;  %v7859_v6 = vrot.slane %v12478_v37, 2 }
 0x29e   : > { %v7858_v59 = vsel %vm1045_vm1, %v7856_v10, %v7857_v62  ;;  %v6025_v40 = vpop.permute.xlu1 %6024  ;;  %v12476_v62 = vld [vmem:[%s12720_s10 + $0x378] ss:$0 sps:$4 sm:$0x77]   ;;  %v14671_v46 = vpop.f32.mrb[19].mxu0 }
 0x29f   : > { %7896 = vrot.lane.b32.xlu1 %v7858_v59, %s12654_s15  ;;  %6063 = vst.msk [vmem:[#allocation2 + $0x48] sm:$0xff] %vm3087_vm15, %v6025_v40  ;;  %7610 = vrot.lane.b32.xlu0 %v7573_v23, %s12653_s14  ;;  %v5420_v22 = vsel %vm3684_vm7, %v5418_v48, %v5419_v2  ;;  %v5133_v59 = vrot.slane %v12476_v62, 3  ;;  %v12479_v40 = vld [vmem:[%s12720_s10 + $0x30c] ss:$0 sps:$4 sm:$0x33]   ;;  %v6078_v48 = vld [vmem:[#allocation2 + $0x40] sm:$0xff] }
 0x2a0   : > { %v12480_v23 = vld [vmem:[%s12720_s10 + $0x4a0] sm:$0xfe]   ;;  %v7860_v2 = vrot.slane %v12479_v40, 2  ;;  %11729 = vmatprep.mubr.msk.bf16.mxu0 %vm3165_vm10, %v6078_v48 }
 0x2a1   : > { %v5706_v62 = vrot.slane %v12480_v23, 1  ;;  %v12484_v48 = vld [vmem:[%s12720_s10 + $0x1c0] sm:$0xf8]  }
 0x2a2   : > { %v8644_v58 = vpop.permute.xlu1 %8643 }
 0x2a3   : > { %5454 = vrot.lane.b32.xlu1 %v5420_v22, %s12655_s16  ;;  %v12489_v22 = vld [vmem:[%s12720_s10 + $0xa8] sm:$0xff]  }
 0x2a4   : > { %v8356_v41 = vpop.permute.xlu0 %8355  ;;  %6606 = vst.msk [vmem:[#allocation2 + $0x30] sm:$0xff] %vm589_vm2, %v12489_v22  ;;  %v3715_v22 = vrot.slane %v12484_v48, 3 }
 0x2a5   : > { %8398 = vst.msk [vmem:[#allocation2 + $0x28] sm:$0xff] %vm2910_vm14, %v8356_v41  ;;  %v12475_v41 = vld [vmem:[%s12720_s10 + $0x370] sm:$0xf8]  }
 0x2a6   : > { %v5132_v44 = vrot.slane %v12475_v41, 3  ;;  %8686 = vst.msk [vmem:[#allocation2 + $0x28] sm:$0xff] %vm3087_vm15, %v8644_v58  ;;  %v12481_v41 = vld [vmem:[%s12720_s10 + $0x4a8] ss:$0 sps:$4 sm:$0x11]  }
 0x2a7   : > { %8073 = vrot.lane.b32.xlu1 %v12477_v32, %s12655_s16  ;;  %v5707_v58 = vrot.slane %v12481_v41, 1  ;;  %v5421_v32 = vrot.slane %v12482_v12, 3  ;;  %v8701_v41 = vld [vmem:[#allocation2 + $0x20] sm:$0xff]  ;;  %v6079_v12 = vld [vmem:[#allocation2 + $0x48] sm:$0xff] }
 0x2a8   : > { %v14664_v10 = vpop.permute.xlu0 %4009  ;;  %v5134_v63 = vsel %vm3684_vm7, %v5132_v44, %v5133_v59  ;;  %v4298_v44 = vpop.permute.xlu1 %4297  ;;  %v7861_v59 = vsel %vm1045_vm1, %v7859_v6, %v7860_v2  ;;  %v12485_v6 = vld [vmem:[%s12720_s10 + $0x1c8] ss:$0 sps:$4 sm:$0x77]   ;;  %v12488_v2 = vld [vmem:[%s12720_s10 + $0x4ec] sm:$0xff]   ;;  %11763 = vmatprep.mubr.msk.bf16.mxu1 %vm3165_vm10, %v8701_v41  ;;  %11730 = vmatmul.mubr.msk.bf16.gmra.mrb[32].mxu0 %vm3165_vm10, %v6079_v12  ;;  %6609 = vst.msk [vmem:[#allocation2 + $0x48] sm:$0xff] %vm589_vm2, %v12566_v33 }
 0x2a9   : > { %5167 = vrot.lane.b32.xlu0 %v5134_v63, %s12654_s15  ;;  %v12483_v63 = vld [vmem:[%s12720_s10 + $0x4bc] ss:$0 sps:$4 sm:$0x77]   ;;  %v5708_v40 = vsel %vm1302_vm0, %v5706_v62, %v5707_v58  ;;  %v12487_v62 = vld [vmem:[%s12720_s10 + $0x4e0] ss:$0 sps:$4 sm:$0x11]  }
 0x2aa   : > { %v5422_v23 = vrot.slane %v12483_v63, 3  ;;  %v8321_v58 = vrot.slane %v12486_v7, 1  ;;  %v12500_v63 = vld [vmem:[%s12720_s10 + $0xc4] sm:$0xff]   ;;  %v12521_v33 = vld [vmem:[%s12720_s10 + $0x310] sm:$0xff]  }
 0x2ab   : > { %5742 = vrot.lane.b32.xlu1 %v5708_v40, %s12656_s17  ;;  %v12490_v41 = vld [vmem:[%s12720_s10 + $0x4a4] sm:$0xf8]   ;;  %6607 = vst.msk [vmem:[#allocation2 + $0x38] sm:$0xff] %vm589_vm2, %v12500_v63 }
 0x2ac   : > { %v6853_v50 = vpop.permute.xlu0 %6852 }
 0x2ad   : > { %7898 = vrot.lane.b32.xlu0 %v7861_v59, %s12654_s15  ;;  %6894 = vst.msk [vmem:[#allocation2 + $0x30] sm:$0xff] %vm1399_vm3, %v6853_v50  ;;  %v5423_v59 = vsel %vm3684_vm7, %v5421_v32, %v5422_v23  ;;  %v3716_v50 = vrot.slane %v12485_v6, 3  ;;  %v8322_v23 = vrot.slane %v12487_v62, 1  ;;  %v8702_v48 = vld [vmem:[#allocation2 + $0x28] sm:$0xff]  ;;  %v12492_v62 = vld [vmem:[%s12720_s10 + $0x4bc] sm:$0xfe]  }
 0x2ae   : > { %11764 = vmatmul.mubr.msk.bf16.gmra.mrb[56].mxu1 %vm3165_vm10, %v8702_v48  ;;  %v12491_v6 = vld [vmem:[%s12720_s10 + $0x4ac] ss:$0 sps:$4 sm:$0x77]  }
 0x2af   : > { %v3717_v32 = vsel %vm3684_vm7, %v3715_v22, %v3716_v50  ;;  %v8323_v7 = vsel %vm1302_vm0, %v8321_v58, %v8322_v23  ;;  %v5994_v22 = vrot.slane %v12490_v41, 3  ;;  %v12493_v58 = vld [vmem:[%s12720_s10 + $0x4c4] ss:$0 sps:$4 sm:$0x11]   ;;  %v12494_v23 = vld [vmem:[%s12720_s10 + $0x1dc] sm:$0xf8]  }
 0x2b0   : > { %v14691_v37 = vpop.permute.xlu0 %4011  ;;  %3759 = vst.msk [vmem:[#allocation2 + $0x50] sm:$0xff] %vm589_vm2, %v3717_v32  ;;  %8361 = vrot.lane.b32.xlu1 %v8323_v7, %s12656_s17  ;;  %v5710_v32 = vrot.slane %v12493_v58, 1 }
 0x2b1   : > { %v7141_v53 = vpop.permute.xlu1 %7140  ;;  %5456 = vrot.lane.b32.xlu0 %v5423_v59, %s12655_s16  ;;  %4047 = vst.msk [vmem:[#allocation2 + $0x50] sm:$0xff] %vm1399_vm3, %v14664_v10  ;;  %v14718_v59 = vpop.f32.mrb[44].mxu1  ;;  %v5995_v10 = vrot.slane %v12491_v6, 3  ;;  %v12496_v6 = vld [vmem:[%s12720_s10 + $0x4e0] sm:$0xfc]  }
 0x2b2   : > { %7182 = vst.msk [vmem:[#allocation2 + $0x30] sm:$0xff] %vm1576_vm4, %v7141_v53  ;;  %15705 = vst [vmem:[#allocation20_spill] sm:$0xff] %v14718_v59  ;;  %v14722_v50 = vpop.f32.mrb[45].mxu1  ;;  %v12511_v59 = vld [vmem:[%s12720_s10 + $0x254] sm:$0xfe]  }
 0x2b3   : > { %4335 = vst.msk [vmem:[#allocation2 + $0x50] sm:$0xff] %vm1576_vm4, %v4298_v44  ;;  %15706 = vst [vmem:[#allocation21_spill] sm:$0xff] %v14722_v50  ;;  %v5996_v63 = vsel %vm3684_vm7, %v5994_v22, %v5995_v10  ;;  %v12495_v44 = vld [vmem:[%s12720_s10 + $0x1e4] ss:$0 sps:$4 sm:$0x77]   ;;  %v14732_v41 = vpop.f32.mrb[46].mxu1 }
 0x2b4   : > { %v6855_v40 = vpop.permute.xlu0 %6854  ;;  %6030 = vrot.lane.b32.xlu1 %v5996_v63, %s12657_s18  ;;  %15707 = vst [vmem:[#allocation22_spill] sm:$0xff] %v14732_v41  ;;  %v14737_v22 = vpop.f32.mrb[47].mxu1  ;;  %v3719_v10 = vrot.slane %v12495_v44, 3  ;;  %v12499_v50 = vld [vmem:[%s12720_s10 + $0x4fc] ss:$0 sps:$4 sm:$0x11]  }
 0x2b5   : > { %8075 = vrot.lane.b32.xlu0 %v12488_v2, %s12655_s16  ;;  %6895 = vst.msk [vmem:[#allocation2 + $0x38] sm:$0xff] %vm1399_vm3, %v6855_v40  ;;  %v5709_v40 = vrot.slane %v12492_v62, 1  ;;  %15708 = vst [vmem:[#allocation23_spill] sm:$0xff] %v14737_v22  ;;  %v12497_v62 = vld [vmem:[%s12720_s10 + $0x4e8] ss:$0 sps:$4 sm:$0x33]  }
 0x2b6   : > { %v4586_v53 = vpop.permute.xlu1 %4585  ;;  %v14742_v63 = vpop.f32.mrb[20].mxu0  ;;  %v12501_v22 = vld [vmem:[%s12720_s10 + $0x4c0] sm:$0xf8]  }
 0x2b7   : > { %4623 = vst.msk [vmem:[#allocation2 + $0x50] sm:$0xff] %vm1865_vm5, %v4586_v53  ;;  %v5711_v7 = vsel %vm1302_vm0, %v5709_v40, %v5710_v32  ;;  %v3718_v53 = vrot.slane %v12494_v23, 3  ;;  %v8610_v32 = vrot.slane %v12497_v62, 2  ;;  %v12498_v23 = vld [vmem:[%s12720_s10 + $0x4f4] sm:$0xfe]  }
 0x2b8   : > { %v4300_v12 = vpop.permute.xlu0 %4299  ;;  %v12509_v41 = vld [vmem:[%s12720_s10 + $0x23c] sm:$0xf8]  }
 0x2b9   : > { %5744 = vrot.lane.b32.xlu0 %v5711_v7, %s12656_s17  ;;  %v3720_v40 = vsel %vm3684_vm7, %v3718_v53, %v3719_v10  ;;  %v8324_v7 = vrot.slane %v12498_v23, 1  ;;  %v12502_v53 = vld [vmem:[%s12720_s10 + $0x4c8] ss:$0 sps:$4 sm:$0x77]   ;;  %v14756_v10 = vpop.f32.mrb[21].mxu0 }
 0x2ba   : > { %v7317_v2 = vpop.permute.xlu1 %7316  ;;  %3760 = vst.msk [vmem:[#allocation2 + $0x58] sm:$0xff] %vm589_vm2, %v3720_v40  ;;  %v12503_v40 = vld [vmem:[%s12720_s10 + $0x238] sm:$0xfe]  }
 0x2bb   : > { %7358 = vst.msk [vmem:[#allocation2 + $0x30] sm:$0xff] %vm1865_vm5, %v7317_v2  ;;  %v8609_v2 = vrot.slane %v12496_v6, 2  ;;  %v8325_v6 = vrot.slane %v12499_v50, 1  ;;  %v5997_v50 = vrot.slane %v12501_v22, 3 }
 0x2bc   : > { %v7143_v48 = vpop.permute.xlu0 %7142  ;;  %4048 = vst.msk [vmem:[#allocation2 + $0x58] sm:$0xff] %vm1399_vm3, %v14691_v37  ;;  %v12506_v22 = vld [vmem:[%s12720_s10 + $0x504] ss:$0 sps:$4 sm:$0x33]  }
 0x2bd   : > { %7183 = vst.msk [vmem:[#allocation2 + $0x38] sm:$0xff] %vm1576_vm4, %v7143_v48  ;;  %v8611_v44 = vsel %vm1045_vm1, %v8609_v2, %v8610_v32  ;;  %4336 = vst.msk [vmem:[#allocation2 + $0x58] sm:$0xff] %vm1576_vm4, %v4300_v12  ;;  %v8326_v37 = vsel %vm1302_vm0, %v8324_v7, %v8325_v6  ;;  %v5998_v2 = vrot.slane %v12502_v53, 3  ;;  %v12504_v32 = vld [vmem:[%s12720_s10 + $0x240] ss:$0 sps:$4 sm:$0x11]  }
 0x2be   : > { %v4874_v58 = vpop.permute.xlu1 %4873  ;;  %8649 = vrot.lane.b32.xlu1 %v8611_v44, %s12657_s18  ;;  %8363 = vrot.lane.b32.xlu0 %v8326_v37, %s12656_s17  ;;  %v3983_v44 = vrot.slane %v12503_v40, 1  ;;  %v3984_v7 = vrot.slane %v12504_v32, 1  ;;  %v12508_v40 = vld [vmem:[%s12720_s10 + $0x128] ss:$0 sps:$4 sm:$0x11]  }
 0x2bf   : > { %4911 = vst.msk [vmem:[#allocation2 + $0x50] sm:$0xff] %vm2154_vm6, %v4874_v58  ;;  %v5999_v23 = vsel %vm3684_vm7, %v5997_v50, %v5998_v2  ;;  %v8613_v50 = vrot.slane %v12506_v22, 2  ;;  %v12507_v2 = vld [vmem:[%s12720_s10 + $0x120] sm:$0xfe]   ;;  %v4271_v22 = vrot.slane %v12509_v41, 3 }
 0x2c0   : > { %v4588_v48 = vpop.permute.xlu0 %4587 }
 0x2c1   : > { %4624 = vst.msk [vmem:[#allocation2 + $0x58] sm:$0xff] %vm1865_vm5, %v4588_v48  ;;  %v14767_v48 = vpop.f32.mrb[22].mxu0 }
 0x2c2   : > { %v7605_v58 = vpop.permute.xlu1 %7604  ;;  %6032 = vrot.lane.b32.xlu1 %v5999_v23, %s12657_s18  ;;  %v14772_v37 = vpop.f32.mrb[23].mxu0  ;;  %v6822_v23 = vrot.slane %v12507_v2, 1  ;;  %v3986_v2 = vrot.slane %v12511_v59, 1 }
 0x2c3   : > { %7646 = vst.msk [vmem:[#allocation2 + $0x30] sm:$0xff] %vm2154_vm6, %v7605_v58  ;;  %v12505_v58 = vld [vmem:[%s12720_s10 + $0x4fc] sm:$0xfc]  }
 0x2c4   : > { %v7319_v62 = vpop.permute.xlu0 %7318  ;;  %v8612_v53 = vrot.slane %v12505_v58, 2  ;;  %v6823_v58 = vrot.slane %v12508_v40, 1 }
 0x2c5   : > { %7359 = vst.msk [vmem:[#allocation2 + $0x38] sm:$0xff] %vm1865_vm5, %v7319_v62  ;;  %v3985_v62 = vsel %vm1302_vm0, %v3983_v44, %v3984_v7  ;;  %v12510_v44 = vld [vmem:[%s12720_s10 + $0x244] ss:$0 sps:$4 sm:$0x77]  }
 0x2c6   : > { %v5162_v12 = vpop.permute.xlu1 %5161  ;;  %4017 = vrot.lane.b32.xlu0 %v3985_v62, %s12650_s11  ;;  %v8614_v32 = vsel %vm1045_vm1, %v8612_v53, %v8613_v50  ;;  %v6824_v7 = vsel %vm1302_vm0, %v6822_v23, %v6823_v58  ;;  %v4272_v62 = vrot.slane %v12510_v44, 3  ;;  %v12512_v53 = vld [vmem:[%s12720_s10 + $0x25c] ss:$0 sps:$4 sm:$0x11]   ;;  %v12515_v44 = vld [vmem:[%s12720_s10 + $0x13c] sm:$0xfe]  }
 0x2c7   : > { %5199 = vst.msk [vmem:[#allocation2 + $0x50] sm:$0xff] %vm2331_vm8, %v5162_v12  ;;  %8651 = vrot.lane.b32.xlu1 %v8614_v32, %s12657_s18  ;;  %v12513_v32 = vld [vmem:[%s12720_s10 + $0x128] sm:$0xfc]  }
 0x2c8   : > { %v4876_v6 = vpop.permute.xlu0 %4875  ;;  %v4273_v40 = vsel %vm3684_vm7, %v4271_v22, %v4272_v62  ;;  %v7110_v58 = vrot.slane %v12513_v32, 2  ;;  %v12516_v22 = vld [vmem:[%s12720_s10 + $0x144] ss:$0 sps:$4 sm:$0x11]  }
 0x2c9   : > { %4912 = vst.msk [vmem:[#allocation2 + $0x58] sm:$0xff] %vm2154_vm6, %v4876_v6  ;;  %v12555_v62 = vld [vmem:[%s12720_s10 + $0xe0] sm:$0xff]  }
 0x2ca   : > { %v7893_v12 = vpop.permute.xlu1 %7892  ;;  %6860 = vrot.lane.b32.xlu0 %v6824_v7, %s12650_s11  ;;  %6608 = vst.msk [vmem:[#allocation2 + $0x40] sm:$0xff] %vm589_vm2, %v12555_v62 }
 0x2cb   : > { %7934 = vst.msk [vmem:[#allocation2 + $0x30] sm:$0xff] %vm2331_vm8, %v7893_v12  ;;  %v3987_v12 = vrot.slane %v12512_v53, 1  ;;  %4305 = vrot.lane.b32.xlu1 %v4273_v40, %s12651_s12  ;;  %v12517_v40 = vld [vmem:[%s12720_s10 + $0x380] sm:$0xf8]  }
 0x2cc   : > { %v7607_v6 = vpop.permute.xlu0 %7606  ;;  %v4559_v32 = vrot.slane %v12517_v40, 3  ;;  %v12523_v40 = vld [vmem:[%s12720_s10 + $0x14c] ss:$0 sps:$4 sm:$0x33]  }
 0x2cd   : > { %7647 = vst.msk [vmem:[#allocation2 + $0x38] sm:$0xff] %vm2154_vm6, %v7607_v6  ;;  %v12514_v6 = vld [vmem:[%s12720_s10 + $0x130] ss:$0 sps:$4 sm:$0x33]   ;;  %v3988_v41 = vsel %vm1302_vm0, %v3986_v2, %v3987_v12  ;;  %v6826_v2 = vrot.slane %v12516_v22, 1 }
 0x2ce   : > { %v5451_v50 = vpop.permute.xlu1 %5450  ;;  %v7111_v59 = vrot.slane %v12514_v6, 2  ;;  %4019 = vrot.lane.b32.xlu0 %v3988_v41, %s12650_s11  ;;  %v12518_v12 = vld [vmem:[%s12720_s10 + $0x388] ss:$0 sps:$4 sm:$0x77]  }
 0x2cf   : > { %5488 = vst.msk [vmem:[#allocation2 + $0x50] sm:$0xff] %vm2621_vm13, %v5451_v50  ;;  %v6825_v50 = vrot.slane %v12515_v44, 1  ;;  %v12520_v44 = vld [vmem:[%s12720_s10 + $0x260] ss:$0 sps:$4 sm:$0x77]  }
 0x2d0   : > { %v5164_v23 = vpop.permute.xlu0 %5163  ;;  %v7112_v53 = vsel %vm1045_vm1, %v7110_v58, %v7111_v59  ;;  %v4560_v58 = vrot.slane %v12518_v12, 3  ;;  %v12519_v59 = vld [vmem:[%s12720_s10 + $0x258] sm:$0xf8]   ;;  %v7114_v12 = vrot.slane %v12523_v40, 2 }
 0x2d1   : > { %5200 = vst.msk [vmem:[#allocation2 + $0x58] sm:$0xff] %vm2331_vm8, %v5164_v23  ;;  %7148 = vrot.lane.b32.xlu1 %v7112_v53, %s12651_s12  ;;  %v6827_v41 = vsel %vm1302_vm0, %v6825_v50, %v6826_v2  ;;  %v4274_v62 = vrot.slane %v12519_v59, 3  ;;  %v4275_v53 = vrot.slane %v12520_v44, 3  ;;  %v12522_v50 = vld [vmem:[%s12720_s10 + $0x144] sm:$0xfc]  }
 0x2d2   : > { %v8070_v7 = vpop.permute.xlu1 %8069  ;;  %6862 = vrot.lane.b32.xlu0 %v6827_v41, %s12650_s11  ;;  %v4561_v22 = vsel %vm3684_vm7, %v4559_v32, %v4560_v58  ;;  %v7113_v2 = vrot.slane %v12522_v50, 2  ;;  %v12525_v32 = vld [vmem:[%s12720_s10 + $0x390] ss:$0 sps:$4 sm:$0x11]  }
 0x2d3   : > { %8111 = vst.msk [vmem:[#allocation2 + $0x30] sm:$0xff] %vm2621_vm13, %v8070_v7  ;;  %v12527_v50 = vld [vmem:[%s12720_s10 + $0x3a4] ss:$0 sps:$4 sm:$0x77]  }
 0x2d4   : > { %v7895_v23 = vpop.permute.xlu0 %7894  ;;  %v7115_v44 = vsel %vm1045_vm1, %v7113_v2, %v7114_v12  ;;  %v12528_v2 = vld [vmem:[%s12720_s10 + $0x318] sm:$0xfe]   ;;  %v12529_v12 = vld [vmem:[%s12720_s10 + $0x320] ss:$0 sps:$4 sm:$0x11]  }
 0x2d5   : > { %7935 = vst.msk [vmem:[#allocation2 + $0x38] sm:$0xff] %vm2331_vm8, %v7895_v23  ;;  %4593 = vrot.lane.b32.xlu1 %v4561_v22, %s12652_s13  ;;  %v4276_v23 = vsel %vm3684_vm7, %v4274_v62, %v4275_v53  ;;  %v12526_v22 = vld [vmem:[%s12720_s10 + $0x39c] sm:$0xf8]   ;;  %v4848_v53 = vrot.slane %v12525_v32, 1 }
 0x2d6   : > { %v5739_v6 = vpop.permute.xlu1 %5738  ;;  %4307 = vrot.lane.b32.xlu0 %v4276_v23, %s12651_s12  ;;  %v4562_v40 = vrot.slane %v12526_v22, 3  ;;  %v7575_v22 = vrot.slane %v12529_v12, 1 }
 0x2d7   : > { %5776 = vst.msk [vmem:[#allocation2 + $0x50] sm:$0xff] %vm2910_vm14, %v5739_v6  ;;  %v12524_v6 = vld [vmem:[%s12720_s10 + $0x388] sm:$0xfe]  }
 0x2d8   : > { %v5453_v7 = vpop.permute.xlu0 %5452 }
 0x2d9   : > { %5489 = vst.msk [vmem:[#allocation2 + $0x58] sm:$0xff] %vm2621_vm13, %v5453_v7  ;;  %7324 = vrot.lane.b32.xlu1 %v12521_v33, %s12652_s13  ;;  %v4847_v7 = vrot.slane %v12524_v6, 1 }
 0x2da   : > { %v8358_v58 = vpop.permute.xlu1 %8357  ;;  %7150 = vrot.lane.b32.xlu0 %v7115_v44, %s12651_s12  ;;  %v7574_v44 = vrot.slane %v12528_v2, 1 }
 0x2db   : > { %8399 = vst.msk [vmem:[#allocation2 + $0x30] sm:$0xff] %vm2910_vm14, %v8358_v58  ;;  %v4849_v33 = vsel %vm1302_vm0, %v4847_v7, %v4848_v53  ;;  %v12530_v58 = vld [vmem:[%s12720_s10 + $0x32c] sm:$0xff]   ;;  %v12532_v53 = vld [vmem:[%s12720_s10 + $0x394] ss:$0 sps:$4 sm:$0x77]  }
 0x2dc   : > { %v8072_v41 = vpop.permute.xlu0 %8071  ;;  %v12531_v7 = vld [vmem:[%s12720_s10 + $0x38c] sm:$0xf8]   ;;  %v5136_v56 = vrot.slane %v12532_v53, 3 }
 0x2dd   : > { %8112 = vst.msk [vmem:[#allocation2 + $0x38] sm:$0xff] %vm2621_vm13, %v8072_v41  ;;  %v4563_v41 = vrot.slane %v12527_v50, 3  ;;  %4881 = vrot.lane.b32.xlu1 %v4849_v33, %s12653_s14  ;;  %v7576_v33 = vsel %vm1302_vm0, %v7574_v44, %v7575_v22 }
 0x2de   : > { %v6027_v6 = vpop.permute.xlu1 %6026 }
 0x2df   : > { %6064 = vst.msk [vmem:[#allocation2 + $0x50] sm:$0xff] %vm3087_vm15, %v6027_v6  ;;  %v4564_v32 = vsel %vm3684_vm7, %v4562_v40, %v4563_v41  ;;  %v5135_v6 = vrot.slane %v12531_v7, 3  ;;  %v12533_v40 = vld [vmem:[%s12720_s10 + $0x3a4] sm:$0xfe]  }
 0x2e0   : > { %v5741_v34 = vpop.permute.xlu0 %5740  ;;  %4595 = vrot.lane.b32.xlu0 %v4564_v32, %s12652_s13  ;;  %v12534_v41 = vld [vmem:[%s12720_s10 + $0x3ac] ss:$0 sps:$4 sm:$0x11]   ;;  %v4850_v12 = vrot.slane %v12533_v40, 1  ;;  %v12535_v32 = vld [vmem:[%s12720_s10 + $0x320] sm:$0xfc]  }
 0x2e1   : > { %5777 = vst.msk [vmem:[#allocation2 + $0x58] sm:$0xff] %vm2910_vm14, %v5741_v34  ;;  %7612 = vrot.lane.b32.xlu1 %v7576_v33, %s12653_s14  ;;  %v5137_v2 = vsel %vm3684_vm7, %v5135_v6, %v5136_v56  ;;  %v4851_v34 = vrot.slane %v12534_v41, 1  ;;  %v7862_v44 = vrot.slane %v12535_v32, 2  ;;  %v7863_v33 = vrot.slane %v12536_v8, 2  ;;  %v12539_v41 = vld [vmem:[%s12720_s10 + $0x4d0] sm:$0xf8]  }
 0x2e2   : > { %v8646_v16 = vpop.permute.xlu1 %8645  ;;  %v12538_v56 = vld [vmem:[%s12720_s10 + $0x33c] ss:$0 sps:$4 sm:$0x11]   ;;  %v12540_v8 = vld [vmem:[%s12720_s10 + $0x4d8] ss:$0 sps:$4 sm:$0x77]  }
 0x2e3   : > { %8687 = vst.msk [vmem:[#allocation2 + $0x30] sm:$0xff] %vm3087_vm15, %v8646_v16  ;;  %v4852_v53 = vsel %vm1302_vm0, %v4850_v12, %v4851_v34  ;;  %v7864_v16 = vsel %vm1045_vm1, %v7862_v44, %v7863_v33  ;;  %v7578_v40 = vrot.slane %v12538_v56, 1  ;;  %v5424_v32 = vrot.slane %v12539_v41, 3  ;;  %v12541_v34 = vld [vmem:[%s12720_s10 + $0x3a8] sm:$0xf8]  }
 0x2e4   : > { %7326 = vrot.lane.b32.xlu0 %v12530_v58, %s12652_s13  ;;  %v8360_v22 = vpop.permute.xlu0 %8359  ;;  %v12537_v58 = vld [vmem:[%s12720_s10 + $0x334] sm:$0xfe]   ;;  %v5425_v44 = vrot.slane %v12540_v8, 3  ;;  %v12544_v41 = vld [vmem:[%s12720_s10 + $0x33c] sm:$0xfc]  }
 0x2e5   : > { %5169 = vrot.lane.b32.xlu1 %v5137_v2, %s12654_s15  ;;  %8400 = vst.msk [vmem:[#allocation2 + $0x38] sm:$0xff] %vm2910_vm14, %v8360_v22  ;;  %v7577_v6 = vrot.slane %v12537_v58, 1  ;;  %v12542_v22 = vld [vmem:[%s12720_s10 + $0x3b0] ss:$0 sps:$4 sm:$0x77]  }
 0x2e6   : > { %v6080_v7 = vld [vmem:[#allocation2 + $0x50] sm:$0xff]  ;;  %v5426_v58 = vsel %vm3684_vm7, %v5424_v32, %v5425_v44  ;;  %v5139_v56 = vrot.slane %v12542_v22, 3  ;;  %v7865_v32 = vrot.slane %v12544_v41, 2  ;;  %v12546_v44 = vld [vmem:[%s12720_s10 + $0x4d8] sm:$0xfe]  }
 0x2e7   : > { %11733 = vmatprep.mubr.msk.bf16.mxu0 %vm3165_vm10, %v6080_v7  ;;  %v6029_v2 = vpop.permute.xlu1 %6028  ;;  %v7579_v12 = vsel %vm1302_vm0, %v7577_v6, %v7578_v40  ;;  %v12619_v6 = vld [vmem:[%s12720_s10 + $0x118] sm:$0xff]   ;;  %v12543_v40 = vld [vmem:[%s12720_s10 + $0x508] sm:$0xff]   ;;  %v12547_v22 = vld [vmem:[%s12720_s10 + $0x4e0] ss:$0 sps:$4 sm:$0x11]  }
 0x2e8   : > { %4883 = vrot.lane.b32.xlu0 %v4852_v53, %s12653_s14  ;;  %6065 = vst.msk [vmem:[#allocation2 + $0x58] sm:$0xff] %vm3087_vm15, %v6029_v2  ;;  %v5138_v53 = vrot.slane %v12541_v34, 3  ;;  %v12545_v2 = vld [vmem:[%s12720_s10 + $0x344] ss:$0 sps:$4 sm:$0x33]  }
 0x2e9   : > { %v14824_v59 = vpop.f32.mrb[24].mxu0  ;;  %7900 = vrot.lane.b32.xlu1 %v7864_v16, %s12654_s15  ;;  %6610 = vst.msk [vmem:[#allocation2 + $0x50] sm:$0xff] %vm589_vm2, %v12619_v6  ;;  %v7866_v34 = vrot.slane %v12545_v2, 2  ;;  %v5713_v6 = vrot.slane %v12547_v22, 1 }
 0x2ea   : > { %v14830_v62 = vpop.f32.mrb[25].mxu0  ;;  %v8703_v33 = vld [vmem:[#allocation2 + $0x30] sm:$0xff]  ;;  %v5140_v8 = vsel %vm3684_vm7, %v5138_v53, %v5139_v56 }
 0x2eb   : > { %v14834_v23 = vpop.f32.mrb[26].mxu0  ;;  %v4014_v7 = vpop.permute.xlu0 %4013  ;;  %11767 = vmatprep.mubr.msk.bf16.mxu1 %vm3165_vm10, %v8703_v33  ;;  %v7867_v53 = vsel %vm1045_vm1, %v7865_v32, %v7866_v34  ;;  %v12548_v56 = vld [vmem:[%s12720_s10 + $0x4ec] sm:$0xf8]   ;;  %v12549_v41 = vld [vmem:[%s12720_s10 + $0x4f4] ss:$0 sps:$4 sm:$0x77]  }
 0x2ec   : > { %v14847_v50 = vpop.f32.mrb[27].mxu0  ;;  %7614 = vrot.lane.b32.xlu0 %v7579_v12, %s12653_s14  ;;  %v8648_v16 = vpop.permute.xlu1 %8647  ;;  %v5427_v2 = vrot.slane %v12548_v56, 3  ;;  %v5428_v36 = vrot.slane %v12549_v41, 3  ;;  %v12550_v32 = vld [vmem:[%s12720_s10 + $0x1f8] sm:$0xf8]  }
 0x2ed   : > { %15709 = vst [vmem:[#allocation24_spill] sm:$0xff] %v14847_v50  ;;  %5458 = vrot.lane.b32.xlu1 %v5426_v58, %s12655_s16  ;;  %8688 = vst.msk [vmem:[#allocation2 + $0x38] sm:$0xff] %vm3087_vm15, %v8648_v16  ;;  %v5712_v58 = vrot.slane %v12546_v44, 1  ;;  %v12551_v34 = vld [vmem:[%s12720_s10 + $0x200] ss:$0 sps:$4 sm:$0x77]  }
 0x2ee   : > { %v12554_v44 = vld [vmem:[%s12720_s10 + $0x524] sm:$0xff]   ;;  %v5429_v22 = vsel %vm3684_vm7, %v5427_v2, %v5428_v36  ;;  %v12552_v56 = vld [vmem:[%s12720_s10 + $0x510] sm:$0xfe]   ;;  %v12556_v2 = vld [vmem:[%s12720_s10 + $0x4dc] sm:$0xf8]  }
 0x2ef   : > { %v6857_v12 = vpop.permute.xlu0 %6856  ;;  %v6081_v33 = vld [vmem:[#allocation2 + $0x58] sm:$0xff] }
 0x2f0   : > { %5171 = vrot.lane.b32.xlu0 %v5140_v8, %s12654_s15  ;;  %6896 = vst.msk [vmem:[#allocation2 + $0x40] sm:$0xff] %vm1399_vm3, %v6857_v12  ;;  %11734 = vmatmul.mubr.msk.bf16.gmra.mrb[36].mxu0 %vm3165_vm10, %v6081_v33  ;;  %v12628_v12 = vld [vmem:[%s12720_s10 + $0x134] sm:$0xff]   ;;  %v3721_v33 = vrot.slane %v12550_v32, 3 }
 0x2f1   : > { %8077 = vrot.lane.b32.xlu1 %v12543_v40, %s12655_s16  ;;  %v5714_v40 = vsel %vm1302_vm0, %v5712_v58, %v5713_v6  ;;  %6611 = vst.msk [vmem:[#allocation2 + $0x58] sm:$0xff] %vm589_vm2, %v12628_v12  ;;  %v12553_v58 = vld [vmem:[%s12720_s10 + $0x518] ss:$0 sps:$4 sm:$0x11]  }
 0x2f2   : > { %v8328_v36 = vrot.slane %v12553_v58, 1 }
 0x2f3   : > { %v14894_v8 = vpop.permute.xlu0 %4015 }
 0x2f4   : > { %v4302_v16 = vpop.permute.xlu1 %4301  ;;  %7902 = vrot.lane.b32.xlu0 %v7867_v53, %s12654_s15  ;;  %v3722_v53 = vrot.slane %v12551_v34, 3  ;;  %v8704_v6 = vld [vmem:[#allocation2 + $0x38] sm:$0xff] }
 0x2f5   : > { %5746 = vrot.lane.b32.xlu1 %v5714_v40, %s12656_s17  ;;  %v8327_v40 = vrot.slane %v12552_v56, 1  ;;  %11768 = vmatmul.mubr.msk.bf16.gmra.mrb[60].mxu1 %vm3165_vm10, %v8704_v6  ;;  %v12559_v6 = vld [vmem:[%s12720_s10 + $0x4fc] ss:$0 sps:$4 sm:$0x11]  }
 0x2f6   : > { %v3723_v41 = vsel %vm3684_vm7, %v3721_v33, %v3722_v53  ;;  %v12558_v53 = vld [vmem:[%s12720_s10 + $0x4f4] sm:$0xfe]  }
 0x2f7   : > { %3761 = vst.msk [vmem:[#allocation2 + $0x60] sm:$0xff] %vm589_vm2, %v3723_v41  ;;  %v8329_v34 = vsel %vm1302_vm0, %v8327_v40, %v8328_v36  ;;  %v12560_v36 = vld [vmem:[%s12720_s10 + $0x214] sm:$0xf8]  }
 0x2f8   : > { %v7145_v55 = vpop.permute.xlu1 %7144  ;;  %5460 = vrot.lane.b32.xlu0 %v5429_v22, %s12655_s16  ;;  %4049 = vst.msk [vmem:[#allocation2 + $0x60] sm:$0xff] %vm1399_vm3, %v4014_v7  ;;  %v12557_v22 = vld [vmem:[%s12720_s10 + $0x4e4] ss:$0 sps:$4 sm:$0x77]  }
 0x2f9   : > { %7184 = vst.msk [vmem:[#allocation2 + $0x40] sm:$0xff] %vm1576_vm4, %v7145_v55  ;;  %v6859_v49 = vpop.permute.xlu0 %6858  ;;  %4337 = vst.msk [vmem:[#allocation2 + $0x60] sm:$0xff] %vm1576_vm4, %v4302_v16  ;;  %8365 = vrot.lane.b32.xlu1 %v8329_v34, %s12656_s17  ;;  %v6001_v58 = vrot.slane %v12557_v22, 3  ;;  %v5716_v16 = vrot.slane %v12559_v6, 1  ;;  %v3724_v34 = vrot.slane %v12560_v36, 3  ;;  %v3725_v22 = vrot.slane %v12561_v3, 3 }
 0x2fa   : > { %6897 = vst.msk [vmem:[#allocation2 + $0x48] sm:$0xff] %vm1399_vm3, %v6859_v49  ;;  %v6000_v49 = vrot.slane %v12556_v2, 3  ;;  %v8615_v6 = vrot.slane %v12562_v43, 2 }
 0x2fc   : > { %v4590_v32 = vpop.permute.xlu1 %4589  ;;  %8079 = vrot.lane.b32.xlu0 %v12554_v44, %s12655_s16  ;;  %v5715_v44 = vrot.slane %v12558_v53, 1  ;;  %v6002_v40 = vsel %vm3684_vm7, %v6000_v49, %v6001_v58  ;;  %v12563_v49 = vld [vmem:[%s12720_s10 + $0x520] ss:$0 sps:$4 sm:$0x33]   ;;  %v3726_v58 = vsel %vm3684_vm7, %v3724_v34, %v3725_v22 }
 0x2fd   : > { %4625 = vst.msk [vmem:[#allocation2 + $0x60] sm:$0xff] %vm1865_vm5, %v4590_v32  ;;  %v4304_v7 = vpop.permute.xlu0 %4303  ;;  %6034 = vrot.lane.b32.xlu1 %v6002_v40, %s12657_s18  ;;  %v12565_v40 = vld [vmem:[%s12720_s10 + $0x534] ss:$0 sps:$4 sm:$0x11]  }
 0x2fe   : > { %v5717_v32 = vsel %vm1302_vm0, %v5715_v44, %v5716_v16  ;;  %3762 = vst.msk [vmem:[#allocation2 + $0x68] sm:$0xff] %vm589_vm2, %v3726_v58  ;;  %v8616_v44 = vrot.slane %v12563_v49, 2  ;;  %v12568_v34 = vld [vmem:[%s12720_s10 + $0x160] ss:$0 sps:$4 sm:$0x11]  }
 0x2ff   : > { %4050 = vst.msk [vmem:[#allocation2 + $0x68] sm:$0xff] %vm1399_vm3, %v14894_v8  ;;  %v12569_v58 = vld [vmem:[%s12720_s10 + $0x4f8] sm:$0xf8]  }
 0x300   : > { %v7321_v41 = vpop.permute.xlu1 %7320  ;;  %5748 = vrot.lane.b32.xlu0 %v5717_v32, %s12656_s17  ;;  %v8617_v36 = vsel %vm1045_vm1, %v8615_v6, %v8616_v44  ;;  %4338 = vst.msk [vmem:[#allocation2 + $0x68] sm:$0xff] %vm1576_vm4, %v4304_v7  ;;  %v12567_v32 = vld [vmem:[%s12720_s10 + $0x158] sm:$0xfe]   ;;  %v12570_v7 = vld [vmem:[%s12720_s10 + $0x500] ss:$0 sps:$4 sm:$0x77]  }
 0x301   : > { %7360 = vst.msk [vmem:[#allocation2 + $0x40] sm:$0xff] %vm1865_vm5, %v7321_v41  ;;  %v7147_v2 = vpop.permute.xlu0 %7146  ;;  %v12564_v41 = vld [vmem:[%s12720_s10 + $0x52c] sm:$0xfe]   ;;  %8653 = vrot.lane.b32.xlu1 %v8617_v36, %s12657_s18  ;;  %v6828_v49 = vrot.slane %v12567_v32, 1  ;;  %v6003_v44 = vrot.slane %v12569_v58, 3 }
 0x302   : > { %v14910_v12 = vpop.f32.mrb[48].mxu1  ;;  %7185 = vst.msk [vmem:[#allocation2 + $0x48] sm:$0xff] %vm1576_vm4, %v7147_v2  ;;  %v8330_v16 = vrot.slane %v12564_v41, 1  ;;  %v8331_v2 = vrot.slane %v12565_v40, 1  ;;  %v12571_v40 = vld [vmem:[%s12720_s10 + $0x174] sm:$0xfe]  }
 0x303   : > { %v14914_v55 = vpop.f32.mrb[49].mxu1 }
 0x304   : > { %v14922_v33 = vpop.f32.mrb[50].mxu1  ;;  %v4878_v53 = vpop.permute.xlu1 %4877  ;;  %v8332_v8 = vsel %vm1302_vm0, %v8330_v16, %v8331_v2  ;;  %v12572_v16 = vld [vmem:[%s12720_s10 + $0x17c] ss:$0 sps:$4 sm:$0x11]   ;;  %v6831_v2 = vrot.slane %v12571_v40, 1 }
 0x305   : > { %v14927_v56 = vpop.f32.mrb[51].mxu1  ;;  %4913 = vst.msk [vmem:[#allocation2 + $0x60] sm:$0xff] %vm2154_vm6, %v4878_v53  ;;  %v4592_v3 = vpop.permute.xlu0 %4591  ;;  %8367 = vrot.lane.b32.xlu0 %v8332_v8, %s12656_s17  ;;  %v6829_v53 = vrot.slane %v12568_v34, 1  ;;  %v6832_v32 = vrot.slane %v12572_v16, 1  ;;  %v12573_v34 = vld [vmem:[%s12720_s10 + $0x534] sm:$0xfc]  }
 0x306   : > { %4626 = vst.msk [vmem:[#allocation2 + $0x68] sm:$0xff] %vm1865_vm5, %v4592_v3  ;;  %v6004_v3 = vrot.slane %v12570_v7, 3  ;;  %v12574_v8 = vld [vmem:[%s12720_s10 + $0x53c] ss:$0 sps:$4 sm:$0x33]  }
 0x307   : > { %v6830_v41 = vsel %vm1302_vm0, %v6828_v49, %v6829_v53  ;;  %v6833_v49 = vsel %vm1302_vm0, %v6831_v2, %v6832_v32  ;;  %v8618_v53 = vrot.slane %v12573_v34, 2  ;;  %v8619_v58 = vrot.slane %v12574_v8, 2  ;;  %v12575_v7 = vld [vmem:[%s12720_s10 + $0x17c] sm:$0xfc]   ;;  %v12579_v8 = vld [vmem:[%s12720_s10 + $0x364] sm:$0xff]  }
 0x308   : > { %v7609_v43 = vpop.permute.xlu1 %7608  ;;  %6864 = vrot.lane.b32.xlu1 %v6830_v41, %s12650_s11  ;;  %v7119_v40 = vrot.slane %v12575_v7, 2  ;;  %v12580_v7 = vld [vmem:[%s12720_s10 + $0x348] sm:$0xff]  }
 0x309   : > { %7648 = vst.msk [vmem:[#allocation2 + $0x40] sm:$0xff] %vm2154_vm6, %v7609_v43  ;;  %v7323_v22 = vpop.permute.xlu0 %7322  ;;  %v6005_v43 = vsel %vm3684_vm7, %v6003_v44, %v6004_v3  ;;  %v8620_v44 = vsel %vm1045_vm1, %v8618_v53, %v8619_v58  ;;  %v12577_v3 = vld [vmem:[%s12720_s10 + $0x160] sm:$0xfc]   ;;  %v12582_v58 = vld [vmem:[%s12720_s10 + $0x374] ss:$0 sps:$4 sm:$0x11]  }
 0x30a   : > { %7361 = vst.msk [vmem:[#allocation2 + $0x48] sm:$0xff] %vm1865_vm5, %v7323_v22  ;;  %6036 = vrot.lane.b32.xlu0 %v6005_v43, %s12657_s18  ;;  %v7116_v2 = vrot.slane %v12577_v3, 2  ;;  %v12584_v3 = vld [vmem:[%s12720_s10 + $0x358] ss:$0 sps:$4 sm:$0x11]  }
 0x30c   : > { %v5166_v6 = vpop.permute.xlu1 %5165  ;;  %6866 = vrot.lane.b32.xlu1 %v6833_v49, %s12650_s11 }
 0x30d   : > { %5201 = vst.msk [vmem:[#allocation2 + $0x60] sm:$0xff] %vm2331_vm8, %v5166_v6  ;;  %v4880_v36 = vpop.permute.xlu0 %4879  ;;  %v12576_v6 = vld [vmem:[%s12720_s10 + $0x184] ss:$0 sps:$4 sm:$0x33]  }
 0x30e   : > { %4914 = vst.msk [vmem:[#allocation2 + $0x68] sm:$0xff] %vm2154_vm6, %v4880_v36  ;;  %8655 = vrot.lane.b32.xlu0 %v8620_v44, %s12657_s18  ;;  %v7120_v16 = vrot.slane %v12576_v6, 2  ;;  %v12578_v36 = vld [vmem:[%s12720_s10 + $0x168] ss:$0 sps:$4 sm:$0x33]   ;;  %v7584_v44 = vrot.slane %v12582_v58, 1 }
 0x30f   : > { %v7117_v34 = vrot.slane %v12578_v36, 2 }
 0x310   : > { %v7121_v32 = vsel %vm1045_vm1, %v7119_v40, %v7120_v16  ;;  %v12583_v40 = vld [vmem:[%s12720_s10 + $0x350] sm:$0xfe]  }
 0x311   : > { %v7897_v22 = vpop.permute.xlu1 %7896  ;;  %v7611_v41 = vpop.permute.xlu0 %7610  ;;  %7154 = vrot.lane.b32.xlu1 %v7121_v32, %s12651_s12  ;;  %v7118_v53 = vsel %vm1045_vm1, %v7116_v2, %v7117_v34  ;;  %v7580_v2 = vrot.slane %v12583_v40, 1  ;;  %v12585_v32 = vld [vmem:[%s12720_s10 + $0x374] sm:$0xfc]   ;;  %v12586_v34 = vld [vmem:[%s12720_s10 + $0x37c] ss:$0 sps:$4 sm:$0x33]  }
 0x312   : > { %7936 = vst.msk [vmem:[#allocation2 + $0x40] sm:$0xff] %vm2331_vm8, %v7897_v22  ;;  %v12581_v22 = vld [vmem:[%s12720_s10 + $0x36c] sm:$0xfe]   ;;  %7152 = vrot.lane.b32.xlu0 %v7118_v53, %s12651_s12  ;;  %v7871_v53 = vrot.slane %v12585_v32, 2  ;;  %v7872_v58 = vrot.slane %v12586_v34, 2  ;;  %v12590_v32 = vld [vmem:[%s12720_s10 + $0x540] sm:$0xff]  }
 0x313   : > { %7649 = vst.msk [vmem:[#allocation2 + $0x48] sm:$0xff] %vm2154_vm6, %v7611_v41  ;;  %v7583_v6 = vrot.slane %v12581_v22, 1 }
 0x315   : > { %v5455_v43 = vpop.permute.xlu1 %5454  ;;  %7330 = vrot.lane.b32.xlu1 %v12579_v8, %s12652_s13  ;;  %v7585_v36 = vsel %vm1302_vm0, %v7583_v6, %v7584_v44  ;;  %v12587_v8 = vld [vmem:[%s12720_s10 + $0x358] sm:$0xfc]   ;;  %v12588_v6 = vld [vmem:[%s12720_s10 + $0x360] ss:$0 sps:$4 sm:$0x33]  }
 0x316   : > { %5490 = vst.msk [vmem:[#allocation2 + $0x60] sm:$0xff] %vm2621_vm13, %v5455_v43  ;;  %v7581_v43 = vrot.slane %v12584_v3, 1  ;;  %7328 = vrot.lane.b32.xlu0 %v12580_v7, %s12652_s13  ;;  %v7868_v44 = vrot.slane %v12587_v8, 2  ;;  %v7873_v7 = vsel %vm1045_vm1, %v7871_v53, %v7872_v58  ;;  %v7869_v40 = vrot.slane %v12588_v6, 2  ;;  %v12591_v3 = vld [vmem:[%s12720_s10 + $0x564] sm:$0xfe]  }
 0x317   : > { %v8336_v34 = vrot.slane %v12591_v3, 1  ;;  %v12593_v53 = vld [vmem:[%s12720_s10 + $0x548] sm:$0xfe]   ;;  %v12594_v8 = vld [vmem:[%s12720_s10 + $0x550] ss:$0 sps:$4 sm:$0x11]  }
 0x318   : > { %v8333_v58 = vrot.slane %v12593_v53, 1  ;;  %v8334_v6 = vrot.slane %v12594_v8, 1 }
 0x319   : > { %v8074_v41 = vpop.permute.xlu1 %8073  ;;  %7618 = vrot.lane.b32.xlu1 %v7585_v36, %s12653_s14  ;;  %v12589_v36 = vld [vmem:[%s12720_s10 + $0x55c] sm:$0xff]  }
 0x31a   : > { %8113 = vst.msk [vmem:[#allocation2 + $0x40] sm:$0xff] %vm2621_vm13, %v8074_v41 }
 0x31b   : > { %v5168_v49 = vpop.permute.xlu0 %5167 }
 0x31c   : > { %5202 = vst.msk [vmem:[#allocation2 + $0x68] sm:$0xff] %vm2331_vm8, %v5168_v49  ;;  %v7582_v49 = vsel %vm1302_vm0, %v7580_v2, %v7581_v43  ;;  %v12592_v2 = vld [vmem:[%s12720_s10 + $0x56c] ss:$0 sps:$4 sm:$0x11]  }
 0x31d   : > { %v5743_v22 = vpop.permute.xlu1 %5742  ;;  %7616 = vrot.lane.b32.xlu0 %v7582_v49, %s12653_s14  ;;  %7906 = vrot.lane.b32.xlu1 %v7873_v7, %s12654_s15  ;;  %v8337_v49 = vrot.slane %v12592_v2, 1  ;;  %v12596_v7 = vld [vmem:[%s12720_s10 + $0x198] ss:$0 sps:$4 sm:$0x11]  }
 0x31e   : > { %5778 = vst.msk [vmem:[#allocation2 + $0x60] sm:$0xff] %vm2910_vm14, %v5743_v22 }
 0x31f   : > { %v7899_v16 = vpop.permute.xlu0 %7898 }
 0x320   : > { %7937 = vst.msk [vmem:[#allocation2 + $0x48] sm:$0xff] %vm2331_vm8, %v7899_v16  ;;  %v7870_v16 = vsel %vm1045_vm1, %v7868_v44, %v7869_v40  ;;  %v8338_v44 = vsel %vm1302_vm0, %v8336_v34, %v8337_v49  ;;  %v12633_v49 = vld [vmem:[%s12720_s10 + $0x150] sm:$0xff]  }
 0x321   : > { %7904 = vrot.lane.b32.xlu0 %v7870_v16, %s12654_s15  ;;  %8083 = vrot.lane.b32.xlu1 %v12589_v36, %s12655_s16  ;;  %v12597_v16 = vld [vmem:[%s12720_s10 + $0x550] sm:$0xfc]   ;;  %v8335_v36 = vsel %vm1302_vm0, %v8333_v58, %v8334_v6 }
 0x322   : > { %v8362_v22 = vpop.permute.xlu1 %8361  ;;  %v8621_v34 = vrot.slane %v12597_v16, 2  ;;  %v12602_v16 = vld [vmem:[%s12720_s10 + $0x574] ss:$0 sps:$4 sm:$0x33]  }
 0x323   : > { %v5457_v41 = vpop.permute.xlu0 %5456  ;;  %8401 = vst.msk [vmem:[#allocation2 + $0x40] sm:$0xff] %vm2910_vm14, %v8362_v22  ;;  %v12598_v22 = vld [vmem:[%s12720_s10 + $0x558] ss:$0 sps:$4 sm:$0x33]  }
 0x324   : > { %5491 = vst.msk [vmem:[#allocation2 + $0x68] sm:$0xff] %vm2621_vm13, %v5457_v41  ;;  %v12595_v41 = vld [vmem:[%s12720_s10 + $0x190] sm:$0xfe]  }
 0x325   : > { %8081 = vrot.lane.b32.xlu0 %v12590_v32, %s12655_s16  ;;  %v6834_v3 = vrot.slane %v12595_v41, 1  ;;  %8371 = vrot.lane.b32.xlu1 %v8338_v44, %s12656_s17  ;;  %v8622_v41 = vrot.slane %v12598_v22, 2  ;;  %v12601_v44 = vld [vmem:[%s12720_s10 + $0x56c] sm:$0xfc]   ;;  %v8625_v22 = vrot.slane %v12602_v16, 2 }
 0x326   : > { %v6031_v40 = vpop.permute.xlu1 %6030 }
 0x327   : > { %v8076_v43 = vpop.permute.xlu0 %8075  ;;  %6066 = vst.msk [vmem:[#allocation2 + $0x60] sm:$0xff] %vm3087_vm15, %v6031_v40  ;;  %v12599_v40 = vld [vmem:[%s12720_s10 + $0x1ac] sm:$0xfe]   ;;  %v8623_v58 = vsel %vm1045_vm1, %v8621_v34, %v8622_v41 }
 0x328   : > { %8114 = vst.msk [vmem:[#allocation2 + $0x48] sm:$0xff] %vm2621_vm13, %v8076_v43  ;;  %v6835_v43 = vrot.slane %v12596_v7, 1  ;;  %v6837_v6 = vrot.slane %v12599_v40, 1 }
 0x329   : > { %8369 = vrot.lane.b32.xlu0 %v8335_v36, %s12656_s17 }
 0x32a   : > { %v6836_v8 = vsel %vm1302_vm0, %v6834_v3, %v6835_v43  ;;  %v8624_v3 = vrot.slane %v12601_v44, 2  ;;  %v12603_v43 = vld [vmem:[%s12720_s10 + $0x1b4] sm:$0xfc]  }
 0x32b   : > { %v5745_v53 = vpop.permute.xlu0 %5744  ;;  %6868 = vrot.lane.b32.xlu1 %v6836_v8, %s12650_s11  ;;  %v7125_v8 = vrot.slane %v12603_v43, 2  ;;  %v12607_v43 = vld [vmem:[%s12720_s10 + $0x39c] sm:$0xff]  }
 0x32c   : > { %5779 = vst.msk [vmem:[#allocation2 + $0x68] sm:$0xff] %vm2910_vm14, %v5745_v53  ;;  %v8626_v40 = vsel %vm1045_vm1, %v8624_v3, %v8625_v22  ;;  %v12610_v22 = vld [vmem:[%s12720_s10 + $0x3ac] ss:$0 sps:$4 sm:$0x11]  }
 0x32d   : > { %8657 = vrot.lane.b32.xlu0 %v8623_v58, %s12657_s18 }
 0x32e   : > { %v6082_v36 = vld [vmem:[#allocation2 + $0x60] sm:$0xff] }
 0x32f   : > { %11737 = vmatprep.mubr.msk.bf16.mxu0 %vm3165_vm10, %v6082_v36  ;;  %6612 = vst.msk [vmem:[#allocation2 + $0x60] sm:$0xff] %vm589_vm2, %v12633_v49  ;;  %v12608_v36 = vld [vmem:[%s12720_s10 + $0x380] sm:$0xff]  }
 0x330   : > { %v8650_v53 = vpop.permute.xlu1 %8649  ;;  %v8364_v34 = vpop.permute.xlu0 %8363 }
 0x331   : > { %8689 = vst.msk [vmem:[#allocation2 + $0x40] sm:$0xff] %vm3087_vm15, %v8650_v53  ;;  %8659 = vrot.lane.b32.xlu0 %v8626_v40, %s12657_s18  ;;  %v12634_v40 = vld [vmem:[%s12720_s10 + $0x16c] sm:$0xff]  }
 0x332   : > { %8402 = vst.msk [vmem:[#allocation2 + $0x48] sm:$0xff] %vm2910_vm14, %v8364_v34 }
 0x334   : > { %v6033_v44 = vpop.permute.xlu1 %6032 }
 0x335   : > { %6067 = vst.msk [vmem:[#allocation2 + $0x68] sm:$0xff] %vm3087_vm15, %v6033_v44  ;;  %v12612_v44 = vld [vmem:[%s12720_s10 + $0x390] ss:$0 sps:$4 sm:$0x11]  }
 0x336   : > { %v15024_v2 = vpop.f32.mrb[28].mxu0 }
 0x337   : > { %15710 = vst [vmem:[#allocation25_spill] sm:$0xff] %v15024_v2  ;;  %v15030_v32 = vpop.f32.mrb[29].mxu0  ;;  %v12600_v2 = vld [vmem:[%s12720_s10 + $0x1b4] ss:$0 sps:$4 sm:$0x11]  }
 0x338   : > { %15711 = vst [vmem:[#allocation26_spill] sm:$0xff] %v15030_v32  ;;  %v6838_v7 = vrot.slane %v12600_v2, 1  ;;  %v15041_v32 = vpop.f32.mrb[30].mxu0  ;;  %v12604_v2 = vld [vmem:[%s12720_s10 + $0x1bc] ss:$0 sps:$4 sm:$0x33]  }
 0x339   : > { %15712 = vst [vmem:[#allocation27_spill] sm:$0xff] %v15041_v32  ;;  %v15051_v41 = vpop.f32.mrb[31].mxu0  ;;  %v7126_v58 = vrot.slane %v12604_v2, 2  ;;  %v4018_v2 = vpop.permute.xlu0 %4017  ;;  %v8705_v34 = vld [vmem:[#allocation2 + $0x40] sm:$0xff] }
 0x33a   : > { %v6839_v19 = vsel %vm1302_vm0, %v6837_v6, %v6838_v7  ;;  %15713 = vst [vmem:[#allocation28_spill] sm:$0xff] %v15051_v41  ;;  %v12605_v6 = vld [vmem:[%s12720_s10 + $0x198] sm:$0xfc]   ;;  %v12606_v7 = vld [vmem:[%s12720_s10 + $0x1a0] ss:$0 sps:$4 sm:$0x33]   ;;  %11771 = vmatprep.mubr.msk.bf16.mxu1 %vm3165_vm10, %v8705_v34 }
 0x33b   : > { %6870 = vrot.lane.b32.xlu1 %v6839_v19, %s12650_s11  ;;  %v7127_v49 = vsel %vm1045_vm1, %v7125_v8, %v7126_v58  ;;  %v7122_v16 = vrot.slane %v12605_v6, 2  ;;  %v7123_v53 = vrot.slane %v12606_v7, 2  ;;  %v12609_v19 = vld [vmem:[%s12720_s10 + $0x3a4] sm:$0xfe]   ;;  %v15068_v58 = vpop.f32.mrb[52].mxu1  ;;  %v7590_v6 = vrot.slane %v12610_v22, 1 }
 0x33c   : > { %v7589_v8 = vrot.slane %v12609_v19, 1  ;;  %v12611_v7 = vld [vmem:[%s12720_s10 + $0x388] sm:$0xfe]   ;;  %v12613_v41 = vld [vmem:[%s12720_s10 + $0x230] sm:$0xf8]  }
 0x33d   : > { %v7124_v3 = vsel %vm1045_vm1, %v7122_v16, %v7123_v53  ;;  %v7586_v16 = vrot.slane %v12611_v7, 1  ;;  %v7587_v53 = vrot.slane %v12612_v44, 1  ;;  %v6861_v19 = vpop.permute.xlu0 %6860  ;;  %v12614_v32 = vld [vmem:[%s12720_s10 + $0x238] ss:$0 sps:$4 sm:$0x77]   ;;  %v3727_v22 = vrot.slane %v12613_v41, 3 }
 0x33e   : > { %7156 = vrot.lane.b32.xlu0 %v7124_v3, %s12651_s12  ;;  %v7591_v34 = vsel %vm1302_vm0, %v7589_v8, %v7590_v6  ;;  %6898 = vst.msk [vmem:[#allocation2 + $0x50] sm:$0xff] %vm1399_vm3, %v6861_v19  ;;  %v6083_v3 = vld [vmem:[#allocation2 + $0x68] sm:$0xff]  ;;  %v3728_v8 = vrot.slane %v12614_v32, 3  ;;  %v12616_v6 = vld [vmem:[%s12720_s10 + $0x3b4] ss:$0 sps:$4 sm:$0x33]  }
 0x33f   : > { %7158 = vrot.lane.b32.xlu1 %v7127_v49, %s12651_s12  ;;  %v8652_v49 = vpop.permute.xlu1 %8651  ;;  %11738 = vmatmul.mubr.msk.bf16.gmra.mrb[40].mxu0 %vm3165_vm10, %v6083_v3  ;;  %6613 = vst.msk [vmem:[#allocation2 + $0x68] sm:$0xff] %vm589_vm2, %v12634_v40  ;;  %v7588_v7 = vsel %vm1302_vm0, %v7586_v16, %v7587_v53  ;;  %v7878_v19 = vrot.slane %v12616_v6, 2  ;;  %v12617_v3 = vld [vmem:[%s12720_s10 + $0x390] sm:$0xfc]   ;;  %v7875_v16 = vrot.slane %v12618_v4, 2 }
 0x340   : > { %8690 = vst.msk [vmem:[#allocation2 + $0x48] sm:$0xff] %vm3087_vm15, %v8652_v49  ;;  %v7877_v49 = vrot.slane %v12615_v29, 2  ;;  %v3729_v41 = vsel %vm3684_vm7, %v3727_v22, %v3728_v8  ;;  %v12620_v32 = vld [vmem:[%s12720_s10 + $0x594] sm:$0xff]   ;;  %v7874_v40 = vrot.slane %v12617_v3, 2 }
 0x341   : > { %v4020_v50 = vpop.permute.xlu0 %4019  ;;  %3763 = vst.msk [vmem:[#allocation2 + $0x70] sm:$0xff] %vm589_vm2, %v3729_v41 }
 0x342   : > { %7332 = vrot.lane.b32.xlu0 %v12608_v36, %s12652_s13  ;;  %4051 = vst.msk [vmem:[#allocation2 + $0x70] sm:$0xff] %vm1399_vm3, %v4018_v2  ;;  %v7879_v29 = vsel %vm1045_vm1, %v7877_v49, %v7878_v19  ;;  %v7876_v22 = vsel %vm1045_vm1, %v7874_v40, %v7875_v16  ;;  %v12623_v2 = vld [vmem:[%s12720_s10 + $0x254] ss:$0 sps:$4 sm:$0x77]   ;;  %v12624_v49 = vld [vmem:[%s12720_s10 + $0x59c] sm:$0xfe]  }
 0x343   : > { %7334 = vrot.lane.b32.xlu1 %v12607_v43, %s12652_s13  ;;  %v15082_v43 = vpop.f32.mrb[53].mxu1  ;;  %v4306_v44 = vpop.permute.xlu1 %4305  ;;  %v12625_v19 = vld [vmem:[%s12720_s10 + $0x5a4] ss:$0 sps:$4 sm:$0x11]  }
 0x344   : > { %v15088_v36 = vpop.f32.mrb[54].mxu1  ;;  %4339 = vst.msk [vmem:[#allocation2 + $0x70] sm:$0xff] %vm1576_vm4, %v4306_v44  ;;  %v3731_v44 = vrot.slane %v12623_v2, 3  ;;  %v8343_v16 = vrot.slane %v12625_v19, 1 }
 0x345   : > { %v6863_v8 = vpop.permute.xlu0 %6862  ;;  %v15109_v41 = vpop.f32.mrb[55].mxu1 }
 0x346   : > { %7620 = vrot.lane.b32.xlu0 %v7588_v7, %s12653_s14  ;;  %v12622_v7 = vld [vmem:[%s12720_s10 + $0x24c] sm:$0xf8]   ;;  %6899 = vst.msk [vmem:[#allocation2 + $0x58] sm:$0xff] %vm1399_vm3, %v6863_v8 }
 0x347   : > { %7622 = vrot.lane.b32.xlu1 %v7591_v34, %s12653_s14  ;;  %v7149_v53 = vpop.permute.xlu1 %7148  ;;  %v12621_v34 = vld [vmem:[%s12720_s10 + $0x578] sm:$0xff]   ;;  %v8706_v6 = vld [vmem:[#allocation2 + $0x48] sm:$0xff]  ;;  %v3730_v4 = vrot.slane %v12622_v7, 3 }
 0x348   : > { %7186 = vst.msk [vmem:[#allocation2 + $0x50] sm:$0xff] %vm1576_vm4, %v7149_v53  ;;  %11772 = vmatmul.mubr.msk.bf16.gmra.mrb[64].mxu1 %vm3165_vm10, %v8706_v6  ;;  %v12626_v53 = vld [vmem:[%s12720_s10 + $0x580] sm:$0xfe]  }
 0x349   : > { %v3732_v40 = vsel %vm3684_vm7, %v3730_v4, %v3731_v44  ;;  %v4308_v7 = vpop.permute.xlu0 %4307  ;;  %v8339_v2 = vrot.slane %v12626_v53, 1 }
 0x34a   : > { %7908 = vrot.lane.b32.xlu0 %v7876_v22, %s12654_s15  ;;  %v12627_v22 = vld [vmem:[%s12720_s10 + $0x588] ss:$0 sps:$4 sm:$0x11]   ;;  %3764 = vst.msk [vmem:[#allocation2 + $0x78] sm:$0xff] %vm589_vm2, %v3732_v40 }
 0x34b   : > { %7910 = vrot.lane.b32.xlu1 %v7879_v29, %s12654_s15  ;;  %v4594_v3 = vpop.permute.xlu1 %4593  ;;  %v8342_v29 = vrot.slane %v12624_v49, 1  ;;  %4052 = vst.msk [vmem:[#allocation2 + $0x78] sm:$0xff] %vm1399_vm3, %v4020_v50  ;;  %v8340_v8 = vrot.slane %v12627_v22, 1  ;;  %v12630_v49 = vld [vmem:[%s12720_s10 + $0x5ac] ss:$0 sps:$4 sm:$0x33]  }
 0x34c   : > { %4627 = vst.msk [vmem:[#allocation2 + $0x70] sm:$0xff] %vm1865_vm5, %v4594_v3  ;;  %v8631_v19 = vrot.slane %v12630_v49, 2  ;;  %v12631_v3 = vld [vmem:[%s12720_s10 + $0x588] sm:$0xfc]   ;;  %v10963_v22 = vld [vmem:[%s15683_s5] ss:$0 sm:$0xff] }
 0x34d   : > { %4340 = vst.msk [vmem:[#allocation2 + $0x78] sm:$0xff] %vm1576_vm4, %v4308_v7  ;;  %v8341_v4 = vsel %vm1302_vm0, %v8339_v2, %v8340_v8  ;;  %v7151_v44 = vpop.permute.xlu0 %7150  ;;  %v8627_v53 = vrot.slane %v12631_v3, 2  ;;  %s12658_s15 = smov 96  }
 0x34e   : > { %8085 = vrot.lane.b32.xlu0 %v12621_v34, %s12655_s16  ;;  %v12629_v34 = vld [vmem:[%s12720_s10 + $0x5a4] sm:$0xfc]   ;;  %7187 = vst.msk [vmem:[#allocation2 + $0x58] sm:$0xff] %vm1576_vm4, %v7151_v44 }
 0x34f   : > { %8087 = vrot.lane.b32.xlu1 %v12620_v32, %s12655_s16  ;;  %v8344_v32 = vsel %vm1302_vm0, %v8342_v29, %v8343_v16  ;;  %v7325_v6 = vpop.permute.xlu1 %7324  ;;  %v8630_v50 = vrot.slane %v12629_v34, 2  ;;  %v12632_v29 = vld [vmem:[%s12720_s10 + $0x590] ss:$0 sps:$4 sm:$0x33]   ;;  %vm851_vm0 = vcmask 130048  }
 0x350   : > { %7362 = vst.msk [vmem:[#allocation2 + $0x50] sm:$0xff] %vm1865_vm5, %v7325_v6  ;;  %v8628_v7 = vrot.slane %v12632_v29, 2 }
 0x351   : > { %v8632_v16 = vsel %vm1045_vm1, %v8630_v50, %v8631_v19  ;;  %853 = vst.msk [vmem:[#allocation3 + $0x8] sm:$0xff] %vm851_vm0, %v14496_v13  ;;  %852 = vst.msk [vmem:[#allocation3] sm:$0xff] %vm851_vm0, %v14503_v30 }
 0x352   : > { %8373 = vrot.lane.b32.xlu0 %v8341_v4, %s12656_s17  ;;  %v8629_v2 = vsel %vm1045_vm1, %v8627_v53, %v8628_v7  ;;  %854 = vst.msk [vmem:[#allocation3 + $0x10] sm:$0xff] %vm851_vm0, %v14563_v11  ;;  %855 = vst.msk [vmem:[#allocation3 + $0x18] sm:$0xff] %vm851_vm0, %v14551_v17  ;;  %vm3490_vm1 = vcmask 261248  }
 0x353   : > { %8375 = vrot.lane.b32.xlu1 %v8344_v32, %s12656_s17  ;;  %v4882_v40 = vpop.permute.xlu1 %4881  ;;  %v4596_v32 = vpop.permute.xlu0 %4595  ;;  %s12659_s17 = smov 112   ;;  %856 = vst.msk [vmem:[#allocation3 + $0x20] sm:$0xff] %vm851_vm0, %v14617_v35  ;;  %857 = vst.msk [vmem:[#allocation3 + $0x28] sm:$0xff] %vm851_vm0, %v14600_v21 }
 0x354   : > { %4915 = vst.msk [vmem:[#allocation2 + $0x70] sm:$0xff] %vm2154_vm6, %v4882_v40 }
 0x355   : > { %4628 = vst.msk [vmem:[#allocation2 + $0x78] sm:$0xff] %vm1865_vm5, %v4596_v32 }
 0x356   : > { %8661 = vrot.lane.b32.xlu0 %v8629_v2, %s12657_s18  ;;  %v12635_v2 = vld [vmem:[%s12720_s10 + $0x188] sm:$0xff]   ;;  %858 = vst.msk [vmem:[#allocation3 + $0x30] sm:$0xff] %vm851_vm0, %v14667_v18  ;;  %859 = vst.msk [vmem:[#allocation3 + $0x38] sm:$0xff] %vm851_vm0, %v14649_v38 }
 0x357   : > { %8663 = vrot.lane.b32.xlu1 %v8632_v16, %s12657_s18  ;;  %v7613_v8 = vpop.permute.xlu1 %7612  ;;  %v7327_v6 = vpop.permute.xlu0 %7326  ;;  %860 = vst.msk [vmem:[#allocation3 + $0x40] sm:$0xff] %vm851_vm0, %v14257_v47  ;;  %861 = vst.msk [vmem:[#allocation3 + $0x48] sm:$0xff] %vm851_vm0, %v14254_v45 }
 0x358   : > { %7650 = vst.msk [vmem:[#allocation2 + $0x50] sm:$0xff] %vm2154_vm6, %v7613_v8 }
 0x359   : > { %7363 = vst.msk [vmem:[#allocation2 + $0x58] sm:$0xff] %vm1865_vm5, %v7327_v6 }
 0x35a   : > { %3162 = vrot.lane.b32.xlu0 %v10963_v22, %s12659_s17  ;;  %862 = vst.msk [vmem:[#allocation3 + $0x50] sm:$0xff] %vm851_vm0, %v14296_v57  ;;  %863 = vst.msk [vmem:[#allocation3 + $0x58] sm:$0xff] %vm851_vm0, %v14274_v14 }
 0x35b   : > { %6128 = vrot.lane.b32.xlu1 %v10963_v22, %s12658_s15  ;;  %v5170_v34 = vpop.permute.xlu1 %5169  ;;  %v4884_v49 = vpop.permute.xlu0 %4883  ;;  %864 = vst.msk [vmem:[#allocation3 + $0x60] sm:$0xff] %vm851_vm0, %v14315_v54  ;;  %865 = vst.msk [vmem:[#allocation3 + $0x68] sm:$0xff] %vm851_vm0, %v14310_v25 }
 0x35c   : > { %5203 = vst.msk [vmem:[#allocation2 + $0x70] sm:$0xff] %vm2331_vm8, %v5170_v34 }
 0x35d   : > { %4916 = vst.msk [vmem:[#allocation2 + $0x78] sm:$0xff] %vm2154_vm6, %v4884_v49 }
 0x35e   : > { %8755 = vrot.lane.b32.xlu0 %v10963_v22, %s12660_s22  ;;  %866 = vst.msk [vmem:[#allocation3 + $0x70] sm:$0xff] %vm851_vm0, %v14329_v15  ;;  %867 = vst.msk [vmem:[#allocation3 + $0x78] sm:$0xff] %vm851_vm0, %v14327_v31 }
 0x35f   : > { %v7901_v4 = vpop.permute.xlu1 %7900  ;;  %v7615_v44 = vpop.permute.xlu0 %7614 }
 0x360   : > { %7938 = vst.msk [vmem:[#allocation2 + $0x50] sm:$0xff] %vm2331_vm8, %v7901_v4 }
 0x361   : > { %7651 = vst.msk [vmem:[#allocation2 + $0x58] sm:$0xff] %vm2154_vm6, %v7615_v44 }
 0x363   : > { %v5459_v50 = vpop.permute.xlu1 %5458  ;;  %v5172_v19 = vpop.permute.xlu0 %5171 }
 0x364   : > { %5492 = vst.msk [vmem:[#allocation2 + $0x70] sm:$0xff] %vm2621_vm13, %v5459_v50 }
 0x365   : > { %5204 = vst.msk [vmem:[#allocation2 + $0x78] sm:$0xff] %vm2331_vm8, %v5172_v19 }
 0x367   : > { %v8078_v3 = vpop.permute.xlu1 %8077  ;;  %v7903_v29 = vpop.permute.xlu0 %7902 }
 0x368   : > { %8115 = vst.msk [vmem:[#allocation2 + $0x50] sm:$0xff] %vm2621_vm13, %v8078_v3 }
 0x369   : > { %7939 = vst.msk [vmem:[#allocation2 + $0x58] sm:$0xff] %vm2331_vm8, %v7903_v29 }
 0x36b   : > { %v5747_v40 = vpop.permute.xlu1 %5746  ;;  %v5461_v16 = vpop.permute.xlu0 %5460 }
 0x36c   : > { %5780 = vst.msk [vmem:[#allocation2 + $0x70] sm:$0xff] %vm2910_vm14, %v5747_v40 }
 0x36d   : > { %5493 = vst.msk [vmem:[#allocation2 + $0x78] sm:$0xff] %vm2621_vm13, %v5461_v16 }
 0x36f   : > { %v8080_v53 = vpop.permute.xlu0 %8079  ;;  %v8366_v22 = vpop.permute.xlu1 %8365 }
 0x370   : > { %8116 = vst.msk [vmem:[#allocation2 + $0x58] sm:$0xff] %vm2621_vm13, %v8080_v53 }
 0x371   : > { %8403 = vst.msk [vmem:[#allocation2 + $0x50] sm:$0xff] %vm2910_vm14, %v8366_v22 }
 0x373   : > { %v6035_v7 = vpop.permute.xlu1 %6034  ;;  %v5749_v32 = vpop.permute.xlu0 %5748 }
 0x374   : > { %6068 = vst.msk [vmem:[#allocation2 + $0x70] sm:$0xff] %vm3087_vm15, %v6035_v7 }
 0x375   : > { %5781 = vst.msk [vmem:[#allocation2 + $0x78] sm:$0xff] %vm2910_vm14, %v5749_v32 }
 0x377   : > { %v8654_v8 = vpop.permute.xlu1 %8653  ;;  %v8368_v34 = vpop.permute.xlu0 %8367 }
 0x378   : > { %8691 = vst.msk [vmem:[#allocation2 + $0x50] sm:$0xff] %vm3087_vm15, %v8654_v8 }
 0x379   : > { %8404 = vst.msk [vmem:[#allocation2 + $0x58] sm:$0xff] %vm2910_vm14, %v8368_v34 }
 0x37b   : > { %v6084_v6 = vld [vmem:[#allocation2 + $0x70] sm:$0xff]  ;;  %v6865_v49 = vpop.permute.xlu1 %6864  ;;  %v15162_v4 = vpop.f32.mrb[32].mxu0 }
 0x37c   : > { %11741 = vmatprep.mubr.msk.bf16.mxu0 %vm3165_vm10, %v6084_v6  ;;  %6614 = vst.msk [vmem:[#allocation2 + $0x70] sm:$0xff] %vm589_vm2, %v12635_v2  ;;  %v15164_v44 = vpop.f32.mrb[33].mxu0  ;;  %v6037_v50 = vpop.permute.xlu0 %6036  ;;  %v12636_v2 = vld [vmem:[%s12720_s10 + $0x1a4] sm:$0xff]  }
 0x37d   : > { %6900 = vst.msk [vmem:[#allocation2 + $0x60] sm:$0xff] %vm1399_vm3, %v6865_v49  ;;  %v15166_v3 = vpop.f32.mrb[34].mxu0 }
 0x37e   : > { %6069 = vst.msk [vmem:[#allocation2 + $0x78] sm:$0xff] %vm3087_vm15, %v6037_v50  ;;  %v15170_v29 = vpop.f32.mrb[35].mxu0 }
 0x37f   : > { %v8707_v19 = vld [vmem:[#allocation2 + $0x50] sm:$0xff]  ;;  %v6867_v16 = vpop.permute.xlu1 %6866 }
 0x380   : > { %11775 = vmatprep.mubr.msk.bf16.mxu1 %vm3165_vm10, %v8707_v19  ;;  %6901 = vst.msk [vmem:[#allocation2 + $0x68] sm:$0xff] %vm1399_vm3, %v6867_v16  ;;  %v8656_v7 = vpop.permute.xlu0 %8655 }
 0x381   : > { %v15172_v40 = vpop.f32.mrb[56].mxu1  ;;  %8692 = vst.msk [vmem:[#allocation2 + $0x58] sm:$0xff] %vm3087_vm15, %v8656_v7 }
 0x382   : > { %v15174_v53 = vpop.f32.mrb[57].mxu1 }
 0x383   : > { %v15177_v22 = vpop.f32.mrb[58].mxu1  ;;  %v7155_v8 = vpop.permute.xlu1 %7154 }
 0x384   : > { %v15179_v32 = vpop.f32.mrb[59].mxu1  ;;  %7189 = vst.msk [vmem:[#allocation2 + $0x68] sm:$0xff] %vm1576_vm4, %v7155_v8  ;;  %v7153_v34 = vpop.permute.xlu0 %7152 }
 0x385   : > { %v6085_v6 = vld [vmem:[#allocation2 + $0x78] sm:$0xff]  ;;  %7188 = vst.msk [vmem:[#allocation2 + $0x60] sm:$0xff] %vm1576_vm4, %v7153_v34 }
 0x386   : > { %11742 = vmatmul.mubr.msk.bf16.gmra.mrb[44].mxu0 %vm3165_vm10, %v6085_v6  ;;  %6615 = vst.msk [vmem:[#allocation2 + $0x78] sm:$0xff] %vm589_vm2, %v12636_v2  ;;  %vm6455_vm2 = vcmask 392448  }
 0x387   : > { %v7331_v49 = vpop.permute.xlu1 %7330 }
 0x388   : > { %7365 = vst.msk [vmem:[#allocation2 + $0x68] sm:$0xff] %vm1865_vm5, %v7331_v49  ;;  %v8708_v50 = vld [vmem:[#allocation2 + $0x58] sm:$0xff]  ;;  %v7329_v19 = vpop.permute.xlu0 %7328 }
 0x389   : > { %11776 = vmatmul.mubr.msk.bf16.gmra.mrb[68].mxu1 %vm3165_vm10, %v8708_v50  ;;  %7364 = vst.msk [vmem:[#allocation2 + $0x60] sm:$0xff] %vm1865_vm5, %v7329_v19 }
 0x38b   : > { %v7619_v16 = vpop.permute.xlu1 %7618 }
 0x38c   : > { %7653 = vst.msk [vmem:[#allocation2 + $0x68] sm:$0xff] %vm2154_vm6, %v7619_v16 }
 0x38f   : > { %v7617_v7 = vpop.permute.xlu0 %7616  ;;  %v7907_v8 = vpop.permute.xlu1 %7906 }
 0x390   : > { %7652 = vst.msk [vmem:[#allocation2 + $0x60] sm:$0xff] %vm2154_vm6, %v7617_v7 }
 0x391   : > { %7941 = vst.msk [vmem:[#allocation2 + $0x68] sm:$0xff] %vm2331_vm8, %v7907_v8  ;;  %v12637_v8 = vld [vmem:[%s15684_s6] sm:$0xff]  }
 0x392   : > { %11787 = vmatprep.subr.bf16.mxu0 %v12637_v8 }
 0x393   : > { %v7905_v2 = vpop.permute.xlu0 %7904  ;;  %v8084_v47 = vpop.permute.xlu1 %8083  ;;  %11788 = vmatpush3.bf16.msra.mxu0 %v12637_v8 }
 0x394   : > { %7940 = vst.msk [vmem:[#allocation2 + $0x60] sm:$0xff] %vm2331_vm8, %v7905_v2 }
 0x395   : > { %8118 = vst.msk [vmem:[#allocation2 + $0x68] sm:$0xff] %vm2621_vm13, %v8084_v47 }
 0x397   : > { %v8082_v45 = vpop.permute.xlu0 %8081  ;;  %v8372_v57 = vpop.permute.xlu1 %8371 }
 0x398   : > { %8117 = vst.msk [vmem:[#allocation2 + $0x60] sm:$0xff] %vm2621_vm13, %v8082_v45 }
 0x399   : > { %8406 = vst.msk [vmem:[#allocation2 + $0x68] sm:$0xff] %vm2910_vm14, %v8372_v57 }
 0x39b   : > { %v8370_v14 = vpop.permute.xlu0 %8369 }
 0x39c   : > { %8405 = vst.msk [vmem:[#allocation2 + $0x60] sm:$0xff] %vm2910_vm14, %v8370_v14 }
 0x39d   : > { %v6869_v54 = vpop.permute.xlu1 %6868 }
 0x39e   : > { %6902 = vst.msk [vmem:[#allocation2 + $0x70] sm:$0xff] %vm1399_vm3, %v6869_v54 }
 0x39f   : > { %v8658_v25 = vpop.permute.xlu0 %8657 }
 0x3a0   : > { %8693 = vst.msk [vmem:[#allocation2 + $0x60] sm:$0xff] %vm3087_vm15, %v8658_v25 }
 0x3a3   : > { %v8660_v31 = vpop.permute.xlu0 %8659 }
 0x3a4   : > { %8694 = vst.msk [vmem:[#allocation2 + $0x68] sm:$0xff] %vm3087_vm15, %v8660_v31 }
 0x3a7   : > { %v8709_v17 = vld [vmem:[#allocation2 + $0x60] sm:$0xff] }
 0x3a8   : > { %11779 = vmatprep.mubr.msk.bf16.mxu1 %vm3165_vm10, %v8709_v17 }
 0x3ab   : > { %v8710_v35 = vld [vmem:[#allocation2 + $0x68] sm:$0xff] }
 0x3ac   : > { %11780 = vmatmul.mubr.msk.bf16.gmra.mrb[72].mxu1 %vm3165_vm10, %v8710_v35 }
 0x3ad   : > { %v6871_v15 = vpop.permute.xlu1 %6870 }
 0x3ae   : > { %6903 = vst.msk [vmem:[#allocation2 + $0x78] sm:$0xff] %vm1399_vm3, %v6871_v15  ;;  %vm9082_vm3 = vcmask 523648  }
 0x3b0   : > { %v7157_v30 = vpop.permute.xlu0 %7156 }
 0x3b1   : > { %v7159_v13 = vpop.permute.xlu1 %7158  ;;  %7190 = vst.msk [vmem:[#allocation2 + $0x70] sm:$0xff] %vm1576_vm4, %v7157_v30  ;;  %v12638_v30 = vld [vmem:[%s15684_s6 + $0x8] sm:$0xff]  }
 0x3b2   : > { %7191 = vst.msk [vmem:[#allocation2 + $0x78] sm:$0xff] %vm1576_vm4, %v7159_v13  ;;  %11789 = vmatprep.subr.bf16.mxu0 %v12638_v30  ;;  %vm9154_vm4 = vcmask 523264  }
 0x3b3   : > { %11790 = vmatpush3.bf16.msra.mxu0 %v12638_v30 }
 0x3b4   : > { %v7333_v21 = vpop.permute.xlu0 %7332 }
 0x3b5   : > { %v7335_v11 = vpop.permute.xlu1 %7334  ;;  %7366 = vst.msk [vmem:[#allocation2 + $0x70] sm:$0xff] %vm1865_vm5, %v7333_v21 }
 0x3b6   : > { %7367 = vst.msk [vmem:[#allocation2 + $0x78] sm:$0xff] %vm1865_vm5, %v7335_v11 }
 0x3b8   : > { %v7621_v18 = vpop.permute.xlu0 %7620 }
 0x3b9   : > { %v7623_v38 = vpop.permute.xlu1 %7622  ;;  %7654 = vst.msk [vmem:[#allocation2 + $0x70] sm:$0xff] %vm2154_vm6, %v7621_v18 }
 0x3ba   : > { %7655 = vst.msk [vmem:[#allocation2 + $0x78] sm:$0xff] %vm2154_vm6, %v7623_v38 }
 0x3bc   : > { %v7909_v34 = vpop.permute.xlu0 %7908 }
 0x3bd   : > { %v7911_v6 = vpop.permute.xlu1 %7910  ;;  %7942 = vst.msk [vmem:[#allocation2 + $0x70] sm:$0xff] %vm2331_vm8, %v7909_v34 }
 0x3be   : > { %7943 = vst.msk [vmem:[#allocation2 + $0x78] sm:$0xff] %vm2331_vm8, %v7911_v6 }
 0x3c0   : > { %v8086_v50 = vpop.permute.xlu0 %8085 }
 0x3c1   : > { %v8088_v49 = vpop.permute.xlu1 %8087  ;;  %8119 = vst.msk [vmem:[#allocation2 + $0x70] sm:$0xff] %vm2621_vm13, %v8086_v50 }
 0x3c2   : > { %8120 = vst.msk [vmem:[#allocation2 + $0x78] sm:$0xff] %vm2621_vm13, %v8088_v49 }
 0x3c3   : > { %v15252_v2 = vpop.f32.mrb[36].mxu0 }
 0x3c4   : > { %v8374_v16 = vpop.permute.xlu0 %8373  ;;  %v15254_v45 = vpop.f32.mrb[37].mxu0 }
 0x3c5   : > { %v8376_v19 = vpop.permute.xlu1 %8375  ;;  %8407 = vst.msk [vmem:[#allocation2 + $0x70] sm:$0xff] %vm2910_vm14, %v8374_v16  ;;  %v15259_v14 = vpop.f32.mrb[38].mxu0 }
 0x3c6   : > { %8408 = vst.msk [vmem:[#allocation2 + $0x78] sm:$0xff] %vm2910_vm14, %v8376_v19  ;;  %v15269_v13 = vpop.f32.mrb[39].mxu0 }
 0x3c8   : > { %v8662_v47 = vpop.permute.xlu0 %8661  ;;  %v11769_v50 = vpop.f32.mrb[60].mxu1 }
 0x3c9   : > { %v8664_v7 = vpop.permute.xlu1 %8663  ;;  %8695 = vst.msk [vmem:[#allocation2 + $0x70] sm:$0xff] %vm3087_vm15, %v8662_v47 }
 0x3ca   : > { %8696 = vst.msk [vmem:[#allocation2 + $0x78] sm:$0xff] %vm3087_vm15, %v8664_v7 }
 0x3cd   : > { %v15257_v57 = vpop.permute.xlu1 %6128 }
 0x3ce   : > { %v6225_v54 = vadd.f32 %v14652_v9, %v15257_v57  ;;  %v6228_v25 = vadd.f32 %v14662_v1, %v15257_v57  ;;  %v6217_v15 = vadd.f32 %v14655_v61, %v15257_v57  ;;  %v6220_v31 = vadd.f32 %v14671_v46, %v15257_v57  ;;  %v15290_v46 = vpop.permute.xlu0 %3162 }
 0x3cf   : > { %v15276_v17 = vadd.f32 %v14742_v63, %v15257_v57  ;;  %v15280_v9 = vadd.f32 %v14767_v48, %v15257_v57  ;;  %v15284_v61 = vadd.f32 %v14756_v10, %v15257_v57  ;;  %v15288_v1 = vadd.f32 %v14772_v37, %v15257_v57 }
 0x3d0   : > { %v6345_v11 = vmax.f32 %v6225_v54, 0.0  ;;  %v6346_v21 = vmax.f32 %v6228_v25, 0.0  ;;  %v6343_v35 = vmax.f32 %v6217_v15, 0.0  ;;  %v6344_v38 = vmax.f32 %v6220_v31, 0.0  ;;  %v8711_v47 = vld [vmem:[#allocation2 + $0x70] sm:$0xff] }
 0x3d1   : > { %v3260_v63 = vadd.f32 %v14164_v51, %v15290_v46  ;;  %v3263_v48 = vadd.f32 %v14176_v26, %v15290_v46  ;;  %v3252_v10 = vadd.f32 %v14170_v27, %v15290_v46  ;;  %v3255_v37 = vadd.f32 %v14179_v20, %v15290_v46  ;;  %v12639_v51 = vld [vmem:[%s15684_s6 + $0x10] sm:$0xff]   ;;  %v8712_v26 = vld [vmem:[#allocation2 + $0x78] sm:$0xff]  ;;  %v8891_v20 = vpop.f32.mrb[61].mxu1  ;;  %11783 = vmatprep.mubr.msk.bf16.mxu1 %vm3165_vm10, %v8711_v47 }
 0x3d2   : > { %v6376_v18 = vpack.c.bf16 %v6346_v21, %v6345_v11  ;;  %v6375_v6 = vpack.c.bf16 %v6344_v38, %v6343_v35  ;;  %v3276_v34 = vadd.f32 %v14181_v60, %v15290_v46  ;;  %v3279_v49 = vadd.f32 %v14194_v39, %v15290_v46  ;;  %v15307_v8 = vpop.permute.xlu0 %8755  ;;  %v11770_v15 = vpop.f32.mrb[62].mxu1  ;;  %11791 = vmatprep.subr.bf16.mxu0 %v12639_v51 }
 0x3d3   : > { %v3380_v19 = vmax.f32 %v3260_v63, 0.0  ;;  %v3381_v27 = vmax.f32 %v3263_v48, 0.0  ;;  %v3378_v16 = vmax.f32 %v3252_v10, 0.0  ;;  %v3379_v7 = vmax.f32 %v3255_v37, 0.0  ;;  %v8894_v35 = vpop.f32.mrb[63].mxu1  ;;  %11784 = vmatmul.mubr.msk.bf16.gmra.mrb[76].mxu1 %vm3165_vm10, %v8712_v26  ;;  %11792 = vmatpush3.bf16.msra.mxu0 %v12639_v51  ;;  %v12640_v48 = vld [vmem:[%s15684_s6 + $0x18] sm:$0xff]  }
 0x3d4   : > { %v3384_v54 = vmax.f32 %v3276_v34, 0.0  ;;  %v3385_v25 = vmax.f32 %v3279_v49, 0.0  ;;  %v3268_v60 = vadd.f32 %v14186_v42, %v15290_v46  ;;  %v3271_v39 = vadd.f32 %v14198_v52, %v15290_v46  ;;  %11793 = vmatprep.subr.bf16.mxu0 %v12640_v48 }
 0x3d5   : > { %v3411_v31 = vpack.c.bf16 %v3381_v27, %v3380_v19  ;;  %v3410_v30 = vpack.c.bf16 %v3379_v7, %v3378_v16  ;;  %v8852_v11 = vadd.f32 %v14910_v12, %v15307_v8  ;;  %v8855_v21 = vadd.f32 %v14922_v33, %v15307_v8 }
 0x3d6   : > { %v8844_v42 = vadd.f32 %v14914_v55, %v15307_v8  ;;  %v8847_v52 = vadd.f32 %v14927_v56, %v15307_v8  ;;  %v3413_v38 = vpack.c.bf16 %v3385_v25, %v3384_v54  ;;  %v3382_v63 = vmax.f32 %v3268_v60, 0.0 }
 0x3d7   : > { %3444 = vrot.lane.b32.xlu0 %v3411_v31, %s12651_s12  ;;  %3442 = vrot.lane.b32.xlu1 %v3410_v30, %s12651_s12  ;;  %v8972_v12 = vmax.f32 %v8852_v11, 0.0  ;;  %v8973_v33 = vmax.f32 %v8855_v21, 0.0  ;;  %v3383_v10 = vmax.f32 %v3271_v39, 0.0  ;;  %v6349_v37 = vmax.f32 %v15276_v17, 0.0 }
 0x3d8   : > { %v8970_v55 = vmax.f32 %v8844_v42, 0.0  ;;  %v8971_v34 = vmax.f32 %v8847_v52, 0.0  ;;  %v6350_v56 = vmax.f32 %v15280_v9, 0.0  ;;  %v6347_v49 = vmax.f32 %v15284_v61, 0.0  ;;  %11794 = vmatpush3.bf16.msra.mxu0 %v12640_v48 }
 0x3d9   : > { %v9003_v51 = vpack.c.bf16 %v8973_v33, %v8972_v12  ;;  %v3412_v26 = vpack.c.bf16 %v3383_v10, %v3382_v63  ;;  %v6348_v19 = vmax.f32 %v15288_v1, 0.0  ;;  %v6305_v27 = vadd.f32 %v15252_v2, %v15257_v57 }
 0x3da   : > { %v9002_v16 = vpack.c.bf16 %v8971_v34, %v8970_v55  ;;  %v6378_v7 = vpack.c.bf16 %v6350_v56, %v6349_v37  ;;  %v6297_v47 = vadd.f32 %v15254_v45, %v15257_v57  ;;  %v6308_v17 = vadd.f32 %v15259_v14, %v15257_v57 }
 0x3db   : > { %6409 = vrot.lane.b32.xlu0 %v6376_v18, %s12653_s14  ;;  %6407 = vrot.lane.b32.xlu1 %v6375_v6, %s12653_s14  ;;  %v6377_v9 = vpack.c.bf16 %v6348_v19, %v6347_v49  ;;  %v6365_v61 = vmax.f32 %v6305_v27, 0.0  ;;  %v8868_v1 = vadd.f32 %v15068_v58, %v15307_v8  ;;  %v8871_v2 = vadd.f32 %v15088_v36, %v15307_v8 }
 0x3dc   : > { %v6363_v54 = vmax.f32 %v6297_v47, 0.0  ;;  %v6366_v25 = vmax.f32 %v6308_v17, 0.0  ;;  %v6300_v45 = vadd.f32 %v15269_v13, %v15257_v57  ;;  %v8860_v14 = vadd.f32 %v15082_v43, %v15307_v8 }
 0x3dd   : > { %v8976_v60 = vmax.f32 %v8868_v1, 0.0  ;;  %v8977_v18 = vmax.f32 %v8871_v2, 0.0  ;;  %v8863_v6 = vadd.f32 %v15109_v41, %v15307_v8  ;;  %v8900_v39 = vadd.f32 %v11769_v50, %v15307_v8  ;;  %v15715_v2 = vld [vmem:[#allocation4_spill] sm:$0xff] }
 0x3de   : > { %v15351_v31 = vpack.c.bf16 %v6366_v25, %v6365_v61  ;;  %v6364_v58 = vmax.f32 %v6300_v45, 0.0  ;;  %v8974_v30 = vmax.f32 %v8860_v14, 0.0  ;;  %v8892_v36 = vadd.f32 %v8891_v20, %v15307_v8 }
 0x3df   : > { %9036 = vrot.lane.b32.xlu0 %v9003_v51, %s12655_s16  ;;  %9034 = vrot.lane.b32.xlu1 %v9002_v16, %s12655_s16  ;;  %v9005_v13 = vpack.c.bf16 %v8977_v18, %v8976_v60  ;;  %v8975_v11 = vmax.f32 %v8863_v6, 0.0  ;;  %v8984_v43 = vmax.f32 %v8900_v39, 0.0  ;;  %v8903_v21 = vadd.f32 %v11770_v15, %v15307_v8 }
 0x3e0   : > { %v15357_v42 = vpack.c.bf16 %v6364_v58, %v6363_v54  ;;  %v8982_v41 = vmax.f32 %v8892_v36, 0.0  ;;  %v8895_v50 = vadd.f32 %v8894_v35, %v15307_v8  ;;  %v3292_v52 = vadd.f32 %v14204_v24, %v15290_v46 }
 0x3e1   : > { %v9004_v63 = vpack.c.bf16 %v8975_v11, %v8974_v30  ;;  %v8985_v48 = vmax.f32 %v8903_v21, 0.0  ;;  %v3295_v20 = vadd.f32 %v14213_v5, %v15290_v46  ;;  %v3284_v12 = vadd.f32 %v14207_v0, %v15290_v46 }
 0x3e2   : > { %v8983_v33 = vmax.f32 %v8895_v50, 0.0  ;;  %v3388_v10 = vmax.f32 %v3292_v52, 0.0  ;;  %v3287_v15 = vadd.f32 %v14336_v28, %v15290_v46  ;;  %v6257_v37 = vadd.f32 %v14824_v59, %v15257_v57  ;;  %v15721_v52 = vld [vmem:[#allocation26_spill] sm:$0xff] }
 0x3e3   : > { %3448 = vrot.lane.b32.xlu0 %v3413_v38, %s12651_s12  ;;  %3446 = vrot.lane.b32.xlu1 %v3412_v26, %s12651_s12  ;;  %v15372_v24 = vpack.c.bf16 %v8985_v48, %v8984_v43  ;;  %v3389_v35 = vmax.f32 %v3295_v20, 0.0  ;;  %v3386_v55 = vmax.f32 %v3284_v12, 0.0  ;;  %v6260_v5 = vadd.f32 %v14834_v23, %v15257_v57  ;;  %v15714_v38 = vld [vmem:[#allocation24_spill] sm:$0xff]  ;;  %v15720_v43 = vld [vmem:[#allocation27_spill] sm:$0xff] }
 0x3e4   : > { %v15376_v0 = vpack.c.bf16 %v8983_v33, %v8982_v41  ;;  %v3387_v34 = vmax.f32 %v3287_v15, 0.0  ;;  %v6353_v56 = vmax.f32 %v6257_v37, 0.0  ;;  %v6249_v28 = vadd.f32 %v14830_v62, %v15257_v57  ;;  %v15722_v20 = vld [vmem:[#allocation28_spill] sm:$0xff] }
 0x3e5   : > { %v3415_v49 = vpack.c.bf16 %v3389_v35, %v3388_v10  ;;  %v6354_v59 = vmax.f32 %v6260_v5, 0.0  ;;  %v6252_v51 = vadd.f32 %v15714_v38, %v15257_v57  ;;  %v8884_v26 = vadd.f32 %v15172_v40, %v15307_v8  ;;  %v15725_v5 = vld [vmem:[#allocation9_spill] sm:$0xff] }
 0x3e6   : > { %v3414_v19 = vpack.c.bf16 %v3387_v34, %v3386_v55  ;;  %v6351_v27 = vmax.f32 %v6249_v28, 0.0  ;;  %v8887_v23 = vadd.f32 %v15177_v22, %v15307_v8  ;;  %v8876_v16 = vadd.f32 %v15174_v53, %v15307_v8  ;;  %v15716_v22 = vld [vmem:[#allocation6_spill] sm:$0xff] }
 0x3e7   : > { %6413 = vrot.lane.b32.xlu0 %v6378_v7, %s12653_s14  ;;  %6411 = vrot.lane.b32.xlu1 %v6377_v9, %s12653_s14  ;;  %v6380_v62 = vpack.c.bf16 %v6354_v59, %v6353_v56  ;;  %v6352_v47 = vmax.f32 %v6252_v51, 0.0  ;;  %v8980_v17 = vmax.f32 %v8884_v26, 0.0  ;;  %v8879_v61 = vadd.f32 %v15179_v32, %v15307_v8  ;;  %v15717_v7 = vld [vmem:[#allocation5_spill] sm:$0xff]  ;;  %v15718_v9 = vld [vmem:[#allocation7_spill] sm:$0xff] }
 0x3e8   : > { %v8981_v1 = vmax.f32 %v8887_v23, 0.0  ;;  %v8978_v40 = vmax.f32 %v8876_v16, 0.0  ;;  %v3308_v54 = vadd.f32 %v15715_v2, %v15290_v46  ;;  %v3311_v25 = vadd.f32 %v15716_v22, %v15290_v46  ;;  %v15719_v32 = vld [vmem:[#allocation25_spill] sm:$0xff]  ;;  %v15726_v56 = vld [vmem:[#allocation11_spill] sm:$0xff]  ;;  %v15727_v2 = vld [vmem:[#allocation12_spill] sm:$0xff] }
 0x3e9   : > { %v6379_v45 = vpack.c.bf16 %v6352_v47, %v6351_v27  ;;  %v8979_v53 = vmax.f32 %v8879_v61, 0.0  ;;  %v3300_v14 = vadd.f32 %v15717_v7, %v15290_v46  ;;  %v3303_v60 = vadd.f32 %v15718_v9, %v15290_v46  ;;  %v15730_v7 = vld [vmem:[#allocation15_spill] sm:$0xff] }
 0x3ea   : > { %v9007_v18 = vpack.c.bf16 %v8981_v1, %v8980_v17  ;;  %v3392_v6 = vmax.f32 %v3308_v54, 0.0  ;;  %v3393_v39 = vmax.f32 %v3311_v25, 0.0  ;;  %v6273_v58 = vadd.f32 %v15719_v32, %v15257_v57 }
 0x3eb   : > { %9040 = vrot.lane.b32.xlu0 %v9005_v13, %s12655_s16  ;;  %9038 = vrot.lane.b32.xlu1 %v9004_v63, %s12655_s16  ;;  %v9006_v30 = vpack.c.bf16 %v8979_v53, %v8978_v40  ;;  %v3390_v36 = vmax.f32 %v3300_v14, 0.0  ;;  %v3391_v11 = vmax.f32 %v3303_v60, 0.0  ;;  %v6276_v21 = vadd.f32 %v15720_v43, %v15257_v57  ;;  %v15723_v13 = vld [vmem:[#allocation8_spill] sm:$0xff]  ;;  %v15724_v63 = vld [vmem:[#allocation10_spill] sm:$0xff]  ;;  %v15729_v53 = vld [vmem:[#allocation13_spill] sm:$0xff] }
 0x3ec   : > { %v3417_v41 = vpack.c.bf16 %v3393_v39, %v3392_v6  ;;  %v6357_v50 = vmax.f32 %v6273_v58, 0.0  ;;  %v6265_v48 = vadd.f32 %v15721_v52, %v15257_v57  ;;  %v6268_v12 = vadd.f32 %v15722_v20, %v15257_v57  ;;  %v15733_v43 = vld [vmem:[#allocation17_spill] sm:$0xff]  ;;  %v15734_v52 = vld [vmem:[#allocation19_spill] sm:$0xff]  ;;  %v15735_v20 = vld [vmem:[#allocation20_spill] sm:$0xff] }
 0x3ed   : > { %v3416_v33 = vpack.c.bf16 %v3391_v11, %v3390_v36  ;;  %v6358_v10 = vmax.f32 %v6276_v21, 0.0  ;;  %v3324_v15 = vadd.f32 %v15723_v13, %v15290_v46  ;;  %v3327_v37 = vadd.f32 %v15724_v63, %v15290_v46  ;;  %v15736_v63 = vld [vmem:[#allocation22_spill] sm:$0xff] }
 0x3ee   : > { %v6355_v35 = vmax.f32 %v6265_v48, 0.0  ;;  %v6356_v55 = vmax.f32 %v6268_v12, 0.0  ;;  %v3316_v34 = vadd.f32 %v15725_v5, %v15290_v46  ;;  %v3319_v28 = vadd.f32 %v15726_v56, %v15290_v46  ;;  %v15737_v5 = vld [vmem:[#allocation21_spill] sm:$0xff] }
 0x3ef   : > { %3452 = vrot.lane.b32.xlu0 %v3415_v49, %s12651_s12  ;;  %3450 = vrot.lane.b32.xlu1 %v3414_v19, %s12651_s12  ;;  %v6382_v59 = vpack.c.bf16 %v6358_v10, %v6357_v50  ;;  %v3396_v38 = vmax.f32 %v3324_v15, 0.0  ;;  %v3397_v51 = vmax.f32 %v3327_v37, 0.0  ;;  %v6289_v26 = vadd.f32 %v15162_v4, %v15257_v57  ;;  %v15728_v4 = vld [vmem:[#allocation14_spill] sm:$0xff] }
 0x3f0   : > { %v6381_v27 = vpack.c.bf16 %v6356_v55, %v6355_v35  ;;  %v3394_v23 = vmax.f32 %v3316_v34, 0.0  ;;  %v3395_v16 = vmax.f32 %v3319_v28, 0.0  ;;  %v6292_v47 = vadd.f32 %v15166_v3, %v15257_v57 }
 0x3f1   : > { %v3419_v17 = vpack.c.bf16 %v3397_v51, %v3396_v38  ;;  %v6361_v61 = vmax.f32 %v6289_v26, 0.0  ;;  %v6281_v1 = vadd.f32 %v15164_v44, %v15257_v57  ;;  %v6284_v49 = vadd.f32 %v15170_v29, %v15257_v57 }
 0x3f2   : > { %v3418_v19 = vpack.c.bf16 %v3395_v16, %v3394_v23  ;;  %v6362_v40 = vmax.f32 %v6292_v47, 0.0  ;;  %v3340_v54 = vadd.f32 %v15727_v2, %v15290_v46  ;;  %v3343_v22 = vadd.f32 %v15728_v4, %v15290_v46 }
 0x3f3   : > { %6417 = vrot.lane.b32.xlu0 %v6380_v62, %s12653_s14  ;;  %6415 = vrot.lane.b32.xlu1 %v6379_v45, %s12653_s14  ;;  %v6359_v3 = vmax.f32 %v6281_v1, 0.0  ;;  %v6360_v25 = vmax.f32 %v6284_v49, 0.0  ;;  %v3332_v44 = vadd.f32 %v15729_v53, %v15290_v46  ;;  %v3335_v29 = vadd.f32 %v15730_v7, %v15290_v46  ;;  %v15731_v62 = vld [vmem:[#allocation16_spill] sm:$0xff]  ;;  %v15732_v45 = vld [vmem:[#allocation18_spill] sm:$0xff] }
 0x3f4   : > { %v6384_v14 = vpack.c.bf16 %v6362_v40, %v6361_v61  ;;  %v3400_v9 = vmax.f32 %v3340_v54, 0.0  ;;  %v3401_v60 = vmax.f32 %v3343_v22, 0.0  ;;  %v3356_v36 = vadd.f32 %v15731_v62, %v15290_v46 }
 0x3f5   : > { %v6383_v6 = vpack.c.bf16 %v6360_v25, %v6359_v3  ;;  %v3398_v39 = vmax.f32 %v3332_v44, 0.0  ;;  %v3399_v32 = vmax.f32 %v3335_v29, 0.0  ;;  %v3359_v11 = vadd.f32 %v15732_v45, %v15290_v46 }
 0x3f6   : > { %v15438_v58 = vpack.c.bf16 %v3401_v60, %v3400_v9  ;;  %v3348_v21 = vadd.f32 %v15733_v43, %v15290_v46  ;;  %v3351_v48 = vadd.f32 %v15734_v52, %v15290_v46  ;;  %v3372_v12 = vadd.f32 %v15735_v20, %v15290_v46 }
 0x3f7   : > { %9044 = vrot.lane.b32.xlu0 %v9007_v18, %s12655_s16  ;;  %9042 = vrot.lane.b32.xlu1 %v9006_v30, %s12655_s16  ;;  %v3420_v50 = vpack.c.bf16 %v3399_v32, %v3398_v39  ;;  %v3404_v10 = vmax.f32 %v3356_v36, 0.0  ;;  %v3405_v13 = vmax.f32 %v3359_v11, 0.0  ;;  %v3375_v37 = vadd.f32 %v15736_v63, %v15290_v46  ;;  %v15738_v30 = vld [vmem:[#allocation23_spill] sm:$0xff] }
 0x3f8   : > { %v3402_v15 = vmax.f32 %v3348_v21, 0.0  ;;  %v3403_v35 = vmax.f32 %v3351_v48, 0.0  ;;  %v3408_v55 = vmax.f32 %v3372_v12, 0.0  ;;  %v3364_v18 = vadd.f32 %v15737_v5, %v15290_v46 }
 0x3f9   : > { %v3367_v34 = vadd.f32 %v15738_v30, %v15290_v46  ;;  %v15458_v56 = vpack.c.bf16 %v3405_v13, %v3404_v10  ;;  %v3409_v28 = vmax.f32 %v3375_v37, 0.0 }
 0x3fa   : > { %v15462_v38 = vpack.c.bf16 %v3403_v35, %v3402_v15  ;;  %v3406_v51 = vmax.f32 %v3364_v18, 0.0 }
 0x3fb   : > { %3456 = vrot.lane.b32.xlu0 %v3417_v41, %s12651_s12  ;;  %3454 = vrot.lane.b32.xlu1 %v3416_v33, %s12651_s12  ;;  %v3407_v26 = vmax.f32 %v3367_v34, 0.0  ;;  %v15464_v23 = vpack.c.bf16 %v3409_v28, %v3408_v55 }
 0x3fd   : > { %v15466_v16 = vpack.c.bf16 %v3407_v26, %v3406_v51 }
 0x3ff   : > { %6421 = vrot.lane.b32.xlu0 %v6382_v59, %s12653_s14  ;;  %6419 = vrot.lane.b32.xlu1 %v6381_v27, %s12653_s14 }
 0x403   : > { %9048 = vrot.lane.b32.xlu0 %v15372_v24, %s12655_s16  ;;  %9046 = vrot.lane.b32.xlu1 %v15376_v0, %s12655_s16 }
 0x407   : > { %3460 = vrot.lane.b32.xlu0 %v3419_v17, %s12651_s12  ;;  %3458 = vrot.lane.b32.xlu1 %v3418_v19, %s12651_s12 }
 0x40b   : > { %6425 = vrot.lane.b32.xlu0 %v6384_v14, %s12653_s14  ;;  %6423 = vrot.lane.b32.xlu1 %v6383_v6, %s12653_s14 }
 0x412   : > { %v11739_v46 = vpop.f32.mrb[40].mxu0 }
 0x413   : > { %v6321_v41 = vadd.f32 %v11739_v46, %v15257_v57  ;;  %v6312_v33 = vpop.f32.mrb[41].mxu0 }
 0x414   : > { %v6313_v59 = vadd.f32 %v6312_v33, %v15257_v57  ;;  %v11740_v27 = vpop.f32.mrb[42].mxu0 }
 0x415   : > { %v6369_v47 = vmax.f32 %v6321_v41, 0.0  ;;  %v6324_v24 = vadd.f32 %v11740_v27, %v15257_v57  ;;  %v6315_v61 = vpop.f32.mrb[43].mxu0 }
 0x416   : > { %v6316_v0 = vadd.f32 %v6315_v61, %v15257_v57  ;;  %v6367_v1 = vmax.f32 %v6313_v59, 0.0 }
 0x417   : > { %v6370_v17 = vmax.f32 %v6324_v24, 0.0 }
 0x418   : > { %v6368_v49 = vmax.f32 %v6316_v0, 0.0 }
 0x419   : > { %v15482_v19 = vpack.c.bf16 %v6370_v17, %v6369_v47 }
 0x41a   : > { %v15484_v40 = vpack.c.bf16 %v6368_v49, %v6367_v1 }
 0x41b   : > { %v11773_v2 = vpop.f32.mrb[64].mxu1 }
 0x41c   : > { %v8916_v54 = vadd.f32 %v11773_v2, %v15307_v8  ;;  %v8907_v4 = vpop.f32.mrb[65].mxu1 }
 0x41d   : > { %v8908_v22 = vadd.f32 %v8907_v4, %v15307_v8  ;;  %v11774_v3 = vpop.f32.mrb[66].mxu1 }
 0x41e   : > { %v8988_v25 = vmax.f32 %v8916_v54, 0.0  ;;  %v8919_v53 = vadd.f32 %v11774_v3, %v15307_v8  ;;  %v8910_v44 = vpop.f32.mrb[67].mxu1 }
 0x41f   : > { %v8911_v7 = vadd.f32 %v8910_v44, %v15307_v8  ;;  %v8986_v14 = vmax.f32 %v8908_v22, 0.0 }
 0x420   : > { %v8989_v29 = vmax.f32 %v8919_v53, 0.0 }
 0x421   : > { %v8987_v9 = vmax.f32 %v8911_v7, 0.0 }
 0x422   : > { %v9011_v60 = vpack.c.bf16 %v8989_v29, %v8988_v25 }
 0x423   : > { %v9010_v6 = vpack.c.bf16 %v8987_v9, %v8986_v14 }
 0x424   : > { %9052 = vrot.lane.b32.xlu0 %v9011_v60, %s12655_s16 }
 0x425   : > { %9050 = vrot.lane.b32.xlu1 %v9010_v6, %s12655_s16 }
 0x428   : > { %3464 = vrot.lane.b32.xlu0 %v15438_v58, %s12651_s12 }
 0x429   : > { %3462 = vrot.lane.b32.xlu1 %v3420_v50, %s12651_s12 }
 0x42c   : > { %6429 = vrot.lane.b32.xlu0 %v15351_v31, %s12653_s14 }
 0x42d   : > { %6427 = vrot.lane.b32.xlu1 %v15357_v42, %s12653_s14 }
 0x449   : > { %v3445_v39 = vpop.permute.xlu0 %3444  ;;  %v3443_v32 = vpop.permute.xlu1 %3442 }
 0x44a   : > { %3492 = vst.msk [vmem:[#allocation3 + $0x8] sm:$0xff] %vm3490_vm1, %v3445_v39  ;;  %3491 = vst.msk [vmem:[#allocation3] sm:$0xff] %vm3490_vm1, %v3443_v32 }
 0x44d   : > { %v6410_v62 = vpop.permute.xlu0 %6409  ;;  %v6408_v36 = vpop.permute.xlu1 %6407 }
 0x44e   : > { %6457 = vst.msk [vmem:[#allocation3 + $0x8] sm:$0xff] %vm6455_vm2, %v6410_v62  ;;  %6456 = vst.msk [vmem:[#allocation3] sm:$0xff] %vm6455_vm2, %v6408_v36 }
 0x451   : > { %v9037_v58 = vpop.permute.xlu0 %9036  ;;  %v9035_v31 = vpop.permute.xlu1 %9034 }
 0x452   : > { %9084 = vst.msk [vmem:[#allocation3 + $0x8] sm:$0xff] %vm9082_vm3, %v9037_v58  ;;  %9083 = vst.msk [vmem:[#allocation3] sm:$0xff] %vm9082_vm3, %v9035_v31 }
 0x455   : > { %v3449_v42 = vpop.permute.xlu0 %3448  ;;  %v3447_v45 = vpop.permute.xlu1 %3446 }
 0x456   : > { %3494 = vst.msk [vmem:[#allocation3 + $0x18] sm:$0xff] %vm3490_vm1, %v3449_v42  ;;  %3493 = vst.msk [vmem:[#allocation3 + $0x10] sm:$0xff] %vm3490_vm1, %v3447_v45 }
 0x459   : > { %v6414_v11 = vpop.permute.xlu0 %6413  ;;  %v6412_v43 = vpop.permute.xlu1 %6411  ;;  %v9099_v21 = vld [vmem:[#allocation3] sm:$0xff]  ;;  %v9100_v50 = vld [vmem:[#allocation3 + $0x8] sm:$0xff] }
 0x45a   : > { %6459 = vst.msk [vmem:[#allocation3 + $0x18] sm:$0xff] %vm6455_vm2, %v6414_v11  ;;  %6458 = vst.msk [vmem:[#allocation3 + $0x10] sm:$0xff] %vm6455_vm2, %v6412_v43  ;;  %11795 = vmatprep.mubr.msk.bf16.mxu0 %vm9154_vm4, %v9099_v21  ;;  %v11743_v10 = vpop.f32.mrb[44].mxu0 }
 0x45b   : > { %11796 = vmatmul.mubr.msk.bf16.vlgmr.msra.gmra.mrb[48].mxu0 %vm9154_vm4, %v9100_v50  ;;  %v6337_v35 = vadd.f32 %v11743_v10, %v15257_v57  ;;  %v6328_v55 = vpop.f32.mrb[45].mxu0 }
 0x45c   : > { %v6329_v5 = vadd.f32 %v6328_v55, %v15257_v57  ;;  %v11744_v18 = vpop.f32.mrb[46].mxu0  ;;  %v11777_v28 = vpop.f32.mrb[68].mxu1 }
 0x45d   : > { %v9041_v52 = vpop.permute.xlu0 %9040  ;;  %v9039_v48 = vpop.permute.xlu1 %9038  ;;  %v6340_v30 = vadd.f32 %v11744_v18, %v15257_v57  ;;  %v6373_v41 = vmax.f32 %v6337_v35, 0.0  ;;  %v8932_v59 = vadd.f32 %v11777_v28, %v15307_v8 }
 0x45e   : > { %9086 = vst.msk [vmem:[#allocation3 + $0x18] sm:$0xff] %vm9082_vm3, %v9041_v52  ;;  %9085 = vst.msk [vmem:[#allocation3 + $0x10] sm:$0xff] %vm9082_vm3, %v9039_v48  ;;  %v6331_v34 = vpop.f32.mrb[47].mxu0  ;;  %v8923_v27 = vpop.f32.mrb[69].mxu1  ;;  %v6371_v47 = vmax.f32 %v6329_v5, 0.0 }
 0x45f   : > { %v6332_v46 = vadd.f32 %v6331_v34, %v15257_v57  ;;  %v6374_v33 = vmax.f32 %v6340_v30, 0.0  ;;  %v8924_v61 = vadd.f32 %v8923_v27, %v15307_v8  ;;  %v11778_v0 = vpop.f32.mrb[70].mxu1  ;;  %v8992_v22 = vmax.f32 %v8932_v59, 0.0 }
 0x460   : > { %v8935_v1 = vadd.f32 %v11778_v0, %v15307_v8  ;;  %v8926_v49 = vpop.f32.mrb[71].mxu1 }
 0x461   : > { %v3453_v20 = vpop.permute.xlu0 %3452  ;;  %v3451_v12 = vpop.permute.xlu1 %3450  ;;  %v6372_v24 = vmax.f32 %v6332_v46, 0.0  ;;  %v6390_v17 = vpack.c.bf16 %v6374_v33, %v6373_v41  ;;  %v8927_v4 = vadd.f32 %v8926_v49, %v15307_v8  ;;  %v8990_v25 = vmax.f32 %v8924_v61, 0.0 }
 0x462   : > { %3496 = vst.msk [vmem:[#allocation3 + $0x28] sm:$0xff] %vm3490_vm1, %v3453_v20  ;;  %3495 = vst.msk [vmem:[#allocation3 + $0x20] sm:$0xff] %vm3490_vm1, %v3451_v12  ;;  %v8993_v3 = vmax.f32 %v8935_v1, 0.0 }
 0x463   : > { %v6389_v2 = vpack.c.bf16 %v6372_v24, %v6371_v47  ;;  %v8991_v53 = vmax.f32 %v8927_v4, 0.0 }
 0x464   : > { %v9013_v44 = vpack.c.bf16 %v8993_v3, %v8992_v22 }
 0x465   : > { %v6418_v13 = vpop.permute.xlu0 %6417  ;;  %v6416_v15 = vpop.permute.xlu1 %6415  ;;  %v9101_v63 = vld [vmem:[#allocation3 + $0x10] sm:$0xff]  ;;  %v9102_v37 = vld [vmem:[#allocation3 + $0x18] sm:$0xff]  ;;  %v9012_v7 = vpack.c.bf16 %v8991_v53, %v8990_v25 }
 0x466   : > { %6461 = vst.msk [vmem:[#allocation3 + $0x28] sm:$0xff] %vm6455_vm2, %v6418_v13  ;;  %6460 = vst.msk [vmem:[#allocation3 + $0x20] sm:$0xff] %vm6455_vm2, %v6416_v15  ;;  %11799 = vmatprep.mubr.msk.bf16.mxu0 %vm9154_vm4, %v9101_v63  ;;  %9056 = vrot.lane.b32.xlu0 %v9013_v44, %s12655_s16 }
 0x467   : > { %11800 = vmatmul.mubr.msk.bf16.gmra.mrb[52].mxu0 %vm9154_vm4, %v9102_v37  ;;  %9054 = vrot.lane.b32.xlu1 %v9012_v7, %s12655_s16 }
 0x469   : > { %v9045_v51 = vpop.permute.xlu0 %9044  ;;  %v9043_v26 = vpop.permute.xlu1 %9042 }
 0x46a   : > { %9088 = vst.msk [vmem:[#allocation3 + $0x28] sm:$0xff] %vm9082_vm3, %v9045_v51  ;;  %9087 = vst.msk [vmem:[#allocation3 + $0x20] sm:$0xff] %vm9082_vm3, %v9043_v26  ;;  %3468 = vrot.lane.b32.xlu0 %v15458_v56, %s12651_s12 }
 0x46b   : > { %3466 = vrot.lane.b32.xlu1 %v15462_v38, %s12651_s12 }
 0x46d   : > { %v3457_v57 = vpop.permute.xlu0 %3456  ;;  %v3455_v54 = vpop.permute.xlu1 %3454 }
 0x46e   : > { %3498 = vst.msk [vmem:[#allocation3 + $0x38] sm:$0xff] %vm3490_vm1, %v3457_v57  ;;  %3497 = vst.msk [vmem:[#allocation3 + $0x30] sm:$0xff] %vm3490_vm1, %v3455_v54  ;;  %6433 = vrot.lane.b32.xlu0 %v15482_v19, %s12653_s14 }
 0x46f   : > { %6431 = vrot.lane.b32.xlu1 %v15484_v40, %s12653_s14 }
 0x471   : > { %v6422_v29 = vpop.permute.xlu0 %6421  ;;  %v6420_v14 = vpop.permute.xlu1 %6419  ;;  %v9103_v9 = vld [vmem:[#allocation3 + $0x20] sm:$0xff]  ;;  %v9104_v60 = vld [vmem:[#allocation3 + $0x28] sm:$0xff] }
 0x472   : > { %6463 = vst.msk [vmem:[#allocation3 + $0x38] sm:$0xff] %vm6455_vm2, %v6422_v29  ;;  %6462 = vst.msk [vmem:[#allocation3 + $0x30] sm:$0xff] %vm6455_vm2, %v6420_v14  ;;  %11803 = vmatprep.mubr.msk.bf16.mxu0 %vm9154_vm4, %v9103_v9 }
 0x473   : > { %11804 = vmatmul.mubr.msk.bf16.gmra.mrb[56].mxu0 %vm9154_vm4, %v9104_v60 }
 0x475   : > { %v9049_v6 = vpop.permute.xlu0 %9048  ;;  %v9047_v39 = vpop.permute.xlu1 %9046 }
 0x476   : > { %9090 = vst.msk [vmem:[#allocation3 + $0x38] sm:$0xff] %vm9082_vm3, %v9049_v6  ;;  %9089 = vst.msk [vmem:[#allocation3 + $0x30] sm:$0xff] %vm9082_vm3, %v9047_v39 }
 0x479   : > { %v3461_v32 = vpop.permute.xlu0 %3460  ;;  %v3459_v62 = vpop.permute.xlu1 %3458 }
 0x47a   : > { %3500 = vst.msk [vmem:[#allocation3 + $0x48] sm:$0xff] %vm3490_vm1, %v3461_v32  ;;  %3499 = vst.msk [vmem:[#allocation3 + $0x40] sm:$0xff] %vm3490_vm1, %v3459_v62 }
 0x47d   : > { %v6426_v36 = vpop.permute.xlu0 %6425  ;;  %v6424_v58 = vpop.permute.xlu1 %6423  ;;  %v9105_v31 = vld [vmem:[#allocation3 + $0x30] sm:$0xff]  ;;  %v9106_v42 = vld [vmem:[#allocation3 + $0x38] sm:$0xff] }
 0x47e   : > { %6465 = vst.msk [vmem:[#allocation3 + $0x48] sm:$0xff] %vm6455_vm2, %v6426_v36  ;;  %6464 = vst.msk [vmem:[#allocation3 + $0x40] sm:$0xff] %vm6455_vm2, %v6424_v58  ;;  %11807 = vmatprep.mubr.msk.bf16.mxu0 %vm9154_vm4, %v9105_v31 }
 0x47f   : > { %11808 = vmatmul.mubr.msk.bf16.gmra.mrb[60].mxu0 %vm9154_vm4, %v9106_v42  ;;  %v11781_v56 = vpop.f32.mrb[72].mxu1 }
 0x480   : > { %v8948_v38 = vadd.f32 %v11781_v56, %v15307_v8  ;;  %v8939_v45 = vpop.f32.mrb[73].mxu1 }
 0x481   : > { %v8940_v19 = vadd.f32 %v8939_v45, %v15307_v8  ;;  %v11782_v11 = vpop.f32.mrb[74].mxu1 }
 0x482   : > { %v8951_v40 = vadd.f32 %v11782_v11, %v15307_v8  ;;  %v8942_v43 = vpop.f32.mrb[75].mxu1  ;;  %v8996_v50 = vmax.f32 %v8948_v38, 0.0 }
 0x483   : > { %v8943_v21 = vadd.f32 %v8942_v43, %v15307_v8  ;;  %v8994_v48 = vmax.f32 %v8940_v19, 0.0 }
 0x484   : > { %v8997_v52 = vmax.f32 %v8951_v40, 0.0 }
 0x485   : > { %v8995_v20 = vmax.f32 %v8943_v21, 0.0 }
 0x486   : > { %v9015_v12 = vpack.c.bf16 %v8997_v52, %v8996_v50 }
 0x487   : > { %v9014_v10 = vpack.c.bf16 %v8995_v20, %v8994_v48 }
 0x488   : > { %9060 = vrot.lane.b32.xlu0 %v9015_v12, %s12655_s16 }
 0x489   : > { %9058 = vrot.lane.b32.xlu1 %v9014_v10, %s12655_s16 }
 0x48c   : > { %3472 = vrot.lane.b32.xlu0 %v15464_v23, %s12651_s12 }
 0x48d   : > { %3470 = vrot.lane.b32.xlu1 %v15466_v16, %s12651_s12 }
 0x490   : > { %6437 = vrot.lane.b32.xlu0 %v6390_v17, %s12653_s14 }
 0x491   : > { %6435 = vrot.lane.b32.xlu1 %v6389_v2, %s12653_s14 }
 0x496   : > { %v9053_v13 = vpop.permute.xlu0 %9052 }
 0x497   : > { %9092 = vst.msk [vmem:[#allocation3 + $0x48] sm:$0xff] %vm9082_vm3, %v9053_v13  ;;  %v9051_v15 = vpop.permute.xlu1 %9050 }
 0x498   : > { %9091 = vst.msk [vmem:[#allocation3 + $0x40] sm:$0xff] %vm9082_vm3, %v9051_v15 }
 0x49a   : > { %v3465_v63 = vpop.permute.xlu0 %3464 }
 0x49b   : > { %3502 = vst.msk [vmem:[#allocation3 + $0x58] sm:$0xff] %vm3490_vm1, %v3465_v63  ;;  %v3463_v37 = vpop.permute.xlu1 %3462 }
 0x49c   : > { %3501 = vst.msk [vmem:[#allocation3 + $0x50] sm:$0xff] %vm3490_vm1, %v3463_v37 }
 0x49e   : > { %v6430_v23 = vpop.permute.xlu0 %6429  ;;  %v9108_v55 = vld [vmem:[#allocation3 + $0x48] sm:$0xff] }
 0x49f   : > { %6467 = vst.msk [vmem:[#allocation3 + $0x58] sm:$0xff] %vm6455_vm2, %v6430_v23  ;;  %v6428_v16 = vpop.permute.xlu1 %6427  ;;  %v9107_v35 = vld [vmem:[#allocation3 + $0x40] sm:$0xff] }
 0x4a0   : > { %6466 = vst.msk [vmem:[#allocation3 + $0x50] sm:$0xff] %vm6455_vm2, %v6428_v16  ;;  %11811 = vmatprep.mubr.msk.bf16.mxu0 %vm9154_vm4, %v9107_v35 }
 0x4a1   : > { %11812 = vmatmul.mubr.msk.bf16.gmra.mrb[64].mxu0 %vm9154_vm4, %v9108_v55 }
 0x4a6   : > { %v11785_v5 = vpop.f32.mrb[76].mxu1 }
 0x4a7   : > { %v8964_v18 = vadd.f32 %v11785_v5, %v15307_v8  ;;  %v8955_v30 = vpop.f32.mrb[77].mxu1 }
 0x4a8   : > { %v8956_v34 = vadd.f32 %v8955_v30, %v15307_v8  ;;  %v11786_v28 = vpop.f32.mrb[78].mxu1 }
 0x4a9   : > { %v8967_v51 = vadd.f32 %v11786_v28, %v15307_v8  ;;  %v8958_v26 = vpop.f32.mrb[79].mxu1  ;;  %v9000_v41 = vmax.f32 %v8964_v18, 0.0 }
 0x4aa   : > { %v8959_v46 = vadd.f32 %v8958_v26, %v15307_v8  ;;  %v8998_v59 = vmax.f32 %v8956_v34, 0.0 }
 0x4ab   : > { %v9001_v33 = vmax.f32 %v8967_v51, 0.0 }
 0x4ac   : > { %v8999_v27 = vmax.f32 %v8959_v46, 0.0 }
 0x4ad   : > { %v9017_v47 = vpack.c.bf16 %v9001_v33, %v9000_v41 }
 0x4ae   : > { %v9016_v24 = vpack.c.bf16 %v8999_v27, %v8998_v59 }
 0x4af   : > { %9064 = vrot.lane.b32.xlu0 %v9017_v47, %s12655_s16 }
 0x4b0   : > { %9062 = vrot.lane.b32.xlu1 %v9016_v24, %s12655_s16  ;;  %s314_s16 = scalar_lea.vmem %s15685_s7, %s15740_s28 }
 0x4b1   : > { %v15601_v9 = vld [vmem:[%s314_s16] ss:$0 sm:$0xff] }
 0x4d8   : > { %v9057_v61 = vpop.permute.xlu0 %9056 }
 0x4d9   : > { %9094 = vst.msk [vmem:[#allocation3 + $0x58] sm:$0xff] %vm9082_vm3, %v9057_v61  ;;  %v9055_v0 = vpop.permute.xlu1 %9054 }
 0x4da   : > { %9093 = vst.msk [vmem:[#allocation3 + $0x50] sm:$0xff] %vm9082_vm3, %v9055_v0 }
 0x4dc   : > { %v3469_v17 = vpop.permute.xlu0 %3468 }
 0x4dd   : > { %3504 = vst.msk [vmem:[#allocation3 + $0x68] sm:$0xff] %vm3490_vm1, %v3469_v17  ;;  %v3467_v8 = vpop.permute.xlu1 %3466 }
 0x4de   : > { %3503 = vst.msk [vmem:[#allocation3 + $0x60] sm:$0xff] %vm3490_vm1, %v3467_v8 }
 0x4e0   : > { %v6434_v1 = vpop.permute.xlu0 %6433  ;;  %v9110_v57 = vld [vmem:[#allocation3 + $0x58] sm:$0xff] }
 0x4e1   : > { %6469 = vst.msk [vmem:[#allocation3 + $0x68] sm:$0xff] %vm6455_vm2, %v6434_v1  ;;  %v6432_v49 = vpop.permute.xlu1 %6431  ;;  %v9109_v2 = vld [vmem:[#allocation3 + $0x50] sm:$0xff] }
 0x4e2   : > { %6468 = vst.msk [vmem:[#allocation3 + $0x60] sm:$0xff] %vm6455_vm2, %v6432_v49  ;;  %11815 = vmatprep.mubr.msk.bf16.mxu0 %vm9154_vm4, %v9109_v2 }
 0x4e3   : > { %11816 = vmatmul.mubr.msk.bf16.gmra.mrb[68].mxu0 %vm9154_vm4, %v9110_v57 }
 0x4fa   : > { %v9061_v54 = vpop.permute.xlu0 %9060 }
 0x4fb   : > { %9096 = vst.msk [vmem:[#allocation3 + $0x68] sm:$0xff] %vm9082_vm3, %v9061_v54  ;;  %v9059_v4 = vpop.permute.xlu1 %9058 }
 0x4fc   : > { %9095 = vst.msk [vmem:[#allocation3 + $0x60] sm:$0xff] %vm9082_vm3, %v9059_v4 }
 0x4fe   : > { %v3473_v22 = vpop.permute.xlu0 %3472 }
 0x4ff   : > { %3506 = vst.msk [vmem:[#allocation3 + $0x78] sm:$0xff] %vm3490_vm1, %v3473_v22  ;;  %v3471_v3 = vpop.permute.xlu1 %3470 }
 0x500   : > { %3505 = vst.msk [vmem:[#allocation3 + $0x70] sm:$0xff] %vm3490_vm1, %v3471_v3 }
 0x502   : > { %v6438_v25 = vpop.permute.xlu0 %6437  ;;  %v9112_v7 = vld [vmem:[#allocation3 + $0x68] sm:$0xff] }
 0x503   : > { %6471 = vst.msk [vmem:[#allocation3 + $0x78] sm:$0xff] %vm6455_vm2, %v6438_v25  ;;  %v6436_v53 = vpop.permute.xlu1 %6435  ;;  %v9111_v44 = vld [vmem:[#allocation3 + $0x60] sm:$0xff] }
 0x504   : > { %6470 = vst.msk [vmem:[#allocation3 + $0x70] sm:$0xff] %vm6455_vm2, %v6436_v53  ;;  %11819 = vmatprep.mubr.msk.bf16.mxu0 %vm9154_vm4, %v9111_v44 }
 0x505   : > { %11820 = vmatmul.mubr.msk.bf16.gmra.mrb[72].mxu0 %vm9154_vm4, %v9112_v7 }
 0x521   : > { %v9065_v29 = vpop.permute.xlu0 %9064 }
 0x522   : > { %9098 = vst.msk [vmem:[#allocation3 + $0x78] sm:$0xff] %vm9082_vm3, %v9065_v29  ;;  %v9063_v14 = vpop.permute.xlu1 %9062 }
 0x523   : > { %9097 = vst.msk [vmem:[#allocation3 + $0x70] sm:$0xff] %vm9082_vm3, %v9063_v14 }
 0x529   : > { %v9114_v39 = vld [vmem:[#allocation3 + $0x78] sm:$0xff] }
 0x52a   : > { %v9113_v60 = vld [vmem:[#allocation3 + $0x70] sm:$0xff] }
 0x52b   : > { %11823 = vmatprep.mubr.msk.bf16.mxu0 %vm9154_vm4, %v9113_v60 }
 0x52c   : > { %11824 = vmatmul.mubr.msk.bf16.gmra.mrb[76].mxu0 %vm9154_vm4, %v9114_v39 }
 0x52e   : > { %v11797_v6 = vpop.f32.mrb[48].mxu0 }
 0x52f   : > { %v9246_v32 = vadd.f32 %v11797_v6, %v15601_v9  ;;  %v9237_v62 = vpop.f32.mrb[49].mxu0 }
 0x530   : > { %v9238_v36 = vadd.f32 %v15601_v9, %v9237_v62  ;;  %v11798_v58 = vpop.f32.mrb[50].mxu0 }
 0x531   : > { %v9366_v31 = vmax.f32 %v9246_v32, 0.0  ;;  %v9249_v42 = vadd.f32 %v11798_v58, %v15601_v9  ;;  %v9240_v56 = vpop.f32.mrb[51].mxu0 }
 0x532   : > { %v9364_v38 = vmax.f32 %v9238_v36, 0.0  ;;  %v9241_v45 = vadd.f32 %v15601_v9, %v9240_v56 }
 0x533   : > { %9398 = vst [vmem:[%s15610_s21 + $0x10] sm:$0xff] %v9366_v31  ;;  %v9367_v19 = vmax.f32 %v9249_v42, 0.0 }
 0x534   : > { %9396 = vst [vmem:[%s15610_s21] sm:$0xff] %v9364_v38  ;;  %v9365_v11 = vmax.f32 %v9241_v45, 0.0 }
 0x535   : > { %9399 = vst [vmem:[%s15610_s21 + $0x18] sm:$0xff] %v9367_v19 }
 0x536   : > { %9397 = vst [vmem:[%s15610_s21 + $0x8] sm:$0xff] %v9365_v11 }
 0x53a   : > { %v11801_v40 = vpop.f32.mrb[52].mxu0 }
 0x53b   : > { %v9262_v43 = vadd.f32 %v11801_v40, %v15601_v9  ;;  %v9253_v21 = vpop.f32.mrb[53].mxu0 }
 0x53c   : > { %v9254_v50 = vadd.f32 %v15601_v9, %v9253_v21  ;;  %v11802_v52 = vpop.f32.mrb[54].mxu0 }
 0x53d   : > { %v9370_v48 = vmax.f32 %v9262_v43, 0.0  ;;  %v9265_v20 = vadd.f32 %v11802_v52, %v15601_v9  ;;  %v9256_v12 = vpop.f32.mrb[55].mxu0 }
 0x53e   : > { %v9368_v10 = vmax.f32 %v9254_v50, 0.0  ;;  %v9257_v13 = vadd.f32 %v15601_v9, %v9256_v12 }
 0x53f   : > { %9402 = vst [vmem:[%s15610_s21 + $0x30] sm:$0xff] %v9370_v48  ;;  %v9371_v15 = vmax.f32 %v9265_v20, 0.0 }
 0x540   : > { %9400 = vst [vmem:[%s15610_s21 + $0x20] sm:$0xff] %v9368_v10  ;;  %v9369_v63 = vmax.f32 %v9257_v13, 0.0 }
 0x541   : > { %9403 = vst [vmem:[%s15610_s21 + $0x38] sm:$0xff] %v9371_v15 }
 0x542   : > { %9401 = vst [vmem:[%s15610_s21 + $0x28] sm:$0xff] %v9369_v63 }
 0x546   : > { %v11805_v37 = vpop.f32.mrb[56].mxu0 }
 0x547   : > { %v9278_v23 = vadd.f32 %v11805_v37, %v15601_v9  ;;  %v9269_v16 = vpop.f32.mrb[57].mxu0 }
 0x548   : > { %v9270_v35 = vadd.f32 %v15601_v9, %v9269_v16  ;;  %v11806_v55 = vpop.f32.mrb[58].mxu0 }
 0x549   : > { %v9374_v5 = vmax.f32 %v9278_v23, 0.0  ;;  %v9281_v18 = vadd.f32 %v11806_v55, %v15601_v9  ;;  %v9272_v30 = vpop.f32.mrb[59].mxu0 }
 0x54a   : > { %v9372_v34 = vmax.f32 %v9270_v35, 0.0  ;;  %v9273_v28 = vadd.f32 %v15601_v9, %v9272_v30 }
 0x54b   : > { %9406 = vst [vmem:[%s15610_s21 + $0x50] sm:$0xff] %v9374_v5  ;;  %v9375_v51 = vmax.f32 %v9281_v18, 0.0 }
 0x54c   : > { %9404 = vst [vmem:[%s15610_s21 + $0x40] sm:$0xff] %v9372_v34  ;;  %v9373_v26 = vmax.f32 %v9273_v28, 0.0 }
 0x54d   : > { %9407 = vst [vmem:[%s15610_s21 + $0x58] sm:$0xff] %v9375_v51 }
 0x54e   : > { %9405 = vst [vmem:[%s15610_s21 + $0x48] sm:$0xff] %v9373_v26 }
 0x552   : > { %v11809_v46 = vpop.f32.mrb[60].mxu0 }
 0x553   : > { %v9294_v41 = vadd.f32 %v11809_v46, %v15601_v9  ;;  %v9285_v33 = vpop.f32.mrb[61].mxu0 }
 0x554   : > { %v9286_v59 = vadd.f32 %v15601_v9, %v9285_v33  ;;  %v11810_v27 = vpop.f32.mrb[62].mxu0 }
 0x555   : > { %v9378_v47 = vmax.f32 %v9294_v41, 0.0  ;;  %v9297_v24 = vadd.f32 %v11810_v27, %v15601_v9  ;;  %v9288_v61 = vpop.f32.mrb[63].mxu0 }
 0x556   : > { %v9376_v0 = vmax.f32 %v9286_v59, 0.0  ;;  %v9289_v17 = vadd.f32 %v15601_v9, %v9288_v61 }
 0x557   : > { %9410 = vst [vmem:[%s15610_s21 + $0x70] sm:$0xff] %v9378_v47  ;;  %v9379_v8 = vmax.f32 %v9297_v24, 0.0 }
 0x558   : > { %9408 = vst [vmem:[%s15610_s21 + $0x60] sm:$0xff] %v9376_v0  ;;  %v9377_v1 = vmax.f32 %v9289_v17, 0.0 }
 0x559   : > { %9411 = vst [vmem:[%s15610_s21 + $0x78] sm:$0xff] %v9379_v8 }
 0x55a   : > { %9409 = vst [vmem:[%s15610_s21 + $0x68] sm:$0xff] %v9377_v1 }
 0x574   : > { %v11813_v49 = vpop.f32.mrb[64].mxu0 }
 0x575   : > { %v9310_v2 = vadd.f32 %v11813_v49, %v15601_v9  ;;  %v9301_v57 = vpop.f32.mrb[65].mxu0 }
 0x576   : > { %v9302_v54 = vadd.f32 %v15601_v9, %v9301_v57  ;;  %v11814_v4 = vpop.f32.mrb[66].mxu0 }
 0x577   : > { %v9382_v22 = vmax.f32 %v9310_v2, 0.0  ;;  %v9313_v3 = vadd.f32 %v11814_v4, %v15601_v9  ;;  %v9304_v25 = vpop.f32.mrb[67].mxu0 }
 0x578   : > { %v9380_v53 = vmax.f32 %v9302_v54, 0.0  ;;  %v9305_v44 = vadd.f32 %v15601_v9, %v9304_v25 }
 0x579   : > { %9414 = vst [vmem:[%s15610_s21 + $0x90] sm:$0xff] %v9382_v22  ;;  %v9383_v7 = vmax.f32 %v9313_v3, 0.0 }
 0x57a   : > { %9412 = vst [vmem:[%s15610_s21 + $0x80] sm:$0xff] %v9380_v53  ;;  %v9381_v29 = vmax.f32 %v9305_v44, 0.0 }
 0x57b   : > { %9415 = vst [vmem:[%s15610_s21 + $0x98] sm:$0xff] %v9383_v7 }
 0x57c   : > { %9413 = vst [vmem:[%s15610_s21 + $0x88] sm:$0xff] %v9381_v29 }
 0x5b6   : > { %v11817_v14 = vpop.f32.mrb[68].mxu0 }
 0x5b7   : > { %v9326_v60 = vadd.f32 %v11817_v14, %v15601_v9  ;;  %v9317_v6 = vpop.f32.mrb[69].mxu0 }
 0x5b8   : > { %v9318_v39 = vadd.f32 %v15601_v9, %v9317_v6  ;;  %v11818_v32 = vpop.f32.mrb[70].mxu0 }
 0x5b9   : > { %v9386_v62 = vmax.f32 %v9326_v60, 0.0  ;;  %v9329_v36 = vadd.f32 %v11818_v32, %v15601_v9  ;;  %v9320_v58 = vpop.f32.mrb[71].mxu0 }
 0x5ba   : > { %v9384_v31 = vmax.f32 %v9318_v39, 0.0  ;;  %v9321_v42 = vadd.f32 %v15601_v9, %v9320_v58 }
 0x5bb   : > { %9418 = vst [vmem:[%s15610_s21 + $0xb0] sm:$0xff] %v9386_v62  ;;  %v9387_v56 = vmax.f32 %v9329_v36, 0.0 }
 0x5bc   : > { %9416 = vst [vmem:[%s15610_s21 + $0xa0] sm:$0xff] %v9384_v31  ;;  %v9385_v38 = vmax.f32 %v9321_v42, 0.0 }
 0x5bd   : > { %9419 = vst [vmem:[%s15610_s21 + $0xb8] sm:$0xff] %v9387_v56 }
 0x5be   : > { %9417 = vst [vmem:[%s15610_s21 + $0xa8] sm:$0xff] %v9385_v38 }
 0x5d8   : > { %v11821_v45 = vpop.f32.mrb[72].mxu0 }
 0x5d9   : > { %v9342_v19 = vadd.f32 %v11821_v45, %v15601_v9  ;;  %v9333_v11 = vpop.f32.mrb[73].mxu0 }
 0x5da   : > { %v9334_v40 = vadd.f32 %v15601_v9, %v9333_v11  ;;  %v11822_v43 = vpop.f32.mrb[74].mxu0 }
 0x5db   : > { %v9390_v21 = vmax.f32 %v9342_v19, 0.0  ;;  %v9345_v50 = vadd.f32 %v11822_v43, %v15601_v9  ;;  %v9336_v52 = vpop.f32.mrb[75].mxu0 }
 0x5dc   : > { %v9388_v48 = vmax.f32 %v9334_v40, 0.0  ;;  %v9337_v20 = vadd.f32 %v15601_v9, %v9336_v52 }
 0x5dd   : > { %9422 = vst [vmem:[%s15610_s21 + $0xd0] sm:$0xff] %v9390_v21  ;;  %v9391_v12 = vmax.f32 %v9345_v50, 0.0 }
 0x5de   : > { %9420 = vst [vmem:[%s15610_s21 + $0xc0] sm:$0xff] %v9388_v48  ;;  %v9389_v10 = vmax.f32 %v9337_v20, 0.0 }
 0x5df   : > { %9423 = vst [vmem:[%s15610_s21 + $0xd8] sm:$0xff] %v9391_v12 }
 0x5e0   : > { %9421 = vst [vmem:[%s15610_s21 + $0xc8] sm:$0xff] %v9389_v10 }
 0x5ff   : > { %v11825_v13 = vpop.f32.mrb[76].mxu0 }
 0x600   : > { %v9358_v15 = vadd.f32 %v11825_v13, %v15601_v9  ;;  %v9349_v63 = vpop.f32.mrb[77].mxu0 }
 0x601   : > { %v9350_v37 = vadd.f32 %v15601_v9, %v9349_v63  ;;  %v11826_v23 = vpop.f32.mrb[78].mxu0 }
 0x602   : > { %v9394_v16 = vmax.f32 %v9358_v15, 0.0  ;;  %v9361_v35 = vadd.f32 %v11826_v23, %v15601_v9  ;;  %v9352_v55 = vpop.f32.mrb[79].mxu0 }
 0x603   : > { %v9392_v5 = vmax.f32 %v9350_v37, 0.0  ;;  %v9353_v18 = vadd.f32 %v15601_v9, %v9352_v55 }
 0x604   : > { %9426 = vst [vmem:[%s15610_s21 + $0xf0] sm:$0xff] %v9394_v16  ;;  %v9395_v30 = vmax.f32 %v9361_v35, 0.0 }
 0x605   : > { %9424 = vst [vmem:[%s15610_s21 + $0xe0] sm:$0xff] %v9392_v5  ;;  %v9393_v34 = vmax.f32 %v9353_v18, 0.0 }
 0x606   : > { %9427 = vst [vmem:[%s15610_s21 + $0xf8] sm:$0xff] %v9395_v30 }
 0x607   : > { %9425 = vst [vmem:[%s15610_s21 + $0xe8] sm:$0xff] %v9393_v34 }
 0x608 PF: > { %s18_s27 = sadd.s32 1, %s12648_s27  }
 0x609   : > { %p15_p4 = scmp.ge.s32.totalorder %s18_s27, 4  }
 0x60b   :  { %17 = sbr.rel (!%p15_p4) target bundleno = 1 (0x1), region = 91 }

</bundles_post_ra>
